<compile_context>
chip_gen: v6e
topology: v6e:2x2x1
jax: 0.10.0
libtpu: 0.0.40
codegen_flags: <defaults>
</compile_context>

<pallas_src>
import functools

import numpy as np

import jax
import jax.numpy as jnp
from jax.experimental import pallas as pl
from jax.experimental.pallas import tpu as pltpu


# ----------------------------------------------------------------------------
# Host-side constant operators (passed to the kernel as small inputs)
# ----------------------------------------------------------------------------

def _upsample_matrix(h, w):
    """(h*w, 4*h*w) bilinear x2 matrix, align_corners=True (nn.Upsample)."""
    def axis_mat(n_in, n_out):
        m = np.zeros((n_in, n_out), np.float32)
        for j in range(n_out):
            if n_in == 1:
                m[0, j] = 1.0
                continue
            src = j * (n_in - 1) / (n_out - 1)
            i0 = min(int(np.floor(src)), n_in - 1)
            i1 = min(i0 + 1, n_in - 1)
            f = src - i0
            m[i0, j] += 1.0 - f
            m[i1, j] += f
        return m
    return np.kron(axis_mat(h, 2 * h), axis_mat(w, 2 * w))


def _pool_select_matrix(h, w):
    """(h*w, h*w//4) 0/1 matrix mapping lane 2i*w+2j -> lane i*(w//2)+j."""
    h2, w2 = h // 2, w // 2
    s = np.zeros((h * w, h2 * w2), np.float32)
    for i in range(h2):
        for j in range(w2):
            s[(2 * i) * w + 2 * j, i * w2 + j] = 1.0
    return s


# ----------------------------------------------------------------------------
# The fused whole-network kernel (one batch element per grid step)
# ----------------------------------------------------------------------------

def _unet_kernel(x_ref, *refs, n_channels, height, width):
    o_ref = refs[-1]
    it = iter(refs[:-1])
    blocks = [tuple(next(it) for _ in range(4)) for _ in range(9)]   # W1,b1,W2,b2
    w_out_ref = next(it)
    b_out_ref = next(it)
    up_refs = [next(it) for _ in range(4)]      # bilinear matrices, deepest first
    pool_refs = [next(it) for _ in range(4)]    # pool select matrices, top first

    sizes = [(height >> k, width >> k) for k in range(5)]

    # Per-resolution column-validity lane masks for the +/-1 column shifts.
    def _col_masks(h, w):
        col = jax.lax.broadcasted_iota(jnp.int32, (1, h * w), 1) % w
        return col != 0, col != (w - 1)          # valid for dx = -1 / dx = +1

    masks = {(h, w): _col_masks(h, w) for (h, w) in sizes if h > 1 and w > 1}

    def conv_bn_relu(x, w_ref, b_ref, h, w):
        """3x3 conv (padding=1, BN scale folded into w) + bias + ReLU.

        x: (C, h*w) f32.  Returns (Cout, h*w) f32.
        """
        c, hw = x.shape
        xb = x.astype(jnp.bfloat16)
        if h == 1 and w == 1:
            # Only the centre tap of the 3x3 kernel sees a valid pixel.
            acc = jnp.dot(w_ref[:, 4 * c:5 * c], xb,
                          preferred_element_type=jnp.float32)
        else:
            keep_m1, keep_p1 = masks[(h, w)]
            zrow = jnp.zeros((c, w), jnp.bfloat16)
            zcol = jnp.zeros((c, 1), jnp.bfloat16)
            rows = (
                jnp.concatenate([zrow, xb[:, :hw - w]], axis=1),   # source row i-1
                xb,                                                # source row i
                jnp.concatenate([xb[:, w:], zrow], axis=1),        # source row i+1
            )
            pieces = []
            for y in rows:                       # tap order (dy, dx) row-major
                pieces.append(jnp.where(
                    keep_m1, jnp.concatenate([zcol, y[:, :hw - 1]], axis=1), 0.0))
                pieces.append(y)
                pieces.append(jnp.where(
                    keep_p1, jnp.concatenate([y[:, 1:], zcol], axis=1), 0.0))
            patches = jnp.concatenate(pieces, axis=0)              # (9c, hw) bf16
            acc = jnp.dot(w_ref[...], patches,
                          preferred_element_type=jnp.float32)
        return jnp.maximum(acc + b_ref[...], 0.0)

    def double_conv(x, blk, h, w):
        w1_ref, b1_ref, w2_ref, b2_ref = blk
        return conv_bn_relu(conv_bn_relu(x, w1_ref, b1_ref, h, w),
                            w2_ref, b2_ref, h, w)

    def maxpool2x2(x, h, w, sel_ref):
        c = x.shape[0]
        m = jnp.maximum(x, jnp.concatenate(
            [x[:, 1:], jnp.zeros((c, 1), x.dtype)], axis=1))
        m = jnp.maximum(m, jnp.concatenate(
            [m[:, w:], jnp.zeros((c, w), x.dtype)], axis=1))
        # Lane compaction (2i*w+2j -> i*(w//2)+j) via a 0/1 selection matmul.
        return jnp.dot(m, sel_ref[...], preferred_element_type=jnp.float32)

    def upsample2x(x, m_ref):
        if x.shape[1] == 1:        # 1x1 -> 2x2 with align_corners=True: copy
            return jnp.concatenate([x, x, x, x], axis=1)
        return jnp.dot(x, m_ref[...], preferred_element_type=jnp.float32)

    x_all = x_ref[...]                           # (n_channels + 1, H*W) f32
    x_img = x_all[:n_channels, :]

    # Encoder.
    x1 = double_conv(x_img, blocks[0], *sizes[0])
    x2 = double_conv(maxpool2x2(x1, *sizes[0], pool_refs[0]), blocks[1], *sizes[1])
    x3 = double_conv(maxpool2x2(x2, *sizes[1], pool_refs[1]), blocks[2], *sizes[2])
    x4 = double_conv(maxpool2x2(x3, *sizes[2], pool_refs[2]), blocks[3], *sizes[3])
    x5 = double_conv(maxpool2x2(x4, *sizes[3], pool_refs[3]), blocks[4], *sizes[4])
    # Dropout2d(p=0) == identity (eval mode).
    # TODO(synk): Dropout2d with p > 0 (random channel masking) not implemented.

    # Decoder: Up = bilinear x2 upsample, cat([skip, up]), DoubleConv.
    # Spatial sizes match exactly at every level here, so Up's F.pad is a no-op.
    x6 = double_conv(jnp.concatenate([x4, upsample2x(x5, up_refs[0])], axis=0),
                     blocks[5], *sizes[3])
    x7 = double_conv(jnp.concatenate([x3, upsample2x(x6, up_refs[1])], axis=0),
                     blocks[6], *sizes[2])
    x8 = double_conv(jnp.concatenate([x2, upsample2x(x7, up_refs[2])], axis=0),
                     blocks[7], *sizes[1])
    x9 = double_conv(jnp.concatenate([x1, upsample2x(x8, up_refs[3])], axis=0),
                     blocks[8], *sizes[0])

    # Output head: 1x1 conv over cat([x9, img, cmv]) + bias + sigmoid.
    c_all = x_all.shape[0]
    cat = jnp.concatenate(
        [x9, x_all[:n_channels, :], x_all[c_all - 1:c_all, :]],
        axis=0).astype(jnp.bfloat16)
    logits = jnp.dot(w_out_ref[...], cat,
                     preferred_element_type=jnp.float32) + b_out_ref[...]
    o_ref[...] = jax.nn.sigmoid(logits)


# ----------------------------------------------------------------------------
# Wrapper: builds the flat argument list and calls the fused kernel once
# ----------------------------------------------------------------------------

def unet2_cmv_forward(x_in, packed, n_channels):
    """x_in: (N, n_channels + 1, H, W) NCHW f32; returns (N, n_classes, H, W)."""
    n, c_all, height, width = x_in.shape
    hw = height * width
    n_classes = packed['out_w'].shape[0]
    assert height % 16 == 0 and width % 16 == 0, "4 maxpool levels need /16"

    x_flat = x_in.reshape(n, c_all, hw).astype(jnp.float32)

    args = [x_flat]
    in_specs = [pl.BlockSpec((None, c_all, hw), lambda i: (i, 0, 0))]

    def add_const(a):
        a = jnp.asarray(a)
        args.append(a)
        in_specs.append(pl.BlockSpec(a.shape, lambda i: (0, 0)))   # all 2-D

    for blk in packed['blocks']:
        for a in blk:
            add_const(a)
    add_const(packed['out_w'])
    add_const(packed['out_b'])
    for lvl in (4, 3, 2, 1):                    # upsample matrices, deepest first
        add_const(_upsample_matrix(height >> lvl, width >> lvl))
    for lvl in (0, 1, 2, 3):                    # pool matrices, top level first
        add_const(_pool_select_matrix(height >> lvl, width >> lvl))

    out = pl.pallas_call(
        functools.partial(_unet_kernel, n_channels=n_channels,
                          height=height, width=width),
        out_shape=jax.ShapeDtypeStruct((n, n_classes, hw), jnp.float32),
        grid=(n,),
        in_specs=in_specs,
        out_specs=pl.BlockSpec((None, n_classes, hw), lambda i: (i, 0, 0)),
        compiler_params=pltpu.CompilerParams(
            dimension_semantics=("parallel",)),
    )(*args)
    return out.reshape(n, n_classes, height, width)


# ----------------------------------------------------------------------------
# Parameter init (deterministic, eval-mode BN) and kernel-side packing
# ----------------------------------------------------------------------------

def _init_bn(key, c, eps=1e-5):
    k1, k2, k3, k4 = jax.random.split(key, 4)
    gamma = 1.0 + 0.1 * jax.random.normal(k1, (c,), jnp.float32)
    beta = 0.1 * jax.random.normal(k2, (c,), jnp.float32)
    mean = 0.1 * jax.random.normal(k3, (c,), jnp.float32)
    var = 1.0 + 0.1 * jax.random.uniform(k4, (c,), jnp.float32)
    scale = gamma * jax.lax.rsqrt(var + eps)
    bias = beta - mean * scale
    return scale, bias


def init_unet_params(key, n_channels, n_classes, filters):
    """Raw f32 conv weights (HWIO) + eval-mode BN folded to scale/bias."""
    f = filters
    specs = [
        (n_channels, f, f),        # inc
        (f, 2 * f, 2 * f),         # down1
        (2 * f, 4 * f, 4 * f),     # down2
        (4 * f, 8 * f, 8 * f),     # down3
        (8 * f, 8 * f, 8 * f),     # down4 (16f // 2)
        (16 * f, 4 * f, 8 * f),    # up1   (out = 8f // 2, mid = in // 2)
        (8 * f, 2 * f, 4 * f),     # up2
        (4 * f, f, 2 * f),         # up3
        (2 * f, f, f),             # up4
    ]
    keys = jax.random.split(key, len(specs) + 1)
    blocks = []
    for k, (ci, co, cm) in zip(keys[:-1], specs):
        k1, k2, k3, k4 = jax.random.split(k, 4)
        w1 = jax.random.normal(k1, (3, 3, ci, cm), jnp.float32) / np.sqrt(9 * ci)
        s1, b1 = _init_bn(k2, cm)
        w2 = jax.random.normal(k3, (3, 3, cm, co), jnp.float32) / np.sqrt(9 * cm)
        s2, b2 = _init_bn(k4, co)
        blocks.append(dict(w1=w1, s1=s1, b1=b1, w2=w2, s2=s2, b2=b2))
    ko_w, ko_b = jax.random.split(keys[-1])
    c_head = filters + n_channels + 1
    out_w = jax.random.normal(ko_w, (n_classes, c_head), jnp.float32) / np.sqrt(c_head)
    out_b = 0.1 * jax.random.normal(ko_b, (n_classes,), jnp.float32)
    return dict(blocks=blocks, out_w=out_w, out_b=out_b)


def pack_params(raw):
    """Fold BN scale into the conv weights and pack each 3x3 conv as a
    (Cout, 9*Cin) bf16 im2col matrix (tap order (dy, dx) row-major)."""
    def fold(w, scale, bias):
        co = w.shape[-1]
        wm = jnp.transpose(w, (3, 0, 1, 2)).reshape(co, -1) * scale[:, None]
        return wm.astype(jnp.bfloat16), bias.reshape(co, 1).astype(jnp.float32)

    blocks = []
    for blk in raw['blocks']:
        w1, b1 = fold(blk['w1'], blk['s1'], blk['b1'])
        w2, b2 = fold(blk['w2'], blk['s2'], blk['b2'])
        blocks.append((w1, b1, w2, b2))
    return dict(blocks=blocks,
                out_w=raw['out_w'].astype(jnp.bfloat16),
                out_b=raw['out_b'].reshape(-1, 1).astype(jnp.float32))


# ----------------------------------------------------------------------------
# Pure-JAX f32 reference of the same forward (for a tolerance check)
# ----------------------------------------------------------------------------

def _ref_conv_bn_relu(x, w, scale, bias):
    y = jax.lax.conv_general_dilated(
        x, w, window_strides=(1, 1), padding=((1, 1), (1, 1)),
        dimension_numbers=('NCHW', 'HWIO', 'NCHW'),
        precision=jax.lax.Precision.HIGHEST)
    y = y * scale[None, :, None, None] + bias[None, :, None, None]
    return jnp.maximum(y, 0.0)


def _ref_double_conv(x, blk):
    h = _ref_conv_bn_relu(x, blk['w1'], blk['s1'], blk['b1'])
    return _ref_conv_bn_relu(h, blk['w2'], blk['s2'], blk['b2'])


def _ref_maxpool(x):
    n, c, h, w = x.shape
    return x.reshape(n, c, h // 2, 2, w // 2, 2).max(axis=(3, 5))


def _ref_upsample(x):
    n, c, h, w = x.shape

    def coords(n_in, n_out):
        if n_in == 1:
            z = jnp.zeros((n_out,), jnp.int32)
            return z, z, jnp.zeros((n_out,), jnp.float32)
        src = jnp.arange(n_out, dtype=jnp.float32) * (n_in - 1) / (n_out - 1)
        i0 = jnp.floor(src).astype(jnp.int32)
        i1 = jnp.minimum(i0 + 1, n_in - 1)
        return i0, i1, src - i0.astype(jnp.float32)

    h0, h1, fh = coords(h, 2 * h)
    w0, w1, fw = coords(w, 2 * w)
    xh = (x[:, :, h0, :] * (1.0 - fh)[None, None, :, None]
          + x[:, :, h1, :] * fh[None, None, :, None])
    return (xh[:, :, :, w0] * (1.0 - fw)[None, None, None, :]
            + xh[:, :, :, w1] * fw[None, None, None, :])


def reference_forward(x_in, raw, n_channels):
    b = raw['blocks']
    x_img = x_in[:, :n_channels]
    x1 = _ref_double_conv(x_img, b[0])
    x2 = _ref_double_conv(_ref_maxpool(x1), b[1])
    x3 = _ref_double_conv(_ref_maxpool(x2), b[2])
    x4 = _ref_double_conv(_ref_maxpool(x3), b[3])
    x5 = _ref_double_conv(_ref_maxpool(x4), b[4])
    x6 = _ref_double_conv(jnp.concatenate([x4, _ref_upsample(x5)], axis=1), b[5])
    x7 = _ref_double_conv(jnp.concatenate([x3, _ref_upsample(x6)], axis=1), b[6])
    x8 = _ref_double_conv(jnp.concatenate([x2, _ref_upsample(x7)], axis=1), b[7])
    x9 = _ref_double_conv(jnp.concatenate([x1, _ref_upsample(x8)], axis=1), b[8])
    cat = jnp.concatenate([x9, x_img, x_in[:, -1:]], axis=1)
    logits = jnp.einsum('oc,nchw->nohw', raw['out_w'], cat,
                        precision=jax.lax.Precision.HIGHEST)
    logits = logits + raw['out_b'][None, :, None, None]
    return jax.nn.sigmoid(logits)


# ----------------------------------------------------------------------------
# Main
# ----------------------------------------------------------------------------

if __name__ == "__main__":
    n_channels, n_classes, filters = 3, 1, 8
    batch, height, width = 2, 16, 16

    key = jax.random.PRNGKey(0)
    k_in, k_par = jax.random.split(key)
    x_in = jax.random.normal(k_in, (batch, n_channels + 1, height, width),
                             jnp.float32)
    raw = init_unet_params(k_par, n_channels, n_classes, filters)
    packed = pack_params(raw)

    fwd = jax.jit(functools.partial(unet2_cmv_forward, n_channels=n_channels))
    out = jax.block_until_ready(fwd(x_in, packed))

    assert out.shape == (batch, n_classes, height, width), out.shape
    assert bool(jnp.all(jnp.isfinite(out)))
    assert bool(jnp.all((out >= 0.0) & (out <= 1.0)))   # sigmoid output range

    # Numerical check against a pure-JAX f32 reference (bf16 MXU tolerance).
    ref = jax.jit(functools.partial(reference_forward,
                                    n_channels=n_channels))(x_in, raw)
    max_err = float(jnp.max(jnp.abs(out - ref)))
    assert max_err < 5e-2, f"max abs error vs reference = {max_err}"

    print("KERNEL_OK")
</pallas_src>

<mosaic_0001>
module attributes {stable_mosaic.version = 11 : i64} {
  func.func @_unet_kernel(%arg0: i32, %arg1: memref<1x4x256xf32, #tpu.memory_space<vmem>>, %arg2: memref<8x27xbf16, #tpu.memory_space<vmem>>, %arg3: memref<8x1xf32, #tpu.memory_space<vmem>>, %arg4: memref<8x72xbf16, #tpu.memory_space<vmem>>, %arg5: memref<8x1xf32, #tpu.memory_space<vmem>>, %arg6: memref<16x72xbf16, #tpu.memory_space<vmem>>, %arg7: memref<16x1xf32, #tpu.memory_space<vmem>>, %arg8: memref<16x144xbf16, #tpu.memory_space<vmem>>, %arg9: memref<16x1xf32, #tpu.memory_space<vmem>>, %arg10: memref<32x144xbf16, #tpu.memory_space<vmem>>, %arg11: memref<32x1xf32, #tpu.memory_space<vmem>>, %arg12: memref<32x288xbf16, #tpu.memory_space<vmem>>, %arg13: memref<32x1xf32, #tpu.memory_space<vmem>>, %arg14: memref<64x288xbf16, #tpu.memory_space<vmem>>, %arg15: memref<64x1xf32, #tpu.memory_space<vmem>>, %arg16: memref<64x576xbf16, #tpu.memory_space<vmem>>, %arg17: memref<64x1xf32, #tpu.memory_space<vmem>>, %arg18: memref<64x576xbf16, #tpu.memory_space<vmem>>, %arg19: memref<64x1xf32, #tpu.memory_space<vmem>>, %arg20: memref<64x576xbf16, #tpu.memory_space<vmem>>, %arg21: memref<64x1xf32, #tpu.memory_space<vmem>>, %arg22: memref<64x1152xbf16, #tpu.memory_space<vmem>>, %arg23: memref<64x1xf32, #tpu.memory_space<vmem>>, %arg24: memref<32x576xbf16, #tpu.memory_space<vmem>>, %arg25: memref<32x1xf32, #tpu.memory_space<vmem>>, %arg26: memref<32x576xbf16, #tpu.memory_space<vmem>>, %arg27: memref<32x1xf32, #tpu.memory_space<vmem>>, %arg28: memref<16x288xbf16, #tpu.memory_space<vmem>>, %arg29: memref<16x1xf32, #tpu.memory_space<vmem>>, %arg30: memref<16x288xbf16, #tpu.memory_space<vmem>>, %arg31: memref<16x1xf32, #tpu.memory_space<vmem>>, %arg32: memref<8x144xbf16, #tpu.memory_space<vmem>>, %arg33: memref<8x1xf32, #tpu.memory_space<vmem>>, %arg34: memref<8x144xbf16, #tpu.memory_space<vmem>>, %arg35: memref<8x1xf32, #tpu.memory_space<vmem>>, %arg36: memref<8x72xbf16, #tpu.memory_space<vmem>>, %arg37: memref<8x1xf32, #tpu.memory_space<vmem>>, %arg38: memref<1x12xbf16, #tpu.memory_space<vmem>>, %arg39: memref<1x1xf32, #tpu.memory_space<vmem>>, %arg40: memref<1x4xf32, #tpu.memory_space<vmem>>, %arg41: memref<4x16xf32, #tpu.memory_space<vmem>>, %arg42: memref<16x64xf32, #tpu.memory_space<vmem>>, %arg43: memref<64x256xf32, #tpu.memory_space<vmem>>, %arg44: memref<256x64xf32, #tpu.memory_space<vmem>>, %arg45: memref<64x16xf32, #tpu.memory_space<vmem>>, %arg46: memref<16x4xf32, #tpu.memory_space<vmem>>, %arg47: memref<4x1xf32, #tpu.memory_space<vmem>>, %arg48: memref<1x1x256xf32, #tpu.memory_space<vmem>>) attributes {dimension_semantics = [#tpu.dimension_semantics<parallel>], iteration_bounds = array<i64: 2>, scalar_prefetch = 0 : i64, scratch_operands = 0 : i64, tpu.core_type = #tpu.core_type<tc>, window_params = [{transform_indices = @transform_0, window_bounds = array<i64: 1, 4, 256>}, {pipeline_mode = #tpu.pipeline_mode<synchronous>, transform_indices = @transform_1, window_bounds = array<i64: 8, 27>}, {pipeline_mode = #tpu.pipeline_mode<synchronous>, transform_indices = @transform_2, window_bounds = array<i64: 8, 1>}, {pipeline_mode = #tpu.pipeline_mode<synchronous>, transform_indices = @transform_3, window_bounds = array<i64: 8, 72>}, {pipeline_mode = #tpu.pipeline_mode<synchronous>, transform_indices = @transform_4, window_bounds = array<i64: 8, 1>}, {pipeline_mode = #tpu.pipeline_mode<synchronous>, transform_indices = @transform_5, window_bounds = array<i64: 16, 72>}, {pipeline_mode = #tpu.pipeline_mode<synchronous>, transform_indices = @transform_6, window_bounds = array<i64: 16, 1>}, {pipeline_mode = #tpu.pipeline_mode<synchronous>, transform_indices = @transform_7, window_bounds = array<i64: 16, 144>}, {pipeline_mode = #tpu.pipeline_mode<synchronous>, transform_indices = @transform_8, window_bounds = array<i64: 16, 1>}, {pipeline_mode = #tpu.pipeline_mode<synchronous>, transform_indices = @transform_9, window_bounds = array<i64: 32, 144>}, {pipeline_mode = #tpu.pipeline_mode<synchronous>, transform_indices = @transform_10, window_bounds = array<i64: 32, 1>}, {pipeline_mode = #tpu.pipeline_mode<synchronous>, transform_indices = @transform_11, window_bounds = array<i64: 32, 288>}, {pipeline_mode = #tpu.pipeline_mode<synchronous>, transform_indices = @transform_12, window_bounds = array<i64: 32, 1>}, {pipeline_mode = #tpu.pipeline_mode<synchronous>, transform_indices = @transform_13, window_bounds = array<i64: 64, 288>}, {pipeline_mode = #tpu.pipeline_mode<synchronous>, transform_indices = @transform_14, window_bounds = array<i64: 64, 1>}, {pipeline_mode = #tpu.pipeline_mode<synchronous>, transform_indices = @transform_15, window_bounds = array<i64: 64, 576>}, {pipeline_mode = #tpu.pipeline_mode<synchronous>, transform_indices = @transform_16, window_bounds = array<i64: 64, 1>}, {pipeline_mode = #tpu.pipeline_mode<synchronous>, transform_indices = @transform_17, window_bounds = array<i64: 64, 576>}, {pipeline_mode = #tpu.pipeline_mode<synchronous>, transform_indices = @transform_18, window_bounds = array<i64: 64, 1>}, {pipeline_mode = #tpu.pipeline_mode<synchronous>, transform_indices = @transform_19, window_bounds = array<i64: 64, 576>}, {pipeline_mode = #tpu.pipeline_mode<synchronous>, transform_indices = @transform_20, window_bounds = array<i64: 64, 1>}, {pipeline_mode = #tpu.pipeline_mode<synchronous>, transform_indices = @transform_21, window_bounds = array<i64: 64, 1152>}, {pipeline_mode = #tpu.pipeline_mode<synchronous>, transform_indices = @transform_22, window_bounds = array<i64: 64, 1>}, {pipeline_mode = #tpu.pipeline_mode<synchronous>, transform_indices = @transform_23, window_bounds = array<i64: 32, 576>}, {pipeline_mode = #tpu.pipeline_mode<synchronous>, transform_indices = @transform_24, window_bounds = array<i64: 32, 1>}, {pipeline_mode = #tpu.pipeline_mode<synchronous>, transform_indices = @transform_25, window_bounds = array<i64: 32, 576>}, {pipeline_mode = #tpu.pipeline_mode<synchronous>, transform_indices = @transform_26, window_bounds = array<i64: 32, 1>}, {pipeline_mode = #tpu.pipeline_mode<synchronous>, transform_indices = @transform_27, window_bounds = array<i64: 16, 288>}, {pipeline_mode = #tpu.pipeline_mode<synchronous>, transform_indices = @transform_28, window_bounds = array<i64: 16, 1>}, {pipeline_mode = #tpu.pipeline_mode<synchronous>, transform_indices = @transform_29, window_bounds = array<i64: 16, 288>}, {pipeline_mode = #tpu.pipeline_mode<synchronous>, transform_indices = @transform_30, window_bounds = array<i64: 16, 1>}, {pipeline_mode = #tpu.pipeline_mode<synchronous>, transform_indices = @transform_31, window_bounds = array<i64: 8, 144>}, {pipeline_mode = #tpu.pipeline_mode<synchronous>, transform_indices = @transform_32, window_bounds = array<i64: 8, 1>}, {pipeline_mode = #tpu.pipeline_mode<synchronous>, transform_indices = @transform_33, window_bounds = array<i64: 8, 144>}, {pipeline_mode = #tpu.pipeline_mode<synchronous>, transform_indices = @transform_34, window_bounds = array<i64: 8, 1>}, {pipeline_mode = #tpu.pipeline_mode<synchronous>, transform_indices = @transform_35, window_bounds = array<i64: 8, 72>}, {pipeline_mode = #tpu.pipeline_mode<synchronous>, transform_indices = @transform_36, window_bounds = array<i64: 8, 1>}, {pipeline_mode = #tpu.pipeline_mode<synchronous>, transform_indices = @transform_37, window_bounds = array<i64: 1, 12>}, {pipeline_mode = #tpu.pipeline_mode<synchronous>, transform_indices = @transform_38, window_bounds = array<i64: 1, 1>}, {pipeline_mode = #tpu.pipeline_mode<synchronous>, transform_indices = @transform_39, window_bounds = array<i64: 1, 4>}, {pipeline_mode = #tpu.pipeline_mode<synchronous>, transform_indices = @transform_40, window_bounds = array<i64: 4, 16>}, {pipeline_mode = #tpu.pipeline_mode<synchronous>, transform_indices = @transform_41, window_bounds = array<i64: 16, 64>}, {pipeline_mode = #tpu.pipeline_mode<synchronous>, transform_indices = @transform_42, window_bounds = array<i64: 64, 256>}, {pipeline_mode = #tpu.pipeline_mode<synchronous>, transform_indices = @transform_43, window_bounds = array<i64: 256, 64>}, {pipeline_mode = #tpu.pipeline_mode<synchronous>, transform_indices = @transform_44, window_bounds = array<i64: 64, 16>}, {pipeline_mode = #tpu.pipeline_mode<synchronous>, transform_indices = @transform_45, window_bounds = array<i64: 16, 4>}, {pipeline_mode = #tpu.pipeline_mode<synchronous>, transform_indices = @transform_46, window_bounds = array<i64: 4, 1>}, {transform_indices = @transform_47, window_bounds = array<i64: 1, 1, 256>}]} {
    %0 = tpu.iota {dimensions = array<i32: 1>} : vector<1x256xi32>
    %c16_i32 = arith.constant 16 : i32
    %c0_i32 = arith.constant 0 : i32
    %1 = arith.cmpi eq, %c16_i32, %c0_i32 : i32
    %c1_i32 = arith.constant 1 : i32
    %2 = arith.select %1, %c1_i32, %c16_i32 : i32
    %3 = vector.broadcast %2 : i32 to vector<1x256xi32>
    %4 = arith.remsi %0, %3 : vector<1x256xi32>
    %c0_i32_0 = arith.constant 0 : i32
    %5 = vector.broadcast %c0_i32_0 : i32 to vector<1x256xi32>
    %6 = arith.cmpi ne, %4, %5 : vector<1x256xi32>
    %c0_i32_1 = arith.constant 0 : i32
    %7 = vector.broadcast %c0_i32_1 : i32 to vector<1x256xi32>
    %8 = arith.cmpi slt, %4, %7 : vector<1x256xi32>
    %c0_i32_2 = arith.constant 0 : i32
    %9 = arith.cmpi slt, %2, %c0_i32_2 : i32
    %10 = vector.broadcast %9 : i1 to vector<1x256xi1>
    %11 = vector.broadcast %10 : vector<1x256xi1> to vector<1x256xi1>
    %12 = arith.xori %8, %11 : vector<1x256xi1>
    %13 = arith.andi %12, %6 : vector<1x256xi1>
    %14 = vector.broadcast %2 : i32 to vector<1x256xi32>
    %15 = arith.addi %4, %14 : vector<1x256xi32>
    %16 = arith.select %13, %15, %4 : vector<1x256xi1>, vector<1x256xi32>
    %c0_i32_3 = arith.constant 0 : i32
    %17 = vector.broadcast %c0_i32_3 : i32 to vector<1x256xi32>
    %18 = arith.cmpi ne, %16, %17 : vector<1x256xi32>
    %c15_i32 = arith.constant 15 : i32
    %19 = vector.broadcast %c15_i32 : i32 to vector<1x256xi32>
    %20 = arith.cmpi ne, %16, %19 : vector<1x256xi32>
    %21 = tpu.iota {dimensions = array<i32: 1>} : vector<1x64xi32>
    %c8_i32 = arith.constant 8 : i32
    %c0_i32_4 = arith.constant 0 : i32
    %22 = arith.cmpi eq, %c8_i32, %c0_i32_4 : i32
    %c1_i32_5 = arith.constant 1 : i32
    %23 = arith.select %22, %c1_i32_5, %c8_i32 : i32
    %24 = vector.broadcast %23 : i32 to vector<1x64xi32>
    %25 = arith.remsi %21, %24 : vector<1x64xi32>
    %c0_i32_6 = arith.constant 0 : i32
    %26 = vector.broadcast %c0_i32_6 : i32 to vector<1x64xi32>
    %27 = arith.cmpi ne, %25, %26 : vector<1x64xi32>
    %c0_i32_7 = arith.constant 0 : i32
    %28 = vector.broadcast %c0_i32_7 : i32 to vector<1x64xi32>
    %29 = arith.cmpi slt, %25, %28 : vector<1x64xi32>
    %c0_i32_8 = arith.constant 0 : i32
    %30 = arith.cmpi slt, %23, %c0_i32_8 : i32
    %31 = vector.broadcast %30 : i1 to vector<1x64xi1>
    %32 = vector.broadcast %31 : vector<1x64xi1> to vector<1x64xi1>
    %33 = arith.xori %29, %32 : vector<1x64xi1>
    %34 = arith.andi %33, %27 : vector<1x64xi1>
    %35 = vector.broadcast %23 : i32 to vector<1x64xi32>
    %36 = arith.addi %25, %35 : vector<1x64xi32>
    %37 = arith.select %34, %36, %25 : vector<1x64xi1>, vector<1x64xi32>
    %c0_i32_9 = arith.constant 0 : i32
    %38 = vector.broadcast %c0_i32_9 : i32 to vector<1x64xi32>
    %39 = arith.cmpi ne, %37, %38 : vector<1x64xi32>
    %c7_i32 = arith.constant 7 : i32
    %40 = vector.broadcast %c7_i32 : i32 to vector<1x64xi32>
    %41 = arith.cmpi ne, %37, %40 : vector<1x64xi32>
    %42 = tpu.iota {dimensions = array<i32: 1>} : vector<1x16xi32>
    %c4_i32 = arith.constant 4 : i32
    %c0_i32_10 = arith.constant 0 : i32
    %43 = arith.cmpi eq, %c4_i32, %c0_i32_10 : i32
    %c1_i32_11 = arith.constant 1 : i32
    %44 = arith.select %43, %c1_i32_11, %c4_i32 : i32
    %45 = vector.broadcast %44 : i32 to vector<1x16xi32>
    %46 = arith.remsi %42, %45 : vector<1x16xi32>
    %c0_i32_12 = arith.constant 0 : i32
    %47 = vector.broadcast %c0_i32_12 : i32 to vector<1x16xi32>
    %48 = arith.cmpi ne, %46, %47 : vector<1x16xi32>
    %c0_i32_13 = arith.constant 0 : i32
    %49 = vector.broadcast %c0_i32_13 : i32 to vector<1x16xi32>
    %50 = arith.cmpi slt, %46, %49 : vector<1x16xi32>
    %c0_i32_14 = arith.constant 0 : i32
    %51 = arith.cmpi slt, %44, %c0_i32_14 : i32
    %52 = vector.broadcast %51 : i1 to vector<1x16xi1>
    %53 = vector.broadcast %52 : vector<1x16xi1> to vector<1x16xi1>
    %54 = arith.xori %50, %53 : vector<1x16xi1>
    %55 = arith.andi %54, %48 : vector<1x16xi1>
    %56 = vector.broadcast %44 : i32 to vector<1x16xi32>
    %57 = arith.addi %46, %56 : vector<1x16xi32>
    %58 = arith.select %55, %57, %46 : vector<1x16xi1>, vector<1x16xi32>
    %c0_i32_15 = arith.constant 0 : i32
    %59 = vector.broadcast %c0_i32_15 : i32 to vector<1x16xi32>
    %60 = arith.cmpi ne, %58, %59 : vector<1x16xi32>
    %c3_i32 = arith.constant 3 : i32
    %61 = vector.broadcast %c3_i32 : i32 to vector<1x16xi32>
    %62 = arith.cmpi ne, %58, %61 : vector<1x16xi32>
    %63 = tpu.iota {dimensions = array<i32: 1>} : vector<1x4xi32>
    %c2_i32 = arith.constant 2 : i32
    %c0_i32_16 = arith.constant 0 : i32
    %64 = arith.cmpi eq, %c2_i32, %c0_i32_16 : i32
    %c1_i32_17 = arith.constant 1 : i32
    %65 = arith.select %64, %c1_i32_17, %c2_i32 : i32
    %66 = vector.broadcast %65 : i32 to vector<1x4xi32>
    %67 = arith.remsi %63, %66 : vector<1x4xi32>
    %c0_i32_18 = arith.constant 0 : i32
    %68 = vector.broadcast %c0_i32_18 : i32 to vector<1x4xi32>
    %69 = arith.cmpi ne, %67, %68 : vector<1x4xi32>
    %c0_i32_19 = arith.constant 0 : i32
    %70 = vector.broadcast %c0_i32_19 : i32 to vector<1x4xi32>
    %71 = arith.cmpi slt, %67, %70 : vector<1x4xi32>
    %c0_i32_20 = arith.constant 0 : i32
    %72 = arith.cmpi slt, %65, %c0_i32_20 : i32
    %73 = vector.broadcast %72 : i1 to vector<1x4xi1>
    %74 = vector.broadcast %73 : vector<1x4xi1> to vector<1x4xi1>
    %75 = arith.xori %71, %74 : vector<1x4xi1>
    %76 = arith.andi %75, %69 : vector<1x4xi1>
    %77 = vector.broadcast %65 : i32 to vector<1x4xi32>
    %78 = arith.addi %67, %77 : vector<1x4xi32>
    %79 = arith.select %76, %78, %67 : vector<1x4xi1>, vector<1x4xi32>
    %c0_i32_21 = arith.constant 0 : i32
    %80 = vector.broadcast %c0_i32_21 : i32 to vector<1x4xi32>
    %81 = arith.cmpi ne, %79, %80 : vector<1x4xi32>
    %c1_i32_22 = arith.constant 1 : i32
    %82 = vector.broadcast %c1_i32_22 : i32 to vector<1x4xi32>
    %83 = arith.cmpi ne, %79, %82 : vector<1x4xi32>
    %c0 = arith.constant 0 : index
    %c0_23 = arith.constant 0 : index
    %c0_24 = arith.constant 0 : index
    %84 = vector.load %arg1[%c0, %c0_23, %c0_24] : memref<1x4x256xf32, #tpu.memory_space<vmem>>, vector<1x4x256xf32>
    %85 = vector.shape_cast %84 : vector<1x4x256xf32> to vector<4x256xf32>
    %86 = vector.extract_strided_slice %85 {offsets = [0, 0], sizes = [3, 256], strides = [1, 1]} : vector<4x256xf32> to vector<3x256xf32>
    %87 = arith.truncf %86 : vector<3x256xf32> to vector<3x256xbf16>
    %cst = arith.constant 0.000000e+00 : bf16
    %88 = vector.broadcast %cst : bf16 to vector<3x16xbf16>
    %cst_25 = arith.constant 0.000000e+00 : bf16
    %89 = vector.broadcast %cst_25 : bf16 to vector<3x1xbf16>
    %90 = vector.extract_strided_slice %87 {offsets = [0, 0], sizes = [3, 240], strides = [1, 1]} : vector<3x256xbf16> to vector<3x240xbf16>
    %91 = tpu.concatenate %88, %90 in 1 : vector<3x16xbf16>, vector<3x240xbf16> -> vector<3x256xbf16>
    %92 = vector.extract_strided_slice %87 {offsets = [0, 16], sizes = [3, 240], strides = [1, 1]} : vector<3x256xbf16> to vector<3x240xbf16>
    %93 = tpu.concatenate %92, %88 in 1 : vector<3x240xbf16>, vector<3x16xbf16> -> vector<3x256xbf16>
    %94 = vector.extract_strided_slice %91 {offsets = [0, 0], sizes = [3, 255], strides = [1, 1]} : vector<3x256xbf16> to vector<3x255xbf16>
    %95 = tpu.concatenate %89, %94 in 1 : vector<3x1xbf16>, vector<3x255xbf16> -> vector<3x256xbf16>
    %cst_26 = arith.constant 0.000000e+00 : f32
    %96 = arith.truncf %cst_26 : f32 to bf16
    %97 = vector.shape_cast %18 : vector<1x256xi1> to vector<1x256xi1>
    %98 = vector.broadcast %97 : vector<1x256xi1> to vector<3x256xi1>
    %99 = vector.broadcast %96 : bf16 to vector<3x256xbf16>
    %100 = arith.select %98, %95, %99 : vector<3x256xi1>, vector<3x256xbf16>
    %101 = vector.extract_strided_slice %91 {offsets = [0, 1], sizes = [3, 255], strides = [1, 1]} : vector<3x256xbf16> to vector<3x255xbf16>
    %102 = tpu.concatenate %101, %89 in 1 : vector<3x255xbf16>, vector<3x1xbf16> -> vector<3x256xbf16>
    %cst_27 = arith.constant 0.000000e+00 : f32
    %103 = arith.truncf %cst_27 : f32 to bf16
    %104 = vector.shape_cast %20 : vector<1x256xi1> to vector<1x256xi1>
    %105 = vector.broadcast %104 : vector<1x256xi1> to vector<3x256xi1>
    %106 = vector.broadcast %103 : bf16 to vector<3x256xbf16>
    %107 = arith.select %105, %102, %106 : vector<3x256xi1>, vector<3x256xbf16>
    %108 = vector.extract_strided_slice %87 {offsets = [0, 0], sizes = [3, 255], strides = [1, 1]} : vector<3x256xbf16> to vector<3x255xbf16>
    %109 = tpu.concatenate %89, %108 in 1 : vector<3x1xbf16>, vector<3x255xbf16> -> vector<3x256xbf16>
    %cst_28 = arith.constant 0.000000e+00 : f32
    %110 = arith.truncf %cst_28 : f32 to bf16
    %111 = vector.shape_cast %18 : vector<1x256xi1> to vector<1x256xi1>
    %112 = vector.broadcast %111 : vector<1x256xi1> to vector<3x256xi1>
    %113 = vector.broadcast %110 : bf16 to vector<3x256xbf16>
    %114 = arith.select %112, %109, %113 : vector<3x256xi1>, vector<3x256xbf16>
    %115 = vector.extract_strided_slice %87 {offsets = [0, 1], sizes = [3, 255], strides = [1, 1]} : vector<3x256xbf16> to vector<3x255xbf16>
    %116 = tpu.concatenate %115, %89 in 1 : vector<3x255xbf16>, vector<3x1xbf16> -> vector<3x256xbf16>
    %cst_29 = arith.constant 0.000000e+00 : f32
    %117 = arith.truncf %cst_29 : f32 to bf16
    %118 = vector.shape_cast %20 : vector<1x256xi1> to vector<1x256xi1>
    %119 = vector.broadcast %118 : vector<1x256xi1> to vector<3x256xi1>
    %120 = vector.broadcast %117 : bf16 to vector<3x256xbf16>
    %121 = arith.select %119, %116, %120 : vector<3x256xi1>, vector<3x256xbf16>
    %122 = vector.extract_strided_slice %93 {offsets = [0, 0], sizes = [3, 255], strides = [1, 1]} : vector<3x256xbf16> to vector<3x255xbf16>
    %123 = tpu.concatenate %89, %122 in 1 : vector<3x1xbf16>, vector<3x255xbf16> -> vector<3x256xbf16>
    %cst_30 = arith.constant 0.000000e+00 : f32
    %124 = arith.truncf %cst_30 : f32 to bf16
    %125 = vector.shape_cast %18 : vector<1x256xi1> to vector<1x256xi1>
    %126 = vector.broadcast %125 : vector<1x256xi1> to vector<3x256xi1>
    %127 = vector.broadcast %124 : bf16 to vector<3x256xbf16>
    %128 = arith.select %126, %123, %127 : vector<3x256xi1>, vector<3x256xbf16>
    %129 = vector.extract_strided_slice %93 {offsets = [0, 1], sizes = [3, 255], strides = [1, 1]} : vector<3x256xbf16> to vector<3x255xbf16>
    %130 = tpu.concatenate %129, %89 in 1 : vector<3x255xbf16>, vector<3x1xbf16> -> vector<3x256xbf16>
    %cst_31 = arith.constant 0.000000e+00 : f32
    %131 = arith.truncf %cst_31 : f32 to bf16
    %132 = vector.shape_cast %20 : vector<1x256xi1> to vector<1x256xi1>
    %133 = vector.broadcast %132 : vector<1x256xi1> to vector<3x256xi1>
    %134 = vector.broadcast %131 : bf16 to vector<3x256xbf16>
    %135 = arith.select %133, %130, %134 : vector<3x256xi1>, vector<3x256xbf16>
    %136 = tpu.concatenate %100, %91, %107, %114, %87, %121, %128, %93, %135 in 0 : vector<3x256xbf16>, vector<3x256xbf16>, vector<3x256xbf16>, vector<3x256xbf16>, vector<3x256xbf16>, vector<3x256xbf16>, vector<3x256xbf16>, vector<3x256xbf16>, vector<3x256xbf16> -> vector<27x256xbf16>
    %c0_32 = arith.constant 0 : index
    %c0_33 = arith.constant 0 : index
    %137 = vector.load %arg2[%c0_32, %c0_33] : memref<8x27xbf16, #tpu.memory_space<vmem>>, vector<8x27xbf16>
    %cst_34 = arith.constant dense<0.000000e+00> : vector<8x256xf32>
    %138 = tpu.matmul %137, %136, %cst_34 {dimension_numbers = #tpu.dot_dimension_numbers<[1], [0], [0], [1], [0, 0, 1, 1], [], []>} : vector<8x27xbf16>, vector<27x256xbf16>, vector<8x256xf32> -> vector<8x256xf32>
    %c0_35 = arith.constant 0 : index
    %c0_36 = arith.constant 0 : index
    %139 = vector.load %arg3[%c0_35, %c0_36] : memref<8x1xf32, #tpu.memory_space<vmem>>, vector<8x1xf32>
    %140 = vector.broadcast %139 : vector<8x1xf32> to vector<8x256xf32>
    %141 = arith.addf %138, %140 : vector<8x256xf32>
    %cst_37 = arith.constant 0.000000e+00 : f32
    %142 = vector.broadcast %cst_37 : f32 to vector<8x256xf32>
    %143 = arith.maximumf %141, %142 : vector<8x256xf32>
    %144 = arith.truncf %143 : vector<8x256xf32> to vector<8x256xbf16>
    %cst_38 = arith.constant 0.000000e+00 : bf16
    %145 = vector.broadcast %cst_38 : bf16 to vector<8x16xbf16>
    %cst_39 = arith.constant 0.000000e+00 : bf16
    %146 = vector.broadcast %cst_39 : bf16 to vector<8x1xbf16>
    %147 = vector.extract_strided_slice %144 {offsets = [0, 0], sizes = [8, 240], strides = [1, 1]} : vector<8x256xbf16> to vector<8x240xbf16>
    %148 = tpu.concatenate %145, %147 in 1 : vector<8x16xbf16>, vector<8x240xbf16> -> vector<8x256xbf16>
    %149 = vector.extract_strided_slice %144 {offsets = [0, 16], sizes = [8, 240], strides = [1, 1]} : vector<8x256xbf16> to vector<8x240xbf16>
    %150 = tpu.concatenate %149, %145 in 1 : vector<8x240xbf16>, vector<8x16xbf16> -> vector<8x256xbf16>
    %151 = vector.extract_strided_slice %148 {offsets = [0, 0], sizes = [8, 255], strides = [1, 1]} : vector<8x256xbf16> to vector<8x255xbf16>
    %152 = tpu.concatenate %146, %151 in 1 : vector<8x1xbf16>, vector<8x255xbf16> -> vector<8x256xbf16>
    %cst_40 = arith.constant 0.000000e+00 : f32
    %153 = arith.truncf %cst_40 : f32 to bf16
    %154 = vector.shape_cast %18 : vector<1x256xi1> to vector<1x256xi1>
    %155 = vector.broadcast %154 : vector<1x256xi1> to vector<8x256xi1>
    %156 = vector.broadcast %153 : bf16 to vector<8x256xbf16>
    %157 = arith.select %155, %152, %156 : vector<8x256xi1>, vector<8x256xbf16>
    %158 = vector.extract_strided_slice %148 {offsets = [0, 1], sizes = [8, 255], strides = [1, 1]} : vector<8x256xbf16> to vector<8x255xbf16>
    %159 = tpu.concatenate %158, %146 in 1 : vector<8x255xbf16>, vector<8x1xbf16> -> vector<8x256xbf16>
    %cst_41 = arith.constant 0.000000e+00 : f32
    %160 = arith.truncf %cst_41 : f32 to bf16
    %161 = vector.shape_cast %20 : vector<1x256xi1> to vector<1x256xi1>
    %162 = vector.broadcast %161 : vector<1x256xi1> to vector<8x256xi1>
    %163 = vector.broadcast %160 : bf16 to vector<8x256xbf16>
    %164 = arith.select %162, %159, %163 : vector<8x256xi1>, vector<8x256xbf16>
    %165 = vector.extract_strided_slice %144 {offsets = [0, 0], sizes = [8, 255], strides = [1, 1]} : vector<8x256xbf16> to vector<8x255xbf16>
    %166 = tpu.concatenate %146, %165 in 1 : vector<8x1xbf16>, vector<8x255xbf16> -> vector<8x256xbf16>
    %cst_42 = arith.constant 0.000000e+00 : f32
    %167 = arith.truncf %cst_42 : f32 to bf16
    %168 = vector.shape_cast %18 : vector<1x256xi1> to vector<1x256xi1>
    %169 = vector.broadcast %168 : vector<1x256xi1> to vector<8x256xi1>
    %170 = vector.broadcast %167 : bf16 to vector<8x256xbf16>
    %171 = arith.select %169, %166, %170 : vector<8x256xi1>, vector<8x256xbf16>
    %172 = vector.extract_strided_slice %144 {offsets = [0, 1], sizes = [8, 255], strides = [1, 1]} : vector<8x256xbf16> to vector<8x255xbf16>
    %173 = tpu.concatenate %172, %146 in 1 : vector<8x255xbf16>, vector<8x1xbf16> -> vector<8x256xbf16>
    %cst_43 = arith.constant 0.000000e+00 : f32
    %174 = arith.truncf %cst_43 : f32 to bf16
    %175 = vector.shape_cast %20 : vector<1x256xi1> to vector<1x256xi1>
    %176 = vector.broadcast %175 : vector<1x256xi1> to vector<8x256xi1>
    %177 = vector.broadcast %174 : bf16 to vector<8x256xbf16>
    %178 = arith.select %176, %173, %177 : vector<8x256xi1>, vector<8x256xbf16>
    %179 = vector.extract_strided_slice %150 {offsets = [0, 0], sizes = [8, 255], strides = [1, 1]} : vector<8x256xbf16> to vector<8x255xbf16>
    %180 = tpu.concatenate %146, %179 in 1 : vector<8x1xbf16>, vector<8x255xbf16> -> vector<8x256xbf16>
    %cst_44 = arith.constant 0.000000e+00 : f32
    %181 = arith.truncf %cst_44 : f32 to bf16
    %182 = vector.shape_cast %18 : vector<1x256xi1> to vector<1x256xi1>
    %183 = vector.broadcast %182 : vector<1x256xi1> to vector<8x256xi1>
    %184 = vector.broadcast %181 : bf16 to vector<8x256xbf16>
    %185 = arith.select %183, %180, %184 : vector<8x256xi1>, vector<8x256xbf16>
    %186 = vector.extract_strided_slice %150 {offsets = [0, 1], sizes = [8, 255], strides = [1, 1]} : vector<8x256xbf16> to vector<8x255xbf16>
    %187 = tpu.concatenate %186, %146 in 1 : vector<8x255xbf16>, vector<8x1xbf16> -> vector<8x256xbf16>
    %cst_45 = arith.constant 0.000000e+00 : f32
    %188 = arith.truncf %cst_45 : f32 to bf16
    %189 = vector.shape_cast %20 : vector<1x256xi1> to vector<1x256xi1>
    %190 = vector.broadcast %189 : vector<1x256xi1> to vector<8x256xi1>
    %191 = vector.broadcast %188 : bf16 to vector<8x256xbf16>
    %192 = arith.select %190, %187, %191 : vector<8x256xi1>, vector<8x256xbf16>
    %193 = tpu.concatenate %157, %148, %164, %171, %144, %178, %185, %150, %192 in 0 : vector<8x256xbf16>, vector<8x256xbf16>, vector<8x256xbf16>, vector<8x256xbf16>, vector<8x256xbf16>, vector<8x256xbf16>, vector<8x256xbf16>, vector<8x256xbf16>, vector<8x256xbf16> -> vector<72x256xbf16>
    %c0_46 = arith.constant 0 : index
    %c0_47 = arith.constant 0 : index
    %194 = vector.load %arg4[%c0_46, %c0_47] : memref<8x72xbf16, #tpu.memory_space<vmem>>, vector<8x72xbf16>
    %cst_48 = arith.constant dense<0.000000e+00> : vector<8x256xf32>
    %195 = tpu.matmul %194, %193, %cst_48 {dimension_numbers = #tpu.dot_dimension_numbers<[1], [0], [0], [1], [0, 0, 1, 1], [], []>} : vector<8x72xbf16>, vector<72x256xbf16>, vector<8x256xf32> -> vector<8x256xf32>
    %c0_49 = arith.constant 0 : index
    %c0_50 = arith.constant 0 : index
    %196 = vector.load %arg5[%c0_49, %c0_50] : memref<8x1xf32, #tpu.memory_space<vmem>>, vector<8x1xf32>
    %197 = vector.broadcast %196 : vector<8x1xf32> to vector<8x256xf32>
    %198 = arith.addf %195, %197 : vector<8x256xf32>
    %cst_51 = arith.constant 0.000000e+00 : f32
    %199 = vector.broadcast %cst_51 : f32 to vector<8x256xf32>
    %200 = arith.maximumf %198, %199 : vector<8x256xf32>
    %201 = vector.extract_strided_slice %200 {offsets = [0, 1], sizes = [8, 255], strides = [1, 1]} : vector<8x256xf32> to vector<8x255xf32>
    %cst_52 = arith.constant 0.000000e+00 : f32
    %202 = vector.broadcast %cst_52 : f32 to vector<8x1xf32>
    %203 = tpu.concatenate %201, %202 in 1 : vector<8x255xf32>, vector<8x1xf32> -> vector<8x256xf32>
    %204 = arith.maximumf %200, %203 : vector<8x256xf32>
    %205 = vector.extract_strided_slice %204 {offsets = [0, 16], sizes = [8, 240], strides = [1, 1]} : vector<8x256xf32> to vector<8x240xf32>
    %cst_53 = arith.constant 0.000000e+00 : f32
    %206 = vector.broadcast %cst_53 : f32 to vector<8x16xf32>
    %207 = tpu.concatenate %205, %206 in 1 : vector<8x240xf32>, vector<8x16xf32> -> vector<8x256xf32>
    %208 = arith.maximumf %204, %207 : vector<8x256xf32>
    %c0_54 = arith.constant 0 : index
    %c0_55 = arith.constant 0 : index
    %209 = vector.load %arg44[%c0_54, %c0_55] : memref<256x64xf32, #tpu.memory_space<vmem>>, vector<256x64xf32>
    %cst_56 = arith.constant dense<0.000000e+00> : vector<8x64xf32>
    %210 = tpu.matmul %208, %209, %cst_56 {dimension_numbers = #tpu.dot_dimension_numbers<[1], [0], [0], [1], [0, 0, 1, 1], [], []>} : vector<8x256xf32>, vector<256x64xf32>, vector<8x64xf32> -> vector<8x64xf32>
    %211 = arith.truncf %210 : vector<8x64xf32> to vector<8x64xbf16>
    %cst_57 = arith.constant 0.000000e+00 : bf16
    %212 = vector.broadcast %cst_57 : bf16 to vector<8x8xbf16>
    %cst_58 = arith.constant 0.000000e+00 : bf16
    %213 = vector.broadcast %cst_58 : bf16 to vector<8x1xbf16>
    %214 = vector.extract_strided_slice %211 {offsets = [0, 0], sizes = [8, 56], strides = [1, 1]} : vector<8x64xbf16> to vector<8x56xbf16>
    %215 = tpu.concatenate %212, %214 in 1 : vector<8x8xbf16>, vector<8x56xbf16> -> vector<8x64xbf16>
    %216 = vector.extract_strided_slice %211 {offsets = [0, 8], sizes = [8, 56], strides = [1, 1]} : vector<8x64xbf16> to vector<8x56xbf16>
    %217 = tpu.concatenate %216, %212 in 1 : vector<8x56xbf16>, vector<8x8xbf16> -> vector<8x64xbf16>
    %218 = vector.extract_strided_slice %215 {offsets = [0, 0], sizes = [8, 63], strides = [1, 1]} : vector<8x64xbf16> to vector<8x63xbf16>
    %219 = tpu.concatenate %213, %218 in 1 : vector<8x1xbf16>, vector<8x63xbf16> -> vector<8x64xbf16>
    %cst_59 = arith.constant 0.000000e+00 : f32
    %220 = arith.truncf %cst_59 : f32 to bf16
    %221 = vector.shape_cast %39 : vector<1x64xi1> to vector<1x64xi1>
    %222 = vector.broadcast %221 : vector<1x64xi1> to vector<8x64xi1>
    %223 = vector.broadcast %220 : bf16 to vector<8x64xbf16>
    %224 = arith.select %222, %219, %223 : vector<8x64xi1>, vector<8x64xbf16>
    %225 = vector.extract_strided_slice %215 {offsets = [0, 1], sizes = [8, 63], strides = [1, 1]} : vector<8x64xbf16> to vector<8x63xbf16>
    %226 = tpu.concatenate %225, %213 in 1 : vector<8x63xbf16>, vector<8x1xbf16> -> vector<8x64xbf16>
    %cst_60 = arith.constant 0.000000e+00 : f32
    %227 = arith.truncf %cst_60 : f32 to bf16
    %228 = vector.shape_cast %41 : vector<1x64xi1> to vector<1x64xi1>
    %229 = vector.broadcast %228 : vector<1x64xi1> to vector<8x64xi1>
    %230 = vector.broadcast %227 : bf16 to vector<8x64xbf16>
    %231 = arith.select %229, %226, %230 : vector<8x64xi1>, vector<8x64xbf16>
    %232 = vector.extract_strided_slice %211 {offsets = [0, 0], sizes = [8, 63], strides = [1, 1]} : vector<8x64xbf16> to vector<8x63xbf16>
    %233 = tpu.concatenate %213, %232 in 1 : vector<8x1xbf16>, vector<8x63xbf16> -> vector<8x64xbf16>
    %cst_61 = arith.constant 0.000000e+00 : f32
    %234 = arith.truncf %cst_61 : f32 to bf16
    %235 = vector.shape_cast %39 : vector<1x64xi1> to vector<1x64xi1>
    %236 = vector.broadcast %235 : vector<1x64xi1> to vector<8x64xi1>
    %237 = vector.broadcast %234 : bf16 to vector<8x64xbf16>
    %238 = arith.select %236, %233, %237 : vector<8x64xi1>, vector<8x64xbf16>
    %239 = vector.extract_strided_slice %211 {offsets = [0, 1], sizes = [8, 63], strides = [1, 1]} : vector<8x64xbf16> to vector<8x63xbf16>
    %240 = tpu.concatenate %239, %213 in 1 : vector<8x63xbf16>, vector<8x1xbf16> -> vector<8x64xbf16>
    %cst_62 = arith.constant 0.000000e+00 : f32
    %241 = arith.truncf %cst_62 : f32 to bf16
    %242 = vector.shape_cast %41 : vector<1x64xi1> to vector<1x64xi1>
    %243 = vector.broadcast %242 : vector<1x64xi1> to vector<8x64xi1>
    %244 = vector.broadcast %241 : bf16 to vector<8x64xbf16>
    %245 = arith.select %243, %240, %244 : vector<8x64xi1>, vector<8x64xbf16>
    %246 = vector.extract_strided_slice %217 {offsets = [0, 0], sizes = [8, 63], strides = [1, 1]} : vector<8x64xbf16> to vector<8x63xbf16>
    %247 = tpu.concatenate %213, %246 in 1 : vector<8x1xbf16>, vector<8x63xbf16> -> vector<8x64xbf16>
    %cst_63 = arith.constant 0.000000e+00 : f32
    %248 = arith.truncf %cst_63 : f32 to bf16
    %249 = vector.shape_cast %39 : vector<1x64xi1> to vector<1x64xi1>
    %250 = vector.broadcast %249 : vector<1x64xi1> to vector<8x64xi1>
    %251 = vector.broadcast %248 : bf16 to vector<8x64xbf16>
    %252 = arith.select %250, %247, %251 : vector<8x64xi1>, vector<8x64xbf16>
    %253 = vector.extract_strided_slice %217 {offsets = [0, 1], sizes = [8, 63], strides = [1, 1]} : vector<8x64xbf16> to vector<8x63xbf16>
    %254 = tpu.concatenate %253, %213 in 1 : vector<8x63xbf16>, vector<8x1xbf16> -> vector<8x64xbf16>
    %cst_64 = arith.constant 0.000000e+00 : f32
    %255 = arith.truncf %cst_64 : f32 to bf16
    %256 = vector.shape_cast %41 : vector<1x64xi1> to vector<1x64xi1>
    %257 = vector.broadcast %256 : vector<1x64xi1> to vector<8x64xi1>
    %258 = vector.broadcast %255 : bf16 to vector<8x64xbf16>
    %259 = arith.select %257, %254, %258 : vector<8x64xi1>, vector<8x64xbf16>
    %260 = tpu.concatenate %224, %215, %231, %238, %211, %245, %252, %217, %259 in 0 : vector<8x64xbf16>, vector<8x64xbf16>, vector<8x64xbf16>, vector<8x64xbf16>, vector<8x64xbf16>, vector<8x64xbf16>, vector<8x64xbf16>, vector<8x64xbf16>, vector<8x64xbf16> -> vector<72x64xbf16>
    %c0_65 = arith.constant 0 : index
    %c0_66 = arith.constant 0 : index
    %261 = vector.load %arg6[%c0_65, %c0_66] : memref<16x72xbf16, #tpu.memory_space<vmem>>, vector<16x72xbf16>
    %cst_67 = arith.constant dense<0.000000e+00> : vector<16x64xf32>
    %262 = tpu.matmul %261, %260, %cst_67 {dimension_numbers = #tpu.dot_dimension_numbers<[1], [0], [0], [1], [0, 0, 1, 1], [], []>} : vector<16x72xbf16>, vector<72x64xbf16>, vector<16x64xf32> -> vector<16x64xf32>
    %c0_68 = arith.constant 0 : index
    %c0_69 = arith.constant 0 : index
    %263 = vector.load %arg7[%c0_68, %c0_69] : memref<16x1xf32, #tpu.memory_space<vmem>>, vector<16x1xf32>
    %264 = vector.broadcast %263 : vector<16x1xf32> to vector<16x64xf32>
    %265 = arith.addf %262, %264 : vector<16x64xf32>
    %cst_70 = arith.constant 0.000000e+00 : f32
    %266 = vector.broadcast %cst_70 : f32 to vector<16x64xf32>
    %267 = arith.maximumf %265, %266 : vector<16x64xf32>
    %268 = arith.truncf %267 : vector<16x64xf32> to vector<16x64xbf16>
    %cst_71 = arith.constant 0.000000e+00 : bf16
    %269 = vector.broadcast %cst_71 : bf16 to vector<16x8xbf16>
    %cst_72 = arith.constant 0.000000e+00 : bf16
    %270 = vector.broadcast %cst_72 : bf16 to vector<16x1xbf16>
    %271 = vector.extract_strided_slice %268 {offsets = [0, 0], sizes = [16, 56], strides = [1, 1]} : vector<16x64xbf16> to vector<16x56xbf16>
    %272 = tpu.concatenate %269, %271 in 1 : vector<16x8xbf16>, vector<16x56xbf16> -> vector<16x64xbf16>
    %273 = vector.extract_strided_slice %268 {offsets = [0, 8], sizes = [16, 56], strides = [1, 1]} : vector<16x64xbf16> to vector<16x56xbf16>
    %274 = tpu.concatenate %273, %269 in 1 : vector<16x56xbf16>, vector<16x8xbf16> -> vector<16x64xbf16>
    %275 = vector.extract_strided_slice %272 {offsets = [0, 0], sizes = [16, 63], strides = [1, 1]} : vector<16x64xbf16> to vector<16x63xbf16>
    %276 = tpu.concatenate %270, %275 in 1 : vector<16x1xbf16>, vector<16x63xbf16> -> vector<16x64xbf16>
    %cst_73 = arith.constant 0.000000e+00 : f32
    %277 = arith.truncf %cst_73 : f32 to bf16
    %278 = vector.shape_cast %39 : vector<1x64xi1> to vector<1x64xi1>
    %279 = vector.broadcast %278 : vector<1x64xi1> to vector<16x64xi1>
    %280 = vector.broadcast %277 : bf16 to vector<16x64xbf16>
    %281 = arith.select %279, %276, %280 : vector<16x64xi1>, vector<16x64xbf16>
    %282 = vector.extract_strided_slice %272 {offsets = [0, 1], sizes = [16, 63], strides = [1, 1]} : vector<16x64xbf16> to vector<16x63xbf16>
    %283 = tpu.concatenate %282, %270 in 1 : vector<16x63xbf16>, vector<16x1xbf16> -> vector<16x64xbf16>
    %cst_74 = arith.constant 0.000000e+00 : f32
    %284 = arith.truncf %cst_74 : f32 to bf16
    %285 = vector.shape_cast %41 : vector<1x64xi1> to vector<1x64xi1>
    %286 = vector.broadcast %285 : vector<1x64xi1> to vector<16x64xi1>
    %287 = vector.broadcast %284 : bf16 to vector<16x64xbf16>
    %288 = arith.select %286, %283, %287 : vector<16x64xi1>, vector<16x64xbf16>
    %289 = vector.extract_strided_slice %268 {offsets = [0, 0], sizes = [16, 63], strides = [1, 1]} : vector<16x64xbf16> to vector<16x63xbf16>
    %290 = tpu.concatenate %270, %289 in 1 : vector<16x1xbf16>, vector<16x63xbf16> -> vector<16x64xbf16>
    %cst_75 = arith.constant 0.000000e+00 : f32
    %291 = arith.truncf %cst_75 : f32 to bf16
    %292 = vector.shape_cast %39 : vector<1x64xi1> to vector<1x64xi1>
    %293 = vector.broadcast %292 : vector<1x64xi1> to vector<16x64xi1>
    %294 = vector.broadcast %291 : bf16 to vector<16x64xbf16>
    %295 = arith.select %293, %290, %294 : vector<16x64xi1>, vector<16x64xbf16>
    %296 = vector.extract_strided_slice %268 {offsets = [0, 1], sizes = [16, 63], strides = [1, 1]} : vector<16x64xbf16> to vector<16x63xbf16>
    %297 = tpu.concatenate %296, %270 in 1 : vector<16x63xbf16>, vector<16x1xbf16> -> vector<16x64xbf16>
    %cst_76 = arith.constant 0.000000e+00 : f32
    %298 = arith.truncf %cst_76 : f32 to bf16
    %299 = vector.shape_cast %41 : vector<1x64xi1> to vector<1x64xi1>
    %300 = vector.broadcast %299 : vector<1x64xi1> to vector<16x64xi1>
    %301 = vector.broadcast %298 : bf16 to vector<16x64xbf16>
    %302 = arith.select %300, %297, %301 : vector<16x64xi1>, vector<16x64xbf16>
    %303 = vector.extract_strided_slice %274 {offsets = [0, 0], sizes = [16, 63], strides = [1, 1]} : vector<16x64xbf16> to vector<16x63xbf16>
    %304 = tpu.concatenate %270, %303 in 1 : vector<16x1xbf16>, vector<16x63xbf16> -> vector<16x64xbf16>
    %cst_77 = arith.constant 0.000000e+00 : f32
    %305 = arith.truncf %cst_77 : f32 to bf16
    %306 = vector.shape_cast %39 : vector<1x64xi1> to vector<1x64xi1>
    %307 = vector.broadcast %306 : vector<1x64xi1> to vector<16x64xi1>
    %308 = vector.broadcast %305 : bf16 to vector<16x64xbf16>
    %309 = arith.select %307, %304, %308 : vector<16x64xi1>, vector<16x64xbf16>
    %310 = vector.extract_strided_slice %274 {offsets = [0, 1], sizes = [16, 63], strides = [1, 1]} : vector<16x64xbf16> to vector<16x63xbf16>
    %311 = tpu.concatenate %310, %270 in 1 : vector<16x63xbf16>, vector<16x1xbf16> -> vector<16x64xbf16>
    %cst_78 = arith.constant 0.000000e+00 : f32
    %312 = arith.truncf %cst_78 : f32 to bf16
    %313 = vector.shape_cast %41 : vector<1x64xi1> to vector<1x64xi1>
    %314 = vector.broadcast %313 : vector<1x64xi1> to vector<16x64xi1>
    %315 = vector.broadcast %312 : bf16 to vector<16x64xbf16>
    %316 = arith.select %314, %311, %315 : vector<16x64xi1>, vector<16x64xbf16>
    %317 = tpu.concatenate %281, %272, %288, %295, %268, %302, %309, %274, %316 in 0 : vector<16x64xbf16>, vector<16x64xbf16>, vector<16x64xbf16>, vector<16x64xbf16>, vector<16x64xbf16>, vector<16x64xbf16>, vector<16x64xbf16>, vector<16x64xbf16>, vector<16x64xbf16> -> vector<144x64xbf16>
    %c0_79 = arith.constant 0 : index
    %c0_80 = arith.constant 0 : index
    %318 = vector.load %arg8[%c0_79, %c0_80] : memref<16x144xbf16, #tpu.memory_space<vmem>>, vector<16x144xbf16>
    %cst_81 = arith.constant dense<0.000000e+00> : vector<16x64xf32>
    %319 = tpu.matmul %318, %317, %cst_81 {dimension_numbers = #tpu.dot_dimension_numbers<[1], [0], [0], [1], [0, 0, 1, 1], [], []>} : vector<16x144xbf16>, vector<144x64xbf16>, vector<16x64xf32> -> vector<16x64xf32>
    %c0_82 = arith.constant 0 : index
    %c0_83 = arith.constant 0 : index
    %320 = vector.load %arg9[%c0_82, %c0_83] : memref<16x1xf32, #tpu.memory_space<vmem>>, vector<16x1xf32>
    %321 = vector.broadcast %320 : vector<16x1xf32> to vector<16x64xf32>
    %322 = arith.addf %319, %321 : vector<16x64xf32>
    %cst_84 = arith.constant 0.000000e+00 : f32
    %323 = vector.broadcast %cst_84 : f32 to vector<16x64xf32>
    %324 = arith.maximumf %322, %323 : vector<16x64xf32>
    %325 = vector.extract_strided_slice %324 {offsets = [0, 1], sizes = [16, 63], strides = [1, 1]} : vector<16x64xf32> to vector<16x63xf32>
    %cst_85 = arith.constant 0.000000e+00 : f32
    %326 = vector.broadcast %cst_85 : f32 to vector<16x1xf32>
    %327 = tpu.concatenate %325, %326 in 1 : vector<16x63xf32>, vector<16x1xf32> -> vector<16x64xf32>
    %328 = arith.maximumf %324, %327 : vector<16x64xf32>
    %329 = vector.extract_strided_slice %328 {offsets = [0, 8], sizes = [16, 56], strides = [1, 1]} : vector<16x64xf32> to vector<16x56xf32>
    %cst_86 = arith.constant 0.000000e+00 : f32
    %330 = vector.broadcast %cst_86 : f32 to vector<16x8xf32>
    %331 = tpu.concatenate %329, %330 in 1 : vector<16x56xf32>, vector<16x8xf32> -> vector<16x64xf32>
    %332 = arith.maximumf %328, %331 : vector<16x64xf32>
    %c0_87 = arith.constant 0 : index
    %c0_88 = arith.constant 0 : index
    %333 = vector.load %arg45[%c0_87, %c0_88] : memref<64x16xf32, #tpu.memory_space<vmem>>, vector<64x16xf32>
    %cst_89 = arith.constant dense<0.000000e+00> : vector<16x16xf32>
    %334 = tpu.matmul %332, %333, %cst_89 {dimension_numbers = #tpu.dot_dimension_numbers<[1], [0], [0], [1], [0, 0, 1, 1], [], []>} : vector<16x64xf32>, vector<64x16xf32>, vector<16x16xf32> -> vector<16x16xf32>
    %335 = arith.truncf %334 : vector<16x16xf32> to vector<16x16xbf16>
    %cst_90 = arith.constant 0.000000e+00 : bf16
    %336 = vector.broadcast %cst_90 : bf16 to vector<16x4xbf16>
    %cst_91 = arith.constant 0.000000e+00 : bf16
    %337 = vector.broadcast %cst_91 : bf16 to vector<16x1xbf16>
    %338 = vector.extract_strided_slice %335 {offsets = [0, 0], sizes = [16, 12], strides = [1, 1]} : vector<16x16xbf16> to vector<16x12xbf16>
    %339 = tpu.concatenate %336, %338 in 1 : vector<16x4xbf16>, vector<16x12xbf16> -> vector<16x16xbf16>
    %340 = vector.extract_strided_slice %335 {offsets = [0, 4], sizes = [16, 12], strides = [1, 1]} : vector<16x16xbf16> to vector<16x12xbf16>
    %341 = tpu.concatenate %340, %336 in 1 : vector<16x12xbf16>, vector<16x4xbf16> -> vector<16x16xbf16>
    %342 = vector.extract_strided_slice %339 {offsets = [0, 0], sizes = [16, 15], strides = [1, 1]} : vector<16x16xbf16> to vector<16x15xbf16>
    %343 = tpu.concatenate %337, %342 in 1 : vector<16x1xbf16>, vector<16x15xbf16> -> vector<16x16xbf16>
    %cst_92 = arith.constant 0.000000e+00 : f32
    %344 = arith.truncf %cst_92 : f32 to bf16
    %345 = vector.shape_cast %60 : vector<1x16xi1> to vector<1x16xi1>
    %346 = vector.broadcast %345 : vector<1x16xi1> to vector<16x16xi1>
    %347 = vector.broadcast %344 : bf16 to vector<16x16xbf16>
    %348 = arith.select %346, %343, %347 : vector<16x16xi1>, vector<16x16xbf16>
    %349 = vector.extract_strided_slice %339 {offsets = [0, 1], sizes = [16, 15], strides = [1, 1]} : vector<16x16xbf16> to vector<16x15xbf16>
    %350 = tpu.concatenate %349, %337 in 1 : vector<16x15xbf16>, vector<16x1xbf16> -> vector<16x16xbf16>
    %cst_93 = arith.constant 0.000000e+00 : f32
    %351 = arith.truncf %cst_93 : f32 to bf16
    %352 = vector.shape_cast %62 : vector<1x16xi1> to vector<1x16xi1>
    %353 = vector.broadcast %352 : vector<1x16xi1> to vector<16x16xi1>
    %354 = vector.broadcast %351 : bf16 to vector<16x16xbf16>
    %355 = arith.select %353, %350, %354 : vector<16x16xi1>, vector<16x16xbf16>
    %356 = vector.extract_strided_slice %335 {offsets = [0, 0], sizes = [16, 15], strides = [1, 1]} : vector<16x16xbf16> to vector<16x15xbf16>
    %357 = tpu.concatenate %337, %356 in 1 : vector<16x1xbf16>, vector<16x15xbf16> -> vector<16x16xbf16>
    %cst_94 = arith.constant 0.000000e+00 : f32
    %358 = arith.truncf %cst_94 : f32 to bf16
    %359 = vector.shape_cast %60 : vector<1x16xi1> to vector<1x16xi1>
    %360 = vector.broadcast %359 : vector<1x16xi1> to vector<16x16xi1>
    %361 = vector.broadcast %358 : bf16 to vector<16x16xbf16>
    %362 = arith.select %360, %357, %361 : vector<16x16xi1>, vector<16x16xbf16>
    %363 = vector.extract_strided_slice %335 {offsets = [0, 1], sizes = [16, 15], strides = [1, 1]} : vector<16x16xbf16> to vector<16x15xbf16>
    %364 = tpu.concatenate %363, %337 in 1 : vector<16x15xbf16>, vector<16x1xbf16> -> vector<16x16xbf16>
    %cst_95 = arith.constant 0.000000e+00 : f32
    %365 = arith.truncf %cst_95 : f32 to bf16
    %366 = vector.shape_cast %62 : vector<1x16xi1> to vector<1x16xi1>
    %367 = vector.broadcast %366 : vector<1x16xi1> to vector<16x16xi1>
    %368 = vector.broadcast %365 : bf16 to vector<16x16xbf16>
    %369 = arith.select %367, %364, %368 : vector<16x16xi1>, vector<16x16xbf16>
    %370 = vector.extract_strided_slice %341 {offsets = [0, 0], sizes = [16, 15], strides = [1, 1]} : vector<16x16xbf16> to vector<16x15xbf16>
    %371 = tpu.concatenate %337, %370 in 1 : vector<16x1xbf16>, vector<16x15xbf16> -> vector<16x16xbf16>
    %cst_96 = arith.constant 0.000000e+00 : f32
    %372 = arith.truncf %cst_96 : f32 to bf16
    %373 = vector.shape_cast %60 : vector<1x16xi1> to vector<1x16xi1>
    %374 = vector.broadcast %373 : vector<1x16xi1> to vector<16x16xi1>
    %375 = vector.broadcast %372 : bf16 to vector<16x16xbf16>
    %376 = arith.select %374, %371, %375 : vector<16x16xi1>, vector<16x16xbf16>
    %377 = vector.extract_strided_slice %341 {offsets = [0, 1], sizes = [16, 15], strides = [1, 1]} : vector<16x16xbf16> to vector<16x15xbf16>
    %378 = tpu.concatenate %377, %337 in 1 : vector<16x15xbf16>, vector<16x1xbf16> -> vector<16x16xbf16>
    %cst_97 = arith.constant 0.000000e+00 : f32
    %379 = arith.truncf %cst_97 : f32 to bf16
    %380 = vector.shape_cast %62 : vector<1x16xi1> to vector<1x16xi1>
    %381 = vector.broadcast %380 : vector<1x16xi1> to vector<16x16xi1>
    %382 = vector.broadcast %379 : bf16 to vector<16x16xbf16>
    %383 = arith.select %381, %378, %382 : vector<16x16xi1>, vector<16x16xbf16>
    %384 = tpu.concatenate %348, %339, %355, %362, %335, %369, %376, %341, %383 in 0 : vector<16x16xbf16>, vector<16x16xbf16>, vector<16x16xbf16>, vector<16x16xbf16>, vector<16x16xbf16>, vector<16x16xbf16>, vector<16x16xbf16>, vector<16x16xbf16>, vector<16x16xbf16> -> vector<144x16xbf16>
    %c0_98 = arith.constant 0 : index
    %c0_99 = arith.constant 0 : index
    %385 = vector.load %arg10[%c0_98, %c0_99] : memref<32x144xbf16, #tpu.memory_space<vmem>>, vector<32x144xbf16>
    %cst_100 = arith.constant dense<0.000000e+00> : vector<32x16xf32>
    %386 = tpu.matmul %385, %384, %cst_100 {dimension_numbers = #tpu.dot_dimension_numbers<[1], [0], [0], [1], [0, 0, 1, 1], [], []>} : vector<32x144xbf16>, vector<144x16xbf16>, vector<32x16xf32> -> vector<32x16xf32>
    %c0_101 = arith.constant 0 : index
    %c0_102 = arith.constant 0 : index
    %387 = vector.load %arg11[%c0_101, %c0_102] : memref<32x1xf32, #tpu.memory_space<vmem>>, vector<32x1xf32>
    %388 = vector.broadcast %387 : vector<32x1xf32> to vector<32x16xf32>
    %389 = arith.addf %386, %388 : vector<32x16xf32>
    %cst_103 = arith.constant 0.000000e+00 : f32
    %390 = vector.broadcast %cst_103 : f32 to vector<32x16xf32>
    %391 = arith.maximumf %389, %390 : vector<32x16xf32>
    %392 = arith.truncf %391 : vector<32x16xf32> to vector<32x16xbf16>
    %cst_104 = arith.constant 0.000000e+00 : bf16
    %393 = vector.broadcast %cst_104 : bf16 to vector<32x4xbf16>
    %cst_105 = arith.constant 0.000000e+00 : bf16
    %394 = vector.broadcast %cst_105 : bf16 to vector<32x1xbf16>
    %395 = vector.extract_strided_slice %392 {offsets = [0, 0], sizes = [32, 12], strides = [1, 1]} : vector<32x16xbf16> to vector<32x12xbf16>
    %396 = tpu.concatenate %393, %395 in 1 : vector<32x4xbf16>, vector<32x12xbf16> -> vector<32x16xbf16>
    %397 = vector.extract_strided_slice %392 {offsets = [0, 4], sizes = [32, 12], strides = [1, 1]} : vector<32x16xbf16> to vector<32x12xbf16>
    %398 = tpu.concatenate %397, %393 in 1 : vector<32x12xbf16>, vector<32x4xbf16> -> vector<32x16xbf16>
    %399 = vector.extract_strided_slice %396 {offsets = [0, 0], sizes = [32, 15], strides = [1, 1]} : vector<32x16xbf16> to vector<32x15xbf16>
    %400 = tpu.concatenate %394, %399 in 1 : vector<32x1xbf16>, vector<32x15xbf16> -> vector<32x16xbf16>
    %cst_106 = arith.constant 0.000000e+00 : f32
    %401 = arith.truncf %cst_106 : f32 to bf16
    %402 = vector.shape_cast %60 : vector<1x16xi1> to vector<1x16xi1>
    %403 = vector.broadcast %402 : vector<1x16xi1> to vector<32x16xi1>
    %404 = vector.broadcast %401 : bf16 to vector<32x16xbf16>
    %405 = arith.select %403, %400, %404 : vector<32x16xi1>, vector<32x16xbf16>
    %406 = vector.extract_strided_slice %396 {offsets = [0, 1], sizes = [32, 15], strides = [1, 1]} : vector<32x16xbf16> to vector<32x15xbf16>
    %407 = tpu.concatenate %406, %394 in 1 : vector<32x15xbf16>, vector<32x1xbf16> -> vector<32x16xbf16>
    %cst_107 = arith.constant 0.000000e+00 : f32
    %408 = arith.truncf %cst_107 : f32 to bf16
    %409 = vector.shape_cast %62 : vector<1x16xi1> to vector<1x16xi1>
    %410 = vector.broadcast %409 : vector<1x16xi1> to vector<32x16xi1>
    %411 = vector.broadcast %408 : bf16 to vector<32x16xbf16>
    %412 = arith.select %410, %407, %411 : vector<32x16xi1>, vector<32x16xbf16>
    %413 = vector.extract_strided_slice %392 {offsets = [0, 0], sizes = [32, 15], strides = [1, 1]} : vector<32x16xbf16> to vector<32x15xbf16>
    %414 = tpu.concatenate %394, %413 in 1 : vector<32x1xbf16>, vector<32x15xbf16> -> vector<32x16xbf16>
    %cst_108 = arith.constant 0.000000e+00 : f32
    %415 = arith.truncf %cst_108 : f32 to bf16
    %416 = vector.shape_cast %60 : vector<1x16xi1> to vector<1x16xi1>
    %417 = vector.broadcast %416 : vector<1x16xi1> to vector<32x16xi1>
    %418 = vector.broadcast %415 : bf16 to vector<32x16xbf16>
    %419 = arith.select %417, %414, %418 : vector<32x16xi1>, vector<32x16xbf16>
    %420 = vector.extract_strided_slice %392 {offsets = [0, 1], sizes = [32, 15], strides = [1, 1]} : vector<32x16xbf16> to vector<32x15xbf16>
    %421 = tpu.concatenate %420, %394 in 1 : vector<32x15xbf16>, vector<32x1xbf16> -> vector<32x16xbf16>
    %cst_109 = arith.constant 0.000000e+00 : f32
    %422 = arith.truncf %cst_109 : f32 to bf16
    %423 = vector.shape_cast %62 : vector<1x16xi1> to vector<1x16xi1>
    %424 = vector.broadcast %423 : vector<1x16xi1> to vector<32x16xi1>
    %425 = vector.broadcast %422 : bf16 to vector<32x16xbf16>
    %426 = arith.select %424, %421, %425 : vector<32x16xi1>, vector<32x16xbf16>
    %427 = vector.extract_strided_slice %398 {offsets = [0, 0], sizes = [32, 15], strides = [1, 1]} : vector<32x16xbf16> to vector<32x15xbf16>
    %428 = tpu.concatenate %394, %427 in 1 : vector<32x1xbf16>, vector<32x15xbf16> -> vector<32x16xbf16>
    %cst_110 = arith.constant 0.000000e+00 : f32
    %429 = arith.truncf %cst_110 : f32 to bf16
    %430 = vector.shape_cast %60 : vector<1x16xi1> to vector<1x16xi1>
    %431 = vector.broadcast %430 : vector<1x16xi1> to vector<32x16xi1>
    %432 = vector.broadcast %429 : bf16 to vector<32x16xbf16>
    %433 = arith.select %431, %428, %432 : vector<32x16xi1>, vector<32x16xbf16>
    %434 = vector.extract_strided_slice %398 {offsets = [0, 1], sizes = [32, 15], strides = [1, 1]} : vector<32x16xbf16> to vector<32x15xbf16>
    %435 = tpu.concatenate %434, %394 in 1 : vector<32x15xbf16>, vector<32x1xbf16> -> vector<32x16xbf16>
    %cst_111 = arith.constant 0.000000e+00 : f32
    %436 = arith.truncf %cst_111 : f32 to bf16
    %437 = vector.shape_cast %62 : vector<1x16xi1> to vector<1x16xi1>
    %438 = vector.broadcast %437 : vector<1x16xi1> to vector<32x16xi1>
    %439 = vector.broadcast %436 : bf16 to vector<32x16xbf16>
    %440 = arith.select %438, %435, %439 : vector<32x16xi1>, vector<32x16xbf16>
    %441 = tpu.concatenate %405, %396, %412, %419, %392, %426, %433, %398, %440 in 0 : vector<32x16xbf16>, vector<32x16xbf16>, vector<32x16xbf16>, vector<32x16xbf16>, vector<32x16xbf16>, vector<32x16xbf16>, vector<32x16xbf16>, vector<32x16xbf16>, vector<32x16xbf16> -> vector<288x16xbf16>
    %c0_112 = arith.constant 0 : index
    %c0_113 = arith.constant 0 : index
    %442 = vector.load %arg12[%c0_112, %c0_113] : memref<32x288xbf16, #tpu.memory_space<vmem>>, vector<32x288xbf16>
    %cst_114 = arith.constant dense<0.000000e+00> : vector<32x16xf32>
    %443 = tpu.matmul %442, %441, %cst_114 {dimension_numbers = #tpu.dot_dimension_numbers<[1], [0], [0], [1], [0, 0, 1, 1], [], []>} : vector<32x288xbf16>, vector<288x16xbf16>, vector<32x16xf32> -> vector<32x16xf32>
    %c0_115 = arith.constant 0 : index
    %c0_116 = arith.constant 0 : index
    %444 = vector.load %arg13[%c0_115, %c0_116] : memref<32x1xf32, #tpu.memory_space<vmem>>, vector<32x1xf32>
    %445 = vector.broadcast %444 : vector<32x1xf32> to vector<32x16xf32>
    %446 = arith.addf %443, %445 : vector<32x16xf32>
    %cst_117 = arith.constant 0.000000e+00 : f32
    %447 = vector.broadcast %cst_117 : f32 to vector<32x16xf32>
    %448 = arith.maximumf %446, %447 : vector<32x16xf32>
    %449 = vector.extract_strided_slice %448 {offsets = [0, 1], sizes = [32, 15], strides = [1, 1]} : vector<32x16xf32> to vector<32x15xf32>
    %cst_118 = arith.constant 0.000000e+00 : f32
    %450 = vector.broadcast %cst_118 : f32 to vector<32x1xf32>
    %451 = tpu.concatenate %449, %450 in 1 : vector<32x15xf32>, vector<32x1xf32> -> vector<32x16xf32>
    %452 = arith.maximumf %448, %451 : vector<32x16xf32>
    %453 = vector.extract_strided_slice %452 {offsets = [0, 4], sizes = [32, 12], strides = [1, 1]} : vector<32x16xf32> to vector<32x12xf32>
    %cst_119 = arith.constant 0.000000e+00 : f32
    %454 = vector.broadcast %cst_119 : f32 to vector<32x4xf32>
    %455 = tpu.concatenate %453, %454 in 1 : vector<32x12xf32>, vector<32x4xf32> -> vector<32x16xf32>
    %456 = arith.maximumf %452, %455 : vector<32x16xf32>
    %c0_120 = arith.constant 0 : index
    %c0_121 = arith.constant 0 : index
    %457 = vector.load %arg46[%c0_120, %c0_121] : memref<16x4xf32, #tpu.memory_space<vmem>>, vector<16x4xf32>
    %cst_122 = arith.constant dense<0.000000e+00> : vector<32x4xf32>
    %458 = tpu.matmul %456, %457, %cst_122 {dimension_numbers = #tpu.dot_dimension_numbers<[1], [0], [0], [1], [0, 0, 1, 1], [], []>} : vector<32x16xf32>, vector<16x4xf32>, vector<32x4xf32> -> vector<32x4xf32>
    %459 = arith.truncf %458 : vector<32x4xf32> to vector<32x4xbf16>
    %cst_123 = arith.constant 0.000000e+00 : bf16
    %460 = vector.broadcast %cst_123 : bf16 to vector<32x2xbf16>
    %cst_124 = arith.constant 0.000000e+00 : bf16
    %461 = vector.broadcast %cst_124 : bf16 to vector<32x1xbf16>
    %462 = vector.extract_strided_slice %459 {offsets = [0, 0], sizes = [32, 2], strides = [1, 1]} : vector<32x4xbf16> to vector<32x2xbf16>
    %463 = tpu.concatenate %460, %462 in 1 : vector<32x2xbf16>, vector<32x2xbf16> -> vector<32x4xbf16>
    %464 = vector.extract_strided_slice %459 {offsets = [0, 2], sizes = [32, 2], strides = [1, 1]} : vector<32x4xbf16> to vector<32x2xbf16>
    %465 = tpu.concatenate %464, %460 in 1 : vector<32x2xbf16>, vector<32x2xbf16> -> vector<32x4xbf16>
    %466 = vector.extract_strided_slice %463 {offsets = [0, 0], sizes = [32, 3], strides = [1, 1]} : vector<32x4xbf16> to vector<32x3xbf16>
    %467 = tpu.concatenate %461, %466 in 1 : vector<32x1xbf16>, vector<32x3xbf16> -> vector<32x4xbf16>
    %cst_125 = arith.constant 0.000000e+00 : f32
    %468 = arith.truncf %cst_125 : f32 to bf16
    %469 = vector.shape_cast %81 : vector<1x4xi1> to vector<1x4xi1>
    %470 = vector.broadcast %469 : vector<1x4xi1> to vector<32x4xi1>
    %471 = vector.broadcast %468 : bf16 to vector<32x4xbf16>
    %472 = arith.select %470, %467, %471 : vector<32x4xi1>, vector<32x4xbf16>
    %473 = vector.extract_strided_slice %463 {offsets = [0, 1], sizes = [32, 3], strides = [1, 1]} : vector<32x4xbf16> to vector<32x3xbf16>
    %474 = tpu.concatenate %473, %461 in 1 : vector<32x3xbf16>, vector<32x1xbf16> -> vector<32x4xbf16>
    %cst_126 = arith.constant 0.000000e+00 : f32
    %475 = arith.truncf %cst_126 : f32 to bf16
    %476 = vector.shape_cast %83 : vector<1x4xi1> to vector<1x4xi1>
    %477 = vector.broadcast %476 : vector<1x4xi1> to vector<32x4xi1>
    %478 = vector.broadcast %475 : bf16 to vector<32x4xbf16>
    %479 = arith.select %477, %474, %478 : vector<32x4xi1>, vector<32x4xbf16>
    %480 = vector.extract_strided_slice %459 {offsets = [0, 0], sizes = [32, 3], strides = [1, 1]} : vector<32x4xbf16> to vector<32x3xbf16>
    %481 = tpu.concatenate %461, %480 in 1 : vector<32x1xbf16>, vector<32x3xbf16> -> vector<32x4xbf16>
    %cst_127 = arith.constant 0.000000e+00 : f32
    %482 = arith.truncf %cst_127 : f32 to bf16
    %483 = vector.shape_cast %81 : vector<1x4xi1> to vector<1x4xi1>
    %484 = vector.broadcast %483 : vector<1x4xi1> to vector<32x4xi1>
    %485 = vector.broadcast %482 : bf16 to vector<32x4xbf16>
    %486 = arith.select %484, %481, %485 : vector<32x4xi1>, vector<32x4xbf16>
    %487 = vector.extract_strided_slice %459 {offsets = [0, 1], sizes = [32, 3], strides = [1, 1]} : vector<32x4xbf16> to vector<32x3xbf16>
    %488 = tpu.concatenate %487, %461 in 1 : vector<32x3xbf16>, vector<32x1xbf16> -> vector<32x4xbf16>
    %cst_128 = arith.constant 0.000000e+00 : f32
    %489 = arith.truncf %cst_128 : f32 to bf16
    %490 = vector.shape_cast %83 : vector<1x4xi1> to vector<1x4xi1>
    %491 = vector.broadcast %490 : vector<1x4xi1> to vector<32x4xi1>
    %492 = vector.broadcast %489 : bf16 to vector<32x4xbf16>
    %493 = arith.select %491, %488, %492 : vector<32x4xi1>, vector<32x4xbf16>
    %494 = vector.extract_strided_slice %465 {offsets = [0, 0], sizes = [32, 3], strides = [1, 1]} : vector<32x4xbf16> to vector<32x3xbf16>
    %495 = tpu.concatenate %461, %494 in 1 : vector<32x1xbf16>, vector<32x3xbf16> -> vector<32x4xbf16>
    %cst_129 = arith.constant 0.000000e+00 : f32
    %496 = arith.truncf %cst_129 : f32 to bf16
    %497 = vector.shape_cast %81 : vector<1x4xi1> to vector<1x4xi1>
    %498 = vector.broadcast %497 : vector<1x4xi1> to vector<32x4xi1>
    %499 = vector.broadcast %496 : bf16 to vector<32x4xbf16>
    %500 = arith.select %498, %495, %499 : vector<32x4xi1>, vector<32x4xbf16>
    %501 = vector.extract_strided_slice %465 {offsets = [0, 1], sizes = [32, 3], strides = [1, 1]} : vector<32x4xbf16> to vector<32x3xbf16>
    %502 = tpu.concatenate %501, %461 in 1 : vector<32x3xbf16>, vector<32x1xbf16> -> vector<32x4xbf16>
    %cst_130 = arith.constant 0.000000e+00 : f32
    %503 = arith.truncf %cst_130 : f32 to bf16
    %504 = vector.shape_cast %83 : vector<1x4xi1> to vector<1x4xi1>
    %505 = vector.broadcast %504 : vector<1x4xi1> to vector<32x4xi1>
    %506 = vector.broadcast %503 : bf16 to vector<32x4xbf16>
    %507 = arith.select %505, %502, %506 : vector<32x4xi1>, vector<32x4xbf16>
    %508 = tpu.concatenate %472, %463, %479, %486, %459, %493, %500, %465, %507 in 0 : vector<32x4xbf16>, vector<32x4xbf16>, vector<32x4xbf16>, vector<32x4xbf16>, vector<32x4xbf16>, vector<32x4xbf16>, vector<32x4xbf16>, vector<32x4xbf16>, vector<32x4xbf16> -> vector<288x4xbf16>
    %c0_131 = arith.constant 0 : index
    %c0_132 = arith.constant 0 : index
    %509 = vector.load %arg14[%c0_131, %c0_132] : memref<64x288xbf16, #tpu.memory_space<vmem>>, vector<64x288xbf16>
    %cst_133 = arith.constant dense<0.000000e+00> : vector<64x4xf32>
    %510 = tpu.matmul %509, %508, %cst_133 {dimension_numbers = #tpu.dot_dimension_numbers<[1], [0], [0], [1], [0, 0, 1, 1], [], []>} : vector<64x288xbf16>, vector<288x4xbf16>, vector<64x4xf32> -> vector<64x4xf32>
    %c0_134 = arith.constant 0 : index
    %c0_135 = arith.constant 0 : index
    %511 = vector.load %arg15[%c0_134, %c0_135] : memref<64x1xf32, #tpu.memory_space<vmem>>, vector<64x1xf32>
    %512 = vector.broadcast %511 : vector<64x1xf32> to vector<64x4xf32>
    %513 = arith.addf %510, %512 : vector<64x4xf32>
    %cst_136 = arith.constant 0.000000e+00 : f32
    %514 = vector.broadcast %cst_136 : f32 to vector<64x4xf32>
    %515 = arith.maximumf %513, %514 : vector<64x4xf32>
    %516 = arith.truncf %515 : vector<64x4xf32> to vector<64x4xbf16>
    %cst_137 = arith.constant 0.000000e+00 : bf16
    %517 = vector.broadcast %cst_137 : bf16 to vector<64x2xbf16>
    %cst_138 = arith.constant 0.000000e+00 : bf16
    %518 = vector.broadcast %cst_138 : bf16 to vector<64x1xbf16>
    %519 = vector.extract_strided_slice %516 {offsets = [0, 0], sizes = [64, 2], strides = [1, 1]} : vector<64x4xbf16> to vector<64x2xbf16>
    %520 = tpu.concatenate %517, %519 in 1 : vector<64x2xbf16>, vector<64x2xbf16> -> vector<64x4xbf16>
    %521 = vector.extract_strided_slice %516 {offsets = [0, 2], sizes = [64, 2], strides = [1, 1]} : vector<64x4xbf16> to vector<64x2xbf16>
    %522 = tpu.concatenate %521, %517 in 1 : vector<64x2xbf16>, vector<64x2xbf16> -> vector<64x4xbf16>
    %523 = vector.extract_strided_slice %520 {offsets = [0, 0], sizes = [64, 3], strides = [1, 1]} : vector<64x4xbf16> to vector<64x3xbf16>
    %524 = tpu.concatenate %518, %523 in 1 : vector<64x1xbf16>, vector<64x3xbf16> -> vector<64x4xbf16>
    %cst_139 = arith.constant 0.000000e+00 : f32
    %525 = arith.truncf %cst_139 : f32 to bf16
    %526 = vector.shape_cast %81 : vector<1x4xi1> to vector<1x4xi1>
    %527 = vector.broadcast %526 : vector<1x4xi1> to vector<64x4xi1>
    %528 = vector.broadcast %525 : bf16 to vector<64x4xbf16>
    %529 = arith.select %527, %524, %528 : vector<64x4xi1>, vector<64x4xbf16>
    %530 = vector.extract_strided_slice %520 {offsets = [0, 1], sizes = [64, 3], strides = [1, 1]} : vector<64x4xbf16> to vector<64x3xbf16>
    %531 = tpu.concatenate %530, %518 in 1 : vector<64x3xbf16>, vector<64x1xbf16> -> vector<64x4xbf16>
    %cst_140 = arith.constant 0.000000e+00 : f32
    %532 = arith.truncf %cst_140 : f32 to bf16
    %533 = vector.shape_cast %83 : vector<1x4xi1> to vector<1x4xi1>
    %534 = vector.broadcast %533 : vector<1x4xi1> to vector<64x4xi1>
    %535 = vector.broadcast %532 : bf16 to vector<64x4xbf16>
    %536 = arith.select %534, %531, %535 : vector<64x4xi1>, vector<64x4xbf16>
    %537 = vector.extract_strided_slice %516 {offsets = [0, 0], sizes = [64, 3], strides = [1, 1]} : vector<64x4xbf16> to vector<64x3xbf16>
    %538 = tpu.concatenate %518, %537 in 1 : vector<64x1xbf16>, vector<64x3xbf16> -> vector<64x4xbf16>
    %cst_141 = arith.constant 0.000000e+00 : f32
    %539 = arith.truncf %cst_141 : f32 to bf16
    %540 = vector.shape_cast %81 : vector<1x4xi1> to vector<1x4xi1>
    %541 = vector.broadcast %540 : vector<1x4xi1> to vector<64x4xi1>
    %542 = vector.broadcast %539 : bf16 to vector<64x4xbf16>
    %543 = arith.select %541, %538, %542 : vector<64x4xi1>, vector<64x4xbf16>
    %544 = vector.extract_strided_slice %516 {offsets = [0, 1], sizes = [64, 3], strides = [1, 1]} : vector<64x4xbf16> to vector<64x3xbf16>
    %545 = tpu.concatenate %544, %518 in 1 : vector<64x3xbf16>, vector<64x1xbf16> -> vector<64x4xbf16>
    %cst_142 = arith.constant 0.000000e+00 : f32
    %546 = arith.truncf %cst_142 : f32 to bf16
    %547 = vector.shape_cast %83 : vector<1x4xi1> to vector<1x4xi1>
    %548 = vector.broadcast %547 : vector<1x4xi1> to vector<64x4xi1>
    %549 = vector.broadcast %546 : bf16 to vector<64x4xbf16>
    %550 = arith.select %548, %545, %549 : vector<64x4xi1>, vector<64x4xbf16>
    %551 = vector.extract_strided_slice %522 {offsets = [0, 0], sizes = [64, 3], strides = [1, 1]} : vector<64x4xbf16> to vector<64x3xbf16>
    %552 = tpu.concatenate %518, %551 in 1 : vector<64x1xbf16>, vector<64x3xbf16> -> vector<64x4xbf16>
    %cst_143 = arith.constant 0.000000e+00 : f32
    %553 = arith.truncf %cst_143 : f32 to bf16
    %554 = vector.shape_cast %81 : vector<1x4xi1> to vector<1x4xi1>
    %555 = vector.broadcast %554 : vector<1x4xi1> to vector<64x4xi1>
    %556 = vector.broadcast %553 : bf16 to vector<64x4xbf16>
    %557 = arith.select %555, %552, %556 : vector<64x4xi1>, vector<64x4xbf16>
    %558 = vector.extract_strided_slice %522 {offsets = [0, 1], sizes = [64, 3], strides = [1, 1]} : vector<64x4xbf16> to vector<64x3xbf16>
    %559 = tpu.concatenate %558, %518 in 1 : vector<64x3xbf16>, vector<64x1xbf16> -> vector<64x4xbf16>
    %cst_144 = arith.constant 0.000000e+00 : f32
    %560 = arith.truncf %cst_144 : f32 to bf16
    %561 = vector.shape_cast %83 : vector<1x4xi1> to vector<1x4xi1>
    %562 = vector.broadcast %561 : vector<1x4xi1> to vector<64x4xi1>
    %563 = vector.broadcast %560 : bf16 to vector<64x4xbf16>
    %564 = arith.select %562, %559, %563 : vector<64x4xi1>, vector<64x4xbf16>
    %565 = tpu.concatenate %529, %520, %536, %543, %516, %550, %557, %522, %564 in 0 : vector<64x4xbf16>, vector<64x4xbf16>, vector<64x4xbf16>, vector<64x4xbf16>, vector<64x4xbf16>, vector<64x4xbf16>, vector<64x4xbf16>, vector<64x4xbf16>, vector<64x4xbf16> -> vector<576x4xbf16>
    %c0_145 = arith.constant 0 : index
    %c0_146 = arith.constant 0 : index
    %566 = vector.load %arg16[%c0_145, %c0_146] : memref<64x576xbf16, #tpu.memory_space<vmem>>, vector<64x576xbf16>
    %cst_147 = arith.constant dense<0.000000e+00> : vector<64x4xf32>
    %567 = tpu.matmul %566, %565, %cst_147 {dimension_numbers = #tpu.dot_dimension_numbers<[1], [0], [0], [1], [0, 0, 1, 1], [], []>} : vector<64x576xbf16>, vector<576x4xbf16>, vector<64x4xf32> -> vector<64x4xf32>
    %c0_148 = arith.constant 0 : index
    %c0_149 = arith.constant 0 : index
    %568 = vector.load %arg17[%c0_148, %c0_149] : memref<64x1xf32, #tpu.memory_space<vmem>>, vector<64x1xf32>
    %569 = vector.broadcast %568 : vector<64x1xf32> to vector<64x4xf32>
    %570 = arith.addf %567, %569 : vector<64x4xf32>
    %cst_150 = arith.constant 0.000000e+00 : f32
    %571 = vector.broadcast %cst_150 : f32 to vector<64x4xf32>
    %572 = arith.maximumf %570, %571 : vector<64x4xf32>
    %573 = vector.extract_strided_slice %572 {offsets = [0, 1], sizes = [64, 3], strides = [1, 1]} : vector<64x4xf32> to vector<64x3xf32>
    %cst_151 = arith.constant 0.000000e+00 : f32
    %574 = vector.broadcast %cst_151 : f32 to vector<64x1xf32>
    %575 = tpu.concatenate %573, %574 in 1 : vector<64x3xf32>, vector<64x1xf32> -> vector<64x4xf32>
    %576 = arith.maximumf %572, %575 : vector<64x4xf32>
    %577 = vector.extract_strided_slice %576 {offsets = [0, 2], sizes = [64, 2], strides = [1, 1]} : vector<64x4xf32> to vector<64x2xf32>
    %cst_152 = arith.constant 0.000000e+00 : f32
    %578 = vector.broadcast %cst_152 : f32 to vector<64x2xf32>
    %579 = tpu.concatenate %577, %578 in 1 : vector<64x2xf32>, vector<64x2xf32> -> vector<64x4xf32>
    %580 = arith.maximumf %576, %579 : vector<64x4xf32>
    %c0_153 = arith.constant 0 : index
    %c0_154 = arith.constant 0 : index
    %581 = vector.load %arg47[%c0_153, %c0_154] : memref<4x1xf32, #tpu.memory_space<vmem>>, vector<4x1xf32>
    %cst_155 = arith.constant dense<0.000000e+00> : vector<64x1xf32>
    %582 = tpu.matmul %580, %581, %cst_155 {dimension_numbers = #tpu.dot_dimension_numbers<[1], [0], [0], [1], [0, 0, 1, 1], [], []>} : vector<64x4xf32>, vector<4x1xf32>, vector<64x1xf32> -> vector<64x1xf32>
    %583 = arith.truncf %582 : vector<64x1xf32> to vector<64x1xbf16>
    %c0_156 = arith.constant 0 : index
    %c256 = arith.constant 256 : index
    %584 = vector.load %arg18[%c0_156, %c256] : memref<64x576xbf16, #tpu.memory_space<vmem>>, vector<64x64xbf16>
    %cst_157 = arith.constant dense<0.000000e+00> : vector<64x1xf32>
    %585 = tpu.matmul %584, %583, %cst_157 {dimension_numbers = #tpu.dot_dimension_numbers<[1], [0], [0], [1], [0, 0, 1, 1], [], []>} : vector<64x64xbf16>, vector<64x1xbf16>, vector<64x1xf32> -> vector<64x1xf32>
    %c0_158 = arith.constant 0 : index
    %c0_159 = arith.constant 0 : index
    %586 = vector.load %arg19[%c0_158, %c0_159] : memref<64x1xf32, #tpu.memory_space<vmem>>, vector<64x1xf32>
    %587 = arith.addf %585, %586 : vector<64x1xf32>
    %cst_160 = arith.constant 0.000000e+00 : f32
    %588 = vector.broadcast %cst_160 : f32 to vector<64x1xf32>
    %589 = arith.maximumf %587, %588 : vector<64x1xf32>
    %590 = arith.truncf %589 : vector<64x1xf32> to vector<64x1xbf16>
    %c0_161 = arith.constant 0 : index
    %c256_162 = arith.constant 256 : index
    %591 = vector.load %arg20[%c0_161, %c256_162] : memref<64x576xbf16, #tpu.memory_space<vmem>>, vector<64x64xbf16>
    %cst_163 = arith.constant dense<0.000000e+00> : vector<64x1xf32>
    %592 = tpu.matmul %591, %590, %cst_163 {dimension_numbers = #tpu.dot_dimension_numbers<[1], [0], [0], [1], [0, 0, 1, 1], [], []>} : vector<64x64xbf16>, vector<64x1xbf16>, vector<64x1xf32> -> vector<64x1xf32>
    %c0_164 = arith.constant 0 : index
    %c0_165 = arith.constant 0 : index
    %593 = vector.load %arg21[%c0_164, %c0_165] : memref<64x1xf32, #tpu.memory_space<vmem>>, vector<64x1xf32>
    %594 = arith.addf %592, %593 : vector<64x1xf32>
    %cst_166 = arith.constant 0.000000e+00 : f32
    %595 = vector.broadcast %cst_166 : f32 to vector<64x1xf32>
    %596 = arith.maximumf %594, %595 : vector<64x1xf32>
    %597 = tpu.concatenate %596, %596, %596, %596 in 1 : vector<64x1xf32>, vector<64x1xf32>, vector<64x1xf32>, vector<64x1xf32> -> vector<64x4xf32>
    %598 = tpu.concatenate %572, %597 in 0 : vector<64x4xf32>, vector<64x4xf32> -> vector<128x4xf32>
    %599 = arith.truncf %598 : vector<128x4xf32> to vector<128x4xbf16>
    %cst_167 = arith.constant 0.000000e+00 : bf16
    %600 = vector.broadcast %cst_167 : bf16 to vector<128x2xbf16>
    %cst_168 = arith.constant 0.000000e+00 : bf16
    %601 = vector.broadcast %cst_168 : bf16 to vector<128x1xbf16>
    %602 = vector.extract_strided_slice %599 {offsets = [0, 0], sizes = [128, 2], strides = [1, 1]} : vector<128x4xbf16> to vector<128x2xbf16>
    %603 = tpu.concatenate %600, %602 in 1 : vector<128x2xbf16>, vector<128x2xbf16> -> vector<128x4xbf16>
    %604 = vector.extract_strided_slice %599 {offsets = [0, 2], sizes = [128, 2], strides = [1, 1]} : vector<128x4xbf16> to vector<128x2xbf16>
    %605 = tpu.concatenate %604, %600 in 1 : vector<128x2xbf16>, vector<128x2xbf16> -> vector<128x4xbf16>
    %606 = vector.extract_strided_slice %603 {offsets = [0, 0], sizes = [128, 3], strides = [1, 1]} : vector<128x4xbf16> to vector<128x3xbf16>
    %607 = tpu.concatenate %601, %606 in 1 : vector<128x1xbf16>, vector<128x3xbf16> -> vector<128x4xbf16>
    %cst_169 = arith.constant 0.000000e+00 : f32
    %608 = arith.truncf %cst_169 : f32 to bf16
    %609 = vector.shape_cast %81 : vector<1x4xi1> to vector<1x4xi1>
    %610 = vector.broadcast %609 : vector<1x4xi1> to vector<128x4xi1>
    %611 = vector.broadcast %608 : bf16 to vector<128x4xbf16>
    %612 = arith.select %610, %607, %611 : vector<128x4xi1>, vector<128x4xbf16>
    %613 = vector.extract_strided_slice %603 {offsets = [0, 1], sizes = [128, 3], strides = [1, 1]} : vector<128x4xbf16> to vector<128x3xbf16>
    %614 = tpu.concatenate %613, %601 in 1 : vector<128x3xbf16>, vector<128x1xbf16> -> vector<128x4xbf16>
    %cst_170 = arith.constant 0.000000e+00 : f32
    %615 = arith.truncf %cst_170 : f32 to bf16
    %616 = vector.shape_cast %83 : vector<1x4xi1> to vector<1x4xi1>
    %617 = vector.broadcast %616 : vector<1x4xi1> to vector<128x4xi1>
    %618 = vector.broadcast %615 : bf16 to vector<128x4xbf16>
    %619 = arith.select %617, %614, %618 : vector<128x4xi1>, vector<128x4xbf16>
    %620 = vector.extract_strided_slice %599 {offsets = [0, 0], sizes = [128, 3], strides = [1, 1]} : vector<128x4xbf16> to vector<128x3xbf16>
    %621 = tpu.concatenate %601, %620 in 1 : vector<128x1xbf16>, vector<128x3xbf16> -> vector<128x4xbf16>
    %cst_171 = arith.constant 0.000000e+00 : f32
    %622 = arith.truncf %cst_171 : f32 to bf16
    %623 = vector.shape_cast %81 : vector<1x4xi1> to vector<1x4xi1>
    %624 = vector.broadcast %623 : vector<1x4xi1> to vector<128x4xi1>
    %625 = vector.broadcast %622 : bf16 to vector<128x4xbf16>
    %626 = arith.select %624, %621, %625 : vector<128x4xi1>, vector<128x4xbf16>
    %627 = vector.extract_strided_slice %599 {offsets = [0, 1], sizes = [128, 3], strides = [1, 1]} : vector<128x4xbf16> to vector<128x3xbf16>
    %628 = tpu.concatenate %627, %601 in 1 : vector<128x3xbf16>, vector<128x1xbf16> -> vector<128x4xbf16>
    %cst_172 = arith.constant 0.000000e+00 : f32
    %629 = arith.truncf %cst_172 : f32 to bf16
    %630 = vector.shape_cast %83 : vector<1x4xi1> to vector<1x4xi1>
    %631 = vector.broadcast %630 : vector<1x4xi1> to vector<128x4xi1>
    %632 = vector.broadcast %629 : bf16 to vector<128x4xbf16>
    %633 = arith.select %631, %628, %632 : vector<128x4xi1>, vector<128x4xbf16>
    %634 = vector.extract_strided_slice %605 {offsets = [0, 0], sizes = [128, 3], strides = [1, 1]} : vector<128x4xbf16> to vector<128x3xbf16>
    %635 = tpu.concatenate %601, %634 in 1 : vector<128x1xbf16>, vector<128x3xbf16> -> vector<128x4xbf16>
    %cst_173 = arith.constant 0.000000e+00 : f32
    %636 = arith.truncf %cst_173 : f32 to bf16
    %637 = vector.shape_cast %81 : vector<1x4xi1> to vector<1x4xi1>
    %638 = vector.broadcast %637 : vector<1x4xi1> to vector<128x4xi1>
    %639 = vector.broadcast %636 : bf16 to vector<128x4xbf16>
    %640 = arith.select %638, %635, %639 : vector<128x4xi1>, vector<128x4xbf16>
    %641 = vector.extract_strided_slice %605 {offsets = [0, 1], sizes = [128, 3], strides = [1, 1]} : vector<128x4xbf16> to vector<128x3xbf16>
    %642 = tpu.concatenate %641, %601 in 1 : vector<128x3xbf16>, vector<128x1xbf16> -> vector<128x4xbf16>
    %cst_174 = arith.constant 0.000000e+00 : f32
    %643 = arith.truncf %cst_174 : f32 to bf16
    %644 = vector.shape_cast %83 : vector<1x4xi1> to vector<1x4xi1>
    %645 = vector.broadcast %644 : vector<1x4xi1> to vector<128x4xi1>
    %646 = vector.broadcast %643 : bf16 to vector<128x4xbf16>
    %647 = arith.select %645, %642, %646 : vector<128x4xi1>, vector<128x4xbf16>
    %648 = tpu.concatenate %612, %603, %619, %626, %599, %633, %640, %605, %647 in 0 : vector<128x4xbf16>, vector<128x4xbf16>, vector<128x4xbf16>, vector<128x4xbf16>, vector<128x4xbf16>, vector<128x4xbf16>, vector<128x4xbf16>, vector<128x4xbf16>, vector<128x4xbf16> -> vector<1152x4xbf16>
    %c0_175 = arith.constant 0 : index
    %c0_176 = arith.constant 0 : index
    %649 = vector.load %arg22[%c0_175, %c0_176] : memref<64x1152xbf16, #tpu.memory_space<vmem>>, vector<64x1152xbf16>
    %cst_177 = arith.constant dense<0.000000e+00> : vector<64x4xf32>
    %650 = tpu.matmul %649, %648, %cst_177 {dimension_numbers = #tpu.dot_dimension_numbers<[1], [0], [0], [1], [0, 0, 1, 1], [], []>} : vector<64x1152xbf16>, vector<1152x4xbf16>, vector<64x4xf32> -> vector<64x4xf32>
    %c0_178 = arith.constant 0 : index
    %c0_179 = arith.constant 0 : index
    %651 = vector.load %arg23[%c0_178, %c0_179] : memref<64x1xf32, #tpu.memory_space<vmem>>, vector<64x1xf32>
    %652 = vector.broadcast %651 : vector<64x1xf32> to vector<64x4xf32>
    %653 = arith.addf %650, %652 : vector<64x4xf32>
    %cst_180 = arith.constant 0.000000e+00 : f32
    %654 = vector.broadcast %cst_180 : f32 to vector<64x4xf32>
    %655 = arith.maximumf %653, %654 : vector<64x4xf32>
    %656 = arith.truncf %655 : vector<64x4xf32> to vector<64x4xbf16>
    %cst_181 = arith.constant 0.000000e+00 : bf16
    %657 = vector.broadcast %cst_181 : bf16 to vector<64x2xbf16>
    %cst_182 = arith.constant 0.000000e+00 : bf16
    %658 = vector.broadcast %cst_182 : bf16 to vector<64x1xbf16>
    %659 = vector.extract_strided_slice %656 {offsets = [0, 0], sizes = [64, 2], strides = [1, 1]} : vector<64x4xbf16> to vector<64x2xbf16>
    %660 = tpu.concatenate %657, %659 in 1 : vector<64x2xbf16>, vector<64x2xbf16> -> vector<64x4xbf16>
    %661 = vector.extract_strided_slice %656 {offsets = [0, 2], sizes = [64, 2], strides = [1, 1]} : vector<64x4xbf16> to vector<64x2xbf16>
    %662 = tpu.concatenate %661, %657 in 1 : vector<64x2xbf16>, vector<64x2xbf16> -> vector<64x4xbf16>
    %663 = vector.extract_strided_slice %660 {offsets = [0, 0], sizes = [64, 3], strides = [1, 1]} : vector<64x4xbf16> to vector<64x3xbf16>
    %664 = tpu.concatenate %658, %663 in 1 : vector<64x1xbf16>, vector<64x3xbf16> -> vector<64x4xbf16>
    %cst_183 = arith.constant 0.000000e+00 : f32
    %665 = arith.truncf %cst_183 : f32 to bf16
    %666 = vector.shape_cast %81 : vector<1x4xi1> to vector<1x4xi1>
    %667 = vector.broadcast %666 : vector<1x4xi1> to vector<64x4xi1>
    %668 = vector.broadcast %665 : bf16 to vector<64x4xbf16>
    %669 = arith.select %667, %664, %668 : vector<64x4xi1>, vector<64x4xbf16>
    %670 = vector.extract_strided_slice %660 {offsets = [0, 1], sizes = [64, 3], strides = [1, 1]} : vector<64x4xbf16> to vector<64x3xbf16>
    %671 = tpu.concatenate %670, %658 in 1 : vector<64x3xbf16>, vector<64x1xbf16> -> vector<64x4xbf16>
    %cst_184 = arith.constant 0.000000e+00 : f32
    %672 = arith.truncf %cst_184 : f32 to bf16
    %673 = vector.shape_cast %83 : vector<1x4xi1> to vector<1x4xi1>
    %674 = vector.broadcast %673 : vector<1x4xi1> to vector<64x4xi1>
    %675 = vector.broadcast %672 : bf16 to vector<64x4xbf16>
    %676 = arith.select %674, %671, %675 : vector<64x4xi1>, vector<64x4xbf16>
    %677 = vector.extract_strided_slice %656 {offsets = [0, 0], sizes = [64, 3], strides = [1, 1]} : vector<64x4xbf16> to vector<64x3xbf16>
    %678 = tpu.concatenate %658, %677 in 1 : vector<64x1xbf16>, vector<64x3xbf16> -> vector<64x4xbf16>
    %cst_185 = arith.constant 0.000000e+00 : f32
    %679 = arith.truncf %cst_185 : f32 to bf16
    %680 = vector.shape_cast %81 : vector<1x4xi1> to vector<1x4xi1>
    %681 = vector.broadcast %680 : vector<1x4xi1> to vector<64x4xi1>
    %682 = vector.broadcast %679 : bf16 to vector<64x4xbf16>
    %683 = arith.select %681, %678, %682 : vector<64x4xi1>, vector<64x4xbf16>
    %684 = vector.extract_strided_slice %656 {offsets = [0, 1], sizes = [64, 3], strides = [1, 1]} : vector<64x4xbf16> to vector<64x3xbf16>
    %685 = tpu.concatenate %684, %658 in 1 : vector<64x3xbf16>, vector<64x1xbf16> -> vector<64x4xbf16>
    %cst_186 = arith.constant 0.000000e+00 : f32
    %686 = arith.truncf %cst_186 : f32 to bf16
    %687 = vector.shape_cast %83 : vector<1x4xi1> to vector<1x4xi1>
    %688 = vector.broadcast %687 : vector<1x4xi1> to vector<64x4xi1>
    %689 = vector.broadcast %686 : bf16 to vector<64x4xbf16>
    %690 = arith.select %688, %685, %689 : vector<64x4xi1>, vector<64x4xbf16>
    %691 = vector.extract_strided_slice %662 {offsets = [0, 0], sizes = [64, 3], strides = [1, 1]} : vector<64x4xbf16> to vector<64x3xbf16>
    %692 = tpu.concatenate %658, %691 in 1 : vector<64x1xbf16>, vector<64x3xbf16> -> vector<64x4xbf16>
    %cst_187 = arith.constant 0.000000e+00 : f32
    %693 = arith.truncf %cst_187 : f32 to bf16
    %694 = vector.shape_cast %81 : vector<1x4xi1> to vector<1x4xi1>
    %695 = vector.broadcast %694 : vector<1x4xi1> to vector<64x4xi1>
    %696 = vector.broadcast %693 : bf16 to vector<64x4xbf16>
    %697 = arith.select %695, %692, %696 : vector<64x4xi1>, vector<64x4xbf16>
    %698 = vector.extract_strided_slice %662 {offsets = [0, 1], sizes = [64, 3], strides = [1, 1]} : vector<64x4xbf16> to vector<64x3xbf16>
    %699 = tpu.concatenate %698, %658 in 1 : vector<64x3xbf16>, vector<64x1xbf16> -> vector<64x4xbf16>
    %cst_188 = arith.constant 0.000000e+00 : f32
    %700 = arith.truncf %cst_188 : f32 to bf16
    %701 = vector.shape_cast %83 : vector<1x4xi1> to vector<1x4xi1>
    %702 = vector.broadcast %701 : vector<1x4xi1> to vector<64x4xi1>
    %703 = vector.broadcast %700 : bf16 to vector<64x4xbf16>
    %704 = arith.select %702, %699, %703 : vector<64x4xi1>, vector<64x4xbf16>
    %705 = tpu.concatenate %669, %660, %676, %683, %656, %690, %697, %662, %704 in 0 : vector<64x4xbf16>, vector<64x4xbf16>, vector<64x4xbf16>, vector<64x4xbf16>, vector<64x4xbf16>, vector<64x4xbf16>, vector<64x4xbf16>, vector<64x4xbf16>, vector<64x4xbf16> -> vector<576x4xbf16>
    %c0_189 = arith.constant 0 : index
    %c0_190 = arith.constant 0 : index
    %706 = vector.load %arg24[%c0_189, %c0_190] : memref<32x576xbf16, #tpu.memory_space<vmem>>, vector<32x576xbf16>
    %cst_191 = arith.constant dense<0.000000e+00> : vector<32x4xf32>
    %707 = tpu.matmul %706, %705, %cst_191 {dimension_numbers = #tpu.dot_dimension_numbers<[1], [0], [0], [1], [0, 0, 1, 1], [], []>} : vector<32x576xbf16>, vector<576x4xbf16>, vector<32x4xf32> -> vector<32x4xf32>
    %c0_192 = arith.constant 0 : index
    %c0_193 = arith.constant 0 : index
    %708 = vector.load %arg25[%c0_192, %c0_193] : memref<32x1xf32, #tpu.memory_space<vmem>>, vector<32x1xf32>
    %709 = vector.broadcast %708 : vector<32x1xf32> to vector<32x4xf32>
    %710 = arith.addf %707, %709 : vector<32x4xf32>
    %cst_194 = arith.constant 0.000000e+00 : f32
    %711 = vector.broadcast %cst_194 : f32 to vector<32x4xf32>
    %712 = arith.maximumf %710, %711 : vector<32x4xf32>
    %c0_195 = arith.constant 0 : index
    %c0_196 = arith.constant 0 : index
    %713 = vector.load %arg41[%c0_195, %c0_196] : memref<4x16xf32, #tpu.memory_space<vmem>>, vector<4x16xf32>
    %cst_197 = arith.constant dense<0.000000e+00> : vector<32x16xf32>
    %714 = tpu.matmul %712, %713, %cst_197 {dimension_numbers = #tpu.dot_dimension_numbers<[1], [0], [0], [1], [0, 0, 1, 1], [], []>} : vector<32x4xf32>, vector<4x16xf32>, vector<32x16xf32> -> vector<32x16xf32>
    %715 = tpu.concatenate %448, %714 in 0 : vector<32x16xf32>, vector<32x16xf32> -> vector<64x16xf32>
    %716 = arith.truncf %715 : vector<64x16xf32> to vector<64x16xbf16>
    %cst_198 = arith.constant 0.000000e+00 : bf16
    %717 = vector.broadcast %cst_198 : bf16 to vector<64x4xbf16>
    %cst_199 = arith.constant 0.000000e+00 : bf16
    %718 = vector.broadcast %cst_199 : bf16 to vector<64x1xbf16>
    %719 = vector.extract_strided_slice %716 {offsets = [0, 0], sizes = [64, 12], strides = [1, 1]} : vector<64x16xbf16> to vector<64x12xbf16>
    %720 = tpu.concatenate %717, %719 in 1 : vector<64x4xbf16>, vector<64x12xbf16> -> vector<64x16xbf16>
    %721 = vector.extract_strided_slice %716 {offsets = [0, 4], sizes = [64, 12], strides = [1, 1]} : vector<64x16xbf16> to vector<64x12xbf16>
    %722 = tpu.concatenate %721, %717 in 1 : vector<64x12xbf16>, vector<64x4xbf16> -> vector<64x16xbf16>
    %723 = vector.extract_strided_slice %720 {offsets = [0, 0], sizes = [64, 15], strides = [1, 1]} : vector<64x16xbf16> to vector<64x15xbf16>
    %724 = tpu.concatenate %718, %723 in 1 : vector<64x1xbf16>, vector<64x15xbf16> -> vector<64x16xbf16>
    %cst_200 = arith.constant 0.000000e+00 : f32
    %725 = arith.truncf %cst_200 : f32 to bf16
    %726 = vector.shape_cast %60 : vector<1x16xi1> to vector<1x16xi1>
    %727 = vector.broadcast %726 : vector<1x16xi1> to vector<64x16xi1>
    %728 = vector.broadcast %725 : bf16 to vector<64x16xbf16>
    %729 = arith.select %727, %724, %728 : vector<64x16xi1>, vector<64x16xbf16>
    %730 = vector.extract_strided_slice %720 {offsets = [0, 1], sizes = [64, 15], strides = [1, 1]} : vector<64x16xbf16> to vector<64x15xbf16>
    %731 = tpu.concatenate %730, %718 in 1 : vector<64x15xbf16>, vector<64x1xbf16> -> vector<64x16xbf16>
    %cst_201 = arith.constant 0.000000e+00 : f32
    %732 = arith.truncf %cst_201 : f32 to bf16
    %733 = vector.shape_cast %62 : vector<1x16xi1> to vector<1x16xi1>
    %734 = vector.broadcast %733 : vector<1x16xi1> to vector<64x16xi1>
    %735 = vector.broadcast %732 : bf16 to vector<64x16xbf16>
    %736 = arith.select %734, %731, %735 : vector<64x16xi1>, vector<64x16xbf16>
    %737 = vector.extract_strided_slice %716 {offsets = [0, 0], sizes = [64, 15], strides = [1, 1]} : vector<64x16xbf16> to vector<64x15xbf16>
    %738 = tpu.concatenate %718, %737 in 1 : vector<64x1xbf16>, vector<64x15xbf16> -> vector<64x16xbf16>
    %cst_202 = arith.constant 0.000000e+00 : f32
    %739 = arith.truncf %cst_202 : f32 to bf16
    %740 = vector.shape_cast %60 : vector<1x16xi1> to vector<1x16xi1>
    %741 = vector.broadcast %740 : vector<1x16xi1> to vector<64x16xi1>
    %742 = vector.broadcast %739 : bf16 to vector<64x16xbf16>
    %743 = arith.select %741, %738, %742 : vector<64x16xi1>, vector<64x16xbf16>
    %744 = vector.extract_strided_slice %716 {offsets = [0, 1], sizes = [64, 15], strides = [1, 1]} : vector<64x16xbf16> to vector<64x15xbf16>
    %745 = tpu.concatenate %744, %718 in 1 : vector<64x15xbf16>, vector<64x1xbf16> -> vector<64x16xbf16>
    %cst_203 = arith.constant 0.000000e+00 : f32
    %746 = arith.truncf %cst_203 : f32 to bf16
    %747 = vector.shape_cast %62 : vector<1x16xi1> to vector<1x16xi1>
    %748 = vector.broadcast %747 : vector<1x16xi1> to vector<64x16xi1>
    %749 = vector.broadcast %746 : bf16 to vector<64x16xbf16>
    %750 = arith.select %748, %745, %749 : vector<64x16xi1>, vector<64x16xbf16>
    %751 = vector.extract_strided_slice %722 {offsets = [0, 0], sizes = [64, 15], strides = [1, 1]} : vector<64x16xbf16> to vector<64x15xbf16>
    %752 = tpu.concatenate %718, %751 in 1 : vector<64x1xbf16>, vector<64x15xbf16> -> vector<64x16xbf16>
    %cst_204 = arith.constant 0.000000e+00 : f32
    %753 = arith.truncf %cst_204 : f32 to bf16
    %754 = vector.shape_cast %60 : vector<1x16xi1> to vector<1x16xi1>
    %755 = vector.broadcast %754 : vector<1x16xi1> to vector<64x16xi1>
    %756 = vector.broadcast %753 : bf16 to vector<64x16xbf16>
    %757 = arith.select %755, %752, %756 : vector<64x16xi1>, vector<64x16xbf16>
    %758 = vector.extract_strided_slice %722 {offsets = [0, 1], sizes = [64, 15], strides = [1, 1]} : vector<64x16xbf16> to vector<64x15xbf16>
    %759 = tpu.concatenate %758, %718 in 1 : vector<64x15xbf16>, vector<64x1xbf16> -> vector<64x16xbf16>
    %cst_205 = arith.constant 0.000000e+00 : f32
    %760 = arith.truncf %cst_205 : f32 to bf16
    %761 = vector.shape_cast %62 : vector<1x16xi1> to vector<1x16xi1>
    %762 = vector.broadcast %761 : vector<1x16xi1> to vector<64x16xi1>
    %763 = vector.broadcast %760 : bf16 to vector<64x16xbf16>
    %764 = arith.select %762, %759, %763 : vector<64x16xi1>, vector<64x16xbf16>
    %765 = tpu.concatenate %729, %720, %736, %743, %716, %750, %757, %722, %764 in 0 : vector<64x16xbf16>, vector<64x16xbf16>, vector<64x16xbf16>, vector<64x16xbf16>, vector<64x16xbf16>, vector<64x16xbf16>, vector<64x16xbf16>, vector<64x16xbf16>, vector<64x16xbf16> -> vector<576x16xbf16>
    %c0_206 = arith.constant 0 : index
    %c0_207 = arith.constant 0 : index
    %766 = vector.load %arg26[%c0_206, %c0_207] : memref<32x576xbf16, #tpu.memory_space<vmem>>, vector<32x576xbf16>
    %cst_208 = arith.constant dense<0.000000e+00> : vector<32x16xf32>
    %767 = tpu.matmul %766, %765, %cst_208 {dimension_numbers = #tpu.dot_dimension_numbers<[1], [0], [0], [1], [0, 0, 1, 1], [], []>} : vector<32x576xbf16>, vector<576x16xbf16>, vector<32x16xf32> -> vector<32x16xf32>
    %c0_209 = arith.constant 0 : index
    %c0_210 = arith.constant 0 : index
    %768 = vector.load %arg27[%c0_209, %c0_210] : memref<32x1xf32, #tpu.memory_space<vmem>>, vector<32x1xf32>
    %769 = vector.broadcast %768 : vector<32x1xf32> to vector<32x16xf32>
    %770 = arith.addf %767, %769 : vector<32x16xf32>
    %cst_211 = arith.constant 0.000000e+00 : f32
    %771 = vector.broadcast %cst_211 : f32 to vector<32x16xf32>
    %772 = arith.maximumf %770, %771 : vector<32x16xf32>
    %773 = arith.truncf %772 : vector<32x16xf32> to vector<32x16xbf16>
    %cst_212 = arith.constant 0.000000e+00 : bf16
    %774 = vector.broadcast %cst_212 : bf16 to vector<32x4xbf16>
    %cst_213 = arith.constant 0.000000e+00 : bf16
    %775 = vector.broadcast %cst_213 : bf16 to vector<32x1xbf16>
    %776 = vector.extract_strided_slice %773 {offsets = [0, 0], sizes = [32, 12], strides = [1, 1]} : vector<32x16xbf16> to vector<32x12xbf16>
    %777 = tpu.concatenate %774, %776 in 1 : vector<32x4xbf16>, vector<32x12xbf16> -> vector<32x16xbf16>
    %778 = vector.extract_strided_slice %773 {offsets = [0, 4], sizes = [32, 12], strides = [1, 1]} : vector<32x16xbf16> to vector<32x12xbf16>
    %779 = tpu.concatenate %778, %774 in 1 : vector<32x12xbf16>, vector<32x4xbf16> -> vector<32x16xbf16>
    %780 = vector.extract_strided_slice %777 {offsets = [0, 0], sizes = [32, 15], strides = [1, 1]} : vector<32x16xbf16> to vector<32x15xbf16>
    %781 = tpu.concatenate %775, %780 in 1 : vector<32x1xbf16>, vector<32x15xbf16> -> vector<32x16xbf16>
    %cst_214 = arith.constant 0.000000e+00 : f32
    %782 = arith.truncf %cst_214 : f32 to bf16
    %783 = vector.shape_cast %60 : vector<1x16xi1> to vector<1x16xi1>
    %784 = vector.broadcast %783 : vector<1x16xi1> to vector<32x16xi1>
    %785 = vector.broadcast %782 : bf16 to vector<32x16xbf16>
    %786 = arith.select %784, %781, %785 : vector<32x16xi1>, vector<32x16xbf16>
    %787 = vector.extract_strided_slice %777 {offsets = [0, 1], sizes = [32, 15], strides = [1, 1]} : vector<32x16xbf16> to vector<32x15xbf16>
    %788 = tpu.concatenate %787, %775 in 1 : vector<32x15xbf16>, vector<32x1xbf16> -> vector<32x16xbf16>
    %cst_215 = arith.constant 0.000000e+00 : f32
    %789 = arith.truncf %cst_215 : f32 to bf16
    %790 = vector.shape_cast %62 : vector<1x16xi1> to vector<1x16xi1>
    %791 = vector.broadcast %790 : vector<1x16xi1> to vector<32x16xi1>
    %792 = vector.broadcast %789 : bf16 to vector<32x16xbf16>
    %793 = arith.select %791, %788, %792 : vector<32x16xi1>, vector<32x16xbf16>
    %794 = vector.extract_strided_slice %773 {offsets = [0, 0], sizes = [32, 15], strides = [1, 1]} : vector<32x16xbf16> to vector<32x15xbf16>
    %795 = tpu.concatenate %775, %794 in 1 : vector<32x1xbf16>, vector<32x15xbf16> -> vector<32x16xbf16>
    %cst_216 = arith.constant 0.000000e+00 : f32
    %796 = arith.truncf %cst_216 : f32 to bf16
    %797 = vector.shape_cast %60 : vector<1x16xi1> to vector<1x16xi1>
    %798 = vector.broadcast %797 : vector<1x16xi1> to vector<32x16xi1>
    %799 = vector.broadcast %796 : bf16 to vector<32x16xbf16>
    %800 = arith.select %798, %795, %799 : vector<32x16xi1>, vector<32x16xbf16>
    %801 = vector.extract_strided_slice %773 {offsets = [0, 1], sizes = [32, 15], strides = [1, 1]} : vector<32x16xbf16> to vector<32x15xbf16>
    %802 = tpu.concatenate %801, %775 in 1 : vector<32x15xbf16>, vector<32x1xbf16> -> vector<32x16xbf16>
    %cst_217 = arith.constant 0.000000e+00 : f32
    %803 = arith.truncf %cst_217 : f32 to bf16
    %804 = vector.shape_cast %62 : vector<1x16xi1> to vector<1x16xi1>
    %805 = vector.broadcast %804 : vector<1x16xi1> to vector<32x16xi1>
    %806 = vector.broadcast %803 : bf16 to vector<32x16xbf16>
    %807 = arith.select %805, %802, %806 : vector<32x16xi1>, vector<32x16xbf16>
    %808 = vector.extract_strided_slice %779 {offsets = [0, 0], sizes = [32, 15], strides = [1, 1]} : vector<32x16xbf16> to vector<32x15xbf16>
    %809 = tpu.concatenate %775, %808 in 1 : vector<32x1xbf16>, vector<32x15xbf16> -> vector<32x16xbf16>
    %cst_218 = arith.constant 0.000000e+00 : f32
    %810 = arith.truncf %cst_218 : f32 to bf16
    %811 = vector.shape_cast %60 : vector<1x16xi1> to vector<1x16xi1>
    %812 = vector.broadcast %811 : vector<1x16xi1> to vector<32x16xi1>
    %813 = vector.broadcast %810 : bf16 to vector<32x16xbf16>
    %814 = arith.select %812, %809, %813 : vector<32x16xi1>, vector<32x16xbf16>
    %815 = vector.extract_strided_slice %779 {offsets = [0, 1], sizes = [32, 15], strides = [1, 1]} : vector<32x16xbf16> to vector<32x15xbf16>
    %816 = tpu.concatenate %815, %775 in 1 : vector<32x15xbf16>, vector<32x1xbf16> -> vector<32x16xbf16>
    %cst_219 = arith.constant 0.000000e+00 : f32
    %817 = arith.truncf %cst_219 : f32 to bf16
    %818 = vector.shape_cast %62 : vector<1x16xi1> to vector<1x16xi1>
    %819 = vector.broadcast %818 : vector<1x16xi1> to vector<32x16xi1>
    %820 = vector.broadcast %817 : bf16 to vector<32x16xbf16>
    %821 = arith.select %819, %816, %820 : vector<32x16xi1>, vector<32x16xbf16>
    %822 = tpu.concatenate %786, %777, %793, %800, %773, %807, %814, %779, %821 in 0 : vector<32x16xbf16>, vector<32x16xbf16>, vector<32x16xbf16>, vector<32x16xbf16>, vector<32x16xbf16>, vector<32x16xbf16>, vector<32x16xbf16>, vector<32x16xbf16>, vector<32x16xbf16> -> vector<288x16xbf16>
    %c0_220 = arith.constant 0 : index
    %c0_221 = arith.constant 0 : index
    %823 = vector.load %arg28[%c0_220, %c0_221] : memref<16x288xbf16, #tpu.memory_space<vmem>>, vector<16x288xbf16>
    %cst_222 = arith.constant dense<0.000000e+00> : vector<16x16xf32>
    %824 = tpu.matmul %823, %822, %cst_222 {dimension_numbers = #tpu.dot_dimension_numbers<[1], [0], [0], [1], [0, 0, 1, 1], [], []>} : vector<16x288xbf16>, vector<288x16xbf16>, vector<16x16xf32> -> vector<16x16xf32>
    %c0_223 = arith.constant 0 : index
    %c0_224 = arith.constant 0 : index
    %825 = vector.load %arg29[%c0_223, %c0_224] : memref<16x1xf32, #tpu.memory_space<vmem>>, vector<16x1xf32>
    %826 = vector.broadcast %825 : vector<16x1xf32> to vector<16x16xf32>
    %827 = arith.addf %824, %826 : vector<16x16xf32>
    %cst_225 = arith.constant 0.000000e+00 : f32
    %828 = vector.broadcast %cst_225 : f32 to vector<16x16xf32>
    %829 = arith.maximumf %827, %828 : vector<16x16xf32>
    %c0_226 = arith.constant 0 : index
    %c0_227 = arith.constant 0 : index
    %830 = vector.load %arg42[%c0_226, %c0_227] : memref<16x64xf32, #tpu.memory_space<vmem>>, vector<16x64xf32>
    %cst_228 = arith.constant dense<0.000000e+00> : vector<16x64xf32>
    %831 = tpu.matmul %829, %830, %cst_228 {dimension_numbers = #tpu.dot_dimension_numbers<[1], [0], [0], [1], [0, 0, 1, 1], [], []>} : vector<16x16xf32>, vector<16x64xf32>, vector<16x64xf32> -> vector<16x64xf32>
    %832 = tpu.concatenate %324, %831 in 0 : vector<16x64xf32>, vector<16x64xf32> -> vector<32x64xf32>
    %833 = arith.truncf %832 : vector<32x64xf32> to vector<32x64xbf16>
    %cst_229 = arith.constant 0.000000e+00 : bf16
    %834 = vector.broadcast %cst_229 : bf16 to vector<32x8xbf16>
    %cst_230 = arith.constant 0.000000e+00 : bf16
    %835 = vector.broadcast %cst_230 : bf16 to vector<32x1xbf16>
    %836 = vector.extract_strided_slice %833 {offsets = [0, 0], sizes = [32, 56], strides = [1, 1]} : vector<32x64xbf16> to vector<32x56xbf16>
    %837 = tpu.concatenate %834, %836 in 1 : vector<32x8xbf16>, vector<32x56xbf16> -> vector<32x64xbf16>
    %838 = vector.extract_strided_slice %833 {offsets = [0, 8], sizes = [32, 56], strides = [1, 1]} : vector<32x64xbf16> to vector<32x56xbf16>
    %839 = tpu.concatenate %838, %834 in 1 : vector<32x56xbf16>, vector<32x8xbf16> -> vector<32x64xbf16>
    %840 = vector.extract_strided_slice %837 {offsets = [0, 0], sizes = [32, 63], strides = [1, 1]} : vector<32x64xbf16> to vector<32x63xbf16>
    %841 = tpu.concatenate %835, %840 in 1 : vector<32x1xbf16>, vector<32x63xbf16> -> vector<32x64xbf16>
    %cst_231 = arith.constant 0.000000e+00 : f32
    %842 = arith.truncf %cst_231 : f32 to bf16
    %843 = vector.shape_cast %39 : vector<1x64xi1> to vector<1x64xi1>
    %844 = vector.broadcast %843 : vector<1x64xi1> to vector<32x64xi1>
    %845 = vector.broadcast %842 : bf16 to vector<32x64xbf16>
    %846 = arith.select %844, %841, %845 : vector<32x64xi1>, vector<32x64xbf16>
    %847 = vector.extract_strided_slice %837 {offsets = [0, 1], sizes = [32, 63], strides = [1, 1]} : vector<32x64xbf16> to vector<32x63xbf16>
    %848 = tpu.concatenate %847, %835 in 1 : vector<32x63xbf16>, vector<32x1xbf16> -> vector<32x64xbf16>
    %cst_232 = arith.constant 0.000000e+00 : f32
    %849 = arith.truncf %cst_232 : f32 to bf16
    %850 = vector.shape_cast %41 : vector<1x64xi1> to vector<1x64xi1>
    %851 = vector.broadcast %850 : vector<1x64xi1> to vector<32x64xi1>
    %852 = vector.broadcast %849 : bf16 to vector<32x64xbf16>
    %853 = arith.select %851, %848, %852 : vector<32x64xi1>, vector<32x64xbf16>
    %854 = vector.extract_strided_slice %833 {offsets = [0, 0], sizes = [32, 63], strides = [1, 1]} : vector<32x64xbf16> to vector<32x63xbf16>
    %855 = tpu.concatenate %835, %854 in 1 : vector<32x1xbf16>, vector<32x63xbf16> -> vector<32x64xbf16>
    %cst_233 = arith.constant 0.000000e+00 : f32
    %856 = arith.truncf %cst_233 : f32 to bf16
    %857 = vector.shape_cast %39 : vector<1x64xi1> to vector<1x64xi1>
    %858 = vector.broadcast %857 : vector<1x64xi1> to vector<32x64xi1>
    %859 = vector.broadcast %856 : bf16 to vector<32x64xbf16>
    %860 = arith.select %858, %855, %859 : vector<32x64xi1>, vector<32x64xbf16>
    %861 = vector.extract_strided_slice %833 {offsets = [0, 1], sizes = [32, 63], strides = [1, 1]} : vector<32x64xbf16> to vector<32x63xbf16>
    %862 = tpu.concatenate %861, %835 in 1 : vector<32x63xbf16>, vector<32x1xbf16> -> vector<32x64xbf16>
    %cst_234 = arith.constant 0.000000e+00 : f32
    %863 = arith.truncf %cst_234 : f32 to bf16
    %864 = vector.shape_cast %41 : vector<1x64xi1> to vector<1x64xi1>
    %865 = vector.broadcast %864 : vector<1x64xi1> to vector<32x64xi1>
    %866 = vector.broadcast %863 : bf16 to vector<32x64xbf16>
    %867 = arith.select %865, %862, %866 : vector<32x64xi1>, vector<32x64xbf16>
    %868 = vector.extract_strided_slice %839 {offsets = [0, 0], sizes = [32, 63], strides = [1, 1]} : vector<32x64xbf16> to vector<32x63xbf16>
    %869 = tpu.concatenate %835, %868 in 1 : vector<32x1xbf16>, vector<32x63xbf16> -> vector<32x64xbf16>
    %cst_235 = arith.constant 0.000000e+00 : f32
    %870 = arith.truncf %cst_235 : f32 to bf16
    %871 = vector.shape_cast %39 : vector<1x64xi1> to vector<1x64xi1>
    %872 = vector.broadcast %871 : vector<1x64xi1> to vector<32x64xi1>
    %873 = vector.broadcast %870 : bf16 to vector<32x64xbf16>
    %874 = arith.select %872, %869, %873 : vector<32x64xi1>, vector<32x64xbf16>
    %875 = vector.extract_strided_slice %839 {offsets = [0, 1], sizes = [32, 63], strides = [1, 1]} : vector<32x64xbf16> to vector<32x63xbf16>
    %876 = tpu.concatenate %875, %835 in 1 : vector<32x63xbf16>, vector<32x1xbf16> -> vector<32x64xbf16>
    %cst_236 = arith.constant 0.000000e+00 : f32
    %877 = arith.truncf %cst_236 : f32 to bf16
    %878 = vector.shape_cast %41 : vector<1x64xi1> to vector<1x64xi1>
    %879 = vector.broadcast %878 : vector<1x64xi1> to vector<32x64xi1>
    %880 = vector.broadcast %877 : bf16 to vector<32x64xbf16>
    %881 = arith.select %879, %876, %880 : vector<32x64xi1>, vector<32x64xbf16>
    %882 = tpu.concatenate %846, %837, %853, %860, %833, %867, %874, %839, %881 in 0 : vector<32x64xbf16>, vector<32x64xbf16>, vector<32x64xbf16>, vector<32x64xbf16>, vector<32x64xbf16>, vector<32x64xbf16>, vector<32x64xbf16>, vector<32x64xbf16>, vector<32x64xbf16> -> vector<288x64xbf16>
    %c0_237 = arith.constant 0 : index
    %c0_238 = arith.constant 0 : index
    %883 = vector.load %arg30[%c0_237, %c0_238] : memref<16x288xbf16, #tpu.memory_space<vmem>>, vector<16x288xbf16>
    %cst_239 = arith.constant dense<0.000000e+00> : vector<16x64xf32>
    %884 = tpu.matmul %883, %882, %cst_239 {dimension_numbers = #tpu.dot_dimension_numbers<[1], [0], [0], [1], [0, 0, 1, 1], [], []>} : vector<16x288xbf16>, vector<288x64xbf16>, vector<16x64xf32> -> vector<16x64xf32>
    %c0_240 = arith.constant 0 : index
    %c0_241 = arith.constant 0 : index
    %885 = vector.load %arg31[%c0_240, %c0_241] : memref<16x1xf32, #tpu.memory_space<vmem>>, vector<16x1xf32>
    %886 = vector.broadcast %885 : vector<16x1xf32> to vector<16x64xf32>
    %887 = arith.addf %884, %886 : vector<16x64xf32>
    %cst_242 = arith.constant 0.000000e+00 : f32
    %888 = vector.broadcast %cst_242 : f32 to vector<16x64xf32>
    %889 = arith.maximumf %887, %888 : vector<16x64xf32>
    %890 = arith.truncf %889 : vector<16x64xf32> to vector<16x64xbf16>
    %cst_243 = arith.constant 0.000000e+00 : bf16
    %891 = vector.broadcast %cst_243 : bf16 to vector<16x8xbf16>
    %cst_244 = arith.constant 0.000000e+00 : bf16
    %892 = vector.broadcast %cst_244 : bf16 to vector<16x1xbf16>
    %893 = vector.extract_strided_slice %890 {offsets = [0, 0], sizes = [16, 56], strides = [1, 1]} : vector<16x64xbf16> to vector<16x56xbf16>
    %894 = tpu.concatenate %891, %893 in 1 : vector<16x8xbf16>, vector<16x56xbf16> -> vector<16x64xbf16>
    %895 = vector.extract_strided_slice %890 {offsets = [0, 8], sizes = [16, 56], strides = [1, 1]} : vector<16x64xbf16> to vector<16x56xbf16>
    %896 = tpu.concatenate %895, %891 in 1 : vector<16x56xbf16>, vector<16x8xbf16> -> vector<16x64xbf16>
    %897 = vector.extract_strided_slice %894 {offsets = [0, 0], sizes = [16, 63], strides = [1, 1]} : vector<16x64xbf16> to vector<16x63xbf16>
    %898 = tpu.concatenate %892, %897 in 1 : vector<16x1xbf16>, vector<16x63xbf16> -> vector<16x64xbf16>
    %cst_245 = arith.constant 0.000000e+00 : f32
    %899 = arith.truncf %cst_245 : f32 to bf16
    %900 = vector.shape_cast %39 : vector<1x64xi1> to vector<1x64xi1>
    %901 = vector.broadcast %900 : vector<1x64xi1> to vector<16x64xi1>
    %902 = vector.broadcast %899 : bf16 to vector<16x64xbf16>
    %903 = arith.select %901, %898, %902 : vector<16x64xi1>, vector<16x64xbf16>
    %904 = vector.extract_strided_slice %894 {offsets = [0, 1], sizes = [16, 63], strides = [1, 1]} : vector<16x64xbf16> to vector<16x63xbf16>
    %905 = tpu.concatenate %904, %892 in 1 : vector<16x63xbf16>, vector<16x1xbf16> -> vector<16x64xbf16>
    %cst_246 = arith.constant 0.000000e+00 : f32
    %906 = arith.truncf %cst_246 : f32 to bf16
    %907 = vector.shape_cast %41 : vector<1x64xi1> to vector<1x64xi1>
    %908 = vector.broadcast %907 : vector<1x64xi1> to vector<16x64xi1>
    %909 = vector.broadcast %906 : bf16 to vector<16x64xbf16>
    %910 = arith.select %908, %905, %909 : vector<16x64xi1>, vector<16x64xbf16>
    %911 = vector.extract_strided_slice %890 {offsets = [0, 0], sizes = [16, 63], strides = [1, 1]} : vector<16x64xbf16> to vector<16x63xbf16>
    %912 = tpu.concatenate %892, %911 in 1 : vector<16x1xbf16>, vector<16x63xbf16> -> vector<16x64xbf16>
    %cst_247 = arith.constant 0.000000e+00 : f32
    %913 = arith.truncf %cst_247 : f32 to bf16
    %914 = vector.shape_cast %39 : vector<1x64xi1> to vector<1x64xi1>
    %915 = vector.broadcast %914 : vector<1x64xi1> to vector<16x64xi1>
    %916 = vector.broadcast %913 : bf16 to vector<16x64xbf16>
    %917 = arith.select %915, %912, %916 : vector<16x64xi1>, vector<16x64xbf16>
    %918 = vector.extract_strided_slice %890 {offsets = [0, 1], sizes = [16, 63], strides = [1, 1]} : vector<16x64xbf16> to vector<16x63xbf16>
    %919 = tpu.concatenate %918, %892 in 1 : vector<16x63xbf16>, vector<16x1xbf16> -> vector<16x64xbf16>
    %cst_248 = arith.constant 0.000000e+00 : f32
    %920 = arith.truncf %cst_248 : f32 to bf16
    %921 = vector.shape_cast %41 : vector<1x64xi1> to vector<1x64xi1>
    %922 = vector.broadcast %921 : vector<1x64xi1> to vector<16x64xi1>
    %923 = vector.broadcast %920 : bf16 to vector<16x64xbf16>
    %924 = arith.select %922, %919, %923 : vector<16x64xi1>, vector<16x64xbf16>
    %925 = vector.extract_strided_slice %896 {offsets = [0, 0], sizes = [16, 63], strides = [1, 1]} : vector<16x64xbf16> to vector<16x63xbf16>
    %926 = tpu.concatenate %892, %925 in 1 : vector<16x1xbf16>, vector<16x63xbf16> -> vector<16x64xbf16>
    %cst_249 = arith.constant 0.000000e+00 : f32
    %927 = arith.truncf %cst_249 : f32 to bf16
    %928 = vector.shape_cast %39 : vector<1x64xi1> to vector<1x64xi1>
    %929 = vector.broadcast %928 : vector<1x64xi1> to vector<16x64xi1>
    %930 = vector.broadcast %927 : bf16 to vector<16x64xbf16>
    %931 = arith.select %929, %926, %930 : vector<16x64xi1>, vector<16x64xbf16>
    %932 = vector.extract_strided_slice %896 {offsets = [0, 1], sizes = [16, 63], strides = [1, 1]} : vector<16x64xbf16> to vector<16x63xbf16>
    %933 = tpu.concatenate %932, %892 in 1 : vector<16x63xbf16>, vector<16x1xbf16> -> vector<16x64xbf16>
    %cst_250 = arith.constant 0.000000e+00 : f32
    %934 = arith.truncf %cst_250 : f32 to bf16
    %935 = vector.shape_cast %41 : vector<1x64xi1> to vector<1x64xi1>
    %936 = vector.broadcast %935 : vector<1x64xi1> to vector<16x64xi1>
    %937 = vector.broadcast %934 : bf16 to vector<16x64xbf16>
    %938 = arith.select %936, %933, %937 : vector<16x64xi1>, vector<16x64xbf16>
    %939 = tpu.concatenate %903, %894, %910, %917, %890, %924, %931, %896, %938 in 0 : vector<16x64xbf16>, vector<16x64xbf16>, vector<16x64xbf16>, vector<16x64xbf16>, vector<16x64xbf16>, vector<16x64xbf16>, vector<16x64xbf16>, vector<16x64xbf16>, vector<16x64xbf16> -> vector<144x64xbf16>
    %c0_251 = arith.constant 0 : index
    %c0_252 = arith.constant 0 : index
    %940 = vector.load %arg32[%c0_251, %c0_252] : memref<8x144xbf16, #tpu.memory_space<vmem>>, vector<8x144xbf16>
    %cst_253 = arith.constant dense<0.000000e+00> : vector<8x64xf32>
    %941 = tpu.matmul %940, %939, %cst_253 {dimension_numbers = #tpu.dot_dimension_numbers<[1], [0], [0], [1], [0, 0, 1, 1], [], []>} : vector<8x144xbf16>, vector<144x64xbf16>, vector<8x64xf32> -> vector<8x64xf32>
    %c0_254 = arith.constant 0 : index
    %c0_255 = arith.constant 0 : index
    %942 = vector.load %arg33[%c0_254, %c0_255] : memref<8x1xf32, #tpu.memory_space<vmem>>, vector<8x1xf32>
    %943 = vector.broadcast %942 : vector<8x1xf32> to vector<8x64xf32>
    %944 = arith.addf %941, %943 : vector<8x64xf32>
    %cst_256 = arith.constant 0.000000e+00 : f32
    %945 = vector.broadcast %cst_256 : f32 to vector<8x64xf32>
    %946 = arith.maximumf %944, %945 : vector<8x64xf32>
    %c0_257 = arith.constant 0 : index
    %c0_258 = arith.constant 0 : index
    %947 = vector.load %arg43[%c0_257, %c0_258] : memref<64x256xf32, #tpu.memory_space<vmem>>, vector<64x256xf32>
    %cst_259 = arith.constant dense<0.000000e+00> : vector<8x256xf32>
    %948 = tpu.matmul %946, %947, %cst_259 {dimension_numbers = #tpu.dot_dimension_numbers<[1], [0], [0], [1], [0, 0, 1, 1], [], []>} : vector<8x64xf32>, vector<64x256xf32>, vector<8x256xf32> -> vector<8x256xf32>
    %949 = tpu.concatenate %200, %948 in 0 : vector<8x256xf32>, vector<8x256xf32> -> vector<16x256xf32>
    %950 = arith.truncf %949 : vector<16x256xf32> to vector<16x256xbf16>
    %cst_260 = arith.constant 0.000000e+00 : bf16
    %951 = vector.broadcast %cst_260 : bf16 to vector<16x16xbf16>
    %cst_261 = arith.constant 0.000000e+00 : bf16
    %952 = vector.broadcast %cst_261 : bf16 to vector<16x1xbf16>
    %953 = vector.extract_strided_slice %950 {offsets = [0, 0], sizes = [16, 240], strides = [1, 1]} : vector<16x256xbf16> to vector<16x240xbf16>
    %954 = tpu.concatenate %951, %953 in 1 : vector<16x16xbf16>, vector<16x240xbf16> -> vector<16x256xbf16>
    %955 = vector.extract_strided_slice %950 {offsets = [0, 16], sizes = [16, 240], strides = [1, 1]} : vector<16x256xbf16> to vector<16x240xbf16>
    %956 = tpu.concatenate %955, %951 in 1 : vector<16x240xbf16>, vector<16x16xbf16> -> vector<16x256xbf16>
    %957 = vector.extract_strided_slice %954 {offsets = [0, 0], sizes = [16, 255], strides = [1, 1]} : vector<16x256xbf16> to vector<16x255xbf16>
    %958 = tpu.concatenate %952, %957 in 1 : vector<16x1xbf16>, vector<16x255xbf16> -> vector<16x256xbf16>
    %cst_262 = arith.constant 0.000000e+00 : f32
    %959 = arith.truncf %cst_262 : f32 to bf16
    %960 = vector.shape_cast %18 : vector<1x256xi1> to vector<1x256xi1>
    %961 = vector.broadcast %960 : vector<1x256xi1> to vector<16x256xi1>
    %962 = vector.broadcast %959 : bf16 to vector<16x256xbf16>
    %963 = arith.select %961, %958, %962 : vector<16x256xi1>, vector<16x256xbf16>
    %964 = vector.extract_strided_slice %954 {offsets = [0, 1], sizes = [16, 255], strides = [1, 1]} : vector<16x256xbf16> to vector<16x255xbf16>
    %965 = tpu.concatenate %964, %952 in 1 : vector<16x255xbf16>, vector<16x1xbf16> -> vector<16x256xbf16>
    %cst_263 = arith.constant 0.000000e+00 : f32
    %966 = arith.truncf %cst_263 : f32 to bf16
    %967 = vector.shape_cast %20 : vector<1x256xi1> to vector<1x256xi1>
    %968 = vector.broadcast %967 : vector<1x256xi1> to vector<16x256xi1>
    %969 = vector.broadcast %966 : bf16 to vector<16x256xbf16>
    %970 = arith.select %968, %965, %969 : vector<16x256xi1>, vector<16x256xbf16>
    %971 = vector.extract_strided_slice %950 {offsets = [0, 0], sizes = [16, 255], strides = [1, 1]} : vector<16x256xbf16> to vector<16x255xbf16>
    %972 = tpu.concatenate %952, %971 in 1 : vector<16x1xbf16>, vector<16x255xbf16> -> vector<16x256xbf16>
    %cst_264 = arith.constant 0.000000e+00 : f32
    %973 = arith.truncf %cst_264 : f32 to bf16
    %974 = vector.shape_cast %18 : vector<1x256xi1> to vector<1x256xi1>
    %975 = vector.broadcast %974 : vector<1x256xi1> to vector<16x256xi1>
    %976 = vector.broadcast %973 : bf16 to vector<16x256xbf16>
    %977 = arith.select %975, %972, %976 : vector<16x256xi1>, vector<16x256xbf16>
    %978 = vector.extract_strided_slice %950 {offsets = [0, 1], sizes = [16, 255], strides = [1, 1]} : vector<16x256xbf16> to vector<16x255xbf16>
    %979 = tpu.concatenate %978, %952 in 1 : vector<16x255xbf16>, vector<16x1xbf16> -> vector<16x256xbf16>
    %cst_265 = arith.constant 0.000000e+00 : f32
    %980 = arith.truncf %cst_265 : f32 to bf16
    %981 = vector.shape_cast %20 : vector<1x256xi1> to vector<1x256xi1>
    %982 = vector.broadcast %981 : vector<1x256xi1> to vector<16x256xi1>
    %983 = vector.broadcast %980 : bf16 to vector<16x256xbf16>
    %984 = arith.select %982, %979, %983 : vector<16x256xi1>, vector<16x256xbf16>
    %985 = vector.extract_strided_slice %956 {offsets = [0, 0], sizes = [16, 255], strides = [1, 1]} : vector<16x256xbf16> to vector<16x255xbf16>
    %986 = tpu.concatenate %952, %985 in 1 : vector<16x1xbf16>, vector<16x255xbf16> -> vector<16x256xbf16>
    %cst_266 = arith.constant 0.000000e+00 : f32
    %987 = arith.truncf %cst_266 : f32 to bf16
    %988 = vector.shape_cast %18 : vector<1x256xi1> to vector<1x256xi1>
    %989 = vector.broadcast %988 : vector<1x256xi1> to vector<16x256xi1>
    %990 = vector.broadcast %987 : bf16 to vector<16x256xbf16>
    %991 = arith.select %989, %986, %990 : vector<16x256xi1>, vector<16x256xbf16>
    %992 = vector.extract_strided_slice %956 {offsets = [0, 1], sizes = [16, 255], strides = [1, 1]} : vector<16x256xbf16> to vector<16x255xbf16>
    %993 = tpu.concatenate %992, %952 in 1 : vector<16x255xbf16>, vector<16x1xbf16> -> vector<16x256xbf16>
    %cst_267 = arith.constant 0.000000e+00 : f32
    %994 = arith.truncf %cst_267 : f32 to bf16
    %995 = vector.shape_cast %20 : vector<1x256xi1> to vector<1x256xi1>
    %996 = vector.broadcast %995 : vector<1x256xi1> to vector<16x256xi1>
    %997 = vector.broadcast %994 : bf16 to vector<16x256xbf16>
    %998 = arith.select %996, %993, %997 : vector<16x256xi1>, vector<16x256xbf16>
    %999 = tpu.concatenate %963, %954, %970, %977, %950, %984, %991, %956, %998 in 0 : vector<16x256xbf16>, vector<16x256xbf16>, vector<16x256xbf16>, vector<16x256xbf16>, vector<16x256xbf16>, vector<16x256xbf16>, vector<16x256xbf16>, vector<16x256xbf16>, vector<16x256xbf16> -> vector<144x256xbf16>
    %c0_268 = arith.constant 0 : index
    %c0_269 = arith.constant 0 : index
    %1000 = vector.load %arg34[%c0_268, %c0_269] : memref<8x144xbf16, #tpu.memory_space<vmem>>, vector<8x144xbf16>
    %cst_270 = arith.constant dense<0.000000e+00> : vector<8x256xf32>
    %1001 = tpu.matmul %1000, %999, %cst_270 {dimension_numbers = #tpu.dot_dimension_numbers<[1], [0], [0], [1], [0, 0, 1, 1], [], []>} : vector<8x144xbf16>, vector<144x256xbf16>, vector<8x256xf32> -> vector<8x256xf32>
    %c0_271 = arith.constant 0 : index
    %c0_272 = arith.constant 0 : index
    %1002 = vector.load %arg35[%c0_271, %c0_272] : memref<8x1xf32, #tpu.memory_space<vmem>>, vector<8x1xf32>
    %1003 = vector.broadcast %1002 : vector<8x1xf32> to vector<8x256xf32>
    %1004 = arith.addf %1001, %1003 : vector<8x256xf32>
    %cst_273 = arith.constant 0.000000e+00 : f32
    %1005 = vector.broadcast %cst_273 : f32 to vector<8x256xf32>
    %1006 = arith.maximumf %1004, %1005 : vector<8x256xf32>
    %1007 = arith.truncf %1006 : vector<8x256xf32> to vector<8x256xbf16>
    %cst_274 = arith.constant 0.000000e+00 : bf16
    %1008 = vector.broadcast %cst_274 : bf16 to vector<8x16xbf16>
    %cst_275 = arith.constant 0.000000e+00 : bf16
    %1009 = vector.broadcast %cst_275 : bf16 to vector<8x1xbf16>
    %1010 = vector.extract_strided_slice %1007 {offsets = [0, 0], sizes = [8, 240], strides = [1, 1]} : vector<8x256xbf16> to vector<8x240xbf16>
    %1011 = tpu.concatenate %1008, %1010 in 1 : vector<8x16xbf16>, vector<8x240xbf16> -> vector<8x256xbf16>
    %1012 = vector.extract_strided_slice %1007 {offsets = [0, 16], sizes = [8, 240], strides = [1, 1]} : vector<8x256xbf16> to vector<8x240xbf16>
    %1013 = tpu.concatenate %1012, %1008 in 1 : vector<8x240xbf16>, vector<8x16xbf16> -> vector<8x256xbf16>
    %1014 = vector.extract_strided_slice %1011 {offsets = [0, 0], sizes = [8, 255], strides = [1, 1]} : vector<8x256xbf16> to vector<8x255xbf16>
    %1015 = tpu.concatenate %1009, %1014 in 1 : vector<8x1xbf16>, vector<8x255xbf16> -> vector<8x256xbf16>
    %cst_276 = arith.constant 0.000000e+00 : f32
    %1016 = arith.truncf %cst_276 : f32 to bf16
    %1017 = vector.shape_cast %18 : vector<1x256xi1> to vector<1x256xi1>
    %1018 = vector.broadcast %1017 : vector<1x256xi1> to vector<8x256xi1>
    %1019 = vector.broadcast %1016 : bf16 to vector<8x256xbf16>
    %1020 = arith.select %1018, %1015, %1019 : vector<8x256xi1>, vector<8x256xbf16>
    %1021 = vector.extract_strided_slice %1011 {offsets = [0, 1], sizes = [8, 255], strides = [1, 1]} : vector<8x256xbf16> to vector<8x255xbf16>
    %1022 = tpu.concatenate %1021, %1009 in 1 : vector<8x255xbf16>, vector<8x1xbf16> -> vector<8x256xbf16>
    %cst_277 = arith.constant 0.000000e+00 : f32
    %1023 = arith.truncf %cst_277 : f32 to bf16
    %1024 = vector.shape_cast %20 : vector<1x256xi1> to vector<1x256xi1>
    %1025 = vector.broadcast %1024 : vector<1x256xi1> to vector<8x256xi1>
    %1026 = vector.broadcast %1023 : bf16 to vector<8x256xbf16>
    %1027 = arith.select %1025, %1022, %1026 : vector<8x256xi1>, vector<8x256xbf16>
    %1028 = vector.extract_strided_slice %1007 {offsets = [0, 0], sizes = [8, 255], strides = [1, 1]} : vector<8x256xbf16> to vector<8x255xbf16>
    %1029 = tpu.concatenate %1009, %1028 in 1 : vector<8x1xbf16>, vector<8x255xbf16> -> vector<8x256xbf16>
    %cst_278 = arith.constant 0.000000e+00 : f32
    %1030 = arith.truncf %cst_278 : f32 to bf16
    %1031 = vector.shape_cast %18 : vector<1x256xi1> to vector<1x256xi1>
    %1032 = vector.broadcast %1031 : vector<1x256xi1> to vector<8x256xi1>
    %1033 = vector.broadcast %1030 : bf16 to vector<8x256xbf16>
    %1034 = arith.select %1032, %1029, %1033 : vector<8x256xi1>, vector<8x256xbf16>
    %1035 = vector.extract_strided_slice %1007 {offsets = [0, 1], sizes = [8, 255], strides = [1, 1]} : vector<8x256xbf16> to vector<8x255xbf16>
    %1036 = tpu.concatenate %1035, %1009 in 1 : vector<8x255xbf16>, vector<8x1xbf16> -> vector<8x256xbf16>
    %cst_279 = arith.constant 0.000000e+00 : f32
    %1037 = arith.truncf %cst_279 : f32 to bf16
    %1038 = vector.shape_cast %20 : vector<1x256xi1> to vector<1x256xi1>
    %1039 = vector.broadcast %1038 : vector<1x256xi1> to vector<8x256xi1>
    %1040 = vector.broadcast %1037 : bf16 to vector<8x256xbf16>
    %1041 = arith.select %1039, %1036, %1040 : vector<8x256xi1>, vector<8x256xbf16>
    %1042 = vector.extract_strided_slice %1013 {offsets = [0, 0], sizes = [8, 255], strides = [1, 1]} : vector<8x256xbf16> to vector<8x255xbf16>
    %1043 = tpu.concatenate %1009, %1042 in 1 : vector<8x1xbf16>, vector<8x255xbf16> -> vector<8x256xbf16>
    %cst_280 = arith.constant 0.000000e+00 : f32
    %1044 = arith.truncf %cst_280 : f32 to bf16
    %1045 = vector.shape_cast %18 : vector<1x256xi1> to vector<1x256xi1>
    %1046 = vector.broadcast %1045 : vector<1x256xi1> to vector<8x256xi1>
    %1047 = vector.broadcast %1044 : bf16 to vector<8x256xbf16>
    %1048 = arith.select %1046, %1043, %1047 : vector<8x256xi1>, vector<8x256xbf16>
    %1049 = vector.extract_strided_slice %1013 {offsets = [0, 1], sizes = [8, 255], strides = [1, 1]} : vector<8x256xbf16> to vector<8x255xbf16>
    %1050 = tpu.concatenate %1049, %1009 in 1 : vector<8x255xbf16>, vector<8x1xbf16> -> vector<8x256xbf16>
    %cst_281 = arith.constant 0.000000e+00 : f32
    %1051 = arith.truncf %cst_281 : f32 to bf16
    %1052 = vector.shape_cast %20 : vector<1x256xi1> to vector<1x256xi1>
    %1053 = vector.broadcast %1052 : vector<1x256xi1> to vector<8x256xi1>
    %1054 = vector.broadcast %1051 : bf16 to vector<8x256xbf16>
    %1055 = arith.select %1053, %1050, %1054 : vector<8x256xi1>, vector<8x256xbf16>
    %1056 = tpu.concatenate %1020, %1011, %1027, %1034, %1007, %1041, %1048, %1013, %1055 in 0 : vector<8x256xbf16>, vector<8x256xbf16>, vector<8x256xbf16>, vector<8x256xbf16>, vector<8x256xbf16>, vector<8x256xbf16>, vector<8x256xbf16>, vector<8x256xbf16>, vector<8x256xbf16> -> vector<72x256xbf16>
    %c0_282 = arith.constant 0 : index
    %c0_283 = arith.constant 0 : index
    %1057 = vector.load %arg36[%c0_282, %c0_283] : memref<8x72xbf16, #tpu.memory_space<vmem>>, vector<8x72xbf16>
    %cst_284 = arith.constant dense<0.000000e+00> : vector<8x256xf32>
    %1058 = tpu.matmul %1057, %1056, %cst_284 {dimension_numbers = #tpu.dot_dimension_numbers<[1], [0], [0], [1], [0, 0, 1, 1], [], []>} : vector<8x72xbf16>, vector<72x256xbf16>, vector<8x256xf32> -> vector<8x256xf32>
    %c0_285 = arith.constant 0 : index
    %c0_286 = arith.constant 0 : index
    %1059 = vector.load %arg37[%c0_285, %c0_286] : memref<8x1xf32, #tpu.memory_space<vmem>>, vector<8x1xf32>
    %1060 = vector.broadcast %1059 : vector<8x1xf32> to vector<8x256xf32>
    %1061 = arith.addf %1058, %1060 : vector<8x256xf32>
    %cst_287 = arith.constant 0.000000e+00 : f32
    %1062 = vector.broadcast %cst_287 : f32 to vector<8x256xf32>
    %1063 = arith.maximumf %1061, %1062 : vector<8x256xf32>
    %1064 = vector.extract_strided_slice %85 {offsets = [0, 0], sizes = [3, 256], strides = [1, 1]} : vector<4x256xf32> to vector<3x256xf32>
    %1065 = vector.extract_strided_slice %85 {offsets = [3, 0], sizes = [1, 256], strides = [1, 1]} : vector<4x256xf32> to vector<1x256xf32>
    %1066 = tpu.concatenate %1063, %1064, %1065 in 0 : vector<8x256xf32>, vector<3x256xf32>, vector<1x256xf32> -> vector<12x256xf32>
    %1067 = arith.truncf %1066 : vector<12x256xf32> to vector<12x256xbf16>
    %c0_288 = arith.constant 0 : index
    %c0_289 = arith.constant 0 : index
    %1068 = vector.load %arg38[%c0_288, %c0_289] : memref<1x12xbf16, #tpu.memory_space<vmem>>, vector<1x12xbf16>
    %cst_290 = arith.constant dense<0.000000e+00> : vector<1x256xf32>
    %1069 = tpu.matmul %1068, %1067, %cst_290 {dimension_numbers = #tpu.dot_dimension_numbers<[1], [0], [0], [1], [0, 0, 1, 1], [], []>} : vector<1x12xbf16>, vector<12x256xbf16>, vector<1x256xf32> -> vector<1x256xf32>
    %c0_291 = arith.constant 0 : index
    %c0_292 = arith.constant 0 : index
    %1070 = vector.load %arg39[%c0_291, %c0_292] : memref<1x1xf32, #tpu.memory_space<vmem>>, vector<1x1xf32>
    %1071 = vector.broadcast %1070 : vector<1x1xf32> to vector<1x256xf32>
    %1072 = arith.addf %1069, %1071 : vector<1x256xf32>
    %1073 = arith.negf %1072 : vector<1x256xf32>
    %1074 = math.exp %1073 : vector<1x256xf32>
    %cst_293 = arith.constant 1.000000e+00 : f32
    %1075 = vector.broadcast %cst_293 : f32 to vector<1x256xf32>
    %1076 = arith.addf %1075, %1074 : vector<1x256xf32>
    %1077 = arith.divf %1075, %1076 : vector<1x256xf32>
    %c0_294 = arith.constant 0 : index
    %c0_295 = arith.constant 0 : index
    %c0_296 = arith.constant 0 : index
    %1078 = vector.load %arg48[%c0_294, %c0_295, %c0_296] : memref<1x1x256xf32, #tpu.memory_space<vmem>>, vector<1x1x256xf32>
    %1079 = vector.shape_cast %1078 : vector<1x1x256xf32> to vector<1x256xf32>
    %1080 = vector.shape_cast %1077 : vector<1x256xf32> to vector<1x1x256xf32>
    tpu.vector_store %arg48[%c0_294, %c0_295, %c0_296], %1080 {strides = array<i32>} : memref<1x1x256xf32, #tpu.memory_space<vmem>>, vector<1x1x256xf32>,
    return
  }
  func.func @transform_0(%arg0: i32) -> (i32, i32, i32) {
    %c0_i32 = arith.constant 0 : i32
    %c0_i32_0 = arith.constant 0 : i32
    %c0_i32_1 = arith.constant 0 : i32
    return %arg0, %c0_i32, %c0_i32_0 : i32, i32, i32
  }
  func.func @transform_1(%arg0: i32) -> (i32, i32) {
    %c0_i32 = arith.constant 0 : i32
    %c0_i32_0 = arith.constant 0 : i32
    %c0_i32_1 = arith.constant 0 : i32
    return %c0_i32, %c0_i32_0 : i32, i32
  }
  func.func @transform_2(%arg0: i32) -> (i32, i32) {
    %c0_i32 = arith.constant 0 : i32
    %c0_i32_0 = arith.constant 0 : i32
    %c0_i32_1 = arith.constant 0 : i32
    return %c0_i32, %c0_i32_0 : i32, i32
  }
  func.func @transform_3(%arg0: i32) -> (i32, i32) {
    %c0_i32 = arith.constant 0 : i32
    %c0_i32_0 = arith.constant 0 : i32
    %c0_i32_1 = arith.constant 0 : i32
    return %c0_i32, %c0_i32_0 : i32, i32
  }
  func.func @transform_4(%arg0: i32) -> (i32, i32) {
    %c0_i32 = arith.constant 0 : i32
    %c0_i32_0 = arith.constant 0 : i32
    %c0_i32_1 = arith.constant 0 : i32
    return %c0_i32, %c0_i32_0 : i32, i32
  }
  func.func @transform_5(%arg0: i32) -> (i32, i32) {
    %c0_i32 = arith.constant 0 : i32
    %c0_i32_0 = arith.constant 0 : i32
    %c0_i32_1 = arith.constant 0 : i32
    return %c0_i32, %c0_i32_0 : i32, i32
  }
  func.func @transform_6(%arg0: i32) -> (i32, i32) {
    %c0_i32 = arith.constant 0 : i32
    %c0_i32_0 = arith.constant 0 : i32
    %c0_i32_1 = arith.constant 0 : i32
    return %c0_i32, %c0_i32_0 : i32, i32
  }
  func.func @transform_7(%arg0: i32) -> (i32, i32) {
    %c0_i32 = arith.constant 0 : i32
    %c0_i32_0 = arith.constant 0 : i32
    %c0_i32_1 = arith.constant 0 : i32
    return %c0_i32, %c0_i32_0 : i32, i32
  }
  func.func @transform_8(%arg0: i32) -> (i32, i32) {
    %c0_i32 = arith.constant 0 : i32
    %c0_i32_0 = arith.constant 0 : i32
    %c0_i32_1 = arith.constant 0 : i32
    return %c0_i32, %c0_i32_0 : i32, i32
  }
  func.func @transform_9(%arg0: i32) -> (i32, i32) {
    %c0_i32 = arith.constant 0 : i32
    %c0_i32_0 = arith.constant 0 : i32
    %c0_i32_1 = arith.constant 0 : i32
    return %c0_i32, %c0_i32_0 : i32, i32
  }
  func.func @transform_10(%arg0: i32) -> (i32, i32) {
    %c0_i32 = arith.constant 0 : i32
    %c0_i32_0 = arith.constant 0 : i32
    %c0_i32_1 = arith.constant 0 : i32
    return %c0_i32, %c0_i32_0 : i32, i32
  }
  func.func @transform_11(%arg0: i32) -> (i32, i32) {
    %c0_i32 = arith.constant 0 : i32
    %c0_i32_0 = arith.constant 0 : i32
    %c0_i32_1 = arith.constant 0 : i32
    return %c0_i32, %c0_i32_0 : i32, i32
  }
  func.func @transform_12(%arg0: i32) -> (i32, i32) {
    %c0_i32 = arith.constant 0 : i32
    %c0_i32_0 = arith.constant 0 : i32
    %c0_i32_1 = arith.constant 0 : i32
    return %c0_i32, %c0_i32_0 : i32, i32
  }
  func.func @transform_13(%arg0: i32) -> (i32, i32) {
    %c0_i32 = arith.constant 0 : i32
    %c0_i32_0 = arith.constant 0 : i32
    %c0_i32_1 = arith.constant 0 : i32
    return %c0_i32, %c0_i32_0 : i32, i32
  }
  func.func @transform_14(%arg0: i32) -> (i32, i32) {
    %c0_i32 = arith.constant 0 : i32
    %c0_i32_0 = arith.constant 0 : i32
    %c0_i32_1 = arith.constant 0 : i32
    return %c0_i32, %c0_i32_0 : i32, i32
  }
  func.func @transform_15(%arg0: i32) -> (i32, i32) {
    %c0_i32 = arith.constant 0 : i32
    %c0_i32_0 = arith.constant 0 : i32
    %c0_i32_1 = arith.constant 0 : i32
    return %c0_i32, %c0_i32_0 : i32, i32
  }
  func.func @transform_16(%arg0: i32) -> (i32, i32) {
    %c0_i32 = arith.constant 0 : i32
    %c0_i32_0 = arith.constant 0 : i32
    %c0_i32_1 = arith.constant 0 : i32
    return %c0_i32, %c0_i32_0 : i32, i32
  }
  func.func @transform_17(%arg0: i32) -> (i32, i32) {
    %c0_i32 = arith.constant 0 : i32
    %c0_i32_0 = arith.constant 0 : i32
    %c0_i32_1 = arith.constant 0 : i32
    return %c0_i32, %c0_i32_0 : i32, i32
  }
  func.func @transform_18(%arg0: i32) -> (i32, i32) {
    %c0_i32 = arith.constant 0 : i32
    %c0_i32_0 = arith.constant 0 : i32
    %c0_i32_1 = arith.constant 0 : i32
    return %c0_i32, %c0_i32_0 : i32, i32
  }
  func.func @transform_19(%arg0: i32) -> (i32, i32) {
    %c0_i32 = arith.constant 0 : i32
    %c0_i32_0 = arith.constant 0 : i32
    %c0_i32_1 = arith.constant 0 : i32
    return %c0_i32, %c0_i32_0 : i32, i32
  }
  func.func @transform_20(%arg0: i32) -> (i32, i32) {
    %c0_i32 = arith.constant 0 : i32
    %c0_i32_0 = arith.constant 0 : i32
    %c0_i32_1 = arith.constant 0 : i32
    return %c0_i32, %c0_i32_0 : i32, i32
  }
  func.func @transform_21(%arg0: i32) -> (i32, i32) {
    %c0_i32 = arith.constant 0 : i32
    %c0_i32_0 = arith.constant 0 : i32
    %c0_i32_1 = arith.constant 0 : i32
    return %c0_i32, %c0_i32_0 : i32, i32
  }
  func.func @transform_22(%arg0: i32) -> (i32, i32) {
    %c0_i32 = arith.constant 0 : i32
    %c0_i32_0 = arith.constant 0 : i32
    %c0_i32_1 = arith.constant 0 : i32
    return %c0_i32, %c0_i32_0 : i32, i32
  }
  func.func @transform_23(%arg0: i32) -> (i32, i32) {
    %c0_i32 = arith.constant 0 : i32
    %c0_i32_0 = arith.constant 0 : i32
    %c0_i32_1 = arith.constant 0 : i32
    return %c0_i32, %c0_i32_0 : i32, i32
  }
  func.func @transform_24(%arg0: i32) -> (i32, i32) {
    %c0_i32 = arith.constant 0 : i32
    %c0_i32_0 = arith.constant 0 : i32
    %c0_i32_1 = arith.constant 0 : i32
    return %c0_i32, %c0_i32_0 : i32, i32
  }
  func.func @transform_25(%arg0: i32) -> (i32, i32) {
    %c0_i32 = arith.constant 0 : i32
    %c0_i32_0 = arith.constant 0 : i32
    %c0_i32_1 = arith.constant 0 : i32
    return %c0_i32, %c0_i32_0 : i32, i32
  }
  func.func @transform_26(%arg0: i32) -> (i32, i32) {
    %c0_i32 = arith.constant 0 : i32
    %c0_i32_0 = arith.constant 0 : i32
    %c0_i32_1 = arith.constant 0 : i32
    return %c0_i32, %c0_i32_0 : i32, i32
  }
  func.func @transform_27(%arg0: i32) -> (i32, i32) {
    %c0_i32 = arith.constant 0 : i32
    %c0_i32_0 = arith.constant 0 : i32
    %c0_i32_1 = arith.constant 0 : i32
    return %c0_i32, %c0_i32_0 : i32, i32
  }
  func.func @transform_28(%arg0: i32) -> (i32, i32) {
    %c0_i32 = arith.constant 0 : i32
    %c0_i32_0 = arith.constant 0 : i32
    %c0_i32_1 = arith.constant 0 : i32
    return %c0_i32, %c0_i32_0 : i32, i32
  }
  func.func @transform_29(%arg0: i32) -> (i32, i32) {
    %c0_i32 = arith.constant 0 : i32
    %c0_i32_0 = arith.constant 0 : i32
    %c0_i32_1 = arith.constant 0 : i32
    return %c0_i32, %c0_i32_0 : i32, i32
  }
  func.func @transform_30(%arg0: i32) -> (i32, i32) {
    %c0_i32 = arith.constant 0 : i32
    %c0_i32_0 = arith.constant 0 : i32
    %c0_i32_1 = arith.constant 0 : i32
    return %c0_i32, %c0_i32_0 : i32, i32
  }
  func.func @transform_31(%arg0: i32) -> (i32, i32) {
    %c0_i32 = arith.constant 0 : i32
    %c0_i32_0 = arith.constant 0 : i32
    %c0_i32_1 = arith.constant 0 : i32
    return %c0_i32, %c0_i32_0 : i32, i32
  }
  func.func @transform_32(%arg0: i32) -> (i32, i32) {
    %c0_i32 = arith.constant 0 : i32
    %c0_i32_0 = arith.constant 0 : i32
    %c0_i32_1 = arith.constant 0 : i32
    return %c0_i32, %c0_i32_0 : i32, i32
  }
  func.func @transform_33(%arg0: i32) -> (i32, i32) {
    %c0_i32 = arith.constant 0 : i32
    %c0_i32_0 = arith.constant 0 : i32
    %c0_i32_1 = arith.constant 0 : i32
    return %c0_i32, %c0_i32_0 : i32, i32
  }
  func.func @transform_34(%arg0: i32) -> (i32, i32) {
    %c0_i32 = arith.constant 0 : i32
    %c0_i32_0 = arith.constant 0 : i32
    %c0_i32_1 = arith.constant 0 : i32
    return %c0_i32, %c0_i32_0 : i32, i32
  }
  func.func @transform_35(%arg0: i32) -> (i32, i32) {
    %c0_i32 = arith.constant 0 : i32
    %c0_i32_0 = arith.constant 0 : i32
    %c0_i32_1 = arith.constant 0 : i32
    return %c0_i32, %c0_i32_0 : i32, i32
  }
  func.func @transform_36(%arg0: i32) -> (i32, i32) {
    %c0_i32 = arith.constant 0 : i32
    %c0_i32_0 = arith.constant 0 : i32
    %c0_i32_1 = arith.constant 0 : i32
    return %c0_i32, %c0_i32_0 : i32, i32
  }
  func.func @transform_37(%arg0: i32) -> (i32, i32) {
    %c0_i32 = arith.constant 0 : i32
    %c0_i32_0 = arith.constant 0 : i32
    %c0_i32_1 = arith.constant 0 : i32
    return %c0_i32, %c0_i32_0 : i32, i32
  }
  func.func @transform_38(%arg0: i32) -> (i32, i32) {
    %c0_i32 = arith.constant 0 : i32
    %c0_i32_0 = arith.constant 0 : i32
    %c0_i32_1 = arith.constant 0 : i32
    return %c0_i32, %c0_i32_0 : i32, i32
  }
  func.func @transform_39(%arg0: i32) -> (i32, i32) {
    %c0_i32 = arith.constant 0 : i32
    %c0_i32_0 = arith.constant 0 : i32
    %c0_i32_1 = arith.constant 0 : i32
    return %c0_i32, %c0_i32_0 : i32, i32
  }
  func.func @transform_40(%arg0: i32) -> (i32, i32) {
    %c0_i32 = arith.constant 0 : i32
    %c0_i32_0 = arith.constant 0 : i32
    %c0_i32_1 = arith.constant 0 : i32
    return %c0_i32, %c0_i32_0 : i32, i32
  }
  func.func @transform_41(%arg0: i32) -> (i32, i32) {
    %c0_i32 = arith.constant 0 : i32
    %c0_i32_0 = arith.constant 0 : i32
    %c0_i32_1 = arith.constant 0 : i32
    return %c0_i32, %c0_i32_0 : i32, i32
  }
  func.func @transform_42(%arg0: i32) -> (i32, i32) {
    %c0_i32 = arith.constant 0 : i32
    %c0_i32_0 = arith.constant 0 : i32
    %c0_i32_1 = arith.constant 0 : i32
    return %c0_i32, %c0_i32_0 : i32, i32
  }
  func.func @transform_43(%arg0: i32) -> (i32, i32) {
    %c0_i32 = arith.constant 0 : i32
    %c0_i32_0 = arith.constant 0 : i32
    %c0_i32_1 = arith.constant 0 : i32
    return %c0_i32, %c0_i32_0 : i32, i32
  }
  func.func @transform_44(%arg0: i32) -> (i32, i32) {
    %c0_i32 = arith.constant 0 : i32
    %c0_i32_0 = arith.constant 0 : i32
    %c0_i32_1 = arith.constant 0 : i32
    return %c0_i32, %c0_i32_0 : i32, i32
  }
  func.func @transform_45(%arg0: i32) -> (i32, i32) {
    %c0_i32 = arith.constant 0 : i32
    %c0_i32_0 = arith.constant 0 : i32
    %c0_i32_1 = arith.constant 0 : i32
    return %c0_i32, %c0_i32_0 : i32, i32
  }
  func.func @transform_46(%arg0: i32) -> (i32, i32) {
    %c0_i32 = arith.constant 0 : i32
    %c0_i32_0 = arith.constant 0 : i32
    %c0_i32_1 = arith.constant 0 : i32
    return %c0_i32, %c0_i32_0 : i32, i32
  }
  func.func @transform_47(%arg0: i32) -> (i32, i32, i32) {
    %c0_i32 = arith.constant 0 : i32
    %c0_i32_0 = arith.constant 0 : i32
    %c0_i32_1 = arith.constant 0 : i32
    return %arg0, %c0_i32, %c0_i32_0 : i32, i32, i32
  }
}

</mosaic_0001>

<bundles_post_ra>
// kernel: unet2_cmv_forward.1
= control target key start
LH: loop header
LB: loop body
LE: loop exit
PB: predicated region body
PF: predicated region fallthrough
CT: control target
= control target key end

     0   :  { %s10605_s6 = smov 1   ;;  %s10606_s10 = smov 2   ;;  %s13483_s0 = inlined_call_operand.smem [shape: u32[48], index: -1, kind: input, shape index: {}] }
   0x1   :  { %s10703_s5 = sld [smem:[%s13483_s0]]   ;;  %s10607_s14 = smov 3  }
   0x2   :  { %s10708_s9 = sld [smem:[%s13483_s0 + %s10605_s6]]   ;;  %s10608_s18 = smov 4  }
   0x3   :  { %s10713_s13 = sld [smem:[%s13483_s0 + %s10606_s10]]   ;;  %s10609_s22 = smov 5  }
   0x4   :  { %s10718_s17 = sld [smem:[%s13483_s0 + %s10607_s14]]   ;;  %s10610_s26 = smov 6  }
   0x5   :  { %s10723_s21 = sld [smem:[%s13483_s0 + %s10608_s18]]   ;;  %s10611_s30 = smov 7  }
   0x6   :  { %s10728_s25 = sld [smem:[%s13483_s0 + %s10609_s22]]   ;;  %s10612_s4 = smov 8  }
   0x7   :  { %13606 = sst [smem:[#allocation41_spill]] %s10703_s5  ;;  %s10613_s10 = smov 9  }
   0x8   :  { %13607 = sst [smem:[#allocation42_spill]] %s10708_s9  ;;  %s10614_s15 = smov 10  }
   0x9   :  { %13608 = sst [smem:[#allocation43_spill]] %s10713_s13  ;;  %s10615_s20 = smov 11  }
   0xa   :  { %s10733_s29 = sld [smem:[%s13483_s0 + %s10610_s26]]   ;;  %s10616_s26 = smov 12  }
   0xb   :  { %13609 = sst [smem:[#allocation44_spill]] %s10723_s21  ;;  %s10617_s1 = smov 13  }
   0xc   :  { %s10738_s3 = sld [smem:[%s13483_s0 + %s10611_s30]]   ;;  %s10618_s7 = smov 14  }
   0xd   :  { %s10743_s8 = sld [smem:[%s13483_s0 + %s10612_s4]]   ;;  %s10620_s22 = smov 16  }
   0xe   :  { %s10748_s14 = sld [smem:[%s13483_s0 + %s10613_s10]]   ;;  %s10621_s28 = smov 17  }
   0xf   :  { %s10753_s19 = sld [smem:[%s13483_s0 + %s10614_s15]]   ;;  %s10619_s15 = smov 15  }
  0x10   :  { %13610 = sst [smem:[#allocation45_spill]] %s10733_s29  ;;  %s10643_s16 = smov 40  }
  0x11   :  { %s10758_s24 = sld [smem:[%s13483_s0 + %s10615_s20]]   ;;  %s10644_s23 = smov 41  }
  0x12   :  { %13611 = sst [smem:[#allocation46_spill]] %s10738_s3  ;;  %s10646_s10 = smov 43  }
  0x13   :  { %13612 = sst [smem:[#allocation47_spill]] %s10743_s8 }
  0x14   :  { %s10763_s30 = sld [smem:[%s13483_s0 + %s10616_s26]]  }
  0x15   :  { %13613 = sst [smem:[#allocation48_spill]] %s10753_s19 }
  0x16   :  { %s10768_s6 = sld [smem:[%s13483_s0 + %s10617_s1]]   ;;  %s10645_s1 = smov 42  }
  0x17   :  { %s10773_s12 = sld [smem:[%s13483_s0 + %s10618_s7]]   ;;  %s10622_s7 = smov 18  }
  0x18   :  { %s10778_s20 = sld [smem:[%s13483_s0 + %s10619_s15]]   ;;  %s10623_s15 = smov 19  }
  0x19   :  { %s10783_s27 = sld [smem:[%s13483_s0 + %s10620_s22]]   ;;  %s10624_s22 = smov 20  }
  0x1a   :  { %13614 = sst [smem:[#allocation49_spill]] %s10763_s30 }
  0x1b   :  { %s10788_s4 = sld [smem:[%s13483_s0 + %s10621_s28]]   ;;  %s10625_s28 = smov 21  }
  0x1c   :  { %13615 = sst [smem:[#allocation50_spill]] %s10768_s6 }
  0x1d   :  { %13616 = sst [smem:[#allocation51_spill]] %s10773_s12 }
  0x1e   :  { %13617 = sst [smem:[#allocation52_spill]] %s10778_s20 }
  0x1f   :  { %13618 = sst [smem:[#allocation53_spill]] %s10783_s27 }
  0x20   :  { %s10793_s12 = sld [smem:[%s13483_s0 + %s10622_s7]]   ;;  %s10626_s7 = smov 22  }
  0x21   :  { %13619 = sst [smem:[#allocation54_spill]] %s10788_s4 }
  0x22   :  { %s10798_s20 = sld [smem:[%s13483_s0 + %s10623_s15]]   ;;  %s10627_s15 = smov 23  }
  0x23   :  { %s10803_s27 = sld [smem:[%s13483_s0 + %s10624_s22]]   ;;  %s10628_s22 = smov 24  }
  0x24   :  { %s10808_s30 = sld [smem:[%s13483_s0 + %s10625_s28]]   ;;  %s10629_s28 = smov 25  }
  0x25   :  { %s10818_s19 = sld [smem:[%s13483_s0 + %s10627_s15]]   ;;  %s10631_s15 = smov 27  }
  0x26   :  { %13620 = sst [smem:[#allocation55_spill]] %s10793_s12 }
  0x27   :  { %s10813_s12 = sld [smem:[%s13483_s0 + %s10626_s7]]   ;;  %s10630_s7 = smov 26  }
  0x28   :  { %s10838_s8 = sld [smem:[%s13483_s0 + %s10631_s15]]   ;;  %s10635_s15 = smov 31  }
  0x29   :  { %13621 = sst [smem:[#allocation56_spill]] %s10803_s27 }
  0x2a   :  { %13622 = sst [smem:[#allocation57_spill]] %s10808_s30 }
  0x2b   :  { %s10823_s27 = sld [smem:[%s13483_s0 + %s10628_s22]]   ;;  %s10632_s22 = smov 28  }
  0x2c   :  { %s10828_s30 = sld [smem:[%s13483_s0 + %s10629_s28]]   ;;  %s10633_s28 = smov 29  }
  0x2d   :  { %13623 = sst [smem:[#allocation58_spill]] %s10813_s12 }
  0x2e   :  { %s10833_s12 = sld [smem:[%s13483_s0 + %s10630_s7]]   ;;  %s10634_s7 = smov 30  }
  0x2f   :  { %13627 = sst [smem:[#allocation62_spill]] %s10838_s8 }
  0x30   :  { %s10848_s29 = sld [smem:[%s13483_s0 + %s10633_s28]]   ;;  %s10637_s28 = smov 33  }
  0x31   :  { %13624 = sst [smem:[#allocation59_spill]] %s10823_s27 }
  0x32   :  { %13625 = sst [smem:[#allocation60_spill]] %s10828_s30 }
  0x33   :  { %s10843_s27 = sld [smem:[%s13483_s0 + %s10632_s22]]   ;;  %s10636_s22 = smov 32  }
  0x34   :  { %13626 = sst [smem:[#allocation61_spill]] %s10833_s12 }
  0x35   :  { %s10853_s12 = sld [smem:[%s13483_s0 + %s10634_s7]]   ;;  %s10638_s7 = smov 34  }
  0x36   :  { %13629 = sst [smem:[#allocation64_spill]] %s10848_s29 }
  0x37   :  { %s10858_s21 = sld [smem:[%s13483_s0 + %s10635_s15]]   ;;  %s10639_s15 = smov 35  }
  0x38   :  { %s10868_s13 = sld [smem:[%s13483_s0 + %s10637_s28]]   ;;  %s10641_s28 = smov 37  }
  0x39   :  { %13628 = sst [smem:[#allocation63_spill]] %s10843_s27 }
  0x3a   :  { %s10863_s27 = sld [smem:[%s13483_s0 + %s10636_s22]]   ;;  %s10640_s22 = smov 36  }
  0x3b   :  { %13630 = sst [smem:[#allocation65_spill]] %s10853_s12 }
  0x3c   :  { %s10873_s12 = sld [smem:[%s13483_s0 + %s10638_s7]]   ;;  %s10642_s7 = smov 38  }
  0x3d   :  { %s10878_s5 = sld [smem:[%s13483_s0 + %s10639_s15]]  }
  0x3e   :  { %13632 = sst [smem:[#allocation67_spill]] %s10868_s13 }
  0x3f   :  { %s10888_s13 = sld [smem:[%s13483_s0 + %s10641_s28]]  }
  0x40   :  { %13631 = sst [smem:[#allocation66_spill]] %s10863_s27 }
  0x41   :  { %s10883_s27 = sld [smem:[%s13483_s0 + %s10640_s22]]  }
  0x42   :  { %13633 = sst [smem:[#allocation68_spill]] %s10873_s12 }
  0x43   :  { %13634 = sst [smem:[#allocation69_spill]] %s10878_s5 }
  0x44   :  { %s8349_s12 = sld [smem:[%s13483_s0 + %s10642_s7]]  }
  0x45   :  { %13636 = sst [smem:[#allocation71_spill]] %s10888_s13 }
  0x46   :  { %s10896_s5 = sld [smem:[%s13483_s0 + %s10643_s16]]   ;;  %s10647_s16 = smov 44  }
  0x47   :  { %13635 = sst [smem:[#allocation70_spill]] %s10883_s27 }
  0x48   :  { %s10901_s27 = sld [smem:[%s13483_s0 + %s10644_s23]]   ;;  %s10648_s23 = smov 45  }
  0x49   :  { %s10906_s13 = sld [smem:[%s13483_s0 + %s10645_s1]]   ;;  %s10649_s1 = smov 46  }
  0x4a   :  { %s10911_s29 = sld [smem:[%s13483_s0 + %s10646_s10]]   ;;  %v100_v0 = vstv %s8349_s12  ;;  %s10650_s10 = smov 47  }
  0x4b   :  { %s10916_s30 = sld [smem:[%s13483_s0 + %s10647_s16]]   ;;  %101 = vst [vmem:[#allocation2] sm:$0x1] %v100_v0 }
  0x4c   :  { %13637 = sst [smem:[#allocation72_spill]] %s10896_s5 }
  0x4d   :  { %s10926_s7 = sld [smem:[%s13483_s0 + %s10649_s1]]  }
  0x4e   :  { %13638 = sst [smem:[#allocation73_spill]] %s10901_s27 }
  0x4f   :  { %s10921_s27 = sld [smem:[%s13483_s0 + %s10648_s23]]  }
  0x50   :  { %13639 = sst [smem:[#allocation74_spill]] %s10911_s29 }
  0x51   :  { %s10931_s16 = sld [smem:[%s13483_s0 + %s10650_s10]]  }
  0x52   :  { %102 = vsyncpa [#allocation4], 0 }
  0x53   :  { %103 = vsyncpa [#allocation6], 0 }
  0x54   :  { %104 = vsyncpa [#allocation9], 0 }
  0x55   :  { %105 = vsyncpa [#allocation12], 0 }
  0x56   :  { %106 = vsyncpa [#allocation15], 0 }
  0x57   :  { %107 = vsyncpa [#allocation18], 0 }
  0x58   :  { %108 = vsyncpa [#allocation21], 0 }
  0x59   :  { %109 = vsyncpa [#allocation24], 0 }
  0x5a   :  { %110 = vsyncpa [#allocation27], 0 }
  0x5b   :  { %111 = vsyncpa [#allocation30], 0  ;;  %s10933_s12 = smov 0  }
  0x5c LB: > { %s10651_s0 = smov [#allocation5]   ;;  %s10939_s15 = sadd.s32 4294967295, %s10603_s12   ;;  %s10603_s12 = sphi %s10933_s12, %s117_s12  }
  0x5d   : > { %s1167_s29 = sshll.u32 %s10651_s0, 4  ;;  %p8360_p0 = scmp.ge.s32.totalorder %s10603_s12, 1  ;;  %s1168_s29 = int_to_ptr.vmem [resolvable:$true] %s1167_s29 }
  0x5e   : > { %p1140_p1 = scmp.lt.s32.totalorder %s10603_s12, 3  ;;  %p13500_p2 = scmp.eq.s32.totalorder %s10939_s15, 0 }
  0x5f   : > { %s10652_s23 = smov [#allocation8]   ;;  %s10653_s1 = smov [#allocation11]  }
  0x60   : > { %p10944_p3 = pnand %p8360_p0, %p1140_p1  ;;  %s1196_s22 = sshll.u32 %s10652_s23, 4  ;;  %s10950_s22 = int_to_ptr.vmem [resolvable:$true] %s1196_s22 }
  0x61   : > { %s1228_s28 = sshll.u32 %s10653_s1, 4  ;;  %s10100_s10 = scalar_lea.vmem %s1168_s29, 64  ;;  %s10958_s28 = int_to_ptr.vmem [resolvable:$true] %s1228_s28 }
  0x62   : > { %s13640_s18 = scalar_select %p10944_p3, 1, 0 }
  0x63   : > { %p9656_p4 = pneg %p10944_p3  ;;  %p10101_p7 = scmp.ne.s32.totalorder %s1168_s29, %s10100_s10 }
  0x64   : > { %p10108_p10 = scmp.lt.s32.totalorder %s1168_s29, %s1168_s29  ;;  %p10109_p11 = scmp.lt.s32.totalorder %s10100_s10, %s10100_s10 }
  0x65   : > { %p10954_p5 = pnand %p13500_p2, %p9656_p4 }
  0x66   : > { %p10110_p12 = por %p10109_p11, %p10108_p10 }
  0x67   : > { %p10962_p6 = pneg %p10954_p5 }
  0x69   : > { %p10103_p8 = pnand %p10101_p7, %p10962_p6 }
  0x6b   : > { %p10104_p9 = pneg %p10103_p8 }
  0x6d   : > { %p10111_p13 = pnand %p10110_p12, %p10104_p9 }
  0x6f   : > { %10114 = shalt.err (!%p10111_p13)
}
  0x70   : > { %9662 = dma.hbm_to_vmem [thread:$0]  (!%p10954_p5), %s10718_s17, 64, %s1168_s29, [#allocation6]  }
  0x71   : > { %s10126_s11 = scalar_lea.vmem %s10950_s22, 256  ;;  %p10134_p7 = scmp.lt.s32.totalorder %s10950_s22, %s10950_s22 }
  0x72   : > { %p10127_p0 = scmp.ne.s32.totalorder %s10950_s22, %s10126_s11  ;;  %p10135_p8 = scmp.lt.s32.totalorder %s10126_s11, %s10126_s11 }
  0x74   : > { %p10129_p1 = pnand %p10127_p0, %p10962_p6  ;;  %p10136_p2 = por %p10135_p8, %p10134_p7 }
  0x76   : > { %p10130_p4 = pneg %p10129_p1 }
  0x78   : > { %p10137_p10 = pnand %p10136_p2, %p10130_p4 }
  0x7a   : > { %10140 = shalt.err (!%p10137_p10)
}
  0x7b   : > { %s13501_s0 = smov 128   ;;  %s13643_s3 = sld [smem:[#allocation46_spill]] }
  0x7c   : > { %s13503_s29 = smov 8   ;;  %s10152_s23 = scalar_lea.vmem %s10958_s28, 768 }
  0x7d   : > { %p10153_p9 = scmp.ne.s32.totalorder %s10958_s28, %s10152_s23  ;;  %p10160_p12 = scmp.lt.s32.totalorder %s10958_s28, %s10958_s28 }
  0x7e   : > { %p10161_p13 = scmp.lt.s32.totalorder %s10152_s23, %s10152_s23 }
  0x7f   : > { %p10155_p11 = pnand %p10153_p9, %p10962_p6 }
  0x80   : > { %p10162_p0 = por %p10161_p13, %p10160_p12 }
  0x81   : > { %9668 = dma.hbm_to_vmem [thread:$0]  (!%p10954_p5), %s13643_s3, 256, %s10950_s22, [#allocation9], %s13501_s0, %s13501_s0, %s13503_s29  }
  0x82   : > { %p10156_p2 = pneg %p10155_p11 }
  0x84   : > { %p10163_p1 = pnand %p10162_p0, %p10156_p2 }
  0x86   : > { %10166 = shalt.err (!%p10163_p1)
}
  0x87   : > { %s13505_s1 = smov 192   ;;  %s13507_s10 = smov 12  }
  0x88   : > { %9674 = dma.hbm_to_vmem [thread:$0]  (!%p10954_p5), %s10758_s24, 768, %s10958_s28, [#allocation12], %s13505_s1, %s13505_s1, %s13507_s10  }
  0x89   : > { %s10658_s22 = smov [#allocation14]  }
  0x8a   : > { %s1266_s11 = sshll.u32 %s10658_s22, 4  ;;  %s1267_s11 = int_to_ptr.vmem [resolvable:$true] %s1266_s11 }
  0x8b   : > { %s10178_s0 = scalar_lea.vmem %s1267_s11, 2560  ;;  %p10186_p10 = scmp.lt.s32.totalorder %s1267_s11, %s1267_s11 }
  0x8c   : > { %p10179_p4 = scmp.ne.s32.totalorder %s1267_s11, %s10178_s0  ;;  %p10187_p9 = scmp.lt.s32.totalorder %s10178_s0, %s10178_s0 }
  0x8e   : > { %p10181_p7 = pnand %p10179_p4, %p10962_p6  ;;  %p10188_p11 = por %p10187_p9, %p10186_p10 }
  0x90   : > { %p10182_p8 = pneg %p10181_p7 }
  0x92   : > { %p10189_p2 = pnand %p10188_p11, %p10182_p8 }
  0x94   : > { %10192 = shalt.err (!%p10189_p2)
}
  0x95   : > { %s13509_s23 = smov 320   ;;  %s13644_s4 = sld [smem:[#allocation54_spill]] }
  0x96   : > { %s13511_s29 = smov 20   ;;  %s10661_s28 = smov [#allocation17]  }
  0x97   : > { %s1304_s22 = sshll.u32 %s10661_s28, 4  ;;  %s10662_s1 = smov [#allocation20]   ;;  %s1305_s22 = int_to_ptr.vmem [resolvable:$true] %s1304_s22 }
  0x98   : > { %s1336_s10 = sshll.u32 %s10662_s1, 4  ;;  %s10204_s3 = scalar_lea.vmem %s1305_s22, 1280  ;;  %s1337_s10 = int_to_ptr.vmem [resolvable:$true] %s1336_s10 }
  0x99   : > { %p10205_p12 = scmp.ne.s32.totalorder %s1305_s22, %s10204_s3  ;;  %p10212_p1 = scmp.lt.s32.totalorder %s1305_s22, %s1305_s22 }
  0x9a   : > { %p10213_p4 = scmp.lt.s32.totalorder %s10204_s3, %s10204_s3 }
  0x9b   : > { %9680 = dma.hbm_to_vmem [thread:$0]  (!%p10954_p5), %s13644_s4, 2560, %s1267_s11, [#allocation15], %s13509_s23, %s13509_s23, %s13511_s29  }
  0x9c   : > { %p10207_p13 = pnand %p10205_p12, %p10962_p6  ;;  %p10214_p7 = por %p10213_p4, %p10212_p1 }
  0x9e   : > { %p10208_p0 = pneg %p10207_p13 }
  0xa0   : > { %p10215_p8 = pnand %p10214_p7, %p10208_p0 }
  0xa2   : > { %10218 = shalt.err (!%p10215_p8)
}
  0xa3   : > { %9686 = dma.hbm_to_vmem [thread:$0]  (!%p10954_p5), %s10818_s19, 1280, %s1305_s22, [#allocation18], %s13509_s23, %s13509_s23, %s13511_s29  }
  0xa4   : > { %s10230_s0 = scalar_lea.vmem %s1337_s10, 384  ;;  %p10238_p2 = scmp.lt.s32.totalorder %s1337_s10, %s1337_s10 }
  0xa5   : > { %p10231_p10 = scmp.ne.s32.totalorder %s1337_s10, %s10230_s0  ;;  %p10239_p12 = scmp.lt.s32.totalorder %s10230_s0, %s10230_s0 }
  0xa7   : > { %p10233_p9 = pnand %p10231_p10, %p10962_p6  ;;  %p10240_p13 = por %p10239_p12, %p10238_p2 }
  0xa9   : > { %p10234_p11 = pneg %p10233_p9 }
  0xab   : > { %p10241_p1 = pnand %p10240_p13, %p10234_p11 }
  0xad   : > { %10244 = shalt.err (!%p10241_p1)
}
  0xae   : > { %s13645_s3 = smov 12   ;;  %s13646_s1 = smov 192  }
  0xaf   : > { %s13647_s8 = sld [smem:[#allocation62_spill]]  ;;  %s10663_s11 = smov [#allocation23]  }
  0xb0   : > { %s1369_s28 = sshll.u32 %s10663_s11, 4  ;;  %s10664_s22 = smov [#allocation26]   ;;  %s1370_s28 = int_to_ptr.vmem [resolvable:$true] %s1369_s28 }
  0xb1   : > { %s1412_s23 = sshll.u32 %s10664_s22, 4  ;;  %s10256_s29 = scalar_lea.vmem %s1370_s28, 128  ;;  %s1413_s23 = int_to_ptr.vmem [resolvable:$true] %s1412_s23 }
  0xb2   : > { %p10257_p0 = scmp.ne.s32.totalorder %s1370_s28, %s10256_s29  ;;  %p10264_p8 = scmp.lt.s32.totalorder %s1370_s28, %s1370_s28 }
  0xb3   : > { %p10265_p10 = scmp.lt.s32.totalorder %s10256_s29, %s10256_s29 }
  0xb4   : > { %p10259_p4 = pnand %p10257_p0, %p10962_p6 }
  0xb5   : > { %9692 = dma.hbm_to_vmem [thread:$0]  (!%p10954_p5), %s13647_s8, 384, %s1337_s10, [#allocation21], %s13646_s1, %s13646_s1, %s13645_s3  }
  0xb6   : > { %p10260_p7 = pneg %p10259_p4  ;;  %p10266_p9 = por %p10265_p10, %p10264_p8 }
  0xb8   : > { %p10267_p11 = pnand %p10266_p9, %p10260_p7 }
  0xba   : > { %10270 = shalt.err (!%p10267_p11)
}
  0xbb   : > { %9698 = dma.hbm_to_vmem [thread:$0]  (!%p10954_p5), %s10858_s21, 128, %s1370_s28, [#allocation24]  }
  0xbc   : > { %s10282_s10 = scalar_lea.vmem %s1413_s23, 64  ;;  %p10290_p1 = scmp.lt.s32.totalorder %s1413_s23, %s1413_s23 }
  0xbd   : > { %p10283_p2 = scmp.ne.s32.totalorder %s1413_s23, %s10282_s10  ;;  %p10291_p3 = scmp.lt.s32.totalorder %s10282_s10, %s10282_s10 }
  0xbf   : > { %p10285_p12 = pnand %p10283_p2, %p10962_p6  ;;  %p10292_p0 = por %p10291_p3, %p10290_p1 }
  0xc1   : > { %p10286_p13 = pneg %p10285_p12 }
  0xc3   : > { %p10293_p4 = pnand %p10292_p0, %p10286_p13 }
  0xc5   : > { %10296 = shalt.err (!%p10293_p4)
}
  0xc6   : > { %s13648_s5 = sld [smem:[#allocation72_spill]]  ;;  %s10665_s29 = smov [#allocation3]  }
  0xc7   : > { %s1153_s0 = sshll.u32 %s10665_s29, 4  ;;  %s10666_s11 = smov [#allocation7]   ;;  %s1154_s0 = int_to_ptr.vmem [resolvable:$true] %s1153_s0 }
  0xc8   : > { %s1180_s28 = sshll.u32 %s10666_s11, 4  ;;  %s10308_s22 = scalar_lea.vmem %s1154_s0, 64  ;;  %s1181_s28 = int_to_ptr.vmem [resolvable:$true] %s1180_s28 }
  0xc9   : > { %p10309_p7 = scmp.ne.s32.totalorder %s1154_s0, %s10308_s22  ;;  %p10316_p9 = scmp.lt.s32.totalorder %s1154_s0, %s1154_s0 }
  0xca   : > { %p10317_p11 = scmp.lt.s32.totalorder %s10308_s22, %s10308_s22 }
  0xcb   : > { %p10311_p8 = pnand %p10309_p7, %p10962_p6 }
  0xcc   : > { %9704 = dma.hbm_to_vmem [thread:$0]  (!%p10954_p5), %s13648_s5, 64, %s1413_s23, [#allocation27]  }
  0xcd   : > { %p10312_p10 = pneg %p10311_p8  ;;  %p10318_p3 = por %p10317_p11, %p10316_p9 }
  0xcf   : > { %p10319_p2 = pnand %p10318_p3, %p10312_p10 }
  0xd1   : > { %10322 = shalt.err (!%p10319_p2)
}
  0xd2   : > { %s13649_s9 = sld [smem:[#allocation42_spill]]  ;;  %s10334_s23 = scalar_lea.vmem %s1181_s28, 128 }
  0xd3   : > { %p10335_p12 = scmp.ne.s32.totalorder %s1181_s28, %s10334_s23  ;;  %p10342_p0 = scmp.lt.s32.totalorder %s1181_s28, %s1181_s28 }
  0xd4   : > { %p10343_p4 = scmp.lt.s32.totalorder %s10334_s23, %s10334_s23 }
  0xd5   : > { %p10337_p13 = pnand %p10335_p12, %p10962_p6 }
  0xd6   : > { %p10344_p7 = por %p10343_p4, %p10342_p0 }
  0xd7   : > { %p10338_p1 = pneg %p10337_p13 }
  0xd8   : > { %9659 = dma.hbm_to_vmem [thread:$0]  (!%p10954_p5), %s13649_s9, 64, %s1154_s0, [#allocation4]  }
  0xd9   : > { %p10345_p8 = pnand %p10344_p7, %p10338_p1 }
  0xdb   : > { %10348 = shalt.err (!%p10345_p8)
}
  0xdc   : > { %s10667_s10 = smov 64   ;;  %s10668_s29 = smov 4  }
  0xdd   : > { %9665 = dma.hbm_to_vmem [thread:$0]  (!%p10954_p5), %s10728_s25, 128, %s1181_s28, [#allocation6], %s10667_s10, %s10667_s10, %s10668_s29  }
  0xde   : > { %s10669_s11 = smov [#allocation10]   ;;  %s10670_s22 = smov [#allocation13]  }
  0xdf   : > { %s1212_s0 = sshll.u32 %s10669_s11, 4  ;;  %s1244_s4 = sshll.u32 %s10670_s22, 4  ;;  %s1213_s0 = int_to_ptr.vmem [resolvable:$true] %s1212_s0  ;;  %s1245_s4 = int_to_ptr.vmem [resolvable:$true] %s1244_s4 }
  0xe0   : > { %s10360_s5 = scalar_lea.vmem %s1213_s0, 512  ;;  %p10368_p3 = scmp.lt.s32.totalorder %s1213_s0, %s1213_s0 }
  0xe1   : > { %p10361_p10 = scmp.ne.s32.totalorder %s1213_s0, %s10360_s5  ;;  %p10369_p2 = scmp.lt.s32.totalorder %s10360_s5, %s10360_s5 }
  0xe3   : > { %p10363_p9 = pnand %p10361_p10, %p10962_p6  ;;  %p10370_p12 = por %p10369_p2, %p10368_p3 }
  0xe5   : > { %p10364_p11 = pneg %p10363_p9 }
  0xe7   : > { %p10371_p13 = pnand %p10370_p12, %p10364_p11 }
  0xe9   : > { %10374 = shalt.err (!%p10371_p13)
}
  0xea   : > { %s13650_s23 = smov 8   ;;  %s13651_s8 = smov 128  }
  0xeb   : > { %9671 = dma.hbm_to_vmem [thread:$0]  (!%p10954_p5), %s10748_s14, 512, %s1213_s0, [#allocation9], %s13651_s8, %s13651_s8, %s13650_s23  }
  0xec   : > { %s10386_s28 = scalar_lea.vmem %s1245_s4, 1536  ;;  %p10394_p7 = scmp.lt.s32.totalorder %s1245_s4, %s1245_s4 }
  0xed   : > { %p10387_p1 = scmp.ne.s32.totalorder %s1245_s4, %s10386_s28  ;;  %p10395_p8 = scmp.lt.s32.totalorder %s10386_s28, %s10386_s28 }
  0xef   : > { %p10389_p0 = pnand %p10387_p1, %p10962_p6  ;;  %p10396_p10 = por %p10395_p8, %p10394_p7 }
  0xf1   : > { %p10390_p4 = pneg %p10389_p0 }
  0xf3   : > { %p10397_p9 = pnand %p10396_p10, %p10390_p4 }
  0xf5   : > { %10400 = shalt.err (!%p10397_p9)
}
  0xf6   : > { %s13652_s6 = sld [smem:[#allocation50_spill]]  ;;  %s10671_s5 = smov [#allocation16]  }
  0xf7   : > { %s1282_s10 = sshll.u32 %s10671_s5, 4  ;;  %s10672_s29 = smov [#allocation19]   ;;  %s1283_s10 = int_to_ptr.vmem [resolvable:$true] %s1282_s10 }
  0xf8   : > { %s1320_s11 = sshll.u32 %s10672_s29, 4  ;;  %s10412_s0 = scalar_lea.vmem %s1283_s10, 2560  ;;  %s1321_s11 = int_to_ptr.vmem [resolvable:$true] %s1320_s11 }
  0xf9   : > { %p10413_p11 = scmp.ne.s32.totalorder %s1283_s10, %s10412_s0  ;;  %p10420_p12 = scmp.lt.s32.totalorder %s1283_s10, %s1283_s10 }
  0xfa   : > { %p10421_p13 = scmp.lt.s32.totalorder %s10412_s0, %s10412_s0 }
  0xfb   : > { %p10415_p3 = pnand %p10413_p11, %p10962_p6 }
  0xfc   : > { %9677 = dma.hbm_to_vmem [thread:$0]  (!%p10954_p5), %s13652_s6, 1536, %s1245_s4, [#allocation12], %s13646_s1, %s13646_s1, %s13645_s3  }
  0xfd   : > { %p10416_p2 = pneg %p10415_p3  ;;  %p10422_p1 = por %p10421_p13, %p10420_p12 }
  0xff   : > { %p10423_p0 = pnand %p10422_p1, %p10416_p2 }
 0x101   : > { %10426 = shalt.err (!%p10423_p0)
}
 0x102   : > { %s13653_s22 = smov 20   ;;  %s13654_s28 = smov 320  }
 0x103   : > { %9683 = dma.hbm_to_vmem [thread:$0]  (!%p10954_p5), %s10798_s20, 2560, %s1283_s10, [#allocation15], %s13654_s28, %s13654_s28, %s13653_s22  }
 0x104   : > { %s10438_s4 = scalar_lea.vmem %s1321_s11, 1280  ;;  %p10446_p10 = scmp.lt.s32.totalorder %s1321_s11, %s1321_s11 }
 0x105   : > { %p10439_p4 = scmp.ne.s32.totalorder %s1321_s11, %s10438_s4  ;;  %p10447_p9 = scmp.lt.s32.totalorder %s10438_s4, %s10438_s4 }
 0x107   : > { %p10441_p7 = pnand %p10439_p4, %p10962_p6  ;;  %p10448_p11 = por %p10447_p9, %p10446_p10 }
 0x109   : > { %p10442_p8 = pneg %p10441_p7 }
 0x10b   : > { %p10449_p3 = pnand %p10448_p11, %p10442_p8 }
 0x10d   : > { %10452 = shalt.err (!%p10449_p3)
}
 0x10e   : > { %s13655_s5 = sld [smem:[#allocation60_spill]]  ;;  %s10673_s10 = smov [#allocation22]  }
 0x10f   : > { %s1352_s29 = sshll.u32 %s10673_s10, 4  ;;  %s10674_s0 = smov [#allocation25]   ;;  %s1353_s29 = int_to_ptr.vmem [resolvable:$true] %s1352_s29 }
 0x110   : > { %s1383_s6 = sshll.u32 %s10674_s0, 4  ;;  %s10464_s9 = scalar_lea.vmem %s1353_s29, 384  ;;  %s1384_s6 = int_to_ptr.vmem [resolvable:$true] %s1383_s6 }
 0x111   : > { %p10465_p2 = scmp.ne.s32.totalorder %s1353_s29, %s10464_s9  ;;  %p10472_p1 = scmp.lt.s32.totalorder %s1353_s29, %s1353_s29 }
 0x112   : > { %p10473_p0 = scmp.lt.s32.totalorder %s10464_s9, %s10464_s9 }
 0x113   : > { %p10467_p12 = pnand %p10465_p2, %p10962_p6 }
 0x114   : > { %9689 = dma.hbm_to_vmem [thread:$0]  (!%p10954_p5), %s13655_s5, 1280, %s1321_s11, [#allocation18], %s13654_s28, %s13654_s28, %s13653_s22  }
 0x115   : > { %p10468_p13 = pneg %p10467_p12  ;;  %p10474_p4 = por %p10473_p0, %p10472_p1 }
 0x117   : > { %p10475_p7 = pnand %p10474_p4, %p10468_p13 }
 0x119   : > { %10478 = shalt.err (!%p10475_p7)
}
 0x11a   : > { %s13656_s11 = sld [smem:[#allocation64_spill]]  ;;  %s10490_s22 = scalar_lea.vmem %s1384_s6, 128 }
 0x11b   : > { %p10491_p8 = scmp.ne.s32.totalorder %s1384_s6, %s10490_s22  ;;  %p10498_p11 = scmp.lt.s32.totalorder %s1384_s6, %s1384_s6 }
 0x11c   : > { %p10499_p3 = scmp.lt.s32.totalorder %s10490_s22, %s10490_s22 }
 0x11d   : > { %p10493_p10 = pnand %p10491_p8, %p10962_p6 }
 0x11e   : > { %p10500_p2 = por %p10499_p3, %p10498_p11 }
 0x11f   : > { %p10494_p9 = pneg %p10493_p10 }
 0x120   : > { %9695 = dma.hbm_to_vmem [thread:$0]  (!%p10954_p5), %s13656_s11, 384, %s1353_s29, [#allocation21], %s13646_s1, %s13646_s1, %s13645_s3  }
 0x121   : > { %p10501_p12 = pnand %p10500_p2, %p10494_p9 }
 0x123   : > { %10504 = shalt.err (!%p10501_p12)
}
 0x124   : > { %s13657_s9 = sld [smem:[#allocation67_spill]]  ;;  %s10675_s28 = smov [#allocation28]  }
 0x125   : > { %s1422_s4 = sshll.u32 %s10675_s28, 4  ;;  %s10676_s3 = smov [#allocation29]   ;;  %s1423_s4 = int_to_ptr.vmem [resolvable:$true] %s1422_s4 }
 0x126   : > { %s1435_s1 = sshll.u32 %s10676_s3, 4  ;;  %s10516_s5 = scalar_lea.vmem %s1423_s4, 256  ;;  %s1436_s1 = int_to_ptr.vmem [resolvable:$true] %s1435_s1 }
 0x127   : > { %p10517_p13 = scmp.ne.s32.totalorder %s1423_s4, %s10516_s5  ;;  %p10524_p4 = scmp.lt.s32.totalorder %s1423_s4, %s1423_s4 }
 0x128   : > { %p10525_p7 = scmp.lt.s32.totalorder %s10516_s5, %s10516_s5 }
 0x129   : > { %p10519_p1 = pnand %p10517_p13, %p10962_p6 }
 0x12a   : > { %9701 = dma.hbm_to_vmem [thread:$0]  (!%p10954_p5), %s13657_s9, 128, %s1384_s6, [#allocation24]  }
 0x12b   : > { %p10520_p0 = pneg %p10519_p1  ;;  %p10526_p8 = por %p10525_p7, %p10524_p4 }
 0x12d   : > { %p10527_p10 = pnand %p10526_p8, %p10520_p0 }
 0x12f   : > { %10530 = shalt.err (!%p10527_p10)
}
 0x130   : > { %s13658_s6 = sld [smem:[#allocation73_spill]]  ;;  %s10542_s10 = scalar_lea.vmem %s1436_s1, 2048 }
 0x131   : > { %p10543_p9 = scmp.ne.s32.totalorder %s1436_s1, %s10542_s10  ;;  %p10550_p2 = scmp.lt.s32.totalorder %s1436_s1, %s1436_s1 }
 0x132   : > { %p10551_p12 = scmp.lt.s32.totalorder %s10542_s10, %s10542_s10 }
 0x133   : > { %p10545_p11 = pnand %p10543_p9, %p10962_p6 }
 0x134   : > { %p10552_p13 = por %p10551_p12, %p10550_p2 }
 0x135   : > { %p10546_p3 = pneg %p10545_p11 }
 0x136   : > { %9707 = dma.hbm_to_vmem [thread:$0]  (!%p10954_p5), %s13658_s6, 256, %s1423_s4, [#allocation27], %s13651_s8, %s13651_s8, %s13650_s23  }
 0x137   : > { %p10553_p1 = pnand %p10552_p13, %p10546_p3 }
 0x139   : > { %10556 = shalt.err (!%p10553_p1)
}
 0x13a   : > { %s10677_s29 = smov 256   ;;  %s10678_s0 = smov 16  }
 0x13b   : > { %9710 = dma.hbm_to_vmem [thread:$0]  (!%p10954_p5), %s10906_s13, 2048, %s1436_s1, [#allocation30], %s10677_s29, %s10677_s29, %s10678_s0  }
 0x13c   : > { %p13659_p0 = scmp.ne.s32.totalorder %s13640_s18, 0 }
 0x13e   : > { %1471 = sbr.rel (%p13659_p0) target bundleno = 11110 (0x2b66), region = 208 }
 0x143   : > { %p13660_p4 = scmp.eq.s32.totalorder %s10939_s15, 0 }
 0x145   : > { %10562 = dma.done.wait (%p13660_p4), [#allocation4], 64   ;;  %p13661_p6 = pmov %p13660_p4 }
 0x146   : > { %p13662_p7 = pmov %p13660_p4 }
 0x147   : > { %10564 = vsyncadd (%p13661_p6), [#allocation4], 4294967232 }
 0x148   : > { %10566 = dma.done.wait (%p13662_p7), [#allocation6], 192   ;;  %p13663_p8 = pmov %p13660_p4 }
 0x149   : > { %p13664_p10 = pmov %p13660_p4 }
 0x14a   : > { %10568 = vsyncadd (%p13663_p8), [#allocation6], 4294967104 }
 0x14b   : > { %10570 = dma.done.wait (%p13664_p10), [#allocation9], 768   ;;  %p13665_p5 = pmov %p13660_p4 }
 0x14c   : > { %p13666_p9 = pmov %p13660_p4 }
 0x14d   : > { %10572 = vsyncadd (%p13665_p5), [#allocation9], 4294966528 }
 0x14e   : > { %10574 = dma.done.wait (%p13666_p9), [#allocation12], 2304   ;;  %p13667_p11 = pmov %p13660_p4 }
 0x14f   : > { %p13668_p3 = pmov %p13660_p4 }
 0x150   : > { %10576 = vsyncadd (%p13667_p11), [#allocation12], 4294964992 }
 0x151   : > { %10578 = dma.done.wait (%p13668_p3), [#allocation15], 5120   ;;  %p13669_p2 = pmov %p13668_p3 }
 0x153   : > { %10580 = vsyncadd (%p13669_p2), [#allocation15], 4294962176  ;;  %p13670_p12 = pmov %p13669_p2 }
 0x154   : > { %p13671_p13 = pmov %p13669_p2 }
 0x155   : > { %10582 = dma.done.wait (%p13670_p12), [#allocation18], 2560  }
 0x156   : > { %10584 = vsyncadd (%p13671_p13), [#allocation18], 4294964736  ;;  %p13672_p1 = pmov %p13669_p2 }
 0x158   : > { %10586 = dma.done.wait (%p13672_p1), [#allocation21], 768   ;;  %p13673_p0 = pmov %p13672_p1 }
 0x15a   : > { %10588 = vsyncadd (%p13673_p0), [#allocation21], 4294966528  ;;  %p13674_p4 = pmov %p13673_p0 }
 0x15b   : > { %p13675_p6 = pmov %p13673_p0 }
 0x15c   : > { %10590 = dma.done.wait (%p13674_p4), [#allocation24], 256  }
 0x15d   : > { %10592 = vsyncadd (%p13675_p6), [#allocation24], 4294967040  ;;  %p13676_p7 = pmov %p13673_p0 }
 0x15e   : > { %p13677_p8 = pmov %p13673_p0 }
 0x15f   : > { %10594 = dma.done.wait (%p13676_p7), [#allocation27], 320  }
 0x160   : > { %10596 = vsyncadd (%p13677_p8), [#allocation27], 4294966976  ;;  %p13678_p10 = pmov %p13673_p0 }
 0x161   : > { %p13679_p5 = pmov %p13673_p0 }
 0x162   : > { %10598 = dma.done.wait (%p13678_p10), [#allocation30], 2048  }
 0x163   : > { %10600 = vsyncadd (%p13679_p5), [#allocation30], 4294965248  ;;  %s13680_s8 = sld [smem:[#allocation41_spill]]  ;;  %p1650_p9 = scmp.lt.s32.totalorder %s10939_s15, 1  ;;  %v13533_v5 = vmov 0   ;;  %vm13514_vm0 = vcmask 130048   ;;  %v13532_v15 = vlaneseq }
 0x164   : > { %s13541_s2 = smov 16   ;;  %s13543_s23 = smov 112   ;;  %2052 = vmatprep.mubr.bf16.mxu0 %v13533_v5  ;;  %9845 = vset.pattern.permute.xlu0 %v13533_v5  ;;  %vm13515_vm1 = vcmask 916480   ;;  %vm13520_vm8 = vcmask 1039360   ;;  %v13687_v32 = vmov 0  ;;  %vm1962_vm11 = vcmask 1044480  }
 0x165   : > { %s14125_s15 = smov (!%p1650_p9, %s10939_s15), 1  ;;  %2242 = vmatprep.mubr.bf16.mxu1 %v13533_v5  ;;  %9856 = vset.pattern.permute.xlu1 %v13533_v5  ;;  %s13597_s11 = smov 1   ;;  %v11208_v16 = vand.u32 127, %v13532_v15  ;;  %v11213_v20 = vshrl.u32 %v13532_v15, 7  ;;  %vm13546_vm12 = vcmask 7168   ;;  %v13690_v38 = vmov 0 }
 0x166   : > { %s8656_s18 = sshll.u32 %s14125_s15, 3  ;;  %s13601_s22 = smov 127   ;;  %vm13516_vm15 = vcmask 1045504   ;;  %v10684_v41 = vmov 65535  }
 0x167   : > { %s13682_s9 = sld [smem:[#allocation43_spill]]  ;;  %v1664_v17 = vadd.s32 128, %v11208_v16  ;;  %v1669_v18 = vand.u32 15, %v11208_v16  ;;  %13683 = vst [vmem:[#allocation76_spill] sm:$0xff] %v11213_v20  ;;  %v11216_v22 = vsub.s32 0, %v11213_v20  ;;  %v1786_v24 = vsub.s32 4, %v11213_v20 }
 0x168   : > { %v2014_v42 = vsel %vm1962_vm11, 4294967295, %v10684_v41  ;;  %s13699_s28 = sld [smem:[#allocation44_spill]]  ;;  %s13555_s3 = smov 8  }
 0x169   : > { %s11147_s26 = scalar_lea.vmem %s13680_s8, %s8656_s18  ;;  %v1676_v19 = vand.u32 15, %v1664_v17  ;;  %vm1691_vm2 = vcmp.ne.s32.totalorder %v1669_v18, 15  ;;  %vm1689_vm4 = vcmp.ne.s32.totalorder %v1669_v18, 0  ;;  %13684 = vst [vmem:[#allocation77_spill] sm:$0xff] %v11216_v22  ;;  %v11255_v52 = vsel %vm13516_vm15, %v2014_v42, 0  ;;  %s13702_s4 = sld [smem:[#allocation74_spill]] }
 0x16a   : > { %v1735_v1 = vld [vmem:[%s11147_s26] sm:$0xff]  ;;  %s13557_s1 = smov 120   ;;  %s13707_s5 = sld [smem:[#allocation45_spill]] }
 0x16b   : > { %v11150_v2 = vpack.c.bf16 %v1735_v1, %v1735_v1  ;;  %v11152_v3 = vcombine.high %v1735_v1, %v1735_v1  ;;  %vm1692_vm3 = vcmp.ne.s32.totalorder %v1676_v19, 15  ;;  %vm1690_vm5 = vcmp.ne.s32.totalorder %v1676_v19, 0  ;;  %s13712_s6 = sld [smem:[#allocation47_spill]]  ;;  %s13559_s10 = smov 4  }
 0x16c   : > { %vm1807_vm6 = vmpackc.low %vm1692_vm3, %vm1691_vm2  ;;  %vm13517_vm2 = vcmask 1042432   ;;  %vm1981_vm3 = vcmask 1040384   ;;  %s13725_s29 = sld [smem:[#allocation48_spill]]  ;;  %s13561_s0 = smov 124  }
 0x16d   : > { %13681 = vst [vmem:[#allocation75_spill] sm:$0xff] %v11152_v3  ;;  %1743 = vrot.lane.b32.xlu1 %v11150_v2, %s13541_s2  ;;  %1753 = vrot.lane.b32.xlu0 %v11150_v2, %s13543_s23  ;;  %v11160_v4 = vpack.c.bf16 %v11152_v3, %v11152_v3  ;;  %v2003_v14 = vld [vmem:[%s13682_s9] sm:$0xff]  ;;  %vm1778_vm7 = vmpackc.low %vm1690_vm5, %vm1689_vm4  ;;  %v1808_v23 = vsel %vm1807_vm6, 65537, %v13533_v5  ;;  %vm1991_vm4 = vsmask.f32 2304  ;;  %vm1948_vm5 = vcmask 1041408  }
 0x16e   : > { %v1779_v26 = vsel %vm1778_vm7, 65537, %v13533_v5  ;;  %v1812_v27 = vrot.slane %v1808_v23, %v11216_v22  ;;  %v11222_v28 = vrot.slane %v1808_v23, %v1786_v24  ;;  %vm1949_vm6 = vsmask.f32 1280  ;;  %s13737_s8 = sld [smem:[#allocation49_spill]]  ;;  %s10691_s18 = smov 126  }
 0x16f   : > { %v1783_v30 = vrot.slane %v1779_v26, %v11216_v22  ;;  %v11225_v31 = vrot.slane %v1779_v26, %v1786_v24  ;;  %vm13527_vm7 = vcmask 1043456   ;;  %s10692_s9 = smov 2  }
 0x170   : > { %13685 = vst [vmem:[#allocation78_spill] sm:$0xff] %v11222_v28  ;;  %vm11227_vm9 = vcmp.ne.s16.totalorder %v1812_v27, 0  ;;  %vm13519_vm10 = vcmp.ne.s16.totalorder %v11222_v28, 0 }
 0x171   : > { %1745 = vrot.lane.b32.xlu1 %v11160_v4, %s13541_s2  ;;  %1755 = vrot.lane.b32.xlu0 %v11160_v4, %s13543_s23  ;;  %13686 = vst [vmem:[#allocation79_spill] sm:$0xff] %v11225_v31  ;;  %v13688_v32 = vsel %vm11227_vm9, 4294967295, %v13687_v32  ;;  %vm11238_vm13 = vcmp.ne.s16.totalorder %v1783_v30, 0  ;;  %vm13521_vm14 = vcmp.ne.s16.totalorder %v11225_v31, 0 }
 0x172   : > { %13689 = vst [vmem:[#allocation80_spill] sm:$0xff] %v13688_v32  ;;  %v13691_v38 = vsel %vm11238_vm13, 4294967295, %v13690_v38 }
 0x173   : > { %13692 = vst [vmem:[#allocation81_spill] sm:$0xff] %v13691_v38 }
 0x175   : > { %1821 = vrot.lane.b32.xlu0 %v11150_v2, %s13597_s11  ;;  %1832 = vrot.lane.b32.xlu1 %v11150_v2, %s13601_s22 }
 0x179   : > { %1834 = vrot.lane.b32.xlu0 %v11160_v4, %s13601_s22  ;;  %1823 = vrot.lane.b32.xlu1 %v11160_v4, %s13597_s11 }
 0x1df   : > { %v1744_v6 = vpop.permute.xlu1 %1743  ;;  %v1754_v7 = vpop.permute.xlu0 %1753 }
 0x1e0   : > { %v11179_v8 = vsel %vm13514_vm0, 0, %v1744_v6 }
 0x1e1   : > { %1763 = vrot.lane.b32.xlu1 %v11179_v8, %s13597_s11  ;;  %v1866_v39 = vshrl.u32 %v11179_v8, 16  ;;  %v1869_v40 = vshll.u32 %v11179_v8, 16 }
 0x1e3   : > { %v1756_v9 = vpop.permute.xlu0 %1755  ;;  %v1746_v12 = vpop.permute.xlu1 %1745  ;;  %v11257_v53 = vrot.slane %v1866_v39, 6  ;;  %v11259_v54 = vrot.slane %v1869_v40, 7 }
 0x1e4   : > { %v11184_v10 = vsel %vm13515_vm1, %v1756_v9, 0  ;;  %v11187_v11 = vsel %vm13515_vm1, %v1754_v7, %v1756_v9  ;;  %v11198_v13 = vsel %vm13514_vm0, %v1744_v6, %v1746_v12  ;;  %vm1963_vm0 = vsmask.f32 4352  ;;  %vm1992_vm1 = vmand %vm13517_vm2, %vm1991_vm4 }
 0x1e5   : > { %1846 = vrot.lane.b32.xlu1 %v11184_v10, %s13597_s11  ;;  %1844 = vrot.lane.b32.xlu0 %v11187_v11, %s13597_s11  ;;  %v1874_v46 = vshrl.u32 %v11198_v13, 16  ;;  %v1877_v47 = vshll.u32 %v11198_v13, 16  ;;  %v1935_v48 = vshrl.u32 %v11184_v10, 16  ;;  %v1938_v49 = vshll.u32 %v11184_v10, 16 }
 0x1e6   : > { %v1928_v51 = vshrl.u32 %v11187_v11, 16  ;;  %v1931_v55 = vshll.u32 %v11187_v11, 16  ;;  %vm1976_vm4 = vcmask 1047552  }
 0x1e7   : > { %v1822_v21 = vpop.permute.xlu0 %1821  ;;  %v1833_v25 = vpop.permute.xlu1 %1832  ;;  %v11268_v61 = vrot.slane %v1874_v46, 6  ;;  %v11270_v62 = vrot.slane %v1877_v47, 7  ;;  %v1937_v63 = vrot.slane %v1935_v48, 5  ;;  %v1940_v0 = vrot.slane %v1938_v49, 6 }
 0x1e8   : > { %v1828_v43 = vsel %vm13546_vm12, 0, %v1822_v21  ;;  %v1930_v7 = vrot.slane %v1928_v51, 5 }
 0x1e9   : > { %1855 = vrot.lane.b32.xlu1 %v11187_v11, %s13601_s22  ;;  %1857 = vrot.lane.b32.xlu0 %v11184_v10, %s13601_s22  ;;  %v1830_v56 = vsel %vm11238_vm13, %v1828_v43, 0  ;;  %v1933_v11 = vrot.slane %v1931_v55, 6 }
 0x1ea   : > { %v1888_v12 = vshrl.u32 %v1830_v56, 16  ;;  %v1891_v24 = vshll.u32 %v1830_v56, 16 }
 0x1eb   : > { %v1835_v29 = vpop.permute.xlu0 %1834  ;;  %v1824_v35 = vpop.permute.xlu1 %1823  ;;  %v1934_v40 = vor.u32 %v1933_v11, %v1930_v7 }
 0x1ec   : > { %v1836_v33 = vsel %vm13520_vm8, %v1833_v25, %v1835_v29  ;;  %v1839_v34 = vsel %vm13520_vm8, %v1835_v29, 0  ;;  %v1941_v29 = vor.u32 %v1940_v0, %v1937_v63  ;;  %v1872_v0 = vor.u32 %v11259_v54, %v11257_v53 }
 0x1ed   : > { %1792 = vrot.lane.b32.xlu1 %v11179_v8, %s13601_s22  ;;  %1794 = vrot.lane.b32.xlu0 %v11198_v13, %s13601_s22  ;;  %v1841_v36 = vsel %vm11227_vm9, %v1836_v33, 0  ;;  %v1842_v37 = vsel %vm13519_vm10, %v1839_v34, 0  ;;  %v1825_v8 = vsel %vm13546_vm12, %v1822_v21, %v1824_v35 }
 0x1ee   : > { %v1908_v44 = vshll.u32 %v1841_v36, 16  ;;  %v1912_v45 = vshll.u32 %v1842_v37, 16  ;;  %v1915_v59 = vshrl.u32 %v1841_v36, 16  ;;  %v1918_v60 = vshrl.u32 %v1842_v37, 16 }
 0x1ef   : > { %v1831_v21 = vsel %vm13521_vm14, %v1825_v8, 0  ;;  %v1890_v36 = vrot.slane %v1888_v12, 3 }
 0x1f0   : > { %v11264_v57 = vrot.slane %v1908_v44, 1  ;;  %v11266_v58 = vrot.slane %v1912_v45, 1  ;;  %v1896_v41 = vshrl.u32 %v1831_v21, 16  ;;  %v1899_v42 = vshll.u32 %v1831_v21, 16 }
 0x1f1   : > { %1765 = vrot.lane.b32.xlu0 %v11198_v13, %s13597_s11  ;;  %v1893_v45 = vrot.slane %v1891_v24, 4 }
 0x1f2   : > { %v1917_v17 = vor.u32 %v1915_v59, %v11264_v57  ;;  %v1920_v18 = vor.u32 %v1918_v60, %v11266_v58  ;;  %v1898_v8 = vrot.slane %v1896_v41, 3 }
 0x1f3   : > { %v1894_v53 = vor.u32 %v1893_v45, %v1890_v36 }
 0x1f5   : > { %2006 = vperm.xlu0 %9845, %v2003_v14  }
 0x253   : > { %v11251_v50 = vpop.permute.xlu1 %1763 }
 0x254   : > { %v1772_v25 = vsel %vm13546_vm12, 0, %v11251_v50 }
 0x255   : > { %v1790_v46 = vsel %vm11238_vm13, %v1772_v25, 0 }
 0x257   : > { %v1847_v1 = vpop.permute.xlu1 %1846  ;;  %v1845_v6 = vpop.permute.xlu0 %1844 }
 0x258   : > { %v1848_v9 = vsel %vm13546_vm12, %v1845_v6, %v1847_v1  ;;  %v1851_v10 = vsel %vm13546_vm12, 0, %v1845_v6 }
 0x259   : > { %v1853_v13 = vsel %vm11238_vm13, %v1851_v10, 0  ;;  %v1854_v14 = vsel %vm13521_vm14, %v1848_v9, 0  ;;  %v1901_v9 = vrot.slane %v1899_v42, 4 }
 0x25a   : > { %v1925_v19 = vrot.slane %v1853_v13, 7  ;;  %v1926_v23 = vrot.slane %v1854_v14, 7  ;;  %v1880_v14 = vor.u32 %v11270_v62, %v11268_v61 }
 0x25b   : > { %v1856_v26 = vpop.permute.xlu1 %1855  ;;  %v1858_v27 = vpop.permute.xlu0 %1857  ;;  %v1902_v21 = vor.u32 %v1901_v9, %v1898_v8 }
 0x25c   : > { %v1859_v30 = vsel %vm13520_vm8, %v1856_v26, %v1858_v27  ;;  %v1862_v33 = vsel %vm13520_vm8, %v1858_v27, 0  ;;  %v1988_v34 = vsel %vm1981_vm3, %v1920_v18, %v1926_v23  ;;  %v1984_v35 = vsel %vm1981_vm3, %v1917_v17, %v1925_v19  ;;  %vm11299_vm3 = vmand %vm1948_vm5, %vm1949_vm6 }
 0x25d   : > { %v1864_v37 = vsel %vm11227_vm9, %v1859_v30, 0  ;;  %v1865_v39 = vsel %vm13519_vm10, %v1862_v33, 0  ;;  %v1994_v49 = vsel %vm1992_vm1, %v1988_v34, %v1941_v29  ;;  %v1993_v51 = vsel %vm1992_vm1, %v1984_v35, %v1934_v40  ;;  %vm11317_vm1 = vmand %vm1962_vm11, %vm1963_vm0  ;;  %v2002_v29 = vld [vmem:[#allocation3] sm:$0xf] }
 0x25e   : > { %v1946_v43 = vrot.slane %v1864_v37, 4  ;;  %v1947_v44 = vrot.slane %v1865_v39, 4  ;;  %v1951_v54 = vsel %vm11299_vm3, %v1790_v46, %v1872_v0  ;;  %v1905_v18 = vrot.slane %v11150_v2, 2 }
 0x25f   : > { %v1793_v47 = vpop.permute.xlu1 %1792  ;;  %v1795_v48 = vpop.permute.xlu0 %1794  ;;  %vm1977_vm0 = vsmask.f32 7424  ;;  %vm2009_vm5 = vcmask 220160   ;;  %vm13697_vm6 = vcmask 916480  }
 0x260   : > { %v1797_v56 = vsel %vm13520_vm8, %v1793_v47, %v1795_v48  ;;  %v1801_v59 = vsel %vm13520_vm8, %v1795_v48, 0  ;;  %v2001_v60 = vsel %vm13527_vm7, %v1994_v49, %v1947_v44  ;;  %v1998_v63 = vsel %vm13527_vm7, %v1993_v51, %v1946_v43  ;;  %vm1978_vm11 = vmand %vm1976_vm4, %vm1977_vm0  ;;  %v2194_v51 = vld [vmem:[%s13699_s28] sm:$0xff]  ;;  %s13749_s28 = sld [smem:[#allocation51_spill]] }
 0x261   : > { %v1819_v1 = vsel %vm11227_vm9, %v1797_v56, 0  ;;  %v2018_v6 = vand.u32 %v11255_v52, %v2001_v60  ;;  %v2016_v7 = vand.u32 %v11255_v52, %v1998_v63  ;;  %v1820_v10 = vsel %vm13519_vm10, %v1801_v59, 0 }
 0x262   : > { %v1885_v11 = vrot.slane %v1819_v1, 5  ;;  %v1906_v52 = vrot.slane %v11160_v4, 2  ;;  %v1886_v23 = vrot.slane %v1820_v10, 5  ;;  %vm13518_vm0 = vcmask 588800  }
 0x263   : > { %2032 = vmatprep.subr.bf16.mxu0 %v2018_v6  ;;  %v1766_v13 = vpop.permute.xlu0 %1765 }
 0x264   : > { %v1768_v17 = vsel %vm13546_vm12, %v11251_v50, %v1766_v13  ;;  %2033 = vmatpush1.bf16.msra.mxu0 %v2016_v7  ;;  %v1956_v19 = vsel %vm13517_vm2, %v1951_v54, %v1885_v11 }
 0x265   : > { %v1791_v24 = vsel %vm13521_vm14, %v1768_v17, 0  ;;  %v1965_v4 = vsel %vm11317_vm1, %v1956_v19, %v1894_v53 }
 0x266   : > { %v1952_v61 = vsel %vm11299_vm3, %v1791_v24, %v1880_v14  ;;  %v1970_v2 = vsel %vm13516_vm15, %v1965_v4, %v1905_v18  ;;  %vm13698_vm3 = vmmov %vm13697_vm6 }
 0x267   : > { %v1960_v62 = vsel %vm13517_vm2, %v1952_v61, %v1886_v23  ;;  %v1979_v27 = vsel %vm1978_vm11, %v1970_v2, %v11264_v57 }
 0x268   : > { %v1966_v50 = vsel %vm11317_vm1, %v1960_v62, %v1902_v21  ;;  %vm13700_vm1 = vcmask 130048  }
 0x269   : > { %v1974_v25 = vsel %vm13516_vm15, %v1966_v50, %v1906_v52  ;;  %vm13701_vm4 = vmmov %vm13700_vm1 }
 0x26a   : > { %v1980_v26 = vsel %vm1978_vm11, %v1974_v25, %v11266_v58  ;;  %vm13705_vm11 = vmmov %vm13698_vm3 }
 0x26b   : > { %2034 = vmatprep.subr.bf16.mxu0 %v1980_v26 }
 0x26c   : > { %2035 = vmatpush1.bf16.msra.mxu0 %v1979_v27 }
 0x26f   : > { %8402 = vmatmul.mubr.msk.bf16.vlgmr.msra.gmra.mxu0 %vm2009_vm5, %v2002_v29  ;;  %vm13706_vm5 = vmmov %vm13698_vm3 }
 0x270   : > { %v2007_v30 = vpop.permute.xlu0 %2006 }
 0x32f   : > { %v2054_v33 = vpop.f32.mrf.mxu0 }
 0x330   : > { %v2055_v34 = vadd.f32 %v2054_v33, %v2007_v30 }
 0x331   : > { %v2056_v35 = vpop.f32.mrf.mxu0 }
 0x332   : > { %v2061_v36 = vmax.f32 %v2055_v34, 0.0  ;;  %v2057_v37 = vadd.f32 %v2056_v35, %v2007_v30 }
 0x333   : > { %v2058_v39 = vpop.f32.mrf.mxu0 }
 0x334   : > { %v11343_v40 = vpack.c.bf16 %v2061_v36, %v2061_v36  ;;  %v2062_v41 = vmax.f32 %v2057_v37, 0.0 }
 0x335   : > { %v2059_v42 = vpop.f32.mrf.mxu0 }
 0x336   : > { %2067 = vrot.lane.b32.xlu0 %v11343_v40, %s13541_s2  ;;  %2074 = vrot.lane.b32.xlu1 %v11343_v40, %s13543_s23  ;;  %v2064_v57 = vpack.c.bf16 %v2062_v41, %v2062_v41 }
 0x33a   : > { %2117 = vrot.lane.b32.xlu0 %v2064_v57, %s13601_s22  ;;  %2076 = vrot.lane.b32.xlu1 %v2064_v57, %s13543_s23 }
 0x33e   : > { %2069 = vrot.lane.b32.xlu1 %v2064_v57, %s13541_s2  ;;  %s13756_s2 = sld [smem:[#allocation52_spill]] }
 0x342   : > { %2115 = vrot.lane.b32.xlu1 %v11343_v40, %s13601_s22 }
 0x3a8   : > { %v2075_v58 = vpop.permute.xlu1 %2074  ;;  %v2068_v46 = vpop.permute.xlu0 %2067 }
 0x3a9   : > { %v11364_v48 = vsel %vm13700_vm1, 0, %v2068_v46  ;;  %vm13525_vm1 = vmmov 0  }
 0x3ac   : > { %v2077_v43 = vpop.permute.xlu1 %2076  ;;  %v2118_v55 = vpop.permute.xlu0 %2117 }
 0x3ad   : > { %v2080_v44 = vsel %vm13697_vm6, %v2077_v43, 0  ;;  %v2078_v45 = vsel %vm13698_vm3, %v2075_v58, %v2077_v43  ;;  %v2122_v59 = vsel %vm13520_vm8, %v2118_v55, 0  ;;  %v2149_v58 = vrot.slane %v11364_v48, 4 }
 0x3ae   : > { %2140 = vrot.lane.b32.xlu1 %v2080_v44, %s13601_s22  ;;  %2138 = vrot.lane.b32.xlu0 %v2078_v45, %s13601_s22  ;;  %v2125_v6 = vsel %vm13519_vm10, %v2122_v59, 0  ;;  %v2160_v11 = vrot.slane %v2080_v44, 4  ;;  %v2159_v12 = vrot.slane %v2078_v45, 4  ;;  %vm13524_vm6 = vcmask 457728  }
 0x3af   : > { %v2158_v13 = vrot.slane %v2125_v6, 4  ;;  %v2307_v6 = vld [vmem:[%s13702_s4 + $0xf0] sm:$0xff]  ;;  %vm13523_vm3 = vcmask 64512  }
 0x3b0   : > { %v2070_v47 = vpop.permute.xlu1 %2069 }
 0x3b1   : > { %v11367_v49 = vsel %vm13701_vm4, %v2068_v46, %v2070_v47  ;;  %v2183_v2 = vsel %vm13527_vm7, %v2064_v57, %v2158_v13  ;;  %v2305_v13 = vld [vmem:[%s13702_s4 + $0xe0] sm:$0xff] }
 0x3b2   : > { %2129 = vrot.lane.b32.xlu1 %v2080_v44, %s13597_s11  ;;  %2127 = vrot.lane.b32.xlu0 %v2078_v45, %s13597_s11  ;;  %v2150_v43 = vrot.slane %v11367_v49, 4 }
 0x3b4   : > { %v2116_v56 = vpop.permute.xlu1 %2115 }
 0x3b5   : > { %v2119_v7 = vsel %vm13520_vm8, %v2116_v56, %v2118_v55 }
 0x3b6   : > { %2106 = vrot.lane.b32.xlu1 %v2064_v57, %s13597_s11  ;;  %2104 = vrot.lane.b32.xlu0 %v11343_v40, %s13597_s11  ;;  %v2124_v52 = vsel %vm11227_vm9, %v2119_v7, 0 }
 0x3b7   : > { %v2157_v4 = vrot.slane %v2124_v52, 4  ;;  %v2289_v52 = vld [vmem:[%s13702_s4 + $0x60] sm:$0xff] }
 0x3b9   : > { %v2179_v30 = vsel %vm13527_vm7, %v11343_v40, %v2157_v4  ;;  %v2301_v4 = vld [vmem:[%s13702_s4 + $0xc0] sm:$0xff] }
 0x3ba   : > { %2093 = vrot.lane.b32.xlu1 %v11364_v48, %s13601_s22  ;;  %2095 = vrot.lane.b32.xlu0 %v11367_v49, %s13601_s22 }
 0x3be   : > { %2084 = vrot.lane.b32.xlu1 %v11367_v49, %s13597_s11  ;;  %2082 = vrot.lane.b32.xlu0 %v11364_v48, %s13597_s11  ;;  %v2193_v49 = vld [vmem:[#allocation5] sm:$0xf] }
 0x3c2   : > { %2197 = vperm.xlu0 %9845, %v2194_v51  }
 0x420   : > { %v2139_v60 = vpop.permute.xlu0 %2138  ;;  %v2141_v63 = vpop.permute.xlu1 %2140 }
 0x421   : > { %v2145_v0 = vsel %vm13520_vm8, %v2141_v63, 0  ;;  %v2142_v1 = vsel %vm13520_vm8, %v2139_v60, %v2141_v63 }
 0x422   : > { %v2148_v8 = vsel %vm13519_vm10, %v2145_v0, 0  ;;  %v2147_v9 = vsel %vm11227_vm9, %v2142_v1, 0  ;;  %v2308_v0 = vld [vmem:[%s13702_s4 + $0xf8] sm:$0xff] }
 0x423   : > { %8403 = vmatprep.subr.msk.bf16.mxu1 %vm13527_vm7, %v2148_v8  ;;  %v2205_v10 = vsel %vm13527_vm7, %v2147_v9, 0  ;;  %v2292_v1 = vld [vmem:[%s13702_s4 + $0x78] sm:$0xff]  ;;  %8657 = vmatprep.subr.mxu0 %v2308_v0  ;;  %v2291_v8 = vld [vmem:[%s13702_s4 + $0x70] sm:$0xff] }
 0x424   : > { %v2128_v53 = vpop.permute.xlu0 %2127  ;;  %2217 = vmatpush1.bf16.msra.mxu1 %v2205_v10  ;;  %v2130_v54 = vpop.permute.xlu1 %2129  ;;  %8658 = vmatpush3.msra.mxu0 %v2292_v1 }
 0x425   : > { %v2134_v14 = vsel %vm13546_vm12, 0, %v2128_v53  ;;  %v2131_v17 = vsel %vm13546_vm12, %v2128_v53, %v2130_v54  ;;  %8659 = vmatprep.subr.mxu0 %v2307_v6  ;;  %v2290_v53 = vld [vmem:[%s13702_s4 + $0x68] sm:$0xff]  ;;  %v13535_v6 = vmov 0.0  }
 0x426   : > { %v2137_v18 = vsel %vm13521_vm14, %v2131_v17, 0  ;;  %v2136_v19 = vsel %vm11238_vm13, %v2134_v14, 0  ;;  %8660 = vmatpush3.msra.mxu0 %v2291_v8  ;;  %v2304_v14 = vld [vmem:[%s13702_s4 + $0xd8] sm:$0xff] }
 0x427   : > { %v2191_v23 = vsel %vm13527_vm7, %v2137_v18, %v2160_v11  ;;  %v2187_v24 = vsel %vm13527_vm7, %v2136_v19, %v2159_v12  ;;  %v2306_v11 = vld [vmem:[%s13702_s4 + $0xe8] sm:$0xff]  ;;  %v2288_v17 = vld [vmem:[%s13702_s4 + $0x58] sm:$0xff]  ;;  %v2303_v18 = vld [vmem:[%s13702_s4 + $0xd0] sm:$0xff] }
 0x428   : > { %v2105_v21 = vpop.permute.xlu0 %2104  ;;  %2218 = vmatprep.subr.bf16.mxu1 %v2191_v23  ;;  %v2107_v61 = vpop.permute.xlu1 %2106  ;;  %8661 = vmatprep.subr.mxu0 %v2306_v11  ;;  %v2287_v19 = vld [vmem:[%s13702_s4 + $0x50] sm:$0xff]  ;;  %v2302_v23 = vld [vmem:[%s13702_s4 + $0xc8] sm:$0xff] }
 0x429   : > { %v2111_v62 = vsel %vm13546_vm12, 0, %v2105_v21  ;;  %v2108_v50 = vsel %vm13546_vm12, %v2105_v21, %v2107_v61  ;;  %2219 = vmatpush1.bf16.msra.mxu1 %v2187_v24  ;;  %8662 = vmatpush3.msra.mxu0 %v2290_v53  ;;  %v2286_v24 = vld [vmem:[%s13702_s4 + $0x48] sm:$0xff]  ;;  %v2285_v21 = vld [vmem:[%s13702_s4 + $0x40] sm:$0xff]  ;;  %v2300_v61 = vld [vmem:[%s13702_s4 + $0xb8] sm:$0xff] }
 0x42a   : > { %v2113_v25 = vsel %vm11238_vm13, %v2111_v62, 0  ;;  %v2114_v26 = vsel %vm13521_vm14, %v2108_v50, 0  ;;  %2220 = vmatprep.subr.bf16.mxu1 %v2183_v2  ;;  %8663 = vmatprep.subr.mxu0 %v2305_v13  ;;  %v2284_v62 = vld [vmem:[%s13702_s4 + $0x38] sm:$0xff]  ;;  %v2299_v50 = vld [vmem:[%s13702_s4 + $0xb0] sm:$0xff]  ;;  %v2461_v53 = vld [vmem:[%s13707_s5 + $0x8] sm:$0xff]  ;;  %v1697_v13 = vand.u32 7, %v11208_v16 }
 0x42b   : > { %v2153_v33 = vrot.slane %v2113_v25, 4  ;;  %v2154_v34 = vrot.slane %v2114_v26, 4  ;;  %8664 = vmatpush3.msra.mxu0 %v2289_v52  ;;  %v2283_v2 = vld [vmem:[%s13702_s4 + $0x30] sm:$0xff]  ;;  %v2298_v25 = vld [vmem:[%s13702_s4 + $0xa8] sm:$0xff] }
 0x42c   : > { %v2096_v27 = vpop.permute.xlu0 %2095  ;;  %v2094_v29 = vpop.permute.xlu1 %2093  ;;  %8665 = vmatprep.subr.mxu0 %v2304_v14  ;;  %v2282_v26 = vld [vmem:[%s13702_s4 + $0x28] sm:$0xff]  ;;  %vm1706_vm4 = vcmp.ne.s32.totalorder %v1697_v13, 7 }
 0x42d   : > { %v2100_v35 = vsel %vm13520_vm8, %v2096_v27, 0  ;;  %v2097_v36 = vsel %vm13520_vm8, %v2094_v29, %v2096_v27  ;;  %2221 = vmatpush1.bf16.msra.mxu1 %v2179_v30  ;;  %8666 = vmatpush3.msra.mxu0 %v2288_v17  ;;  %v2297_v27 = vld [vmem:[%s13702_s4 + $0xa0] sm:$0xff]  ;;  %v2296_v30 = vld [vmem:[%s13702_s4 + $0x98] sm:$0xff]  ;;  %vm11491_vm15 = vmpackc.low %vm1706_vm4, %vm1706_vm4  ;;  %vm13713_vm4 = vcmask 130048  }
 0x42e   : > { %v2102_v37 = vsel %vm11227_vm9, %v2097_v36, 0  ;;  %v2103_v39 = vsel %vm13519_vm10, %v2100_v35, 0  ;;  %8667 = vmatprep.subr.mxu0 %v2303_v18  ;;  %v2281_v29 = vld [vmem:[%s13702_s4 + $0x20] sm:$0xff]  ;;  %v2279_v35 = vld [vmem:[%s13702_s4 + $0x10] sm:$0xff]  ;;  %v2294_v36 = vld [vmem:[%s13702_s4 + $0x88] sm:$0xff]  ;;  %vm13530_vm10 = vcmask 97280  }
 0x42f   : > { %v2175_v41 = vsel %vm13527_vm7, %v2103_v39, %v2154_v34  ;;  %v2171_v42 = vsel %vm13527_vm7, %v2102_v37, %v2153_v33  ;;  %8668 = vmatpush3.msra.mxu0 %v2287_v19  ;;  %v2280_v33 = vld [vmem:[%s13702_s4 + $0x18] sm:$0xff]  ;;  %v2295_v34 = vld [vmem:[%s13702_s4 + $0x90] sm:$0xff]  ;;  %v2278_v37 = vld [vmem:[%s13702_s4 + $0x8] sm:$0xff] }
 0x430   : > { %v2083_v57 = vpop.permute.xlu0 %2082  ;;  %2222 = vmatprep.subr.bf16.mxu1 %v2175_v41  ;;  %v2085_v40 = vpop.permute.xlu1 %2084  ;;  %8669 = vmatprep.subr.mxu0 %v2302_v23  ;;  %v2293_v39 = vld [vmem:[%s13702_s4 + $0x80] sm:$0xff] }
 0x431   : > { %v2089_v44 = vsel %vm13546_vm12, 0, %v2083_v57  ;;  %v2086_v45 = vsel %vm13546_vm12, %v2083_v57, %v2085_v40  ;;  %2223 = vmatpush1.bf16.msra.mxu1 %v2171_v42  ;;  %8670 = vmatpush3.msra.mxu0 %v2286_v24  ;;  %v2277_v41 = vld [vmem:[%s13702_s4] sm:$0xff] }
 0x432   : > { %v2092_v46 = vsel %vm13521_vm14, %v2086_v45, 0  ;;  %v2091_v47 = vsel %vm11238_vm13, %v2089_v44, 0  ;;  %8671 = vmatprep.subr.mxu0 %v2301_v4 }
 0x433   : > { %v2167_v51 = vsel %vm13527_vm7, %v2092_v46, %v2150_v43  ;;  %v2163_v48 = vsel %vm13527_vm7, %v2091_v47, %v2149_v58  ;;  %8672 = vmatpush3.msra.mxu0 %v2285_v21 }
 0x434   : > { %2224 = vmatprep.subr.bf16.mxu1 %v2167_v51  ;;  %8673 = vmatprep.subr.mxu0 %v2300_v61 }
 0x435   : > { %2225 = vmatpush1.bf16.msra.mxu1 %v2163_v48  ;;  %8674 = vmatpush3.msra.mxu0 %v2284_v62 }
 0x436   : > { %8675 = vmatprep.subr.mxu0 %v2299_v50  ;;  %9260 = vmatprep.subr.bf16.mxu1 %v13535_v6 }
 0x437   : > { %8676 = vmatpush3.msra.mxu0 %v2283_v2 }
 0x438   : > { %8404 = vmatmul.mubr.msk.bf16.vlgmr.msra.gmra.mxu1 %vm13518_vm0, %v2193_v49  ;;  %8677 = vmatprep.subr.mxu0 %v2298_v25 }
 0x439   : > { %8678 = vmatpush3.msra.mxu0 %v2282_v26  ;;  %9270 = vmatprep.mubr.msk.bf16.mxu1 %vm13525_vm1, %v13535_v6 }
 0x43a   : > { %8679 = vmatprep.subr.mxu0 %v2297_v27 }
 0x43b   : > { %8680 = vmatpush3.msra.mxu0 %v2281_v29 }
 0x43c   : > { %8681 = vmatprep.subr.mxu0 %v2296_v30 }
 0x43d   : > { %v2198_v55 = vpop.permute.xlu0 %2197  ;;  %8682 = vmatpush3.msra.mxu0 %v2280_v33 }
 0x43e   : > { %8683 = vmatprep.subr.mxu0 %v2295_v34 }
 0x43f   : > { %8684 = vmatpush3.msra.mxu0 %v2279_v35 }
 0x440   : > { %8685 = vmatprep.subr.mxu0 %v2294_v36 }
 0x441   : > { %8686 = vmatpush3.msra.mxu0 %v2278_v37 }
 0x442   : > { %8687 = vmatprep.subr.mxu0 %v2293_v39 }
 0x443   : > { %8688 = vmatpush3.msra.mxu0 %v2277_v41 }
 0x444   : > { %2614 = vmatprep.subr.bf16.mxu0 %v13533_v5 }
 0x4f8   : > { %v2244_v56 = vpop.f32.mrf.mxu1 }
 0x4f9   : > { %v2245_v59 = vadd.f32 %v2244_v56, %v2198_v55 }
 0x4fa   : > { %v2246_v60 = vpop.f32.mrf.mxu1 }
 0x4fb   : > { %v2247_v63 = vadd.f32 %v2246_v60, %v2198_v55  ;;  %v11432_v9 = vmax.f32 %v2245_v59, 0.0 }
 0x4fc   : > { %v2248_v7 = vpop.f32.mrf.mxu1 }
 0x4fd   : > { %13703 = vst [vmem:[#allocation82_spill] sm:$0xff] %v11432_v9  ;;  %v11434_v10 = vmax.f32 %v2247_v63, 0.0 }
 0x4fe   : > { %v2249_v12 = vpop.f32.mrf.mxu1 }
 0x4ff   : > { %13704 = vst [vmem:[#allocation83_spill] sm:$0xff] %v11434_v10  ;;  %v9846_v54 = vpack.i.bf16 %v11432_v9, %v11434_v10 }
 0x501   : > { %9847 = vrot.lane.b32.xlu1 %v9846_v54, %s13601_s22  ;;  %v2460_v54 = vld [vmem:[%s13707_s5] sm:$0xff] }
 0x573   : > { %v9848_v42 = vpop.permute.xlu1 %9847 }
 0x574   : > { %v9850_v57 = vunpack.i.h.bf16 %v9848_v42  ;;  %v9849_v40 = vunpack.i.l.bf16 %v9848_v42 }
 0x576   : > { %v2262_v58 = vsel %vm13520_vm8, %v9849_v40, 0.0  ;;  %v2259_v43 = vsel %vm13520_vm8, %v9850_v57, %v9849_v40  ;;  %vm13726_vm8 = vcmask 130048  }
 0x577   : > { %v2263_v44 = vmax.f32 %v11432_v9, %v2259_v43  ;;  %v2264_v45 = vmax.f32 %v11434_v10, %v2262_v58  ;;  %v9918_v43 = vld [vmem:[#allocation7] sm:$0xff]  }
 0x579   : > { %v9851_v46 = vpack.i.bf16 %v2263_v44, %v2264_v45 }
 0x57b   : > { %9852 = vrot.lane.b32.xlu0 %v9851_v46, %s13543_s23  ;;  %s13757_s23 = sld [smem:[#allocation53_spill]] }
 0x5ed   : > { %v9853_v47 = vpop.permute.xlu0 %9852 }
 0x5ee   : > { %v9855_v51 = vunpack.i.h.bf16 %v9853_v47  ;;  %v9854_v48 = vunpack.i.l.bf16 %v9853_v47 }
 0x5f0   : > { %v2271_v49 = vsel %vm13705_vm11, %v9855_v51, %v9854_v48  ;;  %v2274_v55 = vsel %vm13706_vm5, %v9854_v48, 0.0  ;;  %vm1705_vm11 = vcmp.ne.s32.totalorder %v1697_v13, 0  ;;  %vm13522_vm5 = vcmask 515072  }
 0x5f1   : > { %v2276_v56 = vmax.f32 %v2264_v45, %v2274_v55  ;;  %v2275_v59 = vmax.f32 %v2263_v44, %v2271_v49  ;;  %vm11495_vm2 = vmpackc.low %vm1705_vm11, %vm1705_vm11  ;;  %v2556_v13 = vsel %vm11491_vm15, 65537, %v13533_v5 }
 0x5f3   : > { %2373 = vmatprep.mubr.f32.mxu0 %v2276_v56 }
 0x5f4   : > { %2374 = vmatmul.mubr.f32.vlgmr.msra.gmra.mxu0 %v2275_v59 }
 0x6b4   : > { %v8689_v60 = vpop.f32.mrf.mxu0 }
 0x6b6   : > { %v8690_v63 = vpop.f32.mrf.mxu0 }
 0x6b7   : > { %v8691_v0 = vadd.f32 %v8690_v63, %v8689_v60 }
 0x6b9   : > { %v2379_v1 = vpack.c.bf16 %v8691_v0, %v8691_v0 }
 0x6bb   : > { %2381 = vrot.lane.b32.xlu0 %v2379_v1, %s13555_s3  ;;  %2386 = vrot.lane.b32.xlu1 %v2379_v1, %s13557_s1 }
 0x72d   : > { %v2387_v7 = vpop.permute.xlu1 %2386  ;;  %v2382_v11 = vpop.permute.xlu0 %2381 }
 0x72e   : > { %v2390_v8 = vsel %vm13524_vm6, %v2387_v7, 0  ;;  %v2385_v12 = vsel %vm13523_vm3, 0, %v2382_v11  ;;  %v2590_v11 = vld [vmem:[%s13712_s6] sm:$0xff] }
 0x72f   : > { %2424 = vrot.lane.b32.xlu0 %v2390_v8, %s13597_s11  ;;  %2430 = vrot.lane.b32.xlu1 %v2390_v8, %s13601_s22  ;;  %v2441_v50 = vrot.slane %v2390_v8, 4  ;;  %v2436_v40 = vrot.slane %v2385_v12, 4  ;;  %v2591_v8 = vld [vmem:[%s13712_s6 + $0x8] sm:$0xff] }
 0x733   : > { %2411 = vrot.lane.b32.xlu0 %v2379_v1, %s13597_s11  ;;  %2417 = vrot.lane.b32.xlu1 %v2379_v1, %s13601_s22 }
 0x737   : > { %2392 = vrot.lane.b32.xlu0 %v2385_v12, %s13597_s11  ;;  %2401 = vrot.lane.b32.xlu1 %v2385_v12, %s13601_s22  ;;  %v9919_v12 = vld [vmem:[#allocation8 + $0x4] ss:$8 sps:$4 sm:$0xff]  }
 0x738   : > { %8411 = vmatprep.mubr.msk.bf16.mxu0 %vm13713_vm4, %v9919_v12  ;;  %vm13531_vm4 = vcmask 523264  }
 0x73b   : > { %2469 = vperm.xlu0 %9845, %v2461_v53   ;;  %2464 = vperm.xlu1 %9856, %v2460_v54   ;;  %v2544_v53 = vsel %vm11495_vm2, 65537, %v13533_v5 }
 0x73c   : > { %v2548_v54 = vrot.slane %v2544_v53, %v11216_v22 }
 0x73e   : > { %vm11548_vm11 = vcmp.ne.s16.totalorder %v2548_v54, 0 }
 0x7a1   : > { %v2425_v14 = vpop.permute.xlu0 %2424  ;;  %v2431_v17 = vpop.permute.xlu1 %2430 }
 0x7a2   : > { %v2427_v19 = vsel %vm13546_vm12, 0, %v2425_v14  ;;  %v2433_v23 = vsel %vm13522_vm5, %v2431_v17, 0  ;;  %v13714_v14 = vmov 0  ;;  %v2560_v17 = vrot.slane %v2556_v13, %v11216_v22 }
 0x7a3   : > { %v2435_v24 = vsel %vm11491_vm15, %v2433_v23, 0  ;;  %v2429_v21 = vsel %vm11495_vm2, %v2427_v19, 0  ;;  %v13715_v14 = vsel %vm11548_vm11, 4294967295, %v13714_v14 }
 0x7a4   : > { %v2481_v4 = vsel %vm13527_vm7, %v2435_v24, 0  ;;  %v2456_v29 = vsel %vm13527_vm7, %v2429_v21, %v2441_v50  ;;  %13716 = vst [vmem:[#allocation84_spill] sm:$0xff] %v13715_v14 }
 0x7a5   : > { %v2412_v61 = vpop.permute.xlu0 %2411  ;;  %9261 = vmatpush3.bf16.msra.mxu1 %v2481_v4  ;;  %v2418_v62 = vpop.permute.xlu1 %2417  ;;  %v13717_v4 = vmov 0 }
 0x7a6   : > { %v2420_v2 = vsel %vm13522_vm5, %v2418_v62, 0  ;;  %9262 = vmatprep.subr.bf16.mxu1 %v13535_v6  ;;  %v2414_v26 = vsel %vm13546_vm12, 0, %v2412_v61 }
 0x7a7   : > { %v2422_v25 = vsel %vm11491_vm15, %v2420_v2, 0  ;;  %v2416_v34 = vsel %vm11495_vm2, %v2414_v26, 0 }
 0x7a8   : > { %v2440_v27 = vrot.slane %v2422_v25, 4  ;;  %v2438_v39 = vrot.slane %v2416_v34, 4 }
 0x7a9   : > { %v2402_v30 = vpop.permute.xlu1 %2401  ;;  %9263 = vmatpush3.bf16.msra.mxu1 %v2456_v29  ;;  %v2393_v35 = vpop.permute.xlu0 %2392  ;;  %v13720_v29 = vmov 0 }
 0x7aa   : > { %v2405_v33 = vsel %vm13522_vm5, %v2402_v30, 0  ;;  %9264 = vmatprep.subr.bf16.mxu1 %v13535_v6  ;;  %v2452_v36 = vsel %vm13527_vm7, %v2379_v1, %v2440_v27  ;;  %v2395_v41 = vsel %vm13546_vm12, 0, %v2393_v35 }
 0x7ab   : > { %v2410_v37 = vsel %vm11491_vm15, %v2405_v33, 0  ;;  %v2400_v57 = vsel %vm11495_vm2, %v2395_v41, 0  ;;  %vm11556_vm2 = vcmp.ne.s16.totalorder %v2560_v17, 0  ;;  %vm11575_vm15 = vmneg %vm13523_vm3  ;;  %v2687_v41 = vld [vmem:[%s10916_s30 + $0x30] sm:$0xff] }
 0x7ac   : > { %v2448_v42 = vsel %vm13527_vm7, %v2410_v37, %v2438_v39  ;;  %v2444_v58 = vsel %vm13527_vm7, %v2400_v57, %v2436_v40  ;;  %v13718_v4 = vsel %vm11556_vm2, 4294967295, %v13717_v4  ;;  %v13721_v29 = vsel %vm11575_vm15, 4294967295, %v13720_v29  ;;  %v9921_v37 = vld [vmem:[#allocation8] ss:$8 sps:$4 sm:$0xff]  }
 0x7ad   : > { %9265 = vmatpush3.bf16.msra.mxu1 %v2452_v36  ;;  %13719 = vst [vmem:[#allocation85_spill] sm:$0xff] %v13718_v4  ;;  %13722 = vst [vmem:[#allocation86_spill] sm:$0xff] %v13721_v29  ;;  %v2688_v39 = vld [vmem:[%s10916_s30 + $0x38] sm:$0xff]  ;;  %vm13528_vm7 = vcmask 121856  }
 0x7ae   : > { %9266 = vmatprep.subr.bf16.mxu1 %v13535_v6 }
 0x7b1   : > { %9267 = vmatpush3.bf16.msra.mxu1 %v2448_v42 }
 0x7b2   : > { %9268 = vmatprep.subr.bf16.mxu1 %v13535_v6 }
 0x7b5   : > { %9269 = vmatpush3.bf16.msra.mxu1 %v2444_v58  ;;  %v2686_v58 = vld [vmem:[%s10916_s30 + $0x28] sm:$0xff] }
 0x7b6   : > { %v2465_v44 = vpop.permute.xlu1 %2464  ;;  %v2470_v51 = vpop.permute.xlu0 %2469  ;;  %9274 = vmatprep.subr.mxu1 %v2688_v39 }
 0x7b8   : > { %9271 = vmatmul.mubr.msk.bf16.vlgmr.msra.gmra.mxu1 %vm13518_vm0, %v9918_v43  ;;  %vm13529_vm0 = vcmask 31744  }
 0x7b9   : > { %9275 = vmatpush3.msra.mxu1 %v2688_v39 }
 0x7ba   : > { %9276 = vmatprep.subr.mxu1 %v2687_v41 }
 0x7bb   : > { %9277 = vmatpush3.msra.mxu1 %v2687_v41 }
 0x7bc   : > { %9278 = vmatprep.subr.mxu1 %v2686_v58 }
 0x7bd   : > { %9279 = vmatpush3.msra.mxu1 %v2686_v58 }
 0x878   : > { %v2517_v45 = vpop.f32.mrf.mxu1 }
 0x879   : > { %v2518_v47 = vadd.f32 %v2517_v45, %v2465_v44  ;;  %v2685_v45 = vld [vmem:[%s10916_s30 + $0x20] sm:$0xff] }
 0x87a   : > { %v9272_v46 = vpop.f32.mrf.mxu1  ;;  %9280 = vmatprep.subr.mxu1 %v2685_v45 }
 0x87b   : > { %v2524_v56 = vmax.f32 %v2518_v47, 0.0  ;;  %9281 = vmatpush3.msra.mxu1 %v2685_v45 }
 0x87c   : > { %v2520_v48 = vpop.f32.mrf.mxu1 }
 0x87d   : > { %v2521_v49 = vadd.f32 %v2520_v48, %v2470_v51  ;;  %v2684_v48 = vld [vmem:[%s10916_s30 + $0x18] sm:$0xff] }
 0x87e   : > { %v9273_v55 = vpop.f32.mrf.mxu1  ;;  %9282 = vmatprep.subr.mxu1 %v2684_v48 }
 0x87f   : > { %v2525_v59 = vmax.f32 %v2521_v49, 0.0  ;;  %9283 = vmatpush3.msra.mxu1 %v2684_v48 }
 0x881   : > { %v2526_v60 = vpack.c.bf16 %v2525_v59, %v2524_v56  ;;  %v2683_v56 = vld [vmem:[%s10916_s30 + $0x10] sm:$0xff]  ;;  %v2682_v59 = vld [vmem:[%s10916_s30 + $0x8] sm:$0xff] }
 0x882   : > { %9284 = vmatprep.subr.mxu1 %v2683_v56 }
 0x883   : > { %2528 = vrot.lane.b32.xlu0 %v2526_v60, %s13555_s3  ;;  %2533 = vrot.lane.b32.xlu1 %v2526_v60, %s13557_s1  ;;  %s13779_s3 = sld [smem:[#allocation55_spill]] }
 0x884   : > { %9285 = vmatpush3.msra.mxu1 %v2683_v56 }
 0x885   : > { %9286 = vmatprep.subr.mxu1 %v2682_v59 }
 0x886   : > { %9287 = vmatpush3.msra.mxu1 %v2682_v59  ;;  %v13733_v59 = vmov 0 }
 0x887   : > { %2569 = vrot.lane.b32.xlu0 %v2526_v60, %s13601_s22 }
 0x8f5   : > { %v2529_v63 = vpop.permute.xlu0 %2528  ;;  %v2534_v0 = vpop.permute.xlu1 %2533 }
 0x8f6   : > { %v2531_v1 = vsel %vm13523_vm3, 0, %v2529_v63  ;;  %v2536_v7 = vsel %vm13524_vm6, %v2534_v0, 0 }
 0x8f7   : > { %2551 = vrot.lane.b32.xlu0 %v2531_v1, %s13601_s22  ;;  %2576 = vrot.lane.b32.xlu1 %v2536_v7, %s13597_s11 }
 0x8f8   : > { %2615 = vmatpush1.bf16.msra.mxu0 %v2536_v7 }
 0x8f9   : > { %2616 = vmatprep.subr.bf16.mxu0 %v13533_v5  ;;  %v2570_v19 = vpop.permute.xlu0 %2569 }
 0x8fa   : > { %v2572_v52 = vsel %vm13522_vm5, %v2570_v19, 0 }
 0x8fb   : > { %2582 = vrot.lane.b32.xlu0 %v2536_v7, %s13601_s22  ;;  %2563 = vrot.lane.b32.xlu1 %v2526_v60, %s13597_s11  ;;  %v2574_v21 = vsel %vm11556_vm2, %v2572_v52, 0 }
 0x8ff   : > { %2599 = vperm.xlu0 %9845, %v2591_v8   ;;  %2539 = vrot.lane.b32.xlu1 %v2531_v1, %s13597_s11 }
 0x903   : > { %2594 = vperm.xlu1 %9856, %v2590_v11  }
 0x969   : > { %v2577_v23 = vpop.permute.xlu1 %2576  ;;  %v2552_v50 = vpop.permute.xlu0 %2551 }
 0x96a   : > { %v2579_v24 = vsel %vm13546_vm12, 0, %v2577_v23  ;;  %v2554_v25 = vsel %vm13522_vm5, %v2552_v50, 0  ;;  %v2849_v50 = vld [vmem:[%s13725_s29 + $0x18] sm:$0xff] }
 0x96b   : > { %v2581_v18 = vsel %vm11548_vm11, %v2579_v24, 0  ;;  %v2562_v26 = vsel %vm11556_vm2, %v2554_v25, 0  ;;  %v2848_v25 = vld [vmem:[%s13725_s29 + $0x10] sm:$0xff] }
 0x96c   : > { %2617 = vmatpush1.bf16.msra.mxu0 %v2581_v18 }
 0x96d   : > { %2618 = vmatprep.subr.bf16.mxu0 %v13533_v5  ;;  %v2564_v61 = vpop.permute.xlu1 %2563  ;;  %v2583_v33 = vpop.permute.xlu0 %2582 }
 0x96e   : > { %v2566_v62 = vsel %vm13546_vm12, 0, %v2564_v61  ;;  %v2585_v35 = vsel %vm13522_vm5, %v2583_v33, 0 }
 0x96f   : > { %v2568_v2 = vsel %vm11548_vm11, %v2566_v62, 0  ;;  %v2587_v36 = vsel %vm11556_vm2, %v2585_v35, 0 }
 0x970   : > { %2619 = vmatpush1.bf16.msra.mxu0 %v2574_v21 }
 0x971   : > { %2620 = vmatprep.subr.bf16.mxu0 %v13533_v5  ;;  %v2540_v27 = vpop.permute.xlu1 %2539 }
 0x972   : > { %v2542_v30 = vsel %vm13546_vm12, 0, %v2540_v27  ;;  %v9922_v27 = vld [vmem:[#allocation10 + $0x4] ss:$8 sps:$4 sm:$0xff]  }
 0x973   : > { %v2550_v34 = vsel %vm11548_vm11, %v2542_v30, 0  ;;  %v1711_v30 = vand.u32 3, %v11208_v16 }
 0x974   : > { %2621 = vmatpush1.bf16.msra.mxu0 %v2526_v60  ;;  %v2681_v60 = vld [vmem:[%s10916_s30] sm:$0xff] }
 0x975   : > { %2622 = vmatprep.subr.bf16.mxu0 %v13533_v5  ;;  %9288 = vmatprep.subr.mxu1 %v2681_v60  ;;  %vm1719_vm14 = vcmp.ne.s32.totalorder %v1711_v30, 0  ;;  %vm1720_vm3 = vcmp.ne.s32.totalorder %v1711_v30, 3 }
 0x976   : > { %9289 = vmatpush3.msra.mxu1 %v2681_v60 }
 0x977   : > { %2894 = vmatprep.subr.bf16.mxu1 %v13533_v5 }
 0x978   : > { %2623 = vmatpush1.bf16.msra.mxu0 %v2568_v2  ;;  %v2847_v2 = vld [vmem:[%s13725_s29 + $0x8] sm:$0xff] }
 0x979   : > { %2624 = vmatprep.subr.bf16.mxu0 %v13533_v5 }
 0x97a   : > { %v2600_v46 = vpop.permute.xlu0 %2599 }
 0x97c   : > { %2625 = vmatpush1.bf16.msra.mxu0 %v2562_v26  ;;  %v2846_v26 = vld [vmem:[%s13725_s29] sm:$0xff] }
 0x97d   : > { %2626 = vmatprep.subr.bf16.mxu0 %v13533_v5 }
 0x97e   : > { %v2595_v42 = vpop.permute.xlu1 %2594 }
 0x980   : > { %8410 = vmatpush1.bf16.msk.msra.mxu0 %vm11575_vm15, %v2529_v63 }
 0x981   : > { %2628 = vmatprep.subr.bf16.mxu0 %v13533_v5 }
 0x984   : > { %2629 = vmatpush1.bf16.msra.mxu0 %v2550_v34 }
 0x985   : > { %2644 = vmatprep.subr.bf16.mxu0 %v13533_v5 }
 0x988   : > { %2645 = vmatpush2.bf16.msra.mxu0 %v2587_v36  ;;  %v13727_v36 = vmov 0 }
 0x98b   : > { %2647 = vmatmul.mubr.bf16.vlgmr.msra.gmra.mxu0 %v9921_v37 }
 0xa4b   : > { %v2648_v57 = vpop.f32.mrf.mxu0 }
 0xa4c   : > { %v2649_v40 = vadd.f32 %v2648_v57, %v2595_v42 }
 0xa4d   : > { %v2650_v43 = vpop.f32.mrf.mxu0 }
 0xa4e   : > { %v11592_v44 = vmax.f32 %v2649_v40, 0.0  ;;  %v13730_v40 = vmov 0 }
 0xa4f   : > { %v2651_v47 = vpop.f32.mrf.mxu0 }
 0xa50   : > { %13723 = vst [vmem:[#allocation87_spill] sm:$0xff] %v11592_v44  ;;  %v2652_v51 = vadd.f32 %v2651_v47, %v2600_v46  ;;  %2659 = vrot.lane.b32.xlu1 %v11592_v44, %s13601_s22 }
 0xa51   : > { %v2653_v49 = vpop.f32.mrf.mxu0 }
 0xa52   : > { %v11598_v55 = vmax.f32 %v2652_v51, 0.0 }
 0xa54   : > { %13724 = vst [vmem:[#allocation88_spill] sm:$0xff] %v11598_v55  ;;  %2661 = vrot.lane.b32.xlu0 %v11598_v55, %s13601_s22 }
 0xac2   : > { %v2660_v63 = vpop.permute.xlu1 %2659 }
 0xac3   : > { %v2665_v0 = vsel %vm13522_vm5, %v2660_v63, 0.0 }
 0xac4   : > { %v2667_v1 = vmax.f32 %v11592_v44, %v2665_v0 }
 0xac6   : > { %v2662_v7 = vpop.permute.xlu0 %2661  ;;  %2671 = vrot.lane.b32.xlu1 %v2667_v1, %s13557_s1 }
 0xac7   : > { %v2666_v8 = vsel %vm13522_vm5, %v2662_v7, 0.0  ;;  %vm2793_vm5 = vmpackc.low %vm1719_vm14, %vm1719_vm14 }
 0xac8   : > { %v2668_v11 = vmax.f32 %v11598_v55, %v2666_v8  ;;  %v2794_v33 = vsel %vm2793_vm5, 65537, %v13533_v5  ;;  %vm11663_vm14 = vmneg %vm13529_vm0  ;;  %v9924_v8 = vld [vmem:[#allocation10] ss:$8 sps:$4 sm:$0xff]  }
 0xac9   : > { %v2798_v34 = vrot.slane %v2794_v33, %v11216_v22  ;;  %v13734_v59 = vsel %vm11663_vm14, 4294967295, %v13733_v59 }
 0xaca   : > { %2673 = vrot.lane.b32.xlu0 %v2668_v11, %s13557_s1  ;;  %13735 = vst [vmem:[#allocation91_spill] sm:$0xff] %v13734_v59  ;;  %s13784_s1 = sld [smem:[#allocation56_spill]] }
 0xacb   : > { %vm11636_vm1 = vcmp.ne.s16.totalorder %v2798_v34, 0 }
 0xacc   : > { %v13728_v36 = vsel %vm11636_vm1, 4294967295, %v13727_v36 }
 0xacd   : > { %13729 = vst [vmem:[#allocation89_spill] sm:$0xff] %v13728_v36 }
 0xb38   : > { %v2672_v12 = vpop.permute.xlu1 %2671 }
 0xb39   : > { %v2677_v53 = vsel %vm13524_vm6, %v2672_v12, 0.0  ;;  %v9927_v12 = vld [vmem:[#allocation10 + $0x10] ss:$8 sps:$4 sm:$0xff]  }
 0xb3a   : > { %v2679_v54 = vmax.f32 %v2667_v1, %v2677_v53 }
 0xb3c   : > { %v2674_v13 = vpop.permute.xlu0 %2673  ;;  %9290 = vmatprep.mubr.msk.f32.mxu1 %vm13531_vm4, %v2679_v54 }
 0xb3d   : > { %v2678_v17 = vsel %vm13524_vm6, %v2674_v13, 0.0  ;;  %vm2809_vm6 = vmpackc.low %vm1720_vm3, %vm1720_vm3  ;;  %vm13545_vm3 = vcmask 261120  }
 0xb3e   : > { %v2680_v19 = vmax.f32 %v2668_v11, %v2678_v17  ;;  %v2810_v35 = vsel %vm2809_vm6, 65537, %v13533_v5  ;;  %v9925_v11 = vld [vmem:[#allocation10 + $0x14] ss:$8 sps:$4 sm:$0xff]   ;;  %vm13736_vm6 = vcmask 130048  }
 0xb3f   : > { %v2814_v37 = vrot.slane %v2810_v35, %v11216_v22  ;;  %vm13742_vm5 = vmmov %vm13736_vm6 }
 0xb40   : > { %9291 = vmatmul.mubr.msk.f32.vlgmr.msra.gmra.mxu1 %vm13531_vm4, %v2680_v19 }
 0xb41   : > { %8420 = vmatprep.mubr.msk.bf16.mxu1 %vm13726_vm8, %v9922_v27  ;;  %vm11644_vm8 = vcmp.ne.s16.totalorder %v2814_v37, 0 }
 0xb42   : > { %v13731_v40 = vsel %vm11644_vm8, 4294967295, %v13730_v40 }
 0xb43   : > { %13732 = vst [vmem:[#allocation90_spill] sm:$0xff] %v13731_v40 }
 0xc00   : > { %v9292_v23 = vpop.f32.mrf.mxu1 }
 0xc02   : > { %v2762_v24 = vpop.f32.mrf.mxu1 }
 0xc03   : > { %v2771_v18 = vpack.c.bf16 %v9292_v23, %v2762_v24 }
 0xc05   : > { %2773 = vrot.lane.b32.xlu0 %v2771_v18, %s13559_s10  ;;  %2779 = vrot.lane.b32.xlu1 %v2771_v18, %s13561_s0 }
 0xc09   : > { %2823 = vrot.lane.b32.xlu0 %v2771_v18, %s13601_s22 }
 0xc77   : > { %v2774_v52 = vpop.permute.xlu0 %2773  ;;  %v2780_v21 = vpop.permute.xlu1 %2779 }
 0xc78   : > { %v2777_v61 = vsel %vm13529_vm0, 0, %v2774_v52  ;;  %v2783_v62 = vsel %vm13530_vm10, %v2780_v21, 0 }
 0xc79   : > { %2801 = vrot.lane.b32.xlu0 %v2777_v61, %s13601_s22  ;;  %2830 = vrot.lane.b32.xlu1 %v2783_v62, %s13597_s11 }
 0xc7a   : > { %2895 = vmatpush1.bf16.msra.mxu1 %v2783_v62 }
 0xc7b   : > { %2896 = vmatprep.subr.bf16.mxu1 %v13533_v5  ;;  %v2824_v39 = vpop.permute.xlu0 %2823 }
 0xc7c   : > { %v2826_v58 = vsel %vm13528_vm7, %v2824_v39, 0 }
 0xc7d   : > { %2836 = vrot.lane.b32.xlu0 %v2783_v62, %s13601_s22  ;;  %2817 = vrot.lane.b32.xlu1 %v2771_v18, %s13597_s11  ;;  %v2828_v43 = vsel %vm11644_vm8, %v2826_v58, 0 }
 0xc81   : > { %2867 = vperm.xlu0 %9845, %v2849_v50   ;;  %2786 = vrot.lane.b32.xlu1 %v2777_v61, %s13597_s11 }
 0xc85   : > { %2857 = vperm.xlu0 %9845, %v2847_v2   ;;  %2862 = vperm.xlu1 %9856, %v2848_v25  }
 0xc89   : > { %2852 = vperm.xlu1 %9856, %v2846_v26  }
 0xceb   : > { %v2831_v41 = vpop.permute.xlu1 %2830  ;;  %v2802_v47 = vpop.permute.xlu0 %2801 }
 0xcec   : > { %v2833_v42 = vsel %vm13546_vm12, 0, %v2831_v41  ;;  %v2805_v48 = vsel %vm13528_vm7, %v2802_v47, 0 }
 0xced   : > { %v2835_v57 = vsel %vm11636_vm1, %v2833_v42, 0  ;;  %v2816_v49 = vsel %vm11644_vm8, %v2805_v48, 0 }
 0xcee   : > { %2897 = vmatpush1.bf16.msra.mxu1 %v2835_v57 }
 0xcef   : > { %2898 = vmatprep.subr.bf16.mxu1 %v13533_v5  ;;  %v2818_v45 = vpop.permute.xlu1 %2817  ;;  %v2837_v63 = vpop.permute.xlu0 %2836 }
 0xcf0   : > { %v2820_v46 = vsel %vm13546_vm12, 0, %v2818_v45  ;;  %v2839_v1 = vsel %vm13528_vm7, %v2837_v63, 0 }
 0xcf1   : > { %v2822_v51 = vsel %vm11636_vm1, %v2820_v46, 0  ;;  %v2841_v7 = vsel %vm11644_vm8, %v2839_v1, 0  ;;  %v3056_v1 = vld [vmem:[%s13737_s8 + $0x8] sm:$0xff] }
 0xcf2   : > { %2899 = vmatpush1.bf16.msra.mxu1 %v2828_v43 }
 0xcf3   : > { %2900 = vmatprep.subr.bf16.mxu1 %v13533_v5  ;;  %v2787_v56 = vpop.permute.xlu1 %2786 }
 0xcf4   : > { %v2789_v60 = vsel %vm13546_vm12, 0, %v2787_v56 }
 0xcf5   : > { %v2800_v0 = vsel %vm11636_vm1, %v2789_v60, 0  ;;  %v9930_v60 = vld [vmem:[#allocation11 + $0x4] ss:$12 sps:$4 sm:$0xff]  }
 0xcf6   : > { %2901 = vmatpush1.bf16.msra.mxu1 %v2771_v18  ;;  %3148 = vmatprep.mubr.bf16.mxu0 %v9930_v60 }
 0xcf7   : > { %2902 = vmatprep.subr.bf16.mxu1 %v13533_v5 }
 0xcfa   : > { %2903 = vmatpush1.bf16.msra.mxu1 %v2822_v51 }
 0xcfb   : > { %2904 = vmatprep.subr.bf16.mxu1 %v13533_v5 }
 0xcfc   : > { %v2868_v17 = vpop.permute.xlu0 %2867 }
 0xcfe   : > { %2905 = vmatpush1.bf16.msra.mxu1 %v2816_v49 }
 0xcff   : > { %2906 = vmatprep.subr.bf16.mxu1 %v13533_v5 }
 0xd00   : > { %v2863_v23 = vpop.permute.xlu1 %2862  ;;  %v2858_v21 = vpop.permute.xlu0 %2857 }
 0xd02   : > { %8419 = vmatpush1.bf16.msk.msra.mxu1 %vm11663_vm14, %v2774_v52 }
 0xd03   : > { %2908 = vmatprep.subr.bf16.mxu1 %v13533_v5 }
 0xd04   : > { %v2853_v2 = vpop.permute.xlu1 %2852 }
 0xd06   : > { %2909 = vmatpush1.bf16.msra.mxu1 %v2800_v0  ;;  %v9931_v0 = vld [vmem:[#allocation11 + $0x8] ss:$12 sps:$4 sm:$0xff]  }
 0xd07   : > { %2924 = vmatprep.subr.bf16.mxu1 %v13533_v5 }
 0xd0a   : > { %2925 = vmatpush2.bf16.msra.mxu1 %v2841_v7  ;;  %v3055_v7 = vld [vmem:[%s13737_s8] sm:$0xff] }
 0xd0d   : > { %2927 = vmatmul.mubr.bf16.vlgmr.msra.gmra.mxu1 %v9924_v8  ;;  %v3058_v8 = vld [vmem:[%s13737_s8 + $0x18] sm:$0xff] }
 0xd0e   : > { %8421 = vmatprep.mubr.msk.bf16.mxu1 %vm13736_vm6, %v9925_v11  ;;  %v3057_v11 = vld [vmem:[%s13737_s8 + $0x10] sm:$0xff]  ;;  %vm13743_vm6 = vmmov %vm13742_vm5 }
 0xd15   : > { %2935 = vmatmul.mubr.bf16.gmra.mxu1 %v9927_v12 }
 0xd16   : > { %9297 = vmatprep.mubr.msk.bf16.mxu1 %vm13545_vm3, %v9931_v0 }
 0xdcd   : > { %v2928_v53 = vpop.f32.mrf.mxu1 }
 0xdce   : > { %v2929_v26 = vadd.f32 %v2928_v53, %v2853_v2 }
 0xdcf   : > { %v2930_v54 = vpop.f32.mrf.mxu1 }
 0xdd0   : > { %v2943_v35 = vmax.f32 %v2929_v26, 0.0 }
 0xdd1   : > { %v2931_v13 = vpop.f32.mrf.mxu1 }
 0xdd2   : > { %v2932_v62 = vadd.f32 %v2931_v13, %v2858_v21 }
 0xdd3   : > { %v2933_v19 = vpop.f32.mrf.mxu1 }
 0xdd4   : > { %v2944_v33 = vmax.f32 %v2932_v62, 0.0 }
 0xdd5   : > { %v2936_v24 = vpop.f32.mrf.mxu1 }
 0xdd6   : > { %v2937_v52 = vadd.f32 %v2936_v24, %v2863_v23  ;;  %v11684_v37 = vpack.c.bf16 %v2944_v33, %v2943_v35 }
 0xdd7   : > { %v2938_v18 = vpop.f32.mrf.mxu1 }
 0xdd8   : > { %v2945_v27 = vmax.f32 %v2937_v52, 0.0 }
 0xdd9   : > { %v2939_v61 = vpop.f32.mrf.mxu1 }
 0xdda   : > { %v2940_v50 = vadd.f32 %v2939_v61, %v2868_v17 }
 0xddb   : > { %v2941_v25 = vpop.f32.mrf.mxu1 }
 0xddc   : > { %v2946_v30 = vmax.f32 %v2940_v50, 0.0 }
 0xdde   : > { %v11678_v34 = vpack.c.bf16 %v2946_v30, %v2945_v27 }
 0xde0   : > { %2963 = vrot.lane.b32.xlu0 %v11678_v34, %s13561_s0  ;;  %2953 = vrot.lane.b32.xlu1 %v11678_v34, %s13559_s10 }
 0xde4   : > { %2961 = vrot.lane.b32.xlu0 %v11684_v37, %s13561_s0  ;;  %2951 = vrot.lane.b32.xlu1 %v11684_v37, %s13559_s10  ;;  %s10693_s10 = smov 3  }
 0xde8   : > { %2997 = vrot.lane.b32.xlu0 %v11684_v37, %s13597_s11  ;;  %2999 = vrot.lane.b32.xlu1 %v11678_v34, %s13597_s11 }
 0xe52   : > { %v2964_v39 = vpop.permute.xlu0 %2963  ;;  %v2954_v41 = vpop.permute.xlu1 %2953 }
 0xe53   : > { %9464 = vmatprep.subr.msk.bf16.mxu0 %vm13530_vm10, %v2964_v39  ;;  %v2969_v42 = vsel %vm13530_vm10, %v2964_v39, 0  ;;  %v2959_v57 = vsel %vm13529_vm0, 0, %v2954_v41 }
 0xe54   : > { %3025 = vrot.lane.b32.xlu0 %v2969_v42, %s13597_s11  ;;  %2987 = vrot.lane.b32.xlu1 %v2959_v57, %s13601_s22 }
 0xe56   : > { %v2962_v58 = vpop.permute.xlu0 %2961  ;;  %v2952_v43 = vpop.permute.xlu1 %2951 }
 0xe57   : > { %v2966_v45 = vsel %vm13530_vm10, %v2962_v58, 0  ;;  %v2956_v46 = vsel %vm13529_vm0, 0, %v2952_v43  ;;  %vm13745_vm0 = vmmov %vm13742_vm5 }
 0xe58   : > { %3023 = vrot.lane.b32.xlu0 %v2966_v45, %s13597_s11  ;;  %2985 = vrot.lane.b32.xlu1 %v2956_v46, %s13601_s22 }
 0xe5a   : > { %v2998_v47 = vpop.permute.xlu0 %2997  ;;  %v3000_v51 = vpop.permute.xlu1 %2999 }
 0xe5b   : > { %v3005_v48 = vsel %vm13546_vm12, 0, %v3000_v51  ;;  %v3002_v56 = vsel %vm13546_vm12, 0, %v2998_v47 }
 0xe5c   : > { %v3008_v49 = vsel %vm11636_vm1, %v3005_v48, 0  ;;  %3009 = vrot.lane.b32.xlu0 %v11684_v37, %s13601_s22  ;;  %3011 = vrot.lane.b32.xlu1 %v11678_v34, %s13601_s22  ;;  %v3007_v63 = vsel %vm11636_vm1, %v3002_v56, 0 }
 0xe5d   : > { %8709 = vmatpush3.bf16.msra.mxu0 %v3008_v49 }
 0xe5e   : > { %9465 = vmatprep.subr.msk.bf16.mxu0 %vm13530_vm10, %v2962_v58  ;;  %v9928_v58 = vld [vmem:[#allocation11] ss:$12 sps:$4 sm:$0xff]  }
 0xe60   : > { %2973 = vrot.lane.b32.xlu0 %v2956_v46, %s13597_s11  ;;  %2975 = vrot.lane.b32.xlu1 %v2959_v57, %s13597_s11  ;;  %v9935_v46 = vld [vmem:[#allocation11 + $0x18] ss:$12 sps:$4 sm:$0xff]  }
 0xe61   : > { %8711 = vmatpush3.bf16.msra.mxu0 %v3007_v63 }
 0xe64   : > { %3035 = vrot.lane.b32.xlu0 %v2966_v45, %s13601_s22  ;;  %3037 = vrot.lane.b32.xlu1 %v2969_v42, %s13601_s22  ;;  %v9933_v45 = vld [vmem:[#allocation11 + $0x1c] ss:$12 sps:$4 sm:$0xff]  }
 0xe68   : > { %3066 = vperm.xlu0 %9845, %v3056_v1   ;;  %3061 = vperm.xlu1 %9856, %v3055_v7  }
 0xe6c   : > { %3076 = vperm.xlu0 %9845, %v3058_v8   ;;  %3071 = vperm.xlu1 %9856, %v3057_v11  }
 0xec6   : > { %v3026_v12 = vpop.permute.xlu0 %3025  ;;  %v2988_v53 = vpop.permute.xlu1 %2987 }
 0xec7   : > { %v3031_v54 = vsel %vm13546_vm12, 0, %v3026_v12  ;;  %v2993_v13 = vsel %vm13528_vm7, %v2988_v53, 0 }
 0xec8   : > { %v2996_v17 = vsel %vm11644_vm8, %v2993_v13, 0  ;;  %9466 = vmatprep.subr.msk.bf16.mxu0 %vm11636_vm1, %v3031_v54 }
 0xec9   : > { %8713 = vmatpush3.bf16.msra.mxu0 %v2996_v17 }
 0xeca   : > { %v3024_v19 = vpop.permute.xlu0 %3023  ;;  %v2986_v23 = vpop.permute.xlu1 %2985 }
 0xecb   : > { %v3028_v24 = vsel %vm13546_vm12, 0, %v3024_v19  ;;  %v2990_v18 = vsel %vm13528_vm7, %v2986_v23, 0 }
 0xecc   : > { %v2995_v52 = vsel %vm11644_vm8, %v2990_v18, 0  ;;  %9467 = vmatprep.subr.msk.bf16.mxu0 %vm11636_vm1, %v3028_v24 }
 0xecd   : > { %8715 = vmatpush3.bf16.msra.mxu0 %v2995_v52 }
 0xece   : > { %v3010_v21 = vpop.permute.xlu0 %3009  ;;  %v3012_v61 = vpop.permute.xlu1 %3011 }
 0xecf   : > { %v3017_v62 = vsel %vm13528_vm7, %v3012_v61, 0  ;;  %v3014_v50 = vsel %vm13528_vm7, %v3010_v21, 0 }
 0xed0   : > { %9468 = vmatprep.subr.msk.bf16.mxu0 %vm11644_vm8, %v3017_v62 }
 0xed1   : > { %8717 = vmatpush3.bf16.msk.msra.mxu0 %vm11663_vm14, %v2954_v41 }
 0xed2   : > { %v2974_v2 = vpop.permute.xlu0 %2973  ;;  %9469 = vmatprep.subr.msk.bf16.mxu0 %vm11644_vm8, %v3014_v50  ;;  %v2976_v25 = vpop.permute.xlu1 %2975 }
 0xed3   : > { %v2981_v26 = vsel %vm13546_vm12, 0, %v2976_v25  ;;  %v2978_v41 = vsel %vm13546_vm12, 0, %v2974_v2 }
 0xed4   : > { %v2984_v35 = vsel %vm11636_vm1, %v2981_v26, 0 }
 0xed5   : > { %8719 = vmatpush3.bf16.msk.msra.mxu0 %vm11663_vm14, %v2952_v43  ;;  %v9932_v43 = vld [vmem:[#allocation11 + $0x20] ss:$12 sps:$4 sm:$0xff]  }
 0xed6   : > { %v3036_v27 = vpop.permute.xlu0 %3035  ;;  %8720 = vmatprep.subr.bf16.mxu0 %v11678_v34  ;;  %v3038_v30 = vpop.permute.xlu1 %3037  ;;  %v2983_v34 = vsel %vm11636_vm1, %v2978_v41, 0 }
 0xed7   : > { %v3043_v33 = vsel %vm13528_vm7, %v3038_v30, 0  ;;  %v3040_v42 = vsel %vm13528_vm7, %v3036_v27, 0 }
 0xed8   : > { %v3046_v39 = vsel %vm11644_vm8, %v3043_v33, 0  ;;  %9470 = vmatprep.subr.msk.bf16.mxu1 %vm11644_vm8, %v3043_v33  ;;  %v3045_v57 = vsel %vm11644_vm8, %v3040_v42, 0  ;;  %v3267_v33 = vld [vmem:[%s10921_s27 + $0x8] sm:$0xff] }
 0xed9   : > { %8721 = vmatpush3.bf16.msra.mxu0 %v2984_v35  ;;  %9294 = vmatpush3.bf16.msra.mxu1 %v3046_v39  ;;  %v3266_v35 = vld [vmem:[%s10921_s27] sm:$0xff] }
 0xeda   : > { %8722 = vmatprep.subr.bf16.mxu0 %v11684_v37  ;;  %9471 = vmatprep.subr.msk.bf16.mxu1 %vm11644_vm8, %v3040_v42 }
 0xedd   : > { %8723 = vmatpush3.bf16.msra.mxu0 %v2983_v34  ;;  %9296 = vmatpush3.bf16.msra.mxu1 %v3045_v57 }
 0xede   : > { %9301 = vmatprep.subr.mxu1 %v3267_v33 }
 0xee0   : > { %3149 = vmatmul.mubr.bf16.vlgmr.msra.gmra.mxu0 %v9928_v58  ;;  %9298 = vmatmul.mubr.msk.bf16.vlgmr.msra.gmra.mxu1 %vm13545_vm3, %v9932_v43 }
 0xee1   : > { %3156 = vmatprep.mubr.bf16.mxu0 %v9933_v45  ;;  %9302 = vmatpush3.msra.mxu1 %v3267_v33 }
 0xee2   : > { %9303 = vmatprep.subr.mxu1 %v3266_v35 }
 0xee3   : > { %v3062_v56 = vpop.permute.xlu1 %3061  ;;  %v3067_v11 = vpop.permute.xlu0 %3066  ;;  %9304 = vmatpush3.msra.mxu1 %v3266_v35 }
 0xee7   : > { %v3072_v24 = vpop.permute.xlu1 %3071  ;;  %v3077_v2 = vpop.permute.xlu0 %3076 }
 0xee8   : > { %3157 = vmatmul.mubr.bf16.gmra.mxu0 %v9935_v46 }
 0xfa0   : > { %v8724_v37 = vpop.f32.mrf.mxu0  ;;  %v9299_v47 = vpop.f32.mrf.mxu1 }
 0xfa2   : > { %v8725_v51 = vpop.f32.mrf.mxu0  ;;  %v3199_v48 = vpop.f32.mrf.mxu1 }
 0xfa3   : > { %v8726_v49 = vadd.f32 %v8725_v51, %v8724_v37 }
 0xfa4   : > { %v8727_v60 = vpop.f32.mrf.mxu0  ;;  %v9300_v1 = vpop.f32.mrf.mxu1 }
 0xfa5   : > { %v3151_v63 = vadd.f32 %v8726_v49, %v3062_v56 }
 0xfa6   : > { %v8728_v0 = vpop.f32.mrf.mxu0  ;;  %v3202_v13 = vpop.f32.mrf.mxu1 }
 0xfa7   : > { %v3200_v7 = vadd.f32 %v3199_v48, %v3151_v63  ;;  %v8729_v8 = vadd.f32 %v8728_v0, %v8727_v60 }
 0xfa8   : > { %v8730_v12 = vpop.f32.mrf.mxu0 }
 0xfa9   : > { %v11764_v53 = vmax.f32 %v3200_v7, 0.0  ;;  %v3154_v54 = vadd.f32 %v8729_v8, %v3067_v11 }
 0xfaa   : > { %v8731_v17 = vpop.f32.mrf.mxu0 }
 0xfab   : > { %13738 = vst [vmem:[#allocation92_spill] sm:$0xff] %v11764_v53  ;;  %v3203_v19 = vadd.f32 %v3202_v13, %v3154_v54  ;;  %v8732_v23 = vadd.f32 %v8731_v17, %v8730_v12  ;;  %3222 = vrot.lane.b32.xlu1 %v11764_v53, %s13601_s22 }
 0xfac   : > { %v8733_v18 = vpop.f32.mrf.mxu0 }
 0xfad   : > { %v11768_v52 = vmax.f32 %v3203_v19, 0.0  ;;  %v3159_v21 = vadd.f32 %v8732_v23, %v3072_v24 }
 0xfae   : > { %v8734_v61 = vpop.f32.mrf.mxu0 }
 0xfaf   : > { %13739 = vst [vmem:[#allocation93_spill] sm:$0xff] %v11768_v52  ;;  %v8735_v62 = vadd.f32 %v8734_v61, %v8733_v18  ;;  %3224 = vrot.lane.b32.xlu0 %v11768_v52, %s13601_s22  ;;  %v3208_v50 = vadd.f32 %v9299_v47, %v3159_v21  ;;  %v1725_v21 = vand.u32 1, %v11208_v16 }
 0xfb1   : > { %v3162_v25 = vadd.f32 %v8735_v62, %v3077_v2  ;;  %v11772_v26 = vmax.f32 %v3208_v50, 0.0 }
 0xfb3   : > { %13740 = vst [vmem:[#allocation94_spill] sm:$0xff] %v11772_v26  ;;  %3226 = vrot.lane.b32.xlu1 %v11772_v26, %s13601_s22  ;;  %v3211_v27 = vadd.f32 %v9300_v1, %v3162_v25 }
 0xfb5   : > { %v11776_v30 = vmax.f32 %v3211_v27, 0.0 }
 0xfb7   : > { %13741 = vst [vmem:[#allocation95_spill] sm:$0xff] %v11776_v30  ;;  %3228 = vrot.lane.b32.xlu0 %v11776_v30, %s13601_s22 }
0x101d   : > { %v3223_v39 = vpop.permute.xlu1 %3222 }
0x101e   : > { %v3234_v41 = vsel %vm13528_vm7, %v3223_v39, 0.0 }
0x101f   : > { %v3238_v42 = vmax.f32 %v11764_v53, %v3234_v41  ;;  %v13746_v41 = vmov 0 }
0x1021   : > { %v3225_v34 = vpop.permute.xlu0 %3224  ;;  %3246 = vrot.lane.b32.xlu1 %v3238_v42, %s13561_s0 }
0x1022   : > { %v3235_v57 = vsel %vm13528_vm7, %v3225_v34, 0.0 }
0x1023   : > { %v3239_v58 = vmax.f32 %v11768_v52, %v3235_v57 }
0x1025   : > { %3248 = vrot.lane.b32.xlu0 %v3239_v58, %s13561_s0  ;;  %v3227_v43 = vpop.permute.xlu1 %3226 }
0x1026   : > { %v3236_v45 = vsel %vm13528_vm7, %v3227_v43, 0.0 }
0x1027   : > { %v3240_v46 = vmax.f32 %v11772_v26, %v3236_v45  ;;  %v9938_v45 = vld [vmem:[#allocation13 + $0x4] ss:$12 sps:$4 sm:$0xff]  }
0x1028   : > { %3653 = vmatprep.mubr.bf16.mxu0 %v9938_v45 }
0x1029   : > { %v3229_v37 = vpop.permute.xlu0 %3228  ;;  %3250 = vrot.lane.b32.xlu1 %v3240_v46, %s13561_s0 }
0x102a   : > { %v3237_v47 = vsel %vm13528_vm7, %v3229_v37, 0.0  ;;  %vm13744_vm7 = vmmov %vm13742_vm5  ;;  %v9939_v37 = vld [vmem:[#allocation13 + $0x8] ss:$12 sps:$4 sm:$0xff]  }
0x102b   : > { %v3241_v51 = vmax.f32 %v11776_v30, %v3237_v47  ;;  %v3508_v47 = vld [vmem:[%s13749_s28 + $0x38] sm:$0xff] }
0x102d   : > { %3252 = vrot.lane.b32.xlu0 %v3241_v51, %s13561_s0  ;;  %s13823_s0 = sld [smem:[#allocation58_spill]] }
0x1093   : > { %v3247_v48 = vpop.permute.xlu1 %3246 }
0x1094   : > { %v3258_v49 = vsel %vm13530_vm10, %v3247_v48, 0.0  ;;  %v3506_v48 = vld [vmem:[%s13749_s28 + $0x28] sm:$0xff] }
0x1095   : > { %v3262_v56 = vmax.f32 %v3238_v42, %v3258_v49  ;;  %v3505_v49 = vld [vmem:[%s13749_s28 + $0x20] sm:$0xff] }
0x1097   : > { %v3249_v60 = vpop.permute.xlu0 %3248  ;;  %9305 = vmatprep.mubr.msk.f32.mxu1 %vm13742_vm5, %v3262_v56  ;;  %vm13547_vm5 = vcmask 15360   ;;  %v3504_v56 = vld [vmem:[%s13749_s28 + $0x18] sm:$0xff] }
0x1098   : > { %v3259_v63 = vsel %vm13530_vm10, %v3249_v60, 0.0  ;;  %v3503_v60 = vld [vmem:[%s13749_s28 + $0x10] sm:$0xff] }
0x1099   : > { %v3263_v0 = vmax.f32 %v3239_v58, %v3259_v63  ;;  %v3502_v63 = vld [vmem:[%s13749_s28 + $0x8] sm:$0xff] }
0x109b   : > { %9306 = vmatmul.mubr.msk.f32.vlgmr.msra.gmra.mxu1 %vm13743_vm6, %v3263_v0  ;;  %v3251_v1 = vpop.permute.xlu1 %3250  ;;  %v3501_v0 = vld [vmem:[%s13749_s28] sm:$0xff] }
0x109c   : > { %v3260_v7 = vsel %vm13530_vm10, %v3251_v1, 0.0 }
0x109d   : > { %v3264_v8 = vmax.f32 %v3240_v46, %v3260_v7 }
0x109f   : > { %v3253_v11 = vpop.permute.xlu0 %3252  ;;  %9308 = vmatprep.mubr.msk.f32.mxu1 %vm13744_vm7, %v3264_v8  ;;  %vm1733_vm7 = vcmp.ne.s32.totalorder %v1725_v21, 0  ;;  %v13750_v8 = vmov 0 }
0x10a0   : > { %v3261_v12 = vsel %vm13530_vm10, %v3253_v11, 0.0  ;;  %vm13548_vm10 = vcmask 23552  }
0x10a1   : > { %v3265_v54 = vmax.f32 %v3241_v51, %v3261_v12  ;;  %v3507_v51 = vld [vmem:[%s13749_s28 + $0x30] sm:$0xff] }
0x10a3   : > { %9309 = vmatmul.mubr.msk.f32.gmra.mxu1 %vm13745_vm0, %v3265_v54  ;;  %vm3404_vm0 = vmpackc.low %vm1733_vm7, %vm1733_vm7  ;;  %vm1734_vm7 = vcmp.ne.s32.totalorder %v1725_v21, 1 }
0x10a4   : > { %v3405_v61 = vsel %vm3404_vm0, 65537, %v13533_v5  ;;  %9315 = vmatprep.mubr.msk.bf16.mxu1 %vm13545_vm3, %v9939_v37  ;;  %vm3426_vm0 = vmpackc.low %vm1734_vm7, %vm1734_vm7 }
0x10a5   : > { %v3409_v16 = vrot.slane %v3405_v61, %v11216_v22  ;;  %v3427_v1 = vsel %vm3426_vm0, 65537, %v13533_v5  ;;  %vm11883_vm7 = vmneg %vm13547_vm5  ;;  %vm13758_vm0 = vcmask 523264  }
0x10a6   : > { %v3431_v7 = vrot.slane %v3427_v1, %v11216_v22  ;;  %v9951_v1 = vld [vmem:[#allocation13 + $0x48] ss:$12 sps:$4 sm:$0xff]  }
0x10a7   : > { %vm11836_vm6 = vcmp.ne.s16.totalorder %v3409_v16, 0  ;;  %v13753_v16 = vmov 0 }
0x10a8   : > { %v13747_v41 = vsel %vm11836_vm6, 4294967295, %v13746_v41  ;;  %vm11866_vm4 = vcmp.ne.s16.totalorder %v3431_v7, 0  ;;  %v13754_v16 = vsel %vm11883_vm7, 4294967295, %v13753_v16 }
0x10a9   : > { %13748 = vst [vmem:[#allocation96_spill] sm:$0xff] %v13747_v41  ;;  %v13751_v8 = vsel %vm11866_vm4, 4294967295, %v13750_v8  ;;  %13755 = vst [vmem:[#allocation98_spill] sm:$0xff] %v13754_v16 }
0x10aa   : > { %13752 = vst [vmem:[#allocation97_spill] sm:$0xff] %v13751_v8 }
0x115b   : > { %v9307_v13 = vpop.f32.mrf.mxu1 }
0x115d   : > { %v3346_v17 = vpop.f32.mrf.mxu1 }
0x115e   : > { %v11808_v18 = vpack.c.bf16 %v9307_v13, %v3346_v17 }
0x1163   : > { %v9310_v19 = vpop.f32.mrf.mxu1 }
0x1165   : > { %v3356_v23 = vpop.f32.mrf.mxu1 }
0x1166   : > { %v11802_v24 = vpack.c.bf16 %v9310_v19, %v3356_v23 }
0x1168   : > { %3382 = vrot.lane.b32.xlu0 %v11802_v24, %s10691_s18  ;;  %3371 = vrot.lane.b32.xlu1 %v11802_v24, %s10692_s9 }
0x116c   : > { %3380 = vrot.lane.b32.xlu0 %v11808_v18, %s10691_s18  ;;  %3369 = vrot.lane.b32.xlu1 %v11808_v18, %s10692_s9 }
0x1170   : > { %3435 = vrot.lane.b32.xlu0 %v11808_v18, %s13597_s11  ;;  %3437 = vrot.lane.b32.xlu1 %v11802_v24, %s13597_s11 }
0x11da   : > { %v3383_v62 = vpop.permute.xlu0 %3382  ;;  %v11820_v50 = vpop.permute.xlu1 %3371 }
0x11db   : > { %9472 = vmatprep.subr.msk.bf16.mxu0 %vm13547_vm5, %v3383_v62  ;;  %v3388_v2 = vsel %vm13547_vm5, %v3383_v62, 0  ;;  %v3378_v25 = vsel %vm13547_vm5, 0, %v11820_v50 }
0x11dc   : > { %3463 = vrot.lane.b32.xlu0 %v3388_v2, %s13597_s11  ;;  %3415 = vrot.lane.b32.xlu1 %v3378_v25, %s13601_s22 }
0x11de   : > { %v3381_v27 = vpop.permute.xlu0 %3380  ;;  %v11829_v33 = vpop.permute.xlu1 %3369 }
0x11df   : > { %v3385_v35 = vsel %vm13547_vm5, %v3381_v27, 0  ;;  %v3375_v39 = vsel %vm13547_vm5, 0, %v11829_v33 }
0x11e0   : > { %3461 = vrot.lane.b32.xlu0 %v3385_v35, %s13597_s11  ;;  %3413 = vrot.lane.b32.xlu1 %v3375_v39, %s13601_s22 }
0x11e2   : > { %v3436_v42 = vpop.permute.xlu0 %3435  ;;  %v3438_v34 = vpop.permute.xlu1 %3437 }
0x11e3   : > { %v3443_v57 = vsel %vm13546_vm12, 0, %v3438_v34  ;;  %v3440_v43 = vsel %vm13546_vm12, 0, %v3436_v42 }
0x11e4   : > { %v3446_v58 = vsel %vm11836_vm6, %v3443_v57, 0  ;;  %3447 = vrot.lane.b32.xlu0 %v11808_v18, %s13601_s22  ;;  %3449 = vrot.lane.b32.xlu1 %v11802_v24, %s13601_s22  ;;  %v3445_v46 = vsel %vm11836_vm6, %v3440_v43, 0 }
0x11e5   : > { %8747 = vmatpush3.bf16.msra.mxu0 %v3446_v58 }
0x11e6   : > { %9473 = vmatprep.subr.msk.bf16.mxu0 %vm13547_vm5, %v3381_v27 }
0x11e8   : > { %3392 = vrot.lane.b32.xlu0 %v3375_v39, %s13597_s11  ;;  %3394 = vrot.lane.b32.xlu1 %v3378_v25, %s13597_s11 }
0x11e9   : > { %8749 = vmatpush3.bf16.msra.mxu0 %v3445_v46 }
0x11ec   : > { %3473 = vrot.lane.b32.xlu0 %v3385_v35, %s13601_s22  ;;  %3475 = vrot.lane.b32.xlu1 %v3388_v2, %s13601_s22 }
0x11f0   : > { %3546 = vperm.xlu0 %9845, %v3508_v47   ;;  %3541 = vperm.xlu1 %9856, %v3507_v51   ;;  %v9936_v47 = vld [vmem:[#allocation13] ss:$12 sps:$4 sm:$0xff]  }
0x11f1   : > { %v9940_v51 = vld [vmem:[#allocation13 + $0x20] ss:$12 sps:$4 sm:$0xff]  }
0x11f4   : > { %3536 = vperm.xlu0 %9845, %v3506_v48   ;;  %3531 = vperm.xlu1 %9856, %v3505_v49   ;;  %v9941_v48 = vld [vmem:[#allocation13 + $0x1c] ss:$12 sps:$4 sm:$0xff]   ;;  %v9947_v49 = vld [vmem:[#allocation13 + $0x38] ss:$12 sps:$4 sm:$0xff]  }
0x11f8   : > { %3526 = vperm.xlu0 %9845, %v3504_v56   ;;  %3521 = vperm.xlu1 %9856, %v3503_v60   ;;  %v9948_v56 = vld [vmem:[#allocation13 + $0x50] ss:$12 sps:$4 sm:$0xff]   ;;  %v9944_v60 = vld [vmem:[#allocation13 + $0x34] ss:$12 sps:$4 sm:$0xff]  }
0x11fc   : > { %3516 = vperm.xlu0 %9845, %v3502_v63   ;;  %3511 = vperm.xlu1 %9856, %v3501_v0   ;;  %v9946_v63 = vld [vmem:[#allocation13 + $0x30] ss:$12 sps:$4 sm:$0xff]   ;;  %v9949_v0 = vld [vmem:[#allocation13 + $0x4c] ss:$12 sps:$4 sm:$0xff]  }
0x124e   : > { %v3464_v11 = vpop.permute.xlu0 %3463  ;;  %v3416_v12 = vpop.permute.xlu1 %3415 }
0x124f   : > { %v3469_v54 = vsel %vm13546_vm12, 0, %v3464_v11  ;;  %v3422_v13 = vsel %vm13548_vm10, %v3416_v12, 0 }
0x1250   : > { %v3434_v17 = vsel %vm11866_vm4, %v3422_v13, 0  ;;  %9474 = vmatprep.subr.msk.bf16.mxu0 %vm11836_vm6, %v3469_v54 }
0x1251   : > { %8751 = vmatpush3.bf16.msra.mxu0 %v3434_v17 }
0x1252   : > { %v3462_v19 = vpop.permute.xlu0 %3461  ;;  %v3414_v23 = vpop.permute.xlu1 %3413 }
0x1253   : > { %v3466_v21 = vsel %vm13546_vm12, 0, %v3462_v19  ;;  %v3419_v61 = vsel %vm13548_vm10, %v3414_v23, 0 }
0x1254   : > { %v3433_v62 = vsel %vm11866_vm4, %v3419_v61, 0  ;;  %9475 = vmatprep.subr.msk.bf16.mxu0 %vm11836_vm6, %v3466_v21 }
0x1255   : > { %8753 = vmatpush3.bf16.msra.mxu0 %v3433_v62 }
0x1256   : > { %v3448_v2 = vpop.permute.xlu0 %3447  ;;  %v3450_v25 = vpop.permute.xlu1 %3449 }
0x1257   : > { %v3455_v27 = vsel %vm13548_vm10, %v3450_v25, 0  ;;  %v3452_v35 = vsel %vm13548_vm10, %v3448_v2, 0 }
0x1258   : > { %9476 = vmatprep.subr.msk.bf16.mxu0 %vm11866_vm4, %v3455_v27 }
0x1259   : > { %8755 = vmatpush3.bf16.msk.msra.mxu0 %vm11883_vm7, %v11820_v50 }
0x125a   : > { %v3393_v39 = vpop.permute.xlu0 %3392  ;;  %9477 = vmatprep.subr.msk.bf16.mxu0 %vm11866_vm4, %v3452_v35  ;;  %v3395_v42 = vpop.permute.xlu1 %3394 }
0x125b   : > { %v3400_v34 = vsel %vm13546_vm12, 0, %v3395_v42  ;;  %v3397_v46 = vsel %vm13546_vm12, 0, %v3393_v39 }
0x125c   : > { %v3412_v50 = vsel %vm11836_vm6, %v3400_v34, 0 }
0x125d   : > { %8757 = vmatpush3.bf16.msk.msra.mxu0 %vm11883_vm7, %v11829_v33 }
0x125e   : > { %v3474_v57 = vpop.permute.xlu0 %3473  ;;  %8758 = vmatprep.subr.bf16.mxu0 %v11802_v24  ;;  %v3476_v58 = vpop.permute.xlu1 %3475  ;;  %v3411_v24 = vsel %vm11836_vm6, %v3397_v46, 0 }
0x125f   : > { %v3481_v43 = vsel %vm13548_vm10, %v3476_v58, 0  ;;  %v3478_v37 = vsel %vm13548_vm10, %v3474_v57, 0 }
0x1260   : > { %v3484_v45 = vsel %vm11866_vm4, %v3481_v43, 0  ;;  %9478 = vmatprep.subr.msk.bf16.mxu1 %vm11866_vm4, %v3481_v43  ;;  %v3483_v33 = vsel %vm11866_vm4, %v3478_v37, 0 }
0x1261   : > { %8759 = vmatpush3.bf16.msra.mxu0 %v3412_v50  ;;  %9312 = vmatpush3.bf16.msra.mxu1 %v3484_v45 }
0x1262   : > { %8760 = vmatprep.subr.bf16.mxu0 %v11808_v18  ;;  %9479 = vmatprep.subr.msk.bf16.mxu1 %vm11866_vm4, %v3478_v37  ;;  %v9943_v18 = vld [vmem:[#allocation13 + $0x18] ss:$12 sps:$4 sm:$0xff]  }
0x1265   : > { %8761 = vmatpush3.bf16.msra.mxu0 %v3411_v24  ;;  %9314 = vmatpush3.bf16.msra.mxu1 %v3483_v33 }
0x1268   : > { %3654 = vmatmul.mubr.bf16.vlgmr.msra.gmra.mxu0 %v9936_v47  ;;  %9316 = vmatmul.mubr.msk.bf16.vlgmr.msra.gmra.mxu1 %vm13545_vm3, %v9940_v51 }
0x1269   : > { %3661 = vmatprep.mubr.bf16.mxu0 %v9941_v48  ;;  %9319 = vmatprep.mubr.msk.bf16.mxu1 %vm13545_vm3, %v9947_v49 }
0x126b   : > { %v3547_v54 = vpop.permute.xlu0 %3546  ;;  %v3542_v19 = vpop.permute.xlu1 %3541 }
0x126f   : > { %v3537_v62 = vpop.permute.xlu0 %3536  ;;  %v3532_v25 = vpop.permute.xlu1 %3531 }
0x1270   : > { %3662 = vmatmul.mubr.bf16.gmra.mxu0 %v9943_v18  ;;  %9320 = vmatmul.mubr.msk.bf16.gmra.mxu1 %vm13545_vm3, %v9948_v56  ;;  %vm13759_vm3 = vmmov %vm13758_vm0 }
0x1271   : > { %3669 = vmatprep.mubr.bf16.mxu0 %v9944_v60 }
0x1273   : > { %v3527_v34 = vpop.permute.xlu0 %3526  ;;  %v3522_v58 = vpop.permute.xlu1 %3521 }
0x1277   : > { %v3517_v33 = vpop.permute.xlu0 %3516  ;;  %v3512_v49 = vpop.permute.xlu1 %3511 }
0x1278   : > { %3670 = vmatmul.mubr.bf16.gmra.mxu0 %v9946_v63 }
0x1279   : > { %3677 = vmatprep.mubr.bf16.mxu0 %v9949_v0 }
0x1280   : > { %3678 = vmatmul.mubr.bf16.gmra.mxu0 %v9951_v1 }
0x1328   : > { %v8762_v7 = vpop.f32.mrf.mxu0  ;;  %v9317_v11 = vpop.f32.mrf.mxu1 }
0x132a   : > { %v8763_v12 = vpop.f32.mrf.mxu0  ;;  %v3720_v17 = vpop.f32.mrf.mxu1 }
0x132b   : > { %v8764_v37 = vadd.f32 %v8763_v12, %v8762_v7 }
0x132c   : > { %v8765_v13 = vpop.f32.mrf.mxu0  ;;  %v9318_v61 = vpop.f32.mrf.mxu1 }
0x132d   : > { %v3656_v60 = vadd.f32 %v8764_v37, %v3512_v49 }
0x132e   : > { %v8766_v23 = vpop.f32.mrf.mxu0  ;;  %v3723_v27 = vpop.f32.mrf.mxu1 }
0x132f   : > { %v8767_v45 = vadd.f32 %v8766_v23, %v8765_v13  ;;  %v3721_v23 = vadd.f32 %v3720_v17, %v3656_v60 }
0x1330   : > { %v8768_v21 = vpop.f32.mrf.mxu0  ;;  %v9321_v42 = vpop.f32.mrf.mxu1 }
0x1331   : > { %v3659_v18 = vadd.f32 %v8767_v45, %v3517_v33 }
0x1332   : > { %v8769_v2 = vpop.f32.mrf.mxu0  ;;  %v3736_v50 = vpop.f32.mrf.mxu1 }
0x1333   : > { %v3724_v6 = vadd.f32 %v3723_v27, %v3659_v18  ;;  %v8770_v12 = vadd.f32 %v8769_v2, %v8768_v21 }
0x1334   : > { %v8771_v35 = vpop.f32.mrf.mxu0  ;;  %v9322_v48 = vpop.f32.mrf.mxu1 }
0x1335   : > { %v3752_v20 = vmax.f32 %v3724_v6, 0.0 }
0x1336   : > { %v8772_v39 = vpop.f32.mrf.mxu0  ;;  %v3739_v15 = vpop.f32.mrf.mxu1 }
0x1337   : > { %v8773_v22 = vadd.f32 %v8772_v39, %v8771_v35 }
0x1338   : > { %v8774_v57 = vpop.f32.mrf.mxu0 }
0x1339   : > { %v3667_v45 = vadd.f32 %v8773_v22, %v3527_v34  ;;  %v9954_v34 = vld [vmem:[%s13756_s2 + $0x4] ss:$20 sps:$4 sm:$0xff]  }
0x133a   : > { %v8775_v43 = vpop.f32.mrf.mxu0  ;;  %4175 = vmatprep.mubr.bf16.mxu1 %v9954_v34 }
0x133b   : > { %v8776_v46 = vadd.f32 %v8775_v43, %v8774_v57 }
0x133c   : > { %v8777_v24 = vpop.f32.mrf.mxu0 }
0x133d   : > { %v3672_v47 = vadd.f32 %v8776_v46, %v3532_v25 }
0x133e   : > { %v8778_v51 = vpop.f32.mrf.mxu0 }
0x133f   : > { %v8779_v56 = vadd.f32 %v8778_v51, %v8777_v24  ;;  %v3737_v0 = vadd.f32 %v3736_v50, %v3672_v47  ;;  %v3751_v50 = vmax.f32 %v3721_v23, 0.0 }
0x1340   : > { %v8780_v63 = vpop.f32.mrf.mxu0 }
0x1341   : > { %v3675_v1 = vadd.f32 %v8779_v56, %v3537_v62  ;;  %v3755_v57 = vmax.f32 %v3737_v0, 0.0  ;;  %v3664_v62 = vadd.f32 %v8770_v12, %v3522_v58  ;;  %v9962_v12 = vld [vmem:[%s13756_s2 + $0xc] ss:$20 sps:$4 sm:$0xff]  }
0x1342   : > { %v8781_v5 = vpop.f32.mrf.mxu0  ;;  %4240 = vmatprep.mubr.bf16.mxu0 %v9962_v12 }
0x1343   : > { %v3740_v3 = vadd.f32 %v3739_v15, %v3675_v1  ;;  %v8782_v13 = vadd.f32 %v8781_v5, %v8780_v63  ;;  %v11924_v5 = vpack.c.bf16 %v3752_v20, %v3751_v50  ;;  %v3732_v15 = vadd.f32 %v9318_v61, %v3667_v45 }
0x1344   : > { %v8783_v7 = vpop.f32.mrf.mxu0  ;;  %v3729_v21 = vadd.f32 %v9317_v11, %v3664_v62 }
0x1345   : > { %v3756_v25 = vmax.f32 %v3740_v3, 0.0  ;;  %v3680_v43 = vadd.f32 %v8782_v13, %v3542_v19  ;;  %v3754_v22 = vmax.f32 %v3732_v15, 0.0  ;;  %v3984_v15 = vld [vmem:[%s13757_s23 + $0x8] sm:$0xff] }
0x1346   : > { %v8784_v46 = vpop.f32.mrf.mxu0  ;;  %v3753_v2 = vmax.f32 %v3729_v21, 0.0  ;;  %v3986_v21 = vld [vmem:[%s13757_s23 + $0x18] sm:$0xff] }
0x1347   : > { %v11920_v24 = vpack.c.bf16 %v3756_v25, %v3755_v57  ;;  %v8785_v37 = vadd.f32 %v8784_v46, %v8783_v7  ;;  %v3745_v33 = vadd.f32 %v9321_v42, %v3680_v43 }
0x1348   : > { %v11934_v20 = vpack.c.bf16 %v3754_v22, %v3753_v2  ;;  %v3987_v22 = vld [vmem:[%s13757_s23 + $0x20] sm:$0xff]  ;;  %v3990_v2 = vld [vmem:[%s13757_s23 + $0x38] sm:$0xff] }
0x1349   : > { %v3683_v47 = vadd.f32 %v8785_v37, %v3547_v54  ;;  %3771 = vrot.lane.b32.xlu0 %v11920_v24, %s10692_s9  ;;  %v3757_v3 = vmax.f32 %v3745_v33, 0.0 }
0x134b   : > { %v3748_v17 = vadd.f32 %v9322_v48, %v3683_v47 }
0x134d   : > { %v3758_v19 = vmax.f32 %v3748_v17, 0.0  ;;  %3767 = vrot.lane.b32.xlu0 %v11924_v5, %s10692_s9  ;;  %v3983_v17 = vld [vmem:[%s13757_s23] sm:$0xff] }
0x134f   : > { %v11928_v6 = vpack.c.bf16 %v3758_v19, %v3757_v3  ;;  %v3985_v3 = vld [vmem:[%s13757_s23 + $0x10] sm:$0xff]  ;;  %v3988_v19 = vld [vmem:[%s13757_s23 + $0x28] sm:$0xff] }
0x1351   : > { %3773 = vrot.lane.b32.xlu1 %v11928_v6, %s10692_s9  ;;  %3791 = vrot.lane.b32.xlu0 %v11920_v24, %s10691_s18 }
0x1355   : > { %3769 = vrot.lane.b32.xlu1 %v11934_v20, %s10692_s9  ;;  %3787 = vrot.lane.b32.xlu0 %v11924_v5, %s10691_s18 }
0x1359   : > { %3793 = vrot.lane.b32.xlu1 %v11928_v6, %s10691_s18  ;;  %3863 = vrot.lane.b32.xlu0 %v11920_v24, %s13597_s11 }
0x135d   : > { %3789 = vrot.lane.b32.xlu1 %v11934_v20, %s10691_s18  ;;  %3859 = vrot.lane.b32.xlu0 %v11924_v5, %s13597_s11 }
0x1361   : > { %3865 = vrot.lane.b32.xlu1 %v11928_v6, %s13597_s11  ;;  %3887 = vrot.lane.b32.xlu0 %v11920_v24, %s13601_s22 }
0x1365   : > { %3861 = vrot.lane.b32.xlu1 %v11934_v20, %s13597_s11 }
0x1369   : > { %3889 = vrot.lane.b32.xlu1 %v11928_v6, %s13601_s22 }
0x13bb   : > { %v3772_v11 = vpop.permute.xlu0 %3771 }
0x13bc   : > { %v3782_v54 = vsel %vm13547_vm5, 0, %v3772_v11 }
0x13bd   : > { %3839 = vrot.lane.b32.xlu1 %v3782_v54, %s13601_s22  ;;  %3815 = vrot.lane.b32.xlu0 %v3782_v54, %s13597_s11 }
0x13bf   : > { %v3768_v61 = vpop.permute.xlu0 %3767 }
0x13c0   : > { %v3776_v49 = vsel %vm13547_vm5, 0, %v3768_v61 }
0x13c3   : > { %v3792_v27 = vpop.permute.xlu0 %3791  ;;  %v3774_v35 = vpop.permute.xlu1 %3773 }
0x13c4   : > { %v3785_v39 = vsel %vm13547_vm5, 0, %v3774_v35  ;;  %v3802_v0 = vsel %vm13547_vm5, %v3792_v27, 0 }
0x13c5   : > { %3841 = vrot.lane.b32.xlu0 %v3785_v39, %s13601_s22  ;;  %3817 = vrot.lane.b32.xlu1 %v3785_v39, %s13597_s11 }
0x13c7   : > { %v3770_v42 = vpop.permute.xlu1 %3769  ;;  %v11964_v51 = vpop.permute.xlu0 %3787 }
0x13c8   : > { %v3779_v58 = vsel %vm13547_vm5, 0, %v3770_v42  ;;  %v3796_v57 = vsel %vm13547_vm5, %v11964_v51, 0 }
0x13c9   : > { %3837 = vrot.lane.b32.xlu0 %v3779_v58, %s13601_s22  ;;  %3813 = vrot.lane.b32.xlu1 %v3779_v58, %s13597_s11 }
0x13cb   : > { %v3794_v48 = vpop.permute.xlu1 %3793  ;;  %v3864_v18 = vpop.permute.xlu0 %3863 }
0x13cc   : > { %9488 = vmatprep.subr.msk.bf16.mxu0 %vm13547_vm5, %v3794_v48  ;;  %v3805_v1 = vsel %vm13547_vm5, %v3794_v48, 0  ;;  %v3874_v23 = vsel %vm13546_vm12, 0, %v3864_v18 }
0x13cd   : > { %3811 = vrot.lane.b32.xlu0 %v3776_v49, %s13597_s11  ;;  %3885 = vrot.lane.b32.xlu1 %v11934_v20, %s13601_s22 }
0x13cf   : > { %v3790_v56 = vpop.permute.xlu1 %3789  ;;  %v3860_v13 = vpop.permute.xlu0 %3859 }
0x13d0   : > { %v3799_v25 = vsel %vm13547_vm5, %v3790_v56, 0  ;;  %v3868_v33 = vsel %vm13546_vm12, 0, %v3860_v13 }
0x13d1   : > { %3883 = vrot.lane.b32.xlu0 %v11924_v5, %s13601_s22  ;;  %3835 = vrot.lane.b32.xlu1 %v3776_v49, %s13601_s22 }
0x13d3   : > { %v3866_v60 = vpop.permute.xlu1 %3865  ;;  %v3888_v43 = vpop.permute.xlu0 %3887 }
0x13d4   : > { %v3877_v63 = vsel %vm13546_vm12, 0, %v3866_v60  ;;  %v3898_v62 = vsel %vm13548_vm10, %v3888_v43, 0 }
0x13d5   : > { %3915 = vrot.lane.b32.xlu0 %v3802_v0, %s13597_s11  ;;  %3917 = vrot.lane.b32.xlu1 %v3805_v1, %s13597_s11  ;;  %v3905_v47 = vsel %vm11866_vm4, %v3898_v62, 0  ;;  %v9955_v62 = vld [vmem:[%s13756_s2 + $0x2c] ss:$20 sps:$4 sm:$0xff]  }
0x13d6   : > { %9480 = vmatprep.subr.msk.bf16.mxu1 %vm11836_vm6, %v3877_v63 }
0x13d7   : > { %8793 = vmatpush3.bf16.msk.msra.mxu1 %vm11883_vm7, %v3774_v35  ;;  %v3862_v7 = vpop.permute.xlu1 %3861 }
0x13d8   : > { %9481 = vmatprep.subr.msk.bf16.mxu1 %vm11836_vm6, %v3874_v23  ;;  %v3871_v46 = vsel %vm13546_vm12, 0, %v3862_v7 }
0x13d9   : > { %3911 = vrot.lane.b32.xlu0 %v3796_v57, %s13597_s11  ;;  %3913 = vrot.lane.b32.xlu1 %v3799_v25, %s13597_s11 }
0x13db   : > { %8795 = vmatpush3.bf16.msk.msra.mxu1 %vm11883_vm7, %v3772_v11  ;;  %v3890_v45 = vpop.permute.xlu1 %3889  ;;  %v3989_v11 = vld [vmem:[%s13757_s23 + $0x30] sm:$0xff] }
0x13dc   : > { %9482 = vmatprep.subr.msk.bf16.mxu1 %vm11836_vm6, %v3871_v46  ;;  %v3901_v37 = vsel %vm13548_vm10, %v3890_v45, 0 }
0x13dd   : > { %v3906_v50 = vsel %vm11866_vm4, %v3901_v37, 0  ;;  %3939 = vrot.lane.b32.xlu0 %v3802_v0, %s13601_s22  ;;  %3941 = vrot.lane.b32.xlu1 %v3805_v1, %s13601_s22 }
0x13de   : > { %8833 = vmatpush3.bf16.msra.mxu0 %v3906_v50  ;;  %v9952_v50 = vld [vmem:[%s13756_s2] ss:$20 sps:$4 sm:$0xff]  }
0x13df   : > { %8797 = vmatpush3.bf16.msk.msra.mxu1 %vm11883_vm7, %v3770_v42  ;;  %9489 = vmatprep.subr.msk.bf16.mxu0 %vm13547_vm5, %v3792_v27 }
0x13e0   : > { %9483 = vmatprep.subr.msk.bf16.mxu1 %vm11836_vm6, %v3868_v33 }
0x13e1   : > { %3935 = vrot.lane.b32.xlu0 %v3796_v57, %s13601_s22  ;;  %3937 = vrot.lane.b32.xlu1 %v3799_v25, %s13601_s22 }
0x13e2   : > { %8835 = vmatpush3.bf16.msra.mxu0 %v3905_v47 }
0x13e3   : > { %8799 = vmatpush3.bf16.msk.msra.mxu1 %vm11883_vm7, %v3768_v61  ;;  %9490 = vmatprep.subr.msk.bf16.mxu0 %vm13547_vm5, %v3790_v56 }
0x13e5   : > { %3998 = vperm.xlu0 %9845, %v3984_v15   ;;  %3993 = vperm.xlu1 %9856, %v3983_v17  }
0x13e9   : > { %4008 = vperm.xlu0 %9845, %v3986_v21   ;;  %4003 = vperm.xlu1 %9856, %v3985_v3   ;;  %v9957_v3 = vld [vmem:[%s13756_s2 + $0x28] ss:$20 sps:$4 sm:$0xff]  }
0x13ed   : > { %4018 = vperm.xlu0 %9845, %v3988_v19   ;;  %4013 = vperm.xlu1 %9856, %v3987_v22  }
0x13f1   : > { %4028 = vperm.xlu0 %9845, %v3990_v2   ;;  %4023 = vperm.xlu1 %9856, %v3989_v11   ;;  %v9958_v11 = vld [vmem:[%s13756_s2 + $0x54] ss:$20 sps:$4 sm:$0xff]  }
0x142f   : > { %v3816_v54 = vpop.permute.xlu0 %3815  ;;  %v3840_v27 = vpop.permute.xlu1 %3839 }
0x1430   : > { %v3826_v58 = vsel %vm13546_vm12, 0, %v3816_v54  ;;  %v3850_v48 = vsel %vm13548_vm10, %v3840_v27, 0 }
0x1431   : > { %v3833_v56 = vsel %vm11836_vm6, %v3826_v58, 0 }
0x1437   : > { %v3842_v35 = vpop.permute.xlu0 %3841  ;;  %v3818_v61 = vpop.permute.xlu1 %3817 }
0x1438   : > { %v3853_v39 = vsel %vm13548_vm10, %v3842_v35, 0  ;;  %v3829_v42 = vsel %vm13546_vm12, 0, %v3818_v61 }
0x1439   : > { %v3834_v34 = vsel %vm11836_vm6, %v3829_v42, 0  ;;  %9484 = vmatprep.subr.msk.bf16.mxu1 %vm11866_vm4, %v3853_v39  ;;  %v9960_v39 = vld [vmem:[%s13756_s2 + $0x8] ss:$20 sps:$4 sm:$0xff]   ;;  %v9963_v42 = vld [vmem:[%s13756_s2 + $0x50] ss:$20 sps:$4 sm:$0xff]  }
0x143a   : > { %8801 = vmatpush3.bf16.msra.mxu1 %v3834_v34 }
0x143b   : > { %v3838_v49 = vpop.permute.xlu0 %3837  ;;  %9485 = vmatprep.subr.msk.bf16.mxu1 %vm11866_vm4, %v3850_v48  ;;  %v3814_v18 = vpop.permute.xlu1 %3813  ;;  %v9966_v48 = vld [vmem:[%s13756_s2 + $0x34] ss:$20 sps:$4 sm:$0xff]  }
0x143c   : > { %v3847_v60 = vsel %vm13548_vm10, %v3838_v49, 0  ;;  %v3823_v63 = vsel %vm13546_vm12, 0, %v3814_v18 }
0x143d   : > { %v3832_v23 = vsel %vm11836_vm6, %v3823_v63, 0  ;;  %v9970_v63 = vld [vmem:[%s13756_s2 + $0x5c] ss:$20 sps:$4 sm:$0xff]  }
0x143e   : > { %8803 = vmatpush3.bf16.msra.mxu1 %v3833_v56  ;;  %v9968_v56 = vld [vmem:[%s13756_s2 + $0x78] ss:$20 sps:$4 sm:$0xff]  }
0x143f   : > { %v3812_v0 = vpop.permute.xlu0 %3811  ;;  %9486 = vmatprep.subr.msk.bf16.mxu1 %vm11866_vm4, %v3847_v60  ;;  %v3886_v1 = vpop.permute.xlu1 %3885  ;;  %v9969_v60 = vld [vmem:[%s13756_s2 + $0x30] ss:$20 sps:$4 sm:$0xff]  }
0x1440   : > { %v3895_v13 = vsel %vm13548_vm10, %v3886_v1, 0  ;;  %v3820_v12 = vsel %vm13546_vm12, 0, %v3812_v0  ;;  %v9972_v0 = vld [vmem:[%s13756_s2 + $0x10] ss:$20 sps:$4 sm:$0xff]   ;;  %v9973_v1 = vld [vmem:[%s13756_s2 + $0x58] ss:$20 sps:$4 sm:$0xff]  }
0x1441   : > { %v3904_v7 = vsel %vm11866_vm4, %v3895_v13, 0  ;;  %v3831_v45 = vsel %vm11836_vm6, %v3820_v12, 0  ;;  %v9974_v13 = vld [vmem:[%s13756_s2 + $0x38] ss:$20 sps:$4 sm:$0xff]   ;;  %v9978_v12 = vld [vmem:[%s13756_s2 + $0x80] ss:$20 sps:$4 sm:$0xff]  }
0x1442   : > { %8805 = vmatpush3.bf16.msra.mxu1 %v3832_v23  ;;  %8837 = vmatpush3.bf16.msra.mxu0 %v3904_v7  ;;  %v9975_v23 = vld [vmem:[%s13756_s2 + $0x84] ss:$20 sps:$4 sm:$0xff]   ;;  %v9977_v7 = vld [vmem:[%s13756_s2 + $0x60] ss:$20 sps:$4 sm:$0xff]  }
0x1443   : > { %v3884_v57 = vpop.permute.xlu0 %3883  ;;  %9491 = vmatprep.subr.msk.bf16.mxu0 %vm13547_vm5, %v11964_v51  ;;  %v3836_v25 = vpop.permute.xlu1 %3835  ;;  %vm13761_vm5 = vmmov %vm13758_vm0 }
0x1444   : > { %v3892_v43 = vsel %vm13548_vm10, %v3884_v57, 0  ;;  %v3844_v46 = vsel %vm13548_vm10, %v3836_v25, 0  ;;  %v9979_v57 = vld [vmem:[%s13756_s2 + $0x88] ss:$20 sps:$4 sm:$0xff]  }
0x1445   : > { %v3903_v37 = vsel %vm11866_vm4, %v3892_v43, 0  ;;  %9487 = vmatprep.subr.msk.bf16.mxu1 %vm11866_vm4, %v3844_v46 }
0x1446   : > { %8807 = vmatpush3.bf16.msra.mxu1 %v3831_v45  ;;  %8839 = vmatpush3.bf16.msra.mxu0 %v3903_v37 }
0x1447   : > { %v3916_v51 = vpop.permute.xlu0 %3915  ;;  %v3918_v33 = vpop.permute.xlu1 %3917 }
0x1448   : > { %v3929_v47 = vsel %vm13546_vm12, 0, %v3918_v33  ;;  %v3926_v15 = vsel %vm13546_vm12, 0, %v3916_v51 }
0x1449   : > { %4176 = vmatmul.mubr.bf16.vlgmr.msra.gmra.mxu1 %v9952_v50  ;;  %9492 = vmatprep.subr.msk.bf16.mxu0 %vm11836_vm6, %v3929_v47 }
0x144a   : > { %8841 = vmatpush3.bf16.msra.mxu0 %v11928_v6  ;;  %4183 = vmatprep.mubr.bf16.mxu1 %v9955_v62 }
0x144b   : > { %v3912_v17 = vpop.permute.xlu0 %3911  ;;  %9493 = vmatprep.subr.msk.bf16.mxu0 %vm11836_vm6, %v3926_v15  ;;  %v3914_v21 = vpop.permute.xlu1 %3913 }
0x144c   : > { %v3923_v19 = vsel %vm13546_vm12, 0, %v3914_v21 }
0x144e   : > { %8843 = vmatpush3.bf16.msra.mxu0 %v11920_v24  ;;  %v3920_v24 = vsel %vm13546_vm12, 0, %v3912_v17  ;;  %vm13760_vm12 = vmmov %vm13758_vm0 }
0x144f   : > { %v3940_v22 = vpop.permute.xlu0 %3939  ;;  %9494 = vmatprep.subr.msk.bf16.mxu0 %vm11836_vm6, %v3923_v19  ;;  %v3942_v2 = vpop.permute.xlu1 %3941 }
0x1450   : > { %v3953_v6 = vsel %vm13548_vm10, %v3942_v2, 0  ;;  %v3950_v27 = vsel %vm13548_vm10, %v3940_v22, 0 }
0x1451   : > { %v3958_v54 = vsel %vm11866_vm4, %v3953_v6, 0  ;;  %4184 = vmatmul.mubr.bf16.gmra.mxu1 %v9957_v3  ;;  %9496 = vmatprep.subr.msk.bf16.mxu1 %vm11866_vm4, %v3953_v6  ;;  %v3957_v61 = vsel %vm11866_vm4, %v3950_v27, 0 }
0x1452   : > { %8845 = vmatpush3.bf16.msra.mxu0 %v11934_v20  ;;  %9324 = vmatpush3.bf16.msra.mxu1 %v3958_v54  ;;  %v9964_v20 = vld [vmem:[%s13756_s2 + $0x7c] ss:$20 sps:$4 sm:$0xff]   ;;  %s14020_s2 = sld [smem:[#allocation65_spill]] }
0x1453   : > { %9495 = vmatprep.subr.msk.bf16.mxu0 %vm11836_vm6, %v3920_v24  ;;  %9497 = vmatprep.subr.msk.bf16.mxu1 %vm11866_vm4, %v3950_v27  ;;  %v3938_v35 = vpop.permute.xlu1 %3937  ;;  %v3936_v58 = vpop.permute.xlu0 %3935 }
0x1454   : > { %4191 = vmatprep.mubr.bf16.mxu1 %v9958_v11  ;;  %v3947_v34 = vsel %vm13548_vm10, %v3938_v35, 0  ;;  %v3944_v18 = vsel %vm13548_vm10, %v3936_v58, 0 }
0x1455   : > { %v3956_v49 = vsel %vm11866_vm4, %v3947_v34, 0 }
0x1456   : > { %8847 = vmatpush3.bf16.msra.mxu0 %v11924_v5  ;;  %9326 = vmatpush3.bf16.msra.mxu1 %v3957_v61  ;;  %v3955_v5 = vsel %vm11866_vm4, %v3944_v18, 0 }
0x1457   : > { %9498 = vmatprep.subr.msk.bf16.mxu1 %vm11866_vm4, %v3947_v34 }
0x1459   : > { %4192 = vmatmul.mubr.bf16.gmra.mxu1 %v9963_v42  ;;  %4241 = vmatmul.mubr.bf16.vlgmr.msra.gmra.mxu0 %v9960_v39 }
0x145a   : > { %9328 = vmatpush3.bf16.msra.mxu1 %v3956_v49  ;;  %4199 = vmatprep.mubr.bf16.mxu1 %v9964_v20 }
0x145b   : > { %9499 = vmatprep.subr.msk.bf16.mxu1 %vm11866_vm4, %v3944_v18  ;;  %4248 = vmatprep.mubr.bf16.mxu0 %v9966_v48 }
0x145e   : > { %9330 = vmatpush3.bf16.msra.mxu1 %v3955_v5 }
0x1460   : > { %v3994_v2 = vpop.permute.xlu1 %3993  ;;  %v3999_v27 = vpop.permute.xlu0 %3998 }
0x1461   : > { %4200 = vmatmul.mubr.bf16.gmra.mxu1 %v9968_v56  ;;  %4249 = vmatmul.mubr.bf16.gmra.mxu0 %v9969_v60 }
0x1462   : > { %4256 = vmatprep.mubr.bf16.mxu0 %v9970_v63  ;;  %9331 = vmatprep.mubr.msk.bf16.mxu1 %vm13758_vm0, %v9972_v0  ;;  %vm13765_vm0 = vcmask 31744  }
0x1463   : > { %vm13773_vm15 = vmmov %vm13765_vm0 }
0x1464   : > { %v4004_v34 = vpop.permute.xlu1 %4003  ;;  %v4009_v0 = vpop.permute.xlu0 %4008 }
0x1469   : > { %4257 = vmatmul.mubr.bf16.gmra.mxu0 %v9973_v1  ;;  %9332 = vmatmul.mubr.msk.bf16.vlgmr.msra.gmra.mxu1 %vm13759_vm3, %v9974_v13 }
0x146a   : > { %4264 = vmatprep.mubr.bf16.mxu0 %v9975_v23  ;;  %9335 = vmatprep.mubr.msk.bf16.mxu1 %vm13760_vm12, %v9977_v7  ;;  %vm13762_vm12 = vcmask 1043456  }
0x146b   : > { %vm13763_vm3 = vmmov %vm13762_vm12 }
0x1471   : > { %4265 = vmatmul.mubr.bf16.gmra.mxu0 %v9978_v12  ;;  %9336 = vmatmul.mubr.msk.bf16.gmra.mxu1 %vm13761_vm5, %v9979_v57  ;;  %vm13764_vm5 = vcmask 15360  }
0x1509   : > { %v8808_v25 = vpop.f32.mrf.mxu1 }
0x150b   : > { %v8809_v43 = vpop.f32.mrf.mxu1 }
0x150c   : > { %v8810_v35 = vadd.f32 %v8809_v43, %v8808_v25  ;;  %v4014_v25 = vpop.permute.xlu1 %4013 }
0x150d   : > { %v8811_v46 = vpop.f32.mrf.mxu1 }
0x150e   : > { %v4178_v18 = vadd.f32 %v8810_v35, %v3994_v2 }
0x150f   : > { %v8812_v45 = vpop.f32.mrf.mxu1 }
0x1510   : > { %v8813_v5 = vadd.f32 %v8812_v45, %v8811_v46 }
0x1511   : > { %v8814_v37 = vpop.f32.mrf.mxu1 }
0x1512   : > { %v4181_v43 = vadd.f32 %v8813_v5, %v3999_v27 }
0x1513   : > { %v8815_v50 = vpop.f32.mrf.mxu1 }
0x1514   : > { %v8816_v61 = vadd.f32 %v8815_v50, %v8814_v37 }
0x1515   : > { %v8817_v62 = vpop.f32.mrf.mxu1 }
0x1516   : > { %v4186_v56 = vadd.f32 %v8816_v61, %v4004_v34 }
0x1517   : > { %v8818_v51 = vpop.f32.mrf.mxu1 }
0x1518   : > { %v8819_v1 = vadd.f32 %v8818_v51, %v8817_v62 }
0x1519   : > { %v8820_v33 = vpop.f32.mrf.mxu1  ;;  %v8848_v47 = vpop.f32.mrf.mxu0 }
0x151a   : > { %v4189_v2 = vadd.f32 %v8819_v1, %v4009_v0 }
0x151b   : > { %v8821_v15 = vpop.f32.mrf.mxu1  ;;  %v8849_v17 = vpop.f32.mrf.mxu0 }
0x151c   : > { %v8850_v20 = vadd.f32 %v8849_v17, %v8848_v47  ;;  %v8822_v37 = vadd.f32 %v8821_v15, %v8820_v33 }
0x151d   : > { %v8823_v21 = vpop.f32.mrf.mxu1  ;;  %v8851_v3 = vpop.f32.mrf.mxu0 }
0x151e   : > { %v4243_v23 = vadd.f32 %v8850_v20, %v4178_v18 }
0x151f   : > { %v8824_v19 = vpop.f32.mrf.mxu1  ;;  %v8852_v22 = vpop.f32.mrf.mxu0 }
0x1520   : > { %v8853_v13 = vadd.f32 %v8852_v22, %v8851_v3  ;;  %v8825_v61 = vadd.f32 %v8824_v19, %v8823_v21  ;;  %v4019_v3 = vpop.permute.xlu0 %4018  ;;  %v4194_v22 = vadd.f32 %v8822_v37, %v4014_v25 }
0x1521   : > { %v8826_v6 = vpop.f32.mrf.mxu1  ;;  %v8854_v11 = vpop.f32.mrf.mxu0 }
0x1522   : > { %v4246_v35 = vadd.f32 %v8853_v13, %v4181_v43  ;;  %v4197_v19 = vadd.f32 %v8825_v61, %v4019_v3 }
0x1523   : > { %v8827_v54 = vpop.f32.mrf.mxu1  ;;  %v8855_v24 = vpop.f32.mrf.mxu0 }
0x1524   : > { %v8856_v58 = vadd.f32 %v8855_v24, %v8854_v11  ;;  %v8828_v34 = vadd.f32 %v8827_v54, %v8826_v6 }
0x1525   : > { %v8829_v39 = vpop.f32.mrf.mxu1  ;;  %v8857_v42 = vpop.f32.mrf.mxu0 }
0x1526   : > { %v4251_v7 = vadd.f32 %v8856_v58, %v4186_v56 }
0x1527   : > { %v8830_v48 = vpop.f32.mrf.mxu1  ;;  %v8858_v49 = vpop.f32.mrf.mxu0 }
0x1528   : > { %v8859_v50 = vadd.f32 %v8858_v49, %v8857_v42  ;;  %v4024_v42 = vpop.permute.xlu1 %4023  ;;  %v8831_v56 = vadd.f32 %v8830_v48, %v8829_v39  ;;  %v4442_v48 = vld [vmem:[%s10926_s7] sm:$0xf] }
0x1529   : > { %v8860_v60 = vpop.f32.mrf.mxu0  ;;  %v9333_v63 = vpop.f32.mrf.mxu1  ;;  %v4202_v54 = vadd.f32 %v8828_v34, %v4024_v42  ;;  %9339 = vmatprep.subr.msk.mxu0 %vm13762_vm12, %v4442_v48  ;;  %vm13766_vm12 = vmmov %vm13764_vm5 }
0x152a   : > { %v4316_v17 = vadd.f32 %v9333_v63, %v4251_v7  ;;  %v4254_v20 = vadd.f32 %v8859_v50, %v4189_v2  ;;  %9340 = vmatpush3.msk.msra.mxu0 %vm13763_vm3, %v4442_v48  ;;  %vm13767_vm3 = vmmov %vm13764_vm5 }
0x152b   : > { %v8861_v12 = vpop.f32.mrf.mxu0  ;;  %v4307_v57 = vpop.f32.mrf.mxu1  ;;  %vm13769_vm9 = vmmov %vm13767_vm3 }
0x152c   : > { %v4308_v47 = vadd.f32 %v4307_v57, %v4243_v23  ;;  %v8862_v46 = vadd.f32 %v8861_v12, %v8860_v60  ;;  %v12120_v33 = vmax.f32 %v4316_v17, 0.0  ;;  %v4029_v23 = vpop.permute.xlu0 %4028  ;;  %vm13770_vm13 = vmmov %vm13767_vm3 }
0x152d   : > { %v8863_v11 = vpop.f32.mrf.mxu0  ;;  %v9334_v24 = vpop.f32.mrf.mxu1  ;;  %v4205_v25 = vadd.f32 %v8831_v56, %v4029_v23 }
0x152e   : > { %v12116_v45 = vmax.f32 %v4308_v47, 0.0  ;;  %v4319_v49 = vadd.f32 %v9334_v24, %v4254_v20  ;;  %v4259_v21 = vadd.f32 %v8862_v46, %v4194_v22 }
0x152f   : > { %v8864_v62 = vpop.f32.mrf.mxu0  ;;  %v4310_v51 = vpop.f32.mrf.mxu1 }
0x1530   : > { %v4311_v58 = vadd.f32 %v4310_v51, %v4246_v35  ;;  %4354 = vrot.lane.b32.xlu1 %v12116_v45, %s13601_s22  ;;  %v8865_v18 = vadd.f32 %v8864_v62, %v8863_v11  ;;  %v12128_v7 = vmax.f32 %v4319_v49, 0.0 }
0x1531   : > { %v8866_v15 = vpop.f32.mrf.mxu0  ;;  %v9337_v27 = vpop.f32.mrf.mxu1 }
0x1532   : > { %v12122_v5 = vmax.f32 %v4311_v58, 0.0  ;;  %v4262_v39 = vadd.f32 %v8865_v18, %v4197_v19 }
0x1533   : > { %v8867_v60 = vpop.f32.mrf.mxu0  ;;  %v4323_v6 = vpop.f32.mrf.mxu1 }
0x1534   : > { %v8868_v63 = vadd.f32 %v8867_v60, %v8866_v15  ;;  %v4324_v0 = vadd.f32 %v4323_v6, %v4259_v21  ;;  %4356 = vrot.lane.b32.xlu0 %v12122_v5, %s13601_s22  ;;  %4358 = vrot.lane.b32.xlu1 %v12120_v33, %s13601_s22 }
0x1535   : > { %v8869_v1 = vpop.f32.mrf.mxu0  ;;  %v9338_v13 = vpop.f32.mrf.mxu1 }
0x1536   : > { %v4267_v12 = vadd.f32 %v8868_v63, %v4202_v54  ;;  %v12130_v57 = vmax.f32 %v4324_v0, 0.0 }
0x1537   : > { %v8870_v43 = vpop.f32.mrf.mxu0  ;;  %v4326_v37 = vpop.f32.mrf.mxu1 }
0x1538   : > { %v4332_v50 = vadd.f32 %v9337_v27, %v4267_v12  ;;  %v8871_v47 = vadd.f32 %v8870_v43, %v8869_v1  ;;  %v4327_v17 = vadd.f32 %v4326_v37, %v4262_v39  ;;  %4360 = vrot.lane.b32.xlu0 %v12128_v7, %s13601_s22  ;;  %4362 = vrot.lane.b32.xlu1 %v12130_v57, %s13601_s22 }
0x153a   : > { %v12139_v11 = vmax.f32 %v4332_v50, 0.0  ;;  %v4270_v24 = vadd.f32 %v8871_v47, %v4205_v25  ;;  %v12141_v2 = vmax.f32 %v4327_v17, 0.0 }
0x153c   : > { %v4335_v46 = vadd.f32 %v9338_v13, %v4270_v24  ;;  %4364 = vrot.lane.b32.xlu0 %v12141_v2, %s13601_s22  ;;  %4366 = vrot.lane.b32.xlu1 %v12139_v11, %s13601_s22 }
0x153e   : > { %v12147_v35 = vmax.f32 %v4335_v46, 0.0 }
0x1540   : > { %4368 = vrot.lane.b32.xlu0 %v12147_v35, %s13601_s22 }
0x15a2   : > { %v4355_v61 = vpop.permute.xlu1 %4354 }
0x15a3   : > { %v4378_v62 = vsel %vm13548_vm10, %v4355_v61, 0.0 }
0x15a4   : > { %v4386_v51 = vmax.f32 %v12116_v45, %v4378_v62 }
0x15a6   : > { %v4357_v3 = vpop.permute.xlu0 %4356  ;;  %4402 = vrot.lane.b32.xlu1 %v4386_v51, %s10691_s18  ;;  %v4359_v22 = vpop.permute.xlu1 %4358 }
0x15a7   : > { %v4379_v34 = vsel %vm13548_vm10, %v4357_v3, 0.0  ;;  %v4380_v20 = vsel %vm13548_vm10, %v4359_v22, 0.0 }
0x15a8   : > { %v4387_v58 = vmax.f32 %v12122_v5, %v4379_v34  ;;  %v4388_v15 = vmax.f32 %v12120_v33, %v4380_v20 }
0x15aa   : > { %4404 = vrot.lane.b32.xlu0 %v4387_v58, %s10691_s18  ;;  %v4361_v27 = vpop.permute.xlu0 %4360  ;;  %4406 = vrot.lane.b32.xlu1 %v4388_v15, %s10691_s18  ;;  %v4363_v42 = vpop.permute.xlu1 %4362 }
0x15ab   : > { %v4381_v49 = vsel %vm13548_vm10, %v4361_v27, 0.0  ;;  %v4382_v18 = vsel %vm13548_vm10, %v4363_v42, 0.0 }
0x15ac   : > { %v4389_v21 = vmax.f32 %v12128_v7, %v4381_v49  ;;  %v4390_v19 = vmax.f32 %v12130_v57, %v4382_v18 }
0x15ae   : > { %4408 = vrot.lane.b32.xlu0 %v4389_v21, %s10691_s18  ;;  %v4365_v56 = vpop.permute.xlu0 %4364  ;;  %4410 = vrot.lane.b32.xlu1 %v4390_v19, %s10691_s18  ;;  %v4367_v60 = vpop.permute.xlu1 %4366 }
0x15af   : > { %v4383_v6 = vsel %vm13548_vm10, %v4365_v56, 0.0  ;;  %v4384_v54 = vsel %vm13548_vm10, %v4367_v60, 0.0 }
0x15b0   : > { %v4391_v63 = vmax.f32 %v12141_v2, %v4383_v6  ;;  %v4392_v0 = vmax.f32 %v12139_v11, %v4384_v54 }
0x15b2   : > { %4412 = vrot.lane.b32.xlu0 %v4391_v63, %s10691_s18  ;;  %v4369_v1 = vpop.permute.xlu0 %4368  ;;  %4414 = vrot.lane.b32.xlu1 %v4392_v0, %s10691_s18 }
0x15b3   : > { %v4385_v13 = vsel %vm13548_vm10, %v4369_v1, 0.0  ;;  %vm13768_vm10 = vmmov %vm13765_vm0 }
0x15b4   : > { %v4393_v23 = vmax.f32 %v12147_v35, %v4385_v13 }
0x15b6   : > { %4416 = vrot.lane.b32.xlu0 %v4393_v23, %s10691_s18 }
0x1618   : > { %v4403_v12 = vpop.permute.xlu1 %4402 }
0x1619   : > { %v4426_v39 = vsel %vm13764_vm5, %v4403_v12, 0.0  ;;  %vm13771_vm5 = vmmov %vm13765_vm0 }
0x161a   : > { %v4434_v48 = vmax.f32 %v4386_v51, %v4426_v39 }
0x161c   : > { %v4405_v25 = vpop.permute.xlu0 %4404  ;;  %9341 = vmatprep.mubr.msk.f32.mxu0 %vm13765_vm0, %v4434_v48  ;;  %v4407_v43 = vpop.permute.xlu1 %4406  ;;  %v9981_v48 = vld [vmem:[#allocation14 + $0x30] ss:$20 sps:$4 sm:$0xff]  }
0x161d   : > { %v4427_v37 = vsel %vm13766_vm12, %v4405_v25, 0.0  ;;  %v4428_v50 = vsel %vm13767_vm3, %v4407_v43, 0.0  ;;  %vm13772_vm12 = vmmov %vm13767_vm3  ;;  %v9982_v25 = vld [vmem:[#allocation14 + $0x58] ss:$20 sps:$4 sm:$0xff]   ;;  %v9983_v43 = vld [vmem:[#allocation14 + $0x80] ss:$20 sps:$4 sm:$0xff]  }
0x161e   : > { %v4435_v47 = vmax.f32 %v4387_v58, %v4427_v37  ;;  %v4436_v17 = vmax.f32 %v4388_v15, %v4428_v50  ;;  %v9984_v37 = vld [vmem:[#allocation16 + $0x8] ss:$20 sps:$4 sm:$0xff]  }
0x1620   : > { %v4409_v24 = vpop.permute.xlu0 %4408  ;;  %9342 = vmatmul.mubr.msk.f32.vlgmr.msra.gmra.mxu0 %vm13768_vm10, %v4435_v47  ;;  %v4411_v46 = vpop.permute.xlu1 %4410  ;;  %vm13775_vm10 = vmmov %vm13767_vm3 }
0x1621   : > { %v4429_v61 = vsel %vm13769_vm9, %v4409_v24, 0.0  ;;  %v4430_v62 = vsel %vm13770_vm13, %v4411_v46, 0.0  ;;  %9344 = vmatprep.mubr.msk.f32.mxu0 %vm13771_vm5, %v4436_v17  ;;  %vm13774_vm9 = vmmov %vm13765_vm0  ;;  %v4593_v46 = vld [vmem:[%s13779_s3 + $0x30] sm:$0xff] }
0x1622   : > { %v4437_v51 = vmax.f32 %v4389_v21, %v4429_v61  ;;  %v4438_v3 = vmax.f32 %v4390_v19, %v4430_v62  ;;  %vm13776_vm13 = vmmov %vm13765_vm0  ;;  %v9980_v21 = vld [vmem:[#allocation14 + $0x8] ss:$20 sps:$4 sm:$0xff]  }
0x1623   : > { %vm13777_vm5 = vmmov %vm13765_vm0 }
0x1624   : > { %v4413_v22 = vpop.permute.xlu0 %4412  ;;  %9345 = vmatmul.mubr.msk.f32.gmra.mxu0 %vm13765_vm0, %v4437_v51  ;;  %v4415_v34 = vpop.permute.xlu1 %4414  ;;  %vm13778_vm0 = vcmask 523264   ;;  %v4591_v51 = vld [vmem:[%s13779_s3 + $0x20] sm:$0xff] }
0x1625   : > { %v4431_v20 = vsel %vm13772_vm12, %v4413_v22, 0.0  ;;  %v4432_v58 = vsel %vm13767_vm3, %v4415_v34, 0.0  ;;  %9347 = vmatprep.mubr.msk.f32.mxu0 %vm13773_vm15, %v4438_v3  ;;  %9361 = vmatprep.mubr.msk.bf16.mxu1 %vm13778_vm0, %v9980_v21  ;;  %vm13780_vm15 = vmmov %vm13778_vm0  ;;  %v4594_v3 = vld [vmem:[%s13779_s3 + $0x38] sm:$0xff] }
0x1626   : > { %v4439_v15 = vmax.f32 %v4391_v63, %v4431_v20  ;;  %v4440_v27 = vmax.f32 %v4392_v0, %v4432_v58  ;;  %vm13781_vm12 = vmmov %vm13778_vm0  ;;  %v4590_v34 = vld [vmem:[%s13779_s3 + $0x18] sm:$0xff]  ;;  %v4592_v58 = vld [vmem:[%s13779_s3 + $0x28] sm:$0xff] }
0x1627   : > { %vm13782_vm3 = vmmov %vm13778_vm0 }
0x1628   : > { %v4417_v42 = vpop.permute.xlu0 %4416  ;;  %9348 = vmatmul.mubr.msk.f32.gmra.mxu0 %vm13774_vm9, %v4439_v15  ;;  %vm13783_vm9 = vmmov %vm13778_vm0 }
0x1629   : > { %v4433_v49 = vsel %vm13775_vm10, %v4417_v42, 0.0  ;;  %9350 = vmatprep.mubr.msk.f32.mxu0 %vm13776_vm13, %v4440_v27  ;;  %v4589_v42 = vld [vmem:[%s13779_s3 + $0x10] sm:$0xff]  ;;  %vm13785_vm10 = vmmov %vm13778_vm0 }
0x162a   : > { %v4441_v18 = vmax.f32 %v4393_v23, %v4433_v49  ;;  %vm13786_vm13 = vmmov %vm13778_vm0 }
0x162c   : > { %9351 = vmatmul.mubr.msk.f32.gmra.mxu0 %vm13777_vm5, %v4441_v18  ;;  %vm13787_vm5 = vmmov %vm13778_vm0  ;;  %vm13788_vm0 = vcmask 7168  }
0x162d   : > { %9377 = vmatprep.mubr.msk.bf16.mxu0 %vm13783_vm9, %v9984_v37  ;;  %vm13792_vm9 = vcmask 23552  }
0x16e0   : > { %v9343_v19 = vpop.f32.mrf.mxu0 }
0x16e2   : > { %v4536_v56 = vpop.f32.mrf.mxu0 }
0x16e3   : > { %v4575_v23 = vpack.c.bf16 %v9343_v19, %v4536_v56 }
0x16e4   : > { %v9346_v60 = vpop.f32.mrf.mxu0 }
0x16e6   : > { %v4546_v6 = vpop.f32.mrf.mxu0 }
0x16e7   : > { %v4576_v39 = vpack.c.bf16 %v9346_v60, %v4546_v6  ;;  %v4588_v60 = vld [vmem:[%s13779_s3 + $0x8] sm:$0xff] }
0x16e8   : > { %v9349_v54 = vpop.f32.mrf.mxu0 }
0x16ea   : > { %v4556_v63 = vpop.f32.mrf.mxu0 }
0x16eb   : > { %v4577_v12 = vpack.c.bf16 %v9349_v54, %v4556_v63 }
0x16ec   : > { %v9352_v0 = vpop.f32.mrf.mxu0 }
0x16ee   : > { %v4566_v1 = vpop.f32.mrf.mxu0 }
0x16ef   : > { %v4578_v13 = vpack.c.bf16 %v9352_v0, %v4566_v1  ;;  %v4587_v1 = vld [vmem:[%s13779_s3] sm:$0xff] }
0x16f1   : > { %9353 = vmatprep.subr.bf16.mxu1 %v4578_v13 }
0x16f2   : > { %9354 = vmatpush3.bf16.msra.mxu1 %v4578_v13 }
0x16f3   : > { %9355 = vmatprep.subr.bf16.mxu1 %v4577_v12 }
0x16f6   : > { %9356 = vmatpush3.bf16.msra.mxu1 %v4577_v12 }
0x16f7   : > { %9357 = vmatprep.subr.bf16.mxu1 %v4576_v39 }
0x16fa   : > { %9358 = vmatpush3.bf16.msra.mxu1 %v4576_v39 }
0x16fb   : > { %9359 = vmatprep.subr.bf16.mxu1 %v4575_v23 }
0x16fe   : > { %9360 = vmatpush3.bf16.msra.mxu1 %v4575_v23 }
0x1701   : > { %9362 = vmatmul.mubr.msk.bf16.vlgmr.msra.gmra.mxu1 %vm13780_vm15, %v9981_v48  ;;  %vm13789_vm15 = vmmov %vm13788_vm0 }
0x1702   : > { %9365 = vmatprep.mubr.msk.bf16.mxu1 %vm13781_vm12, %v9982_v25  ;;  %vm13790_vm12 = vcmask 15360  }
0x1709   : > { %9366 = vmatmul.mubr.msk.bf16.gmra.mxu1 %vm13782_vm3, %v9983_v43  ;;  %vm13791_vm3 = vmmov %vm13790_vm12 }
0x17c1   : > { %v9363_v50 = vpop.f32.mrf.mxu1 }
0x17c2   : > { %v4670_v6 = vadd.f32 %v9363_v50, %v4589_v42 }
0x17c3   : > { %v4661_v47 = vpop.f32.mrf.mxu1 }
0x17c4   : > { %v4694_v23 = vmax.f32 %v4670_v6, 0.0  ;;  %v4662_v48 = vadd.f32 %v4661_v47, %v4587_v1  ;;  %v9987_v47 = vld [vmem:[#allocation16 + $0x80] ss:$20 sps:$4 sm:$0xff]  }
0x17c5   : > { %v9364_v17 = vpop.f32.mrf.mxu1  ;;  %v4717_v6 = vld [vmem:[%s13784_s1 + $0x28] sm:$0xff] }
0x17c6   : > { %v4673_v18 = vadd.f32 %v9364_v17, %v4590_v34  ;;  %v4692_v37 = vmax.f32 %v4662_v48, 0.0  ;;  %v9985_v17 = vld [vmem:[#allocation16 + $0x30] ss:$20 sps:$4 sm:$0xff]   ;;  %v4713_v48 = vld [vmem:[%s13784_s1 + $0x8] sm:$0xff] }
0x17c7   : > { %v4664_v24 = vpop.f32.mrf.mxu1 }
0x17c8   : > { %v4695_v13 = vmax.f32 %v4673_v18, 0.0  ;;  %v4665_v12 = vadd.f32 %v4664_v24, %v4588_v60  ;;  %v9986_v24 = vld [vmem:[#allocation16 + $0x58] ss:$20 sps:$4 sm:$0xff]  }
0x17c9   : > { %v9367_v61 = vpop.f32.mrf.mxu1 }
0x17ca   : > { %v4686_v22 = vadd.f32 %v9367_v61, %v4593_v46  ;;  %v4701_v25 = vpack.c.bf16 %v4695_v13, %v4694_v23  ;;  %v4693_v43 = vmax.f32 %v4665_v12, 0.0  ;;  %v4714_v46 = vld [vmem:[%s13784_s1 + $0x10] sm:$0xff] }
0x17cb   : > { %v4677_v62 = vpop.f32.mrf.mxu1 }
0x17cc   : > { %v4678_v15 = vadd.f32 %v4677_v62, %v4591_v51  ;;  %v4698_v21 = vmax.f32 %v4686_v22, 0.0  ;;  %v4700_v50 = vpack.c.bf16 %v4693_v43, %v4692_v37  ;;  %v4715_v51 = vld [vmem:[%s13784_s1 + $0x18] sm:$0xff]  ;;  %v4712_v43 = vld [vmem:[%s13784_s1] sm:$0xff] }
0x17cd   : > { %v9368_v20 = vpop.f32.mrf.mxu1 }
0x17ce   : > { %v4689_v27 = vadd.f32 %v9368_v20, %v4594_v3  ;;  %v4696_v54 = vmax.f32 %v4678_v15, 0.0 }
0x17cf   : > { %v4680_v49 = vpop.f32.mrf.mxu1 }
0x17d0   : > { %v4699_v19 = vmax.f32 %v4689_v27, 0.0  ;;  %v4681_v56 = vadd.f32 %v4680_v49, %v4592_v58  ;;  %v4718_v27 = vld [vmem:[%s13784_s1 + $0x30] sm:$0xff] }
0x17d2   : > { %v4703_v63 = vpack.c.bf16 %v4699_v19, %v4698_v21  ;;  %v4697_v0 = vmax.f32 %v4681_v56, 0.0  ;;  %v4719_v21 = vld [vmem:[%s13784_s1 + $0x38] sm:$0xff]  ;;  %v4716_v56 = vld [vmem:[%s13784_s1 + $0x20] sm:$0xff]  ;;  %s13962_s1 = sld [smem:[#allocation61_spill]] }
0x17d4   : > { %v4702_v39 = vpack.c.bf16 %v4697_v0, %v4696_v54  ;;  %9369 = vmatprep.subr.bf16.mxu0 %v4703_v63 }
0x17d5   : > { %9370 = vmatpush3.bf16.msra.mxu0 %v4703_v63 }
0x17d6   : > { %9371 = vmatprep.subr.bf16.mxu0 %v4702_v39 }
0x17d9   : > { %9372 = vmatpush3.bf16.msra.mxu0 %v4702_v39 }
0x17da   : > { %9373 = vmatprep.subr.bf16.mxu0 %v4701_v25 }
0x17dd   : > { %9374 = vmatpush3.bf16.msra.mxu0 %v4701_v25 }
0x17de   : > { %9375 = vmatprep.subr.bf16.mxu0 %v4700_v50 }
0x17e1   : > { %9376 = vmatpush3.bf16.msra.mxu0 %v4700_v50 }
0x17e4   : > { %9378 = vmatmul.mubr.msk.bf16.vlgmr.msra.gmra.mxu0 %vm13785_vm10, %v9985_v17  ;;  %vm13793_vm10 = vmmov %vm13792_vm9 }
0x17e5   : > { %9381 = vmatprep.mubr.msk.bf16.mxu0 %vm13786_vm13, %v9986_v24  ;;  %vm13794_vm13 = vmmov %vm13788_vm0 }
0x17ec   : > { %9382 = vmatmul.mubr.msk.bf16.gmra.mxu0 %vm13787_vm5, %v9987_v47  ;;  %vm13795_vm5 = vmmov %vm13788_vm0 }
0x18a4   : > { %v9379_v61 = vpop.f32.mrf.mxu0 }
0x18a5   : > { %v12209_v3 = vadd.f32 %v9379_v61, %v4714_v46 }
0x18a6   : > { %v4786_v62 = vpop.f32.mrf.mxu0 }
0x18a7   : > { %v4819_v58 = vmax.f32 %v12209_v3, 0.0  ;;  %v12231_v17 = vadd.f32 %v4786_v62, %v4712_v43 }
0x18a8   : > { %v9380_v22 = vpop.f32.mrf.mxu0 }
0x18a9   : > { %v12211_v34 = vadd.f32 %v9380_v22, %v4715_v51  ;;  %v4817_v47 = vmax.f32 %v12231_v17, 0.0  ;;  %v12299_v17 = vpack.c.bf16 %v12128_v7, %v12120_v33 }
0x18aa   : > { %v4789_v20 = vpop.f32.mrf.mxu0 }
0x18ab   : > { %v4820_v15 = vmax.f32 %v12211_v34, 0.0  ;;  %v12229_v37 = vadd.f32 %v4789_v20, %v4713_v48 }
0x18ac   : > { %v9383_v42 = vpop.f32.mrf.mxu0 }
0x18ad   : > { %v9862_v49 = vpack.i.bf16 %v4820_v15, %v4819_v58  ;;  %v4811_v19 = vadd.f32 %v9383_v42, %v4718_v27  ;;  %v4818_v24 = vmax.f32 %v12229_v37, 0.0 }
0x18ae   : > { %v4802_v18 = vpop.f32.mrf.mxu0 }
0x18af   : > { %9863 = vrot.lane.b32.xlu0 %v9862_v49, %s10692_s9  ;;  %9858 = vrot.lane.b32.xlu1 %v9862_v49, %s13597_s11  ;;  %v4823_v0 = vmax.f32 %v4811_v19, 0.0  ;;  %v4803_v1 = vadd.f32 %v4802_v18, %v4716_v56  ;;  %v9902_v46 = vpack.i.bf16 %v4818_v24, %v4817_v47 }
0x18b0   : > { %v9384_v60 = vpop.f32.mrf.mxu0 }
0x18b1   : > { %v4814_v54 = vadd.f32 %v9384_v60, %v4719_v21  ;;  %v4821_v25 = vmax.f32 %v4803_v1, 0.0 }
0x18b2   : > { %v4805_v63 = vpop.f32.mrf.mxu0 }
0x18b3   : > { %v4824_v13 = vmax.f32 %v4814_v54, 0.0  ;;  %v4806_v12 = vadd.f32 %v4805_v63, %v4717_v6 }
0x18b5   : > { %v4822_v39 = vmax.f32 %v4806_v12, 0.0  ;;  %v9872_v23 = vpack.i.bf16 %v4824_v13, %v4823_v0 }
0x18b7   : > { %9873 = vrot.lane.b32.xlu0 %v9872_v23, %s10692_s9  ;;  %9868 = vrot.lane.b32.xlu1 %v9872_v23, %s13597_s11  ;;  %v9882_v50 = vpack.i.bf16 %v4822_v39, %v4821_v25 }
0x18bb   : > { %9878 = vrot.lane.b32.xlu1 %v9872_v23, %s10693_s10  ;;  %9883 = vrot.lane.b32.xlu0 %v9882_v50, %s13597_s11 }
0x18bf   : > { %9888 = vrot.lane.b32.xlu1 %v9882_v50, %s10692_s9  ;;  %9898 = vrot.lane.b32.xlu0 %v9882_v50, %s10693_s10 }
0x18c3   : > { %9893 = vrot.lane.b32.xlu1 %v9862_v49, %s10693_s10  ;;  %9903 = vrot.lane.b32.xlu0 %v9902_v46, %s13597_s11 }
0x18c7   : > { %9908 = vrot.lane.b32.xlu1 %v9902_v46, %s10692_s9  ;;  %9913 = vrot.lane.b32.xlu0 %v9902_v46, %s10693_s10  ;;  %s13814_s10 = sld [smem:[#allocation57_spill]] }
0x1921   : > { %v9864_v61 = vpop.permute.xlu0 %9863  ;;  %v9859_v62 = vpop.permute.xlu1 %9858 }
0x1922   : > { %v9861_v23 = vunpack.i.h.bf16 %v9859_v62  ;;  %v9860_v48 = vunpack.i.l.bf16 %v9859_v62 }
0x1924   : > { %v4908_v62 = vsel %vm13788_vm0, %v4820_v15, %v9861_v23 }
0x1929   : > { %v9874_v51 = vpop.permute.xlu0 %9873  ;;  %v9869_v22 = vpop.permute.xlu1 %9868 }
0x192a   : > { %v9871_v20 = vunpack.i.h.bf16 %v9869_v22  ;;  %v9870_v27 = vunpack.i.l.bf16 %v9869_v22  ;;  %v9876_v42 = vunpack.i.h.bf16 %v9874_v51  ;;  %v9875_v18 = vunpack.i.l.bf16 %v9874_v51 }
0x192c   : > { %v4912_v21 = vsel %vm13788_vm0, %v4824_v13, %v9871_v20  ;;  %v4911_v19 = vsel %vm13789_vm15, %v4823_v0, %v9870_v27  ;;  %vm13796_vm15 = vmmov %vm13788_vm0 }
0x192d   : > { %v9879_v56 = vpop.permute.xlu1 %9878  ;;  %v9884_v60 = vpop.permute.xlu0 %9883  ;;  %v4919_v54 = vsel %vm13790_vm12, %v4911_v19, %v9875_v18  ;;  %v4920_v63 = vsel %vm13791_vm3, %v4912_v21, %v9876_v42  ;;  %v9865_v18 = vunpack.i.l.bf16 %v9864_v61  ;;  %v4907_v19 = vsel %vm13796_vm15, %v4819_v58, %v9860_v48  ;;  %vm13797_vm12 = vmmov %vm13791_vm3 }
0x192e   : > { %v9881_v49 = vunpack.i.h.bf16 %v9879_v56  ;;  %v9880_v6 = vunpack.i.l.bf16 %v9879_v56  ;;  %v9886_v1 = vunpack.i.h.bf16 %v9884_v60  ;;  %v9885_v12 = vunpack.i.l.bf16 %v9884_v60  ;;  %vm13801_vm0 = vmmov %vm13792_vm9 }
0x192f   : > { %v9866_v56 = vunpack.i.h.bf16 %v9864_v61  ;;  %vm13802_vm15 = vmmov %vm13801_vm0 }
0x1930   : > { %v4927_v43 = vsel %vm13792_vm9, %v4919_v54, %v9880_v6  ;;  %v4928_v50 = vsel %vm13793_vm10, %v4920_v63, %v9881_v49  ;;  %v4910_v42 = vsel %vm13794_vm13, %v4822_v39, %v9886_v1  ;;  %v4909_v21 = vsel %vm13795_vm5, %v4821_v25, %v9885_v12  ;;  %vm13798_vm10 = vmmov %vm13792_vm9 }
0x1931   : > { %v12249_v46 = vpack.c.bf16 %v4928_v50, %v4927_v43  ;;  %v9889_v13 = vpop.permute.xlu1 %9888  ;;  %v9899_v0 = vpop.permute.xlu0 %9898  ;;  %vm13799_vm13 = vmmov %vm13791_vm3 }
0x1932   : > { %v9891_v51 = vunpack.i.h.bf16 %v9889_v13  ;;  %v9890_v22 = vunpack.i.l.bf16 %v9889_v13  ;;  %v9901_v20 = vunpack.i.h.bf16 %v9899_v0  ;;  %v9900_v27 = vunpack.i.l.bf16 %v9899_v0  ;;  %vm13800_vm5 = vmmov %vm13791_vm3 }
0x1933   : > { %4959 = vrot.lane.b32.xlu1 %v12249_v46, %s10692_s9  ;;  %v4915_v15 = vsel %vm13799_vm13, %v4907_v19, %v9865_v18  ;;  %v4916_v3 = vsel %vm13800_vm5, %v4908_v62, %v9866_v56  ;;  %vm13807_vm13 = vmmov %vm13801_vm0 }
0x1934   : > { %v4917_v60 = vsel %vm13797_vm12, %v4909_v21, %v9890_v22  ;;  %v4918_v49 = vsel %vm13791_vm3, %v4910_v42, %v9891_v51  ;;  %vm13803_vm12 = vcmask 7168   ;;  %v12287_v42 = vpack.c.bf16 %v12147_v35, %v12139_v11 }
0x1935   : > { %v4925_v61 = vsel %vm13792_vm9, %v4917_v60, %v9900_v27  ;;  %v4926_v39 = vsel %vm13798_vm10, %v4918_v49, %v9901_v20  ;;  %v9894_v25 = vpop.permute.xlu1 %9893  ;;  %v9904_v6 = vpop.permute.xlu0 %9903  ;;  %vm13804_vm3 = vmmov %vm13803_vm12  ;;  %v12303_v11 = vpack.c.bf16 %v12141_v2, %v12130_v57  ;;  %v12311_v35 = vpack.c.bf16 %v12122_v5, %v12116_v45 }
0x1936   : > { %v12265_v54 = vpack.c.bf16 %v4926_v39, %v4925_v61  ;;  %v9896_v63 = vunpack.i.h.bf16 %v9894_v25  ;;  %v9895_v34 = vunpack.i.l.bf16 %v9894_v25  ;;  %v9906_v1 = vunpack.i.h.bf16 %v9904_v6  ;;  %vm13805_vm9 = vmmov %vm13800_vm5 }
0x1937   : > { %v9905_v58 = vunpack.i.l.bf16 %v9904_v6  ;;  %vm13806_vm10 = vmmov %vm13800_vm5 }
0x1938   : > { %v4924_v12 = vsel %vm13801_vm0, %v4916_v3, %v9896_v63  ;;  %v4923_v23 = vsel %vm13802_vm15, %v4915_v15, %v9895_v34  ;;  %4957 = vrot.lane.b32.xlu0 %v12265_v54, %s10692_s9  ;;  %v4906_v20 = vsel %vm13803_vm12, %v4818_v24, %v9906_v1  ;;  %vm13808_vm5 = vmmov %vm13801_vm0  ;;  %v9990_v3 = vld [vmem:[%s13814_s10 + $0x4] ss:$36 sps:$4 sm:$0xff]  }
0x1939   : > { %v12273_v48 = vpack.c.bf16 %v4924_v12, %v4923_v23  ;;  %v9909_v43 = vpop.permute.xlu1 %9908  ;;  %v9914_v50 = vpop.permute.xlu0 %9913  ;;  %v4905_v27 = vsel %vm13804_vm3, %v4817_v47, %v9905_v58  ;;  %vm13809_vm0 = vmmov %vm13805_vm9  ;;  %5633 = vmatprep.mubr.bf16.mxu1 %v9990_v3  ;;  %v9996_v58 = vld [vmem:[%s13814_s10 + $0xc] ss:$36 sps:$4 sm:$0xff]  }
0x193a   : > { %v9911_v13 = vunpack.i.h.bf16 %v9909_v43  ;;  %v9910_v0 = vunpack.i.l.bf16 %v9909_v43  ;;  %v9916_v51 = vunpack.i.h.bf16 %v9914_v50  ;;  %v9915_v22 = vunpack.i.l.bf16 %v9914_v50  ;;  %vm13810_vm15 = vmmov %vm13809_vm0  ;;  %5698 = vmatprep.mubr.bf16.mxu0 %v9996_v58 }
0x193b   : > { %4955 = vrot.lane.b32.xlu1 %v12273_v48, %s10692_s9  ;;  %vm13811_vm12 = vmmov %vm13809_vm0 }
0x193c   : > { %v4913_v56 = vsel %vm13805_vm9, %v4905_v27, %v9910_v0  ;;  %v4914_v18 = vsel %vm13806_vm10, %v4906_v20, %v9911_v13  ;;  %vm13812_vm3 = vmmov %vm13809_vm0  ;;  %vm13815_vm10 = vcmask 7168  }
0x193d   : > { %v4921_v21 = vsel %vm13807_vm13, %v4913_v56, %v9915_v22  ;;  %v4922_v37 = vsel %vm13808_vm5, %v4914_v18, %v9916_v51  ;;  %vm13813_vm9 = vmmov %vm13809_vm0 }
0x193e   : > { %v12291_v24 = vpack.c.bf16 %v4922_v37, %v4921_v21  ;;  %vm13816_vm13 = vmmov %vm13809_vm0 }
0x193f   : > { %4951 = vrot.lane.b32.xlu1 %v12287_v42, %s10692_s9  ;;  %vm13817_vm5 = vmmov %vm13809_vm0 }
0x1940   : > { %4953 = vrot.lane.b32.xlu0 %v12291_v24, %s10692_s9 }
0x1943   : > { %4947 = vrot.lane.b32.xlu1 %v12299_v17, %s10692_s9 }
0x1944   : > { %4949 = vrot.lane.b32.xlu0 %v12303_v11, %s10692_s9 }
0x1947   : > { %4999 = vrot.lane.b32.xlu1 %v12249_v46, %s10691_s18 }
0x1948   : > { %4945 = vrot.lane.b32.xlu0 %v12311_v35, %s10692_s9 }
0x194b   : > { %4995 = vrot.lane.b32.xlu1 %v12273_v48, %s10691_s18 }
0x194c   : > { %4993 = vrot.lane.b32.xlu0 %v12291_v24, %s10691_s18 }
0x194f   : > { %4991 = vrot.lane.b32.xlu1 %v12287_v42, %s10691_s18 }
0x1950   : > { %5143 = vrot.lane.b32.xlu0 %v12249_v46, %s13597_s11 }
0x1953   : > { %4989 = vrot.lane.b32.xlu1 %v12303_v11, %s10691_s18 }
0x1954   : > { %4997 = vrot.lane.b32.xlu0 %v12265_v54, %s10691_s18 }
0x1957   : > { %4987 = vrot.lane.b32.xlu1 %v12299_v17, %s10691_s18 }
0x1958   : > { %5141 = vrot.lane.b32.xlu0 %v12265_v54, %s13597_s11 }
0x195b   : > { %4985 = vrot.lane.b32.xlu1 %v12311_v35, %s10691_s18 }
0x19a5   : > { %v4960_v45 = vpop.permute.xlu1 %4959 }
0x19a6   : > { %8905 = vmatprep.subr.msk.bf16.mxu1 %vm11883_vm7, %v4960_v45  ;;  %v4983_v60 = vsel %vm13812_vm3, 0, %v4960_v45  ;;  %vm13820_vm3 = vmmov %vm13809_vm0 }
0x19aa   : > { %v12339_v5 = vpop.permute.xlu0 %4957 }
0x19ab   : > { %v4980_v61 = vsel %vm13813_vm9, 0, %v12339_v5  ;;  %vm13821_vm9 = vmmov %vm13809_vm0 }
0x19ad   : > { %v12337_v33 = vpop.permute.xlu1 %4955 }
0x19ae   : > { %v4977_v7 = vsel %vm13809_vm0, 0, %v12337_v33 }
0x19af   : > { %5043 = vrot.lane.b32.xlu0 %v4977_v7, %s13597_s11 }
0x19b1   : > { %v12344_v57 = vpop.permute.xlu1 %4951 }
0x19b2   : > { %v12346_v2 = vpop.permute.xlu0 %4953  ;;  %v4971_v47 = vsel %vm13810_vm15, 0, %v12344_v57  ;;  %vm13818_vm15 = vmmov %vm13809_vm0 }
0x19b3   : > { %5039 = vrot.lane.b32.xlu1 %v4971_v47, %s13597_s11  ;;  %v4974_v62 = vsel %vm13811_vm12, 0, %v12346_v2  ;;  %vm13819_vm12 = vmmov %vm13809_vm0 }
0x19b4   : > { %5041 = vrot.lane.b32.xlu0 %v4974_v62, %s13597_s11 }
0x19b5   : > { %v12370_v6 = vpop.permute.xlu1 %4947 }
0x19b6   : > { %v12354_v19 = vpop.permute.xlu0 %4949  ;;  %v4965_v15 = vsel %vm13817_vm5, 0, %v12370_v6  ;;  %vm13825_vm5 = vmmov %vm13809_vm0 }
0x19b7   : > { %5095 = vrot.lane.b32.xlu1 %v4983_v60, %s13601_s22  ;;  %v4968_v34 = vsel %vm13816_vm13, 0, %v12354_v19  ;;  %vm13824_vm13 = vmmov %vm13809_vm0 }
0x19b8   : > { %5047 = vrot.lane.b32.xlu0 %v4983_v60, %s13597_s11  ;;  %v5371_v60 = vld [vmem:[%s13823_s0 + $0x10] sm:$0xff] }
0x19b9   : > { %v12403_v12 = vpop.permute.xlu1 %4999 }
0x19ba   : > { %v12359_v49 = vpop.permute.xlu0 %4945  ;;  %v5023_v23 = vsel %vm13818_vm15, %v12403_v12, 0  ;;  %vm13826_vm15 = vcmask 23552  }
0x19bb   : > { %5139 = vrot.lane.b32.xlu1 %v12273_v48, %s13597_s11  ;;  %v4962_v1 = vsel %vm13809_vm0, 0, %v12359_v49 }
0x19bc   : > { %5045 = vrot.lane.b32.xlu0 %v4980_v61, %s13597_s11 }
0x19bd   : > { %v12413_v43 = vpop.permute.xlu1 %4995 }
0x19be   : > { %v12366_v39 = vpop.permute.xlu0 %4993  ;;  %v5017_v51 = vsel %vm13820_vm3, %v12413_v43, 0 }
0x19bf   : > { %5089 = vrot.lane.b32.xlu1 %v4974_v62, %s13601_s22  ;;  %v5014_v22 = vsel %vm13821_vm9, %v12366_v39, 0  ;;  %v5376_v62 = vld [vmem:[%s13823_s0 + $0x38] sm:$0xff] }
0x19c0   : > { %5091 = vrot.lane.b32.xlu0 %v4977_v7, %s13601_s22  ;;  %v5375_v7 = vld [vmem:[%s13823_s0 + $0x30] sm:$0xff] }
0x19c1   : > { %v12423_v0 = vpop.permute.xlu1 %4991 }
0x19c2   : > { %v5144_v25 = vpop.permute.xlu0 %5143 }
0x19c3   : > { %v5167_v63 = vsel %vm13815_vm10, 0, %v5144_v25  ;;  %5093 = vrot.lane.b32.xlu1 %v4980_v61, %s13601_s22  ;;  %vm13822_vm10 = vmmov %vm13809_vm0  ;;  %v5374_v61 = vld [vmem:[%s13823_s0 + $0x28] sm:$0xff]  ;;  %v5369_v25 = vld [vmem:[%s13823_s0] sm:$0xff] }
0x19c4   : > { %5037 = vrot.lane.b32.xlu0 %v4968_v34, %s13597_s11  ;;  %9500 = vmatprep.subr.msk.bf16.mxu0 %vm11836_vm6, %v5167_v63  ;;  %v5011_v27 = vsel %vm13822_vm10, %v12423_v0, 0  ;;  %v5372_v63 = vld [vmem:[%s13823_s0 + $0x18] sm:$0xff] }
0x19c5   : > { %v12434_v20 = vpop.permute.xlu1 %4989 }
0x19c6   : > { %v12415_v50 = vpop.permute.xlu0 %4997  ;;  %v5008_v18 = vsel %vm13824_vm13, %v12434_v20, 0 }
0x19c7   : > { %5035 = vrot.lane.b32.xlu1 %v4965_v15, %s13597_s11  ;;  %v5020_v13 = vsel %vm13819_vm12, %v12415_v50, 0  ;;  %vm13827_vm12 = vcmask 7168  }
0x19c8   : > { %5137 = vrot.lane.b32.xlu0 %v12291_v24, %s13597_s11  ;;  %vm13828_vm3 = vmmov %vm13827_vm12 }
0x19c9   : > { %v12442_v56 = vpop.permute.xlu1 %4987  ;;  %vm13829_vm9 = vmmov %vm13828_vm3 }
0x19ca   : > { %v5005_v21 = vsel %vm13825_vm5, %v12442_v56, 0  ;;  %vm13830_vm10 = vmmov %vm13828_vm3 }
0x19cb   : > { %5135 = vrot.lane.b32.xlu1 %v12287_v42, %s13597_s11  ;;  %vm13831_vm13 = vmmov %vm13828_vm3 }
0x19cc   : > { %5087 = vrot.lane.b32.xlu0 %v4971_v47, %s13601_s22  ;;  %v5373_v47 = vld [vmem:[%s13823_s0 + $0x20] sm:$0xff]  ;;  %vm13832_vm5 = vmmov %vm13826_vm15 }
0x19cd   : > { %v12451_v37 = vpop.permute.xlu1 %4985 }
0x19ce   : > { %v5002_v45 = vsel %vm13809_vm0, %v12451_v37, 0  ;;  %vm13833_vm0 = vmmov %vm13828_vm3 }
0x19cf   : > { %5085 = vrot.lane.b32.xlu1 %v4968_v34, %s13601_s22  ;;  %v5370_v34 = vld [vmem:[%s13823_s0 + $0x8] sm:$0xff]  ;;  %s13944_s0 = smov 1  }
0x19d0   : > { %5033 = vrot.lane.b32.xlu0 %v4962_v1, %s13597_s11 }
0x19d3   : > { %5191 = vrot.lane.b32.xlu1 %v12249_v46, %s13601_s22 }
0x19d4   : > { %5133 = vrot.lane.b32.xlu0 %v12303_v11, %s13597_s11 }
0x19d7   : > { %5131 = vrot.lane.b32.xlu1 %v12299_v17, %s13597_s11 }
0x19d8   : > { %5083 = vrot.lane.b32.xlu0 %v4965_v15, %s13601_s22  ;;  %v5142_v15 = vpop.permute.xlu0 %5141 }
0x19db   : > { %5081 = vrot.lane.b32.xlu1 %v4962_v1, %s13601_s22 }
0x19dc   : > { %5189 = vrot.lane.b32.xlu0 %v12265_v54, %s13601_s22 }
0x19df   : > { %5187 = vrot.lane.b32.xlu1 %v12273_v48, %s13601_s22 }
0x19e0   : > { %5129 = vrot.lane.b32.xlu0 %v12311_v35, %s13597_s11 }
0x19e3   : > { %5185 = vrot.lane.b32.xlu1 %v12291_v24, %s13601_s22 }
0x19e4   : > { %5247 = vrot.lane.b32.xlu0 %v5023_v23, %s13597_s11 }
0x19e7   : > { %5183 = vrot.lane.b32.xlu1 %v12287_v42, %s13601_s22 }
0x19e8   : > { %5245 = vrot.lane.b32.xlu0 %v5020_v13, %s13597_s11 }
0x19eb   : > { %5181 = vrot.lane.b32.xlu1 %v12303_v11, %s13601_s22 }
0x19ec   : > { %5243 = vrot.lane.b32.xlu0 %v5017_v51, %s13597_s11 }
0x19ef   : > { %5179 = vrot.lane.b32.xlu1 %v12299_v17, %s13601_s22 }
0x19f0   : > { %5241 = vrot.lane.b32.xlu0 %v5014_v22, %s13597_s11 }
0x19f3   : > { %5177 = vrot.lane.b32.xlu1 %v12311_v35, %s13601_s22 }
0x19f4   : > { %5239 = vrot.lane.b32.xlu0 %v5011_v27, %s13597_s11 }
0x19f7   : > { %5295 = vrot.lane.b32.xlu1 %v5023_v23, %s13601_s22 }
0x19f8   : > { %5237 = vrot.lane.b32.xlu0 %v5008_v18, %s13597_s11 }
0x19fb   : > { %5293 = vrot.lane.b32.xlu1 %v5020_v13, %s13601_s22 }
0x19fc   : > { %5235 = vrot.lane.b32.xlu0 %v5005_v21, %s13597_s11 }
0x19ff   : > { %5291 = vrot.lane.b32.xlu1 %v5017_v51, %s13601_s22 }
0x1a00   : > { %5233 = vrot.lane.b32.xlu0 %v5002_v45, %s13597_s11 }
0x1a03   : > { %5287 = vrot.lane.b32.xlu1 %v5011_v27, %s13601_s22 }
0x1a04   : > { %5289 = vrot.lane.b32.xlu0 %v5014_v22, %s13601_s22 }
0x1a07   : > { %5283 = vrot.lane.b32.xlu1 %v5005_v21, %s13601_s22 }
0x1a08   : > { %5285 = vrot.lane.b32.xlu0 %v5008_v18, %s13601_s22  ;;  %v5164_v18 = vsel %vm13828_vm3, 0, %v5142_v15  ;;  %vm13836_vm3 = vmmov %vm13833_vm0 }
0x1a0b   : > { %5409 = vperm.xlu1 %9856, %v5375_v7  }
0x1a0c   : > { %5281 = vrot.lane.b32.xlu0 %v5002_v45, %s13601_s22 }
0x1a0f   : > { %5399 = vperm.xlu1 %9856, %v5373_v47  }
0x1a10   : > { %5414 = vperm.xlu0 %9845, %v5376_v62  }
0x1a13   : > { %5389 = vperm.xlu1 %9856, %v5371_v60  }
0x1a14   : > { %5404 = vperm.xlu0 %9845, %v5374_v61  }
0x1a17   : > { %5379 = vperm.xlu1 %9856, %v5369_v25  }
0x1a18   : > { %5394 = vperm.xlu0 %9845, %v5372_v63  }
0x1a1c   : > { %5384 = vperm.xlu0 %9845, %v5370_v34  }
0x1a21   : > { %v5044_v3 = vpop.permute.xlu0 %5043 }
0x1a22   : > { %v5065_v60 = vsel %vm13830_vm10, 0, %v5044_v3  ;;  %vm13838_vm10 = vmmov %vm13833_vm0 }
0x1a23   : > { %v5078_v63 = vsel %vm11836_vm6, %v5065_v60, 0 }
0x1a25   : > { %v5040_v1 = vpop.permute.xlu1 %5039 }
0x1a26   : > { %v5042_v58 = vpop.permute.xlu0 %5041 }
0x1a29   : > { %v5096_v23 = vpop.permute.xlu1 %5095 }
0x1a2a   : > { %v5119_v13 = vsel %vm13826_vm15, %v5096_v23, 0  ;;  %v5048_v51 = vpop.permute.xlu0 %5047  ;;  %vm13834_vm15 = vmmov %vm13832_vm5 }
0x1a2b   : > { %v5128_v22 = vsel %vm11866_vm4, %v5119_v13, 0  ;;  %v5071_v27 = vsel %vm13827_vm12, 0, %v5048_v51  ;;  %vm13835_vm12 = vmmov %vm13833_vm0 }
0x1a2c   : > { %v5080_v21 = vsel %vm11836_vm6, %v5071_v27, 0  ;;  %8946 = vmatpush3.bf16.msra.mxu0 %v5128_v22 }
0x1a2d   : > { %v5140_v45 = vpop.permute.xlu1 %5139  ;;  %8906 = vmatpush3.bf16.msra.mxu1 %v5080_v21  ;;  %9501 = vmatprep.subr.msk.bf16.mxu0 %vm11836_vm6, %v5164_v18 }
0x1a2e   : > { %8907 = vmatprep.subr.msk.bf16.mxu1 %vm11883_vm7, %v12339_v5  ;;  %v5046_v7 = vpop.permute.xlu0 %5045  ;;  %v5062_v5 = vsel %vm13831_vm13, 0, %v5042_v58  ;;  %v5161_v13 = vsel %vm13833_vm0, 0, %v5140_v45  ;;  %v5059_v58 = vsel %vm13835_vm12, 0, %v5040_v1  ;;  %vm13839_vm13 = vmmov %vm13833_vm0 }
0x1a2f   : > { %v5068_v47 = vsel %vm13829_vm9, 0, %v5046_v7  ;;  %v5076_v21 = vsel %vm11836_vm6, %v5059_v58, 0  ;;  %vm13837_vm9 = vmmov %vm13832_vm5  ;;  %v9988_v58 = vld [vmem:[%s13814_s10] ss:$36 sps:$4 sm:$0xff]  }
0x1a30   : > { %v5079_v62 = vsel %vm11836_vm6, %v5068_v47, 0  ;;  %vm13841_vm12 = vmmov %vm13833_vm0 }
0x1a31   : > { %v5090_v61 = vpop.permute.xlu1 %5089  ;;  %8908 = vmatpush3.bf16.msra.mxu1 %v5079_v62 }
0x1a32   : > { %8909 = vmatprep.subr.msk.bf16.mxu1 %vm11883_vm7, %v12337_v33  ;;  %v5092_v25 = vpop.permute.xlu0 %5091  ;;  %v5077_v33 = vsel %vm11836_vm6, %v5062_v5, 0  ;;  %v5110_v1 = vsel %vm13837_vm9, %v5090_v61, 0  ;;  %vm13843_vm9 = vmmov %vm13832_vm5 }
0x1a33   : > { %v5113_v51 = vsel %vm13834_vm15, %v5092_v25, 0  ;;  %v5125_v47 = vsel %vm11866_vm4, %v5110_v1, 0  ;;  %vm13840_vm15 = vmmov %vm13832_vm5 }
0x1a34   : > { %v5126_v27 = vsel %vm11866_vm4, %v5113_v51, 0 }
0x1a35   : > { %v5094_v34 = vpop.permute.xlu1 %5093  ;;  %8910 = vmatpush3.bf16.msra.mxu1 %v5078_v63 }
0x1a36   : > { %v5116_v15 = vsel %vm13832_vm5, %v5094_v34, 0  ;;  %8911 = vmatprep.subr.msk.bf16.mxu1 %vm11883_vm7, %v12346_v2  ;;  %v5038_v3 = vpop.permute.xlu0 %5037 }
0x1a37   : > { %v5127_v23 = vsel %vm11866_vm4, %v5116_v15, 0  ;;  %v5056_v45 = vsel %vm13838_vm10, 0, %v5038_v3  ;;  %vm13844_vm10 = vmmov %vm13833_vm0 }
0x1a38   : > { %8948 = vmatpush3.bf16.msra.mxu0 %v5127_v23  ;;  %v5075_v62 = vsel %vm11836_vm6, %v5056_v45, 0 }
0x1a39   : > { %v5036_v22 = vpop.permute.xlu1 %5035  ;;  %8912 = vmatpush3.bf16.msra.mxu1 %v5077_v33  ;;  %9502 = vmatprep.subr.msk.bf16.mxu0 %vm11836_vm6, %v5161_v13 }
0x1a3a   : > { %8913 = vmatprep.subr.msk.bf16.mxu1 %vm11883_vm7, %v12344_v57  ;;  %v5138_v2 = vpop.permute.xlu0 %5137  ;;  %v5053_v25 = vsel %vm13833_vm0, 0, %v5036_v22 }
0x1a3b   : > { %v5158_v18 = vsel %vm13836_vm3, 0, %v5138_v2  ;;  %v5074_v34 = vsel %vm11836_vm6, %v5053_v25, 0  ;;  %vm13842_vm3 = vmmov %vm13833_vm0 }
0x1a3c   : > { %8950 = vmatpush3.bf16.msra.mxu0 %v5126_v27  ;;  %vm13846_vm0 = vmmov %vm13832_vm5 }
0x1a3d   : > { %v5136_v7 = vpop.permute.xlu1 %5135  ;;  %8914 = vmatpush3.bf16.msra.mxu1 %v5076_v21  ;;  %9503 = vmatprep.subr.msk.bf16.mxu0 %vm11836_vm6, %v5158_v18  ;;  %v9991_v18 = vld [vmem:[%s13814_s10 + $0x4c] ss:$36 sps:$4 sm:$0xff]  }
0x1a3e   : > { %8915 = vmatprep.subr.msk.bf16.mxu1 %vm11883_vm7, %v12354_v19  ;;  %v5088_v57 = vpop.permute.xlu0 %5087  ;;  %v5155_v60 = vsel %vm13839_vm13, 0, %v5136_v7  ;;  %vm13845_vm13 = vmmov %vm13832_vm5 }
0x1a3f   : > { %v5107_v61 = vsel %vm13832_vm5, %v5088_v57, 0 }
0x1a40   : > { %8952 = vmatpush3.bf16.msra.mxu0 %v5125_v47  ;;  %v5124_v5 = vsel %vm11866_vm4, %v5107_v61, 0  ;;  %v9993_v47 = vld [vmem:[%s13814_s10 + $0x48] ss:$36 sps:$4 sm:$0xff]  }
0x1a41   : > { %v5086_v63 = vpop.permute.xlu1 %5085  ;;  %8916 = vmatpush3.bf16.msra.mxu1 %v5075_v62  ;;  %9504 = vmatprep.subr.msk.bf16.mxu0 %vm11836_vm6, %v5155_v60 }
0x1a42   : > { %8917 = vmatprep.subr.msk.bf16.mxu1 %vm11883_vm7, %v12370_v6  ;;  %v5034_v19 = vpop.permute.xlu0 %5033  ;;  %v5104_v15 = vsel %vm13840_vm15, %v5086_v63, 0  ;;  %vm13847_vm15 = vmmov %vm13846_vm0  ;;  %v9997_v63 = vld [vmem:[%s13814_s10 + $0x94] ss:$36 sps:$4 sm:$0xff]  }
0x1a43   : > { %v5050_v3 = vsel %vm13841_vm12, 0, %v5034_v19  ;;  %v5123_v13 = vsel %vm11866_vm4, %v5104_v15, 0  ;;  %vm13848_vm12 = vmmov %vm13842_vm3 }
0x1a44   : > { %8954 = vmatpush3.bf16.msra.mxu0 %v5124_v5  ;;  %v5073_v51 = vsel %vm11836_vm6, %v5050_v3, 0  ;;  %v9994_v5 = vld [vmem:[%s13814_s10 + $0x8] ss:$36 sps:$4 sm:$0xff]   ;;  %v10000_v3 = vld [vmem:[%s13814_s10 + $0x54] ss:$36 sps:$4 sm:$0xff]  }
0x1a45   : > { %v5192_v23 = vpop.permute.xlu1 %5191  ;;  %8918 = vmatpush3.bf16.msra.mxu1 %v5074_v34 }
0x1a46   : > { %8919 = vmatprep.subr.msk.bf16.mxu1 %vm11883_vm7, %v12359_v49  ;;  %v5134_v6 = vpop.permute.xlu0 %5133  ;;  %v5215_v22 = vsel %vm13843_vm9, %v5192_v23, 0  ;;  %vm13850_vm9 = vcmask 15360  }
0x1a47   : > { %v5152_v33 = vsel %vm13842_vm3, 0, %v5134_v6  ;;  %vm13849_vm3 = vmmov %vm13846_vm0 }
0x1a48   : > { %9505 = vmatprep.subr.msk.bf16.mxu0 %vm11836_vm6, %v5152_v33 }
0x1a49   : > { %v5132_v2 = vpop.permute.xlu1 %5131  ;;  %8920 = vmatpush3.bf16.msra.mxu1 %v5073_v51  ;;  %8956 = vmatpush3.bf16.msra.mxu0 %v5123_v13  ;;  %v10003_v51 = vld [vmem:[%s13814_s10 + $0xdc] ss:$36 sps:$4 sm:$0xff]  }
0x1a4a   : > { %v5149_v49 = vsel %vm13844_vm10, 0, %v5132_v2  ;;  %9508 = vmatprep.subr.msk.bf16.mxu1 %vm11866_vm4, %v5215_v22  ;;  %v5084_v27 = vpop.permute.xlu0 %5083 }
0x1a4b   : > { %v5101_v21 = vsel %vm13845_vm13, %v5084_v27, 0  ;;  %9506 = vmatprep.subr.msk.bf16.mxu0 %vm11836_vm6, %v5149_v49  ;;  %vm13851_vm13 = vmmov %vm13846_vm0  ;;  %v10006_v27 = vld [vmem:[%s13814_s10 + $0x9c] ss:$36 sps:$4 sm:$0xff]  }
0x1a4c   : > { %v5122_v1 = vsel %vm11866_vm4, %v5101_v21, 0  ;;  %5634 = vmatmul.mubr.bf16.vlgmr.msra.gmra.mxu1 %v9988_v58 }
0x1a4d   : > { %v5082_v45 = vpop.permute.xlu1 %5081  ;;  %8958 = vmatpush3.bf16.msra.mxu0 %v5122_v1  ;;  %8986 = vmatpush3.bf16.msra.mxu1 %v12249_v46 }
0x1a4e   : > { %v5190_v7 = vpop.permute.xlu0 %5189  ;;  %5641 = vmatprep.mubr.bf16.mxu1 %v9991_v18  ;;  %v5098_v62 = vsel %vm13846_vm0, %v5082_v45, 0  ;;  %vm13853_vm0 = vmmov %vm13844_vm10 }
0x1a4f   : > { %v5212_v57 = vsel %vm13832_vm5, %v5190_v7, 0  ;;  %v5121_v19 = vsel %vm11866_vm4, %v5098_v62, 0  ;;  %vm13852_vm5 = vmmov %vm13850_vm9  ;;  %v10011_v7 = vld [vmem:[%s13814_s10 + $0x14] ss:$36 sps:$4 sm:$0xff]  }
0x1a50   : > { %9509 = vmatprep.subr.msk.bf16.mxu1 %vm11866_vm4, %v5212_v57 }
0x1a51   : > { %v5188_v60 = vpop.permute.xlu1 %5187  ;;  %8988 = vmatpush3.bf16.msra.mxu1 %v12265_v54 }
0x1a52   : > { %v5209_v61 = vsel %vm13847_vm15, %v5188_v60, 0  ;;  %v5130_v25 = vpop.permute.xlu0 %5129  ;;  %vm13854_vm15 = vmmov %vm13849_vm3 }
0x1a53   : > { %v5146_v46 = vsel %vm13848_vm12, 0, %v5130_v25  ;;  %9510 = vmatprep.subr.msk.bf16.mxu1 %vm11866_vm4, %v5209_v61  ;;  %vm13855_vm12 = vmmov %vm13852_vm5  ;;  %v10012_v61 = vld [vmem:[%s13814_s10 + $0xe4] ss:$36 sps:$4 sm:$0xff]  }
0x1a54   : > { %5642 = vmatmul.mubr.bf16.gmra.mxu1 %v9993_v47  ;;  %9507 = vmatprep.subr.msk.bf16.mxu0 %vm11836_vm6, %v5146_v46 }
0x1a55   : > { %v5186_v54 = vpop.permute.xlu1 %5185  ;;  %8960 = vmatpush3.bf16.msra.mxu0 %v5121_v19  ;;  %8990 = vmatpush3.bf16.msra.mxu1 %v12273_v48  ;;  %v9999_v48 = vld [vmem:[%s13814_s10 + $0x90] ss:$36 sps:$4 sm:$0xff]  }
0x1a56   : > { %v5206_v34 = vsel %vm13849_vm3, %v5186_v54, 0  ;;  %9516 = vmatprep.subr.msk.bf16.mxu0 %vm13850_vm9, %v12403_v12  ;;  %v5248_v15 = vpop.permute.xlu0 %5247  ;;  %5649 = vmatprep.mubr.bf16.mxu1 %v9997_v63  ;;  %vm13856_vm3 = vmmov %vm13853_vm0 }
0x1a57   : > { %v5271_v23 = vsel %vm13844_vm10, 0, %v5248_v15  ;;  %9511 = vmatprep.subr.msk.bf16.mxu1 %vm11866_vm4, %v5206_v34  ;;  %vm13857_vm9 = vmmov %vm13851_vm13  ;;  %v10014_v15 = vld [vmem:[%s13814_s10 + $0xe0] ss:$36 sps:$4 sm:$0xff]  }
0x1a58   : > { %v5280_v6 = vsel %vm11836_vm6, %v5271_v23, 0  ;;  %5699 = vmatmul.mubr.bf16.vlgmr.msra.gmra.mxu0 %v9994_v5  ;;  %vm13858_vm10 = vmmov %vm13852_vm5  ;;  %v10015_v5 = vld [vmem:[%s13814_s10 + $0x5c] ss:$36 sps:$4 sm:$0xff]  }
0x1a59   : > { %v5184_v33 = vpop.permute.xlu1 %5183  ;;  %8992 = vmatpush3.bf16.msra.mxu1 %v12291_v24  ;;  %9026 = vmatpush3.bf16.msra.mxu0 %v5280_v6  ;;  %v10002_v24 = vld [vmem:[%s13814_s10 + $0x50] ss:$36 sps:$4 sm:$0xff]   ;;  %v10020_v6 = vld [vmem:[%s13814_s10 + $0x1c] ss:$36 sps:$4 sm:$0xff]  }
0x1a5a   : > { %v5203_v12 = vsel %vm13851_vm13, %v5184_v33, 0  ;;  %9517 = vmatprep.subr.msk.bf16.mxu0 %vm13852_vm5, %v12415_v50  ;;  %v5246_v13 = vpop.permute.xlu0 %5245  ;;  %5706 = vmatprep.mubr.bf16.mxu0 %v10000_v3  ;;  %vm13859_vm13 = vmmov %vm13853_vm0 }
0x1a5b   : > { %v5268_v58 = vsel %vm13853_vm0, 0, %v5246_v13  ;;  %9512 = vmatprep.subr.msk.bf16.mxu1 %vm11866_vm4, %v5203_v12  ;;  %vm13860_vm5 = vmmov %vm13857_vm9  ;;  %v10017_v13 = vld [vmem:[%s13814_s10 + $0x58] ss:$36 sps:$4 sm:$0xff]  }
0x1a5c   : > { %v5279_v22 = vsel %vm11836_vm6, %v5268_v58, 0  ;;  %5650 = vmatmul.mubr.bf16.gmra.mxu1 %v9999_v48  ;;  %vm13861_vm0 = vmmov %vm13858_vm10 }
0x1a5d   : > { %v5182_v2 = vpop.permute.xlu1 %5181  ;;  %8994 = vmatpush3.bf16.msra.mxu1 %v12287_v42  ;;  %9028 = vmatpush3.bf16.msra.mxu0 %v5279_v22  ;;  %v10005_v42 = vld [vmem:[%s13814_s10 + $0xd8] ss:$36 sps:$4 sm:$0xff]   ;;  %v10021_v22 = vld [vmem:[%s13814_s10 + $0xa4] ss:$36 sps:$4 sm:$0xff]  }
0x1a5e   : > { %v5200_v50 = vsel %vm13854_vm15, %v5182_v2, 0  ;;  %9518 = vmatprep.subr.msk.bf16.mxu0 %vm13855_vm12, %v12413_v43  ;;  %v5244_v49 = vpop.permute.xlu0 %5243  ;;  %5657 = vmatprep.mubr.bf16.mxu1 %v10003_v51  ;;  %vm13862_vm15 = vmmov %vm13856_vm3 }
0x1a5f   : > { %v5265_v18 = vsel %vm13856_vm3, 0, %v5244_v49  ;;  %9513 = vmatprep.subr.msk.bf16.mxu1 %vm11866_vm4, %v5200_v50  ;;  %vm13863_vm12 = vmmov %vm13860_vm5  ;;  %v10018_v49 = vld [vmem:[%s13814_s10 + $0x18] ss:$36 sps:$4 sm:$0xff]  }
0x1a60   : > { %v5278_v21 = vsel %vm11836_vm6, %v5265_v18, 0  ;;  %5707 = vmatmul.mubr.bf16.gmra.mxu0 %v10002_v24  ;;  %vm13864_vm3 = vmmov %vm13861_vm0 }
0x1a61   : > { %v5180_v1 = vpop.permute.xlu1 %5179  ;;  %8996 = vmatpush3.bf16.msra.mxu1 %v12303_v11  ;;  %9030 = vmatpush3.bf16.msra.mxu0 %v5278_v21  ;;  %v10008_v11 = vld [vmem:[%s13814_s10 + $0x98] ss:$36 sps:$4 sm:$0xff]  }
0x1a62   : > { %v5197_v43 = vsel %vm13857_vm9, %v5180_v1, 0  ;;  %9519 = vmatprep.subr.msk.bf16.mxu0 %vm13858_vm10, %v12366_v39  ;;  %v5242_v45 = vpop.permute.xlu0 %5241  ;;  %5714 = vmatprep.mubr.bf16.mxu0 %v10006_v27  ;;  %vm13865_vm9 = vmmov %vm13859_vm13  ;;  %v10023_v1 = vld [vmem:[%s13814_s10 + $0xa0] ss:$36 sps:$4 sm:$0xff]  }
0x1a63   : > { %v5262_v57 = vsel %vm13859_vm13, 0, %v5242_v45  ;;  %9514 = vmatprep.subr.msk.bf16.mxu1 %vm11866_vm4, %v5197_v43  ;;  %vm13866_vm10 = vmmov %vm13860_vm5  ;;  %v10027_v45 = vld [vmem:[%s13814_s10 + $0xec] ss:$36 sps:$4 sm:$0xff]  }
0x1a64   : > { %v5277_v47 = vsel %vm11836_vm6, %v5262_v57, 0  ;;  %5658 = vmatmul.mubr.bf16.gmra.mxu1 %v10005_v42  ;;  %vm13867_vm13 = vmmov %vm13861_vm0 }
0x1a65   : > { %v5178_v62 = vpop.permute.xlu1 %5177  ;;  %8998 = vmatpush3.bf16.msra.mxu1 %v12299_v17  ;;  %9032 = vmatpush3.bf16.msra.mxu0 %v5277_v47  ;;  %v10009_v17 = vld [vmem:[%s13814_s10 + $0x10] ss:$36 sps:$4 sm:$0xff]   ;;  %v10026_v47 = vld [vmem:[%s13814_s10 + $0x60] ss:$36 sps:$4 sm:$0xff]  }
0x1a66   : > { %v5194_v39 = vsel %vm13860_vm5, %v5178_v62, 0  ;;  %9520 = vmatprep.subr.msk.bf16.mxu0 %vm13861_vm0, %v12423_v0  ;;  %v5240_v60 = vpop.permute.xlu0 %5239  ;;  %5763 = vmatprep.mubr.bf16.mxu1 %v10011_v7  ;;  %vm13868_vm5 = vmmov %vm13865_vm9  ;;  %v10030_v62 = vld [vmem:[%s13814_s10 + $0xac] ss:$36 sps:$4 sm:$0xff]  }
0x1a67   : > { %v5259_v25 = vsel %vm13862_vm15, 0, %v5240_v60  ;;  %9515 = vmatprep.subr.msk.bf16.mxu1 %vm11866_vm4, %v5194_v39  ;;  %vm13869_vm0 = vmmov %vm13866_vm10 }
0x1a68   : > { %v5276_v63 = vsel %vm11836_vm6, %v5259_v25, 0  ;;  %5715 = vmatmul.mubr.bf16.gmra.mxu0 %v10008_v11  ;;  %vm13870_vm15 = vmmov %vm13864_vm3 }
0x1a69   : > { %v5296_v46 = vpop.permute.xlu1 %5295  ;;  %9000 = vmatpush3.bf16.msra.mxu1 %v12311_v35  ;;  %9034 = vmatpush3.bf16.msra.mxu0 %v5276_v63  ;;  %v10033_v63 = vld [vmem:[%s13814_s10 + $0x20] ss:$36 sps:$4 sm:$0xff]  }
0x1a6a   : > { %v5319_v0 = vsel %vm13863_vm12, %v5296_v46, 0  ;;  %9521 = vmatprep.subr.msk.bf16.mxu0 %vm13864_vm3, %v12434_v20  ;;  %v5238_v19 = vpop.permute.xlu0 %5237  ;;  %5722 = vmatprep.mubr.bf16.mxu0 %v10012_v61  ;;  %vm13871_vm12 = vmmov %vm13868_vm5  ;;  %v10029_v61 = vld [vmem:[%s13814_s10 + $0xe8] ss:$36 sps:$4 sm:$0xff]  }
0x1a6b   : > { %v5328_v54 = vsel %vm11866_vm4, %v5319_v0, 0  ;;  %v5256_v34 = vsel %vm13865_vm9, 0, %v5238_v19  ;;  %9524 = vmatprep.subr.msk.bf16.mxu1 %vm11866_vm4, %v5319_v0  ;;  %vm13872_vm3 = vmmov %vm13869_vm0  ;;  %v10032_v0 = vld [vmem:[%s13814_s10 + $0xa8] ss:$36 sps:$4 sm:$0xff]  }
0x1a6c   : > { %v5275_v35 = vsel %vm11836_vm6, %v5256_v34, 0  ;;  %5764 = vmatmul.mubr.bf16.vlgmr.msra.gmra.mxu1 %v10009_v17  ;;  %vm13873_vm9 = vmmov %vm13869_vm0  ;;  %v10034_v34 = vld [vmem:[%s13814_s10 + $0x68] ss:$36 sps:$4 sm:$0xff]  }
0x1a6d   : > { %v5294_v3 = vpop.permute.xlu1 %5293  ;;  %9036 = vmatpush3.bf16.msra.mxu0 %v5275_v35  ;;  %9386 = vmatpush3.bf16.msra.mxu1 %v5328_v54  ;;  %v10038_v35 = vld [vmem:[%s13814_s10 + $0xb0] ss:$36 sps:$4 sm:$0xff]  }
0x1a6e   : > { %v5316_v20 = vsel %vm13866_vm10, %v5294_v3, 0  ;;  %9522 = vmatprep.subr.msk.bf16.mxu0 %vm13867_vm13, %v12442_v56  ;;  %v5236_v23 = vpop.permute.xlu0 %5235  ;;  %5771 = vmatprep.mubr.bf16.mxu1 %v10015_v5  ;;  %vm13874_vm10 = vmmov %vm13869_vm0  ;;  %v10035_v5 = vld [vmem:[%s13814_s10 + $0xf4] ss:$36 sps:$4 sm:$0xff]  }
0x1a6f   : > { %v5327_v48 = vsel %vm11866_vm4, %v5316_v20, 0  ;;  %v5253_v33 = vsel %vm13868_vm5, 0, %v5236_v23  ;;  %9525 = vmatprep.subr.msk.bf16.mxu1 %vm11866_vm4, %v5316_v20  ;;  %vm13875_vm13 = vmmov %vm13869_vm0  ;;  %v10039_v3 = vld [vmem:[%s13814_s10 + $0xf8] ss:$36 sps:$4 sm:$0xff]  }
0x1a70   : > { %v5274_v12 = vsel %vm11836_vm6, %v5253_v33, 0  ;;  %5723 = vmatmul.mubr.bf16.gmra.mxu0 %v10014_v15  ;;  %vm13876_vm5 = vmmov %vm13869_vm0  ;;  %v10037_v15 = vld [vmem:[%s13814_s10 + $0xf0] ss:$36 sps:$4 sm:$0xff]  }
0x1a71   : > { %v5292_v51 = vpop.permute.xlu1 %5291  ;;  %9038 = vmatpush3.bf16.msra.mxu0 %v5274_v12  ;;  %9388 = vmatpush3.bf16.msra.mxu1 %v5327_v48 }
0x1a72   : > { %v5313_v56 = vsel %vm13869_vm0, %v5292_v51, 0  ;;  %9523 = vmatprep.subr.msk.bf16.mxu0 %vm13870_vm15, %v12451_v37  ;;  %v5234_v58 = vpop.permute.xlu0 %5233  ;;  %5828 = vmatprep.mubr.bf16.mxu0 %v10020_v6  ;;  %v10024_v37 = vld [vmem:[%s13814_s10 + $0x64] ss:$36 sps:$4 sm:$0xff]   ;;  %vm13897_vm0 = vmmov %vm13870_vm15 }
0x1a73   : > { %v5326_v24 = vsel %vm11866_vm4, %v5313_v56, 0  ;;  %v5250_v2 = vsel %vm13871_vm12, 0, %v5234_v58  ;;  %9526 = vmatprep.subr.msk.bf16.mxu1 %vm11866_vm4, %v5313_v56  ;;  %vm13898_vm15 = vmmov %vm13897_vm0 }
0x1a74   : > { %v5273_v50 = vsel %vm11836_vm6, %v5250_v2, 0  ;;  %5772 = vmatmul.mubr.bf16.gmra.mxu1 %v10017_v13  ;;  %vm13899_vm12 = vmmov %vm13897_vm0 }
0x1a75   : > { %9040 = vmatpush3.bf16.msra.mxu0 %v5273_v50  ;;  %9390 = vmatpush3.bf16.msra.mxu1 %v5326_v24  ;;  %v5288_v27 = vpop.permute.xlu1 %5287 }
0x1a76   : > { %v5290_v18 = vpop.permute.xlu0 %5289  ;;  %5779 = vmatprep.mubr.bf16.mxu1 %v10021_v22  ;;  %v5307_v43 = vsel %vm13873_vm9, %v5288_v27, 0  ;;  %vm13901_vm9 = vcmask 7168  }
0x1a77   : > { %v5310_v21 = vsel %vm13872_vm3, %v5290_v18, 0  ;;  %v5324_v57 = vsel %vm11866_vm4, %v5307_v43, 0  ;;  %vm13900_vm3 = vmmov %vm13897_vm0 }
0x1a78   : > { %v5325_v42 = vsel %vm11866_vm4, %v5310_v21, 0  ;;  %5829 = vmatmul.mubr.bf16.vlgmr.msra.gmra.mxu0 %v10018_v49  ;;  %9527 = vmatprep.subr.msk.bf16.mxu1 %vm11866_vm4, %v5310_v21 }
0x1a79   : > { %9392 = vmatpush3.bf16.msra.mxu1 %v5325_v42  ;;  %5836 = vmatprep.mubr.bf16.mxu0 %v10024_v37  ;;  %v5284_v39 = vpop.permute.xlu1 %5283 }
0x1a7a   : > { %9528 = vmatprep.subr.msk.bf16.mxu1 %vm11866_vm4, %v5307_v43  ;;  %v5286_v7 = vpop.permute.xlu0 %5285  ;;  %v5301_v25 = vsel %vm13875_vm13, %v5284_v39, 0  ;;  %vm13903_vm13 = vmmov %vm13897_vm0 }
0x1a7b   : > { %v5304_v11 = vsel %vm13874_vm10, %v5286_v7, 0  ;;  %v5322_v46 = vsel %vm11866_vm4, %v5301_v25, 0  ;;  %vm13902_vm10 = vmmov %vm13876_vm5 }
0x1a7c   : > { %5780 = vmatmul.mubr.bf16.gmra.mxu1 %v10023_v1  ;;  %v5323_v60 = vsel %vm11866_vm4, %v5304_v11, 0 }
0x1a7d   : > { %9394 = vmatpush3.bf16.msra.mxu1 %v5324_v57  ;;  %5787 = vmatprep.mubr.bf16.mxu1 %v10027_v45 }
0x1a7e   : > { %9529 = vmatprep.subr.msk.bf16.mxu1 %vm11866_vm4, %v5304_v11  ;;  %v5282_v17 = vpop.permute.xlu0 %5281 }
0x1a7f   : > { %v5298_v19 = vsel %vm13876_vm5, %v5282_v17, 0  ;;  %vm13906_vm5 = vmmov %vm13897_vm0 }
0x1a80   : > { %5837 = vmatmul.mubr.bf16.gmra.mxu0 %v10026_v47  ;;  %v5321_v54 = vsel %vm11866_vm4, %v5298_v19, 0 }
0x1a81   : > { %9396 = vmatpush3.bf16.msra.mxu1 %v5323_v60  ;;  %5844 = vmatprep.mubr.bf16.mxu0 %v10030_v62 }
0x1a82   : > { %9530 = vmatprep.subr.msk.bf16.mxu1 %vm11866_vm4, %v5301_v25 }
0x1a84   : > { %5788 = vmatmul.mubr.bf16.gmra.mxu1 %v10029_v61 }
0x1a85   : > { %9398 = vmatpush3.bf16.msra.mxu1 %v5322_v46  ;;  %9401 = vmatprep.mubr.bf16.mxu1 %v10033_v63 }
0x1a86   : > { %9531 = vmatprep.subr.msk.bf16.mxu1 %vm11866_vm4, %v5298_v19  ;;  %v12707_v20 = vpop.permute.xlu1 %5409 }
0x1a87   : > { %13877 = vst [vmem:[#allocation99_spill] sm:$0xff] %v12707_v20 }
0x1a88   : > { %5845 = vmatmul.mubr.bf16.gmra.mxu0 %v10032_v0 }
0x1a89   : > { %9400 = vmatpush3.bf16.msra.mxu1 %v5321_v54  ;;  %5852 = vmatprep.mubr.bf16.mxu0 %v10035_v5 }
0x1a8a   : > { %v12709_v6 = vpop.permute.xlu1 %5399 }
0x1a8b   : > { %13878 = vst [vmem:[#allocation100_spill] sm:$0xff] %v12709_v6 }
0x1a8c   : > { %9402 = vmatmul.mubr.bf16.vlgmr.msra.gmra.mxu1 %v10034_v34 }
0x1a8d   : > { %9405 = vmatprep.mubr.bf16.mxu1 %v10038_v35 }
0x1a8e   : > { %v12711_v51 = vpop.permute.xlu1 %5389 }
0x1a90   : > { %5853 = vmatmul.mubr.bf16.gmra.mxu0 %v10037_v15 }
0x1a92   : > { %v5380_v50 = vpop.permute.xlu1 %5379 }
0x1a94   : > { %9406 = vmatmul.mubr.bf16.gmra.mxu1 %v10039_v3 }
0x1b0c   : > { %v8921_v23 = vpop.f32.mrf.mxu1 }
0x1b0e   : > { %v8922_v48 = vpop.f32.mrf.mxu1 }
0x1b0f   : > { %v8923_v33 = vadd.f32 %v8922_v48, %v8921_v23 }
0x1b10   : > { %v8924_v12 = vpop.f32.mrf.mxu1 }
0x1b11   : > { %v5636_v27 = vadd.f32 %v8923_v33, %v5380_v50 }
0x1b12   : > { %v8925_v13 = vpop.f32.mrf.mxu1 }
0x1b13   : > { %v12713_v56 = vadd.f32 %v8925_v13, %v8924_v12  ;;  %v5415_v13 = vpop.permute.xlu0 %5414 }
0x1b14   : > { %v8927_v58 = vpop.f32.mrf.mxu1 }
0x1b16   : > { %v8928_v22 = vpop.f32.mrf.mxu1 }
0x1b17   : > { %v5405_v32 = vpop.permute.xlu0 %5404  ;;  %v8929_v40 = vadd.f32 %v8928_v22, %v8927_v58 }
0x1b18   : > { %v8930_v24 = vpop.f32.mrf.mxu1  ;;  %v8961_v2 = vpop.f32.mrf.mxu0 }
0x1b1a   : > { %v8931_v49 = vpop.f32.mrf.mxu1  ;;  %v8962_v37 = vpop.f32.mrf.mxu0 }
0x1b1b   : > { %v8963_v18 = vadd.f32 %v8962_v37, %v8961_v2  ;;  %v5395_v14 = vpop.permute.xlu0 %5394  ;;  %v8932_v52 = vadd.f32 %v8931_v49, %v8930_v24 }
0x1b1c   : > { %v8933_v21 = vpop.f32.mrf.mxu1  ;;  %v8964_v42 = vpop.f32.mrf.mxu0 }
0x1b1d   : > { %v12715_v1 = vadd.f32 %v8963_v18, %v5636_v27  ;;  %v5647_v20 = vadd.f32 %v8932_v52, %v5395_v14 }
0x1b1e   : > { %v8934_v43 = vpop.f32.mrf.mxu1  ;;  %v8965_v45 = vpop.f32.mrf.mxu0 }
0x1b1f   : > { %v8966_v53 = vadd.f32 %v8965_v45, %v8964_v42  ;;  %v5385_v16 = vpop.permute.xlu0 %5384 }
0x1b20   : > { %v8936_v7 = vpop.f32.mrf.mxu1  ;;  %v12717_v57 = vpop.f32.mrf.mxu0  ;;  %v5639_v8 = vadd.f32 %v12713_v56, %v5385_v16 }
0x1b21   : > { %13879 = vst [vmem:[#allocation101_spill] sm:$0xff] %v12717_v57 }
0x1b22   : > { %v8937_v47 = vpop.f32.mrf.mxu1  ;;  %v12719_v11 = vpop.f32.mrf.mxu0  ;;  %v5704_v6 = vadd.f32 %v8966_v53, %v5639_v8 }
0x1b23   : > { %13880 = vst [vmem:[#allocation102_spill] sm:$0xff] %v12719_v11 }
0x1b24   : > { %v8939_v62 = vpop.f32.mrf.mxu1  ;;  %v8970_v39 = vpop.f32.mrf.mxu0 }
0x1b26   : > { %v8940_v60 = vpop.f32.mrf.mxu1  ;;  %v8971_v61 = vpop.f32.mrf.mxu0 }
0x1b27   : > { %v8972_v58 = vadd.f32 %v8971_v61, %v8970_v39 }
0x1b28   : > { %v8942_v25 = vpop.f32.mrf.mxu1  ;;  %v8973_v63 = vpop.f32.mrf.mxu0  ;;  %v13889_v53 = vld [vmem:[#allocation101_spill] sm:$0xff] }
0x1b2a   : > { %v8943_v17 = vpop.f32.mrf.mxu1  ;;  %v8974_v46 = vpop.f32.mrf.mxu0  ;;  %v13890_v52 = vld [vmem:[#allocation102_spill] sm:$0xff] }
0x1b2b   : > { %v8944_v42 = vadd.f32 %v8943_v17, %v8942_v25  ;;  %v8975_v45 = vadd.f32 %v8974_v46, %v8973_v63  ;;  %v8969_v8 = vadd.f32 %v13890_v52, %v13889_v53 }
0x1b2c   : > { %v8976_v0 = vpop.f32.mrf.mxu0  ;;  %v9001_v19 = vpop.f32.mrf.mxu1 }
0x1b2e   : > { %v8977_v5 = vpop.f32.mrf.mxu0  ;;  %v9002_v54 = vpop.f32.mrf.mxu1 }
0x1b2f   : > { %v9003_v41 = vadd.f32 %v9002_v54, %v9001_v19  ;;  %v5712_v19 = vadd.f32 %v8972_v58, %v5647_v20 }
0x1b30   : > { %v8979_v34 = vpop.f32.mrf.mxu0  ;;  %v9004_v35 = vpop.f32.mrf.mxu1 }
0x1b31   : > { %v5766_v16 = vadd.f32 %v9003_v41, %v12715_v1 }
0x1b32   : > { %v8980_v15 = vpop.f32.mrf.mxu0  ;;  %v9005_v3 = vpop.f32.mrf.mxu1 }
0x1b33   : > { %v9006_v11 = vadd.f32 %v9005_v3, %v9004_v35  ;;  %v8981_v22 = vadd.f32 %v8980_v15, %v8979_v34 }
0x1b34   : > { %v8982_v23 = vpop.f32.mrf.mxu0  ;;  %v12721_v48 = vpop.f32.mrf.mxu1 }
0x1b35   : > { %13881 = vst [vmem:[#allocation103_spill] sm:$0xff] %v12721_v48  ;;  %v8941_v48 = vadd.f32 %v8940_v60, %v8939_v62  ;;  %v13888_v62 = vld [vmem:[#allocation99_spill] sm:$0xff]  ;;  %v5769_v39 = vadd.f32 %v9006_v11, %v5704_v6 }
0x1b36   : > { %v8983_v33 = vpop.f32.mrf.mxu0  ;;  %v12723_v12 = vpop.f32.mrf.mxu1 }
0x1b37   : > { %13882 = vst [vmem:[#allocation104_spill] sm:$0xff] %v12723_v12  ;;  %v8935_v12 = vadd.f32 %v8934_v43, %v8933_v21  ;;  %v13887_v21 = vld [vmem:[#allocation100_spill] sm:$0xff]  ;;  %v5660_v60 = vadd.f32 %v8941_v48, %v13888_v62  ;;  %v8984_v63 = vadd.f32 %v8983_v33, %v8982_v23 }
0x1b38   : > { %v12725_v2 = vpop.f32.mrf.mxu1  ;;  %v9041_v50 = vpop.f32.mrf.mxu0 }
0x1b39   : > { %13883 = vst [vmem:[#allocation105_spill] sm:$0xff] %v12725_v2  ;;  %v8938_v2 = vadd.f32 %v8937_v47, %v8936_v7  ;;  %v5652_v43 = vadd.f32 %v8935_v12, %v13887_v21  ;;  %v5725_v25 = vadd.f32 %v8981_v22, %v5660_v60 }
0x1b3a   : > { %v12727_v37 = vpop.f32.mrf.mxu1  ;;  %v9042_v27 = vpop.f32.mrf.mxu0 }
0x1b3b   : > { %13884 = vst [vmem:[#allocation106_spill] sm:$0xff] %v12727_v37  ;;  %v9043_v57 = vadd.f32 %v9042_v27, %v9041_v50  ;;  %v5655_v14 = vadd.f32 %v8938_v2, %v5405_v32  ;;  %v5717_v1 = vadd.f32 %v8975_v45, %v5652_v43 }
0x1b3c   : > { %v9013_v18 = vpop.f32.mrf.mxu1  ;;  %v9044_v28 = vpop.f32.mrf.mxu0 }
0x1b3d   : > { %v5831_v61 = vadd.f32 %v9043_v57, %v5766_v16 }
0x1b3e   : > { %v9014_v31 = vpop.f32.mrf.mxu1  ;;  %v9045_v38 = vpop.f32.mrf.mxu0  ;;  %v13894_v23 = vld [vmem:[#allocation104_spill] sm:$0xff] }
0x1b3f   : > { %v9046_v56 = vadd.f32 %v9045_v38, %v9044_v28  ;;  %v9015_v17 = vadd.f32 %v9014_v31, %v9013_v18  ;;  %v5663_v38 = vadd.f32 %v8944_v42, %v5415_v13  ;;  %v13893_v31 = vld [vmem:[#allocation103_spill] sm:$0xff] }
0x1b40   : > { %v9016_v10 = vpop.f32.mrf.mxu1  ;;  %v12729_v9 = vpop.f32.mrf.mxu0  ;;  %v9009_v48 = vadd.f32 %v13894_v23, %v13893_v31 }
0x1b41   : > { %13885 = vst [vmem:[#allocation107_spill] sm:$0xff] %v12729_v9  ;;  %v5834_v54 = vadd.f32 %v9046_v56, %v5769_v39  ;;  %v5728_v3 = vadd.f32 %v8984_v63, %v5663_v38  ;;  %v5782_v33 = vadd.f32 %v9015_v17, %v5717_v1 }
0x1b42   : > { %v9017_v29 = vpop.f32.mrf.mxu1  ;;  %v12731_v4 = vpop.f32.mrf.mxu0 }
0x1b43   : > { %13886 = vst [vmem:[#allocation108_spill] sm:$0xff] %v12731_v4  ;;  %v5644_v4 = vadd.f32 %v8929_v40, %v12711_v51  ;;  %v8978_v40 = vadd.f32 %v8977_v5, %v8976_v0  ;;  %v9018_v32 = vadd.f32 %v9017_v29, %v9016_v10 }
0x1b44   : > { %v9019_v55 = vpop.f32.mrf.mxu1  ;;  %v9050_v44 = vpop.f32.mrf.mxu0 }
0x1b45   : > { %v5720_v0 = vadd.f32 %v8978_v40, %v5655_v14  ;;  %v5709_v10 = vadd.f32 %v8969_v8, %v5644_v4 }
0x1b46   : > { %v9020_v59 = vpop.f32.mrf.mxu1  ;;  %v9051_v36 = vpop.f32.mrf.mxu0 }
0x1b47   : > { %v9021_v51 = vadd.f32 %v9020_v59, %v9019_v55  ;;  %v13891_v55 = vld [vmem:[#allocation105_spill] sm:$0xff]  ;;  %v13892_v59 = vld [vmem:[#allocation106_spill] sm:$0xff]  ;;  %v9052_v12 = vadd.f32 %v9051_v36, %v9050_v44  ;;  %v5785_v22 = vadd.f32 %v9018_v32, %v5720_v0  ;;  %v5774_v44 = vadd.f32 %v9009_v48, %v5709_v10 }
0x1b48   : > { %v9022_v30 = vpop.f32.mrf.mxu1  ;;  %v9053_v26 = vpop.f32.mrf.mxu0  ;;  %v9012_v5 = vadd.f32 %v13892_v59, %v13891_v55  ;;  %v13895_v42 = vld [vmem:[#allocation107_spill] sm:$0xff]  ;;  %v10045_v48 = vld [vmem:[#allocation17 + $0x8] ss:$20 sps:$4 sm:$0xff]  }
0x1b49   : > { %v5790_v34 = vadd.f32 %v9021_v51, %v5725_v25  ;;  %v10042_v32 = vld [vmem:[#allocation17 + $0x4] ss:$20 sps:$4 sm:$0xff]  }
0x1b4a   : > { %v9023_v9 = vpop.f32.mrf.mxu1  ;;  %v9054_v37 = vpop.f32.mrf.mxu0  ;;  %v5777_v29 = vadd.f32 %v9012_v5, %v5712_v19  ;;  %6258 = vmatprep.mubr.bf16.mxu0 %v10042_v32 }
0x1b4b   : > { %v9024_v6 = vadd.f32 %v9023_v9, %v9022_v30  ;;  %v9055_v57 = vadd.f32 %v9054_v37, %v9053_v26  ;;  %v13896_v9 = vld [vmem:[#allocation108_spill] sm:$0xff] }
0x1b4c   : > { %v9056_v24 = vpop.f32.mrf.mxu0  ;;  %v12735_v49 = vpop.f32.mrf.mxu1  ;;  %v9049_v26 = vadd.f32 %v13896_v9, %v13895_v42  ;;  %v5842_v36 = vadd.f32 %v9052_v12, %v5777_v29 }
0x1b4d   : > { %v5793_v45 = vadd.f32 %v9024_v6, %v5728_v3  ;;  %v5847_v21 = vadd.f32 %v9055_v57, %v5782_v33 }
0x1b4e   : > { %v9057_v7 = vpop.f32.mrf.mxu0  ;;  %v5895_v47 = vpop.f32.mrf.mxu1  ;;  %v5839_v4 = vadd.f32 %v9049_v26, %v5774_v44 }
0x1b4f   : > { %v5896_v46 = vadd.f32 %v5895_v47, %v5831_v61  ;;  %v9058_v50 = vadd.f32 %v9057_v7, %v9056_v24 }
0x1b50   : > { %v9059_v41 = vpop.f32.mrf.mxu0  ;;  %v9404_v28 = vpop.f32.mrf.mxu1  ;;  %v5904_v53 = vadd.f32 %v12735_v49, %v5839_v4 }
0x1b51   : > { %v5926_v27 = vmax.f32 %v5896_v46, 0.0  ;;  %v5850_v40 = vadd.f32 %v9058_v50, %v5785_v22  ;;  %v5907_v7 = vadd.f32 %v9404_v28, %v5842_v36 }
0x1b52   : > { %v9060_v35 = vpop.f32.mrf.mxu0  ;;  %v5898_v15 = vpop.f32.mrf.mxu1  ;;  %v5928_v17 = vmax.f32 %v5904_v53, 0.0 }
0x1b53   : > { %v9061_v20 = vadd.f32 %v9060_v35, %v9059_v41  ;;  %v5899_v11 = vadd.f32 %v5898_v15, %v5834_v54  ;;  %v5929_v19 = vmax.f32 %v5907_v7, 0.0 }
0x1b54   : > { %v9062_v13 = vpop.f32.mrf.mxu0  ;;  %v9407_v2 = vpop.f32.mrf.mxu1 }
0x1b55   : > { %v5927_v18 = vmax.f32 %v5899_v11, 0.0  ;;  %v5855_v58 = vadd.f32 %v9061_v20, %v5790_v34  ;;  %v12759_v41 = vpack.c.bf16 %v5929_v19, %v5928_v17 }
0x1b56   : > { %v9063_v30 = vpop.f32.mrf.mxu0  ;;  %v5911_v37 = vpop.f32.mrf.mxu1 }
0x1b57   : > { %v12748_v16 = vpack.c.bf16 %v5927_v18, %v5926_v27  ;;  %v9064_v56 = vadd.f32 %v9063_v30, %v9062_v13  ;;  %v5920_v24 = vadd.f32 %v9407_v2, %v5855_v58  ;;  %v5912_v62 = vadd.f32 %v5911_v37, %v5847_v21  ;;  %v10047_v13 = vld [vmem:[#allocation17 + $0xc] ss:$20 sps:$4 sm:$0xff]  }
0x1b58   : > { %v9408_v43 = vpop.f32.mrf.mxu1  ;;  %6307 = vmatprep.mubr.bf16.mxu1 %v10047_v13  ;;  %v10052_v13 = vld [vmem:[#allocation17 + $0x10] ss:$20 sps:$4 sm:$0xff]  }
0x1b59   : > { %v5858_v60 = vadd.f32 %v9064_v56, %v5793_v45  ;;  %v5932_v52 = vmax.f32 %v5920_v24, 0.0  ;;  %v5930_v8 = vmax.f32 %v5912_v62, 0.0 }
0x1b5a   : > { %v5914_v51 = vpop.f32.mrf.mxu1 }
0x1b5b   : > { %v5923_v47 = vadd.f32 %v9408_v43, %v5858_v60  ;;  %v5915_v14 = vadd.f32 %v5914_v51, %v5850_v40 }
0x1b5d   : > { %v5933_v39 = vmax.f32 %v5923_v47, 0.0  ;;  %v5931_v61 = vmax.f32 %v5915_v14, 0.0 }
0x1b5f   : > { %v12751_v25 = vpack.c.bf16 %v5933_v39, %v5932_v52  ;;  %v12753_v63 = vpack.c.bf16 %v5931_v61, %v5930_v8 }
0x1b61   : > { %5948 = vrot.lane.b32.xlu1 %v12751_v25, %s10692_s9  ;;  %5946 = vrot.lane.b32.xlu0 %v12753_v63, %s10692_s9 }
0x1b65   : > { %5968 = vrot.lane.b32.xlu0 %v12751_v25, %s10691_s18  ;;  %5944 = vrot.lane.b32.xlu1 %v12759_v41, %s10692_s9 }
0x1b69   : > { %5966 = vrot.lane.b32.xlu0 %v12753_v63, %s10691_s18  ;;  %5942 = vrot.lane.b32.xlu1 %v12748_v16, %s10692_s9  ;;  %s13938_s9 = smov 124  }
0x1b6d   : > { %5962 = vrot.lane.b32.xlu0 %v12748_v16, %s10691_s18  ;;  %5964 = vrot.lane.b32.xlu1 %v12759_v41, %s10691_s18  ;;  %s13911_s18 = sld [smem:[#allocation59_spill]] }
0x1b71   : > { %6064 = vrot.lane.b32.xlu0 %v12751_v25, %s13601_s22  ;;  %6040 = vrot.lane.b32.xlu1 %v12751_v25, %s13597_s11 }
0x1b73   : > { %v6147_v56 = vld [vmem:[%s13911_s18 + $0x8] sm:$0xff]  ;;  %v6146_v44 = vld [vmem:[%s13911_s18] sm:$0xff]  ;;  %v6149_v43 = vld [vmem:[%s13911_s18 + $0x18] sm:$0xff] }
0x1b74   : > { %v6148_v24 = vld [vmem:[%s13911_s18 + $0x10] sm:$0xff] }
0x1b75   : > { %6058 = vrot.lane.b32.xlu0 %v12748_v16, %s13601_s22  ;;  %6036 = vrot.lane.b32.xlu1 %v12759_v41, %s13597_s11 }
0x1b79   : > { %6038 = vrot.lane.b32.xlu0 %v12753_v63, %s13597_s11  ;;  %6034 = vrot.lane.b32.xlu1 %v12748_v16, %s13597_s11 }
0x1b7d   : > { %6062 = vrot.lane.b32.xlu0 %v12753_v63, %s13601_s22  ;;  %6060 = vrot.lane.b32.xlu1 %v12759_v41, %s13601_s22 }
0x1bd3   : > { %v5949_v49 = vpop.permute.xlu1 %5948  ;;  %v5947_v28 = vpop.permute.xlu0 %5946 }
0x1bd4   : > { %v5960_v55 = vsel %vm13899_vm12, 0, %v5949_v49  ;;  %v5957_v34 = vsel %vm13900_vm3, 0, %v5947_v28  ;;  %vm13909_vm12 = vmmov %vm13901_vm9 }
0x1bd5   : > { %vm13910_vm3 = vmmov %vm13897_vm0 }
0x1bd7   : > { %v5945_v38 = vpop.permute.xlu1 %5944  ;;  %v5969_v1 = vpop.permute.xlu0 %5968 }
0x1bd8   : > { %9540 = vmatprep.subr.msk.bf16.mxu1 %vm13897_vm0, %v5969_v1  ;;  %v5954_v46 = vsel %vm13898_vm15, 0, %v5945_v38  ;;  %v5980_v23 = vsel %vm13906_vm5, %v5969_v1, 0  ;;  %vm13908_vm15 = vmmov %vm13897_vm0 }
0x1bd9   : > { %6012 = vrot.lane.b32.xlu0 %v5954_v46, %s13601_s22  ;;  %5988 = vrot.lane.b32.xlu1 %v5954_v46, %s13597_s11  ;;  %vm13913_vm5 = vmmov %vm13901_vm9 }
0x1bdb   : > { %v5943_v54 = vpop.permute.xlu1 %5942  ;;  %v5967_v0 = vpop.permute.xlu0 %5966 }
0x1bdc   : > { %v5951_v20 = vsel %vm13903_vm13, 0, %v5943_v54  ;;  %v5977_v2 = vsel %vm13908_vm15, %v5967_v0, 0  ;;  %vm13912_vm13 = vmmov %vm13897_vm0 }
0x1bdd   : > { %6016 = vrot.lane.b32.xlu0 %v5960_v55, %s13601_s22  ;;  %5992 = vrot.lane.b32.xlu1 %v5960_v55, %s13597_s11  ;;  %vm13915_vm15 = vmmov %vm13910_vm3 }
0x1bdf   : > { %v5965_v59 = vpop.permute.xlu1 %5964  ;;  %v5963_v5 = vpop.permute.xlu0 %5962 }
0x1be0   : > { %v5974_v58 = vsel %vm13910_vm3, %v5965_v59, 0  ;;  %v5971_v26 = vsel %vm13912_vm13, %v5963_v5, 0  ;;  %vm13920_vm13 = vmmov %vm13913_vm5 }
0x1be1   : > { %6014 = vrot.lane.b32.xlu1 %v5957_v34, %s13601_s22  ;;  %5990 = vrot.lane.b32.xlu0 %v5957_v34, %s13597_s11 }
0x1be3   : > { %v6041_v35 = vpop.permute.xlu1 %6040  ;;  %v6065_v15 = vpop.permute.xlu0 %6064 }
0x1be4   : > { %v6052_v6 = vsel %vm13901_vm9, 0, %v6041_v35  ;;  %v6076_v57 = vsel %vm13902_vm10, %v6065_v15, 0  ;;  %v10043_v35 = vld [vmem:[#allocation17 + $0x2c] ss:$20 sps:$4 sm:$0xff]  }
0x1be5   : > { %v6081_v3 = vsel %vm11866_vm4, %v6076_v57, 0  ;;  %9532 = vmatprep.subr.msk.bf16.mxu0 %vm11836_vm6, %v6052_v6  ;;  %5986 = vrot.lane.b32.xlu0 %v5951_v20, %s13597_s11 }
0x1be6   : > { %6092 = vrot.lane.b32.xlu1 %v5980_v23, %s13597_s11  ;;  %9078 = vmatpush3.bf16.msk.msra.mxu0 %vm11883_vm7, %v5949_v49 }
0x1be7   : > { %9106 = vmatpush3.bf16.msra.mxu1 %v6081_v3  ;;  %v6037_v33 = vpop.permute.xlu1 %6036  ;;  %v6059_v12 = vpop.permute.xlu0 %6058 }
0x1be8   : > { %9541 = vmatprep.subr.msk.bf16.mxu1 %vm13897_vm0, %v5967_v0  ;;  %v6046_v10 = vsel %vm13901_vm9, 0, %v6037_v33  ;;  %vm13914_vm0 = vmmov %vm13902_vm10  ;;  %v10048_v33 = vld [vmem:[#allocation17 + $0x28] ss:$20 sps:$4 sm:$0xff]  }
0x1be9   : > { %6090 = vrot.lane.b32.xlu0 %v5977_v2, %s13597_s11  ;;  %vm13918_vm9 = vmmov %vm13914_vm0 }
0x1bea   : > { %6010 = vrot.lane.b32.xlu1 %v5951_v20, %s13601_s22 }
0x1beb   : > { %v6035_v50 = vpop.permute.xlu1 %6034  ;;  %v6039_v27 = vpop.permute.xlu0 %6038 }
0x1bec   : > { %v6049_v18 = vsel %vm13909_vm12, 0, %v6039_v27  ;;  %v6043_v30 = vsel %vm13913_vm5, 0, %v6035_v50  ;;  %vm13916_vm12 = vmmov %vm13914_vm0 }
0x1bed   : > { %6116 = vrot.lane.b32.xlu0 %v5980_v23, %s13601_s22  ;;  %9533 = vmatprep.subr.msk.bf16.mxu0 %vm11836_vm6, %v6049_v18  ;;  %v6067_v21 = vsel %vm13916_vm12, %v6059_v12, 0  ;;  %vm13922_vm12 = vmmov %vm13913_vm5 }
0x1bee   : > { %6088 = vrot.lane.b32.xlu1 %v5974_v58, %s13597_s11  ;;  %9080 = vmatpush3.bf16.msk.msra.mxu0 %vm11883_vm7, %v5947_v28  ;;  %v6078_v36 = vsel %vm11866_vm4, %v6067_v21, 0 }
0x1bef   : > { %9534 = vmatprep.subr.msk.bf16.mxu0 %vm11836_vm6, %v6046_v10  ;;  %v6063_v29 = vpop.permute.xlu0 %6062  ;;  %v6061_v22 = vpop.permute.xlu1 %6060  ;;  %v6377_v10 = vld [vmem:[#allocation26] sm:$0xf] }
0x1bf0   : > { %v6073_v42 = vsel %vm13902_vm10, %v6063_v29, 0  ;;  %v6070_v37 = vsel %vm13914_vm0, %v6061_v22, 0  ;;  %vm13919_vm10 = vmmov %vm13914_vm0 }
0x1bf1   : > { %v6080_v9 = vsel %vm11866_vm4, %v6073_v42, 0  ;;  %6114 = vrot.lane.b32.xlu0 %v5977_v2, %s13601_s22  ;;  %v6079_v45 = vsel %vm11866_vm4, %v6070_v37, 0 }
0x1bf2   : > { %6086 = vrot.lane.b32.xlu1 %v5971_v26, %s13597_s11  ;;  %9082 = vmatpush3.bf16.msk.msra.mxu0 %vm11883_vm7, %v5945_v38  ;;  %s13939_s11 = smov 4  }
0x1bf3   : > { %9108 = vmatpush3.bf16.msra.mxu1 %v6080_v9  ;;  %9535 = vmatprep.subr.msk.bf16.mxu0 %vm11836_vm6, %v6043_v30 }
0x1bf4   : > { %9542 = vmatprep.subr.msk.bf16.mxu1 %vm13915_vm15, %v5965_v59  ;;  %vm13921_vm15 = vmmov %vm13913_vm5 }
0x1bf5   : > { %6110 = vrot.lane.b32.xlu0 %v5971_v26, %s13601_s22 }
0x1bf6   : > { %6112 = vrot.lane.b32.xlu1 %v5974_v58, %s13601_s22  ;;  %9084 = vmatpush3.bf16.msk.msra.mxu0 %vm11883_vm7, %v5943_v54  ;;  %vm13917_vm7 = vmmov %vm13913_vm5  ;;  %v10053_v58 = vld [vmem:[#allocation17 + $0x38] ss:$20 sps:$4 sm:$0xff]  }
0x1bf7   : > { %9110 = vmatpush3.bf16.msra.mxu1 %v6079_v45 }
0x1bf8   : > { %9543 = vmatprep.subr.msk.bf16.mxu1 %vm13910_vm3, %v5963_v5  ;;  %vm13923_vm3 = vmmov %vm13913_vm5  ;;  %v10040_v5 = vld [vmem:[#allocation17] ss:$20 sps:$4 sm:$0xff]  }
0x1bf9   : > { %6157 = vperm.xlu0 %9845, %v6147_v56  }
0x1bfa   : > { %6152 = vperm.xlu1 %9856, %v6146_v44  }
0x1bfb   : > { %9112 = vmatpush3.bf16.msra.mxu1 %v6078_v36 }
0x1bfd   : > { %6167 = vperm.xlu0 %9845, %v6149_v43  }
0x1bfe   : > { %6162 = vperm.xlu1 %9856, %v6148_v24  }
0x1c4b   : > { %v5989_v62 = vpop.permute.xlu1 %5988  ;;  %v6013_v60 = vpop.permute.xlu0 %6012 }
0x1c4c   : > { %v5998_v61 = vsel %vm13913_vm5, 0, %v5989_v62  ;;  %v6022_v19 = vsel %vm13914_vm0, %v6013_v60, 0  ;;  %vm13928_vm5 = vmmov %vm13923_vm3 }
0x1c4d   : > { %v6007_v28 = vsel %vm11836_vm6, %v5998_v61, 0 }
0x1c4f   : > { %v5993_v40 = vpop.permute.xlu1 %5992  ;;  %v6017_v4 = vpop.permute.xlu0 %6016 }
0x1c50   : > { %v6004_v51 = vsel %vm13917_vm7, 0, %v5993_v40  ;;  %v6028_v7 = vsel %vm13918_vm9, %v6017_v4, 0  ;;  %vm13924_vm7 = vmmov %vm13914_vm0 }
0x1c51   : > { %v6009_v47 = vsel %vm11836_vm6, %v6004_v51, 0  ;;  %9536 = vmatprep.subr.msk.bf16.mxu0 %vm11866_vm4, %v6028_v7  ;;  %vm13925_vm9 = vmmov %vm13914_vm0 }
0x1c52   : > { %9086 = vmatpush3.bf16.msra.mxu0 %v6009_v47 }
0x1c53   : > { %v6015_v14 = vpop.permute.xlu1 %6014  ;;  %v5991_v53 = vpop.permute.xlu0 %5990 }
0x1c54   : > { %v6025_v52 = vsel %vm13919_vm10, %v6015_v14, 0  ;;  %v6001_v8 = vsel %vm13920_vm13, 0, %v5991_v53  ;;  %vm13926_vm10 = vmmov %vm13923_vm3 }
0x1c55   : > { %v6008_v39 = vsel %vm11836_vm6, %v6001_v8, 0  ;;  %9537 = vmatprep.subr.msk.bf16.mxu0 %vm11866_vm4, %v6025_v52  ;;  %vm13927_vm13 = vmmov %vm13914_vm0 }
0x1c56   : > { %9088 = vmatpush3.bf16.msra.mxu0 %v6008_v39 }
0x1c57   : > { %9538 = vmatprep.subr.msk.bf16.mxu0 %vm11866_vm4, %v6022_v19  ;;  %v5987_v17 = vpop.permute.xlu0 %5986 }
0x1c58   : > { %v6093_v49 = vpop.permute.xlu1 %6092  ;;  %v5995_v1 = vsel %vm13922_vm12, 0, %v5987_v17 }
0x1c59   : > { %v6104_v38 = vsel %vm13921_vm15, 0, %v6093_v49  ;;  %v6006_v59 = vsel %vm11836_vm6, %v5995_v1, 0  ;;  %vm13930_vm15 = vcmask 523264  }
0x1c5a   : > { %9544 = vmatprep.subr.msk.bf16.mxu1 %vm11836_vm6, %v6104_v38  ;;  %9090 = vmatpush3.bf16.msra.mxu0 %v6007_v28  ;;  %vm13931_vm12 = vmmov %vm13930_vm15 }
0x1c5b   : > { %9114 = vmatpush3.bf16.msra.mxu1 %v12751_v25  ;;  %v6091_v46 = vpop.permute.xlu0 %6090 }
0x1c5c   : > { %v6011_v54 = vpop.permute.xlu1 %6010  ;;  %v6101_v0 = vsel %vm13923_vm3, 0, %v6091_v46  ;;  %vm13932_vm3 = vcmask 1043456  }
0x1c5d   : > { %v6019_v55 = vsel %vm13924_vm7, %v6011_v54, 0  ;;  %9545 = vmatprep.subr.msk.bf16.mxu1 %vm11836_vm6, %v6101_v0  ;;  %vm13933_vm7 = vmmov %vm13932_vm3 }
0x1c5e   : > { %9539 = vmatprep.subr.msk.bf16.mxu0 %vm11866_vm4, %v6019_v55 }
0x1c5f   : > { %9092 = vmatpush3.bf16.msra.mxu0 %v6006_v59  ;;  %9116 = vmatpush3.bf16.msra.mxu1 %v12753_v63  ;;  %v6117_v25 = vpop.permute.xlu0 %6116 }
0x1c60   : > { %v6089_v32 = vpop.permute.xlu1 %6088  ;;  %v6128_v34 = vsel %vm13925_vm9, %v6117_v25, 0 }
0x1c61   : > { %v6098_v15 = vsel %vm13926_vm10, 0, %v6089_v32  ;;  %v6133_v6 = vsel %vm11866_vm4, %v6128_v34, 0  ;;  %9548 = vmatprep.subr.msk.bf16.mxu0 %vm11866_vm4, %v6128_v34 }
0x1c62   : > { %6259 = vmatmul.mubr.bf16.vlgmr.msra.gmra.mxu0 %v10040_v5  ;;  %9546 = vmatprep.subr.msk.bf16.mxu1 %vm11836_vm6, %v6098_v15 }
0x1c63   : > { %9118 = vmatpush3.bf16.msra.mxu1 %v12759_v41  ;;  %9410 = vmatpush3.bf16.msra.mxu0 %v6133_v6  ;;  %v6115_v63 = vpop.permute.xlu0 %6114  ;;  %v10051_v41 = vld [vmem:[#allocation17 + $0x34] ss:$20 sps:$4 sm:$0xff]  }
0x1c64   : > { %v6087_v57 = vpop.permute.xlu1 %6086  ;;  %v6125_v20 = vsel %vm13927_vm13, %v6115_v63, 0  ;;  %6266 = vmatprep.mubr.bf16.mxu0 %v10043_v35 }
0x1c65   : > { %v6095_v3 = vsel %vm13928_vm5, 0, %v6087_v57  ;;  %v6132_v23 = vsel %vm11866_vm4, %v6125_v20, 0  ;;  %9549 = vmatprep.subr.msk.bf16.mxu0 %vm11866_vm4, %v6125_v20  ;;  %vm13945_vm5 = vcmask 97280  }
0x1c66   : > { %9547 = vmatprep.subr.msk.bf16.mxu1 %vm11836_vm6, %v6095_v3  ;;  %vm13929_vm6 = vmmov %vm13914_vm0 }
0x1c67   : > { %9120 = vmatpush3.bf16.msra.mxu1 %v12748_v16  ;;  %9412 = vmatpush3.bf16.msra.mxu0 %v6132_v23  ;;  %v6111_v50 = vpop.permute.xlu0 %6110  ;;  %v10049_v16 = vld [vmem:[#allocation17 + $0x30] ss:$20 sps:$4 sm:$0xff]  }
0x1c68   : > { %v6113_v12 = vpop.permute.xlu1 %6112  ;;  %v6119_v31 = vsel %vm13929_vm6, %v6111_v50, 0  ;;  %v13942_v50 = vld [vmem:[#allocation92_spill] sm:$0xff] }
0x1c69   : > { %v6122_v2 = vsel %vm13914_vm0, %v6113_v12, 0  ;;  %v6130_v18 = vsel %vm11866_vm4, %v6119_v31, 0  ;;  %v13940_v12 = vld [vmem:[#allocation94_spill] sm:$0xff] }
0x1c6a   : > { %v6131_v27 = vsel %vm11866_vm4, %v6122_v2, 0  ;;  %6267 = vmatmul.mubr.bf16.gmra.mxu0 %v10048_v33  ;;  %6308 = vmatmul.mubr.bf16.vlgmr.msra.gmra.mxu1 %v10045_v48 }
0x1c6b   : > { %9550 = vmatprep.subr.msk.bf16.mxu0 %vm11866_vm4, %v6122_v2  ;;  %6315 = vmatprep.mubr.bf16.mxu1 %v10051_v41 }
0x1c6c   : > { %9414 = vmatpush3.bf16.msra.mxu0 %v6131_v27  ;;  %9417 = vmatprep.mubr.msk.bf16.mxu0 %vm13930_vm15, %v10052_v13  ;;  %v13941_v13 = vld [vmem:[#allocation95_spill] sm:$0xff]  ;;  %v13943_v27 = vld [vmem:[#allocation93_spill] sm:$0xff]  ;;  %vm13948_vm15 = vmmov %vm13945_vm5 }
0x1c6d   : > { %9551 = vmatprep.subr.msk.bf16.mxu0 %vm11866_vm4, %v6119_v31  ;;  %vm13934_vm4 = vcmask 31744   ;;  %v12935_v2 = vpack.c.bf16 %v13941_v13, %v13940_v12  ;;  %v12943_v31 = vpack.c.bf16 %v13943_v27, %v13942_v50 }
0x1c6e   : > { %vm13935_vm9 = vmmov %vm13934_vm4 }
0x1c6f   : > { %vm13936_vm10 = vmmov %vm13934_vm4 }
0x1c70   : > { %9416 = vmatpush3.bf16.msra.mxu0 %v6130_v18  ;;  %vm13937_vm13 = vmmov %vm13934_vm4 }
0x1c71   : > { %9421 = vmatprep.subr.msk.mxu0 %vm13932_vm3, %v6377_v10  ;;  %vm13946_vm0 = vmmov %vm13934_vm4 }
0x1c72   : > { %6316 = vmatmul.mubr.bf16.gmra.mxu1 %v10049_v16  ;;  %vm13947_vm6 = vmmov %vm13946_vm0 }
0x1c73   : > { %9418 = vmatmul.mubr.msk.bf16.vlgmr.msra.gmra.mxu0 %vm13931_vm12, %v10053_v58  ;;  %vm13949_vm12 = vmmov %vm13945_vm5 }
0x1c74   : > { %9422 = vmatpush3.msk.msra.mxu0 %vm13933_vm7, %v6377_v10  ;;  %v6158_v60 = vpop.permute.xlu0 %6157  ;;  %vm13950_vm3 = vmmov %vm13946_vm0 }
0x1c75   : > { %v6153_v11 = vpop.permute.xlu1 %6152  ;;  %vm13951_vm7 = vmmov %vm13945_vm5 }
0x1c78   : > { %v6168_v46 = vpop.permute.xlu0 %6167 }
0x1c79   : > { %v6163_v47 = vpop.permute.xlu1 %6162 }
0x1d22   : > { %v9093_v29 = vpop.f32.mrf.mxu0 }
0x1d24   : > { %v9094_v22 = vpop.f32.mrf.mxu0 }
0x1d25   : > { %v9095_v56 = vadd.f32 %v9094_v22, %v9093_v29 }
0x1d26   : > { %v9096_v42 = vpop.f32.mrf.mxu0 }
0x1d27   : > { %v6261_v40 = vadd.f32 %v9095_v56, %v6153_v11 }
0x1d28   : > { %v9097_v9 = vpop.f32.mrf.mxu0 }
0x1d29   : > { %v9098_v4 = vadd.f32 %v9097_v9, %v9096_v42 }
0x1d2a   : > { %v9099_v26 = vpop.f32.mrf.mxu0  ;;  %v9121_v30 = vpop.f32.mrf.mxu1 }
0x1d2b   : > { %v6264_v17 = vadd.f32 %v9098_v4, %v6158_v60 }
0x1d2c   : > { %v9100_v37 = vpop.f32.mrf.mxu0  ;;  %v9122_v45 = vpop.f32.mrf.mxu1 }
0x1d2d   : > { %v9123_v36 = vadd.f32 %v9122_v45, %v9121_v30  ;;  %v9101_v62 = vadd.f32 %v9100_v37, %v9099_v26 }
0x1d2e   : > { %v9102_v21 = vpop.f32.mrf.mxu0  ;;  %v9124_v44 = vpop.f32.mrf.mxu1 }
0x1d2f   : > { %v6310_v52 = vadd.f32 %v9123_v36, %v6261_v40  ;;  %v6269_v8 = vadd.f32 %v9101_v62, %v6163_v47 }
0x1d30   : > { %v9103_v43 = vpop.f32.mrf.mxu0  ;;  %v9125_v24 = vpop.f32.mrf.mxu1 }
0x1d31   : > { %v9126_v14 = vadd.f32 %v9125_v24, %v9124_v44  ;;  %v9104_v39 = vadd.f32 %v9103_v43, %v9102_v21  ;;  %v10056_v21 = vld [vmem:[#allocation19 + $0x4] ss:$20 sps:$4 sm:$0xff]   ;;  %v10059_v44 = vld [vmem:[#allocation19 + $0xc] ss:$20 sps:$4 sm:$0xff]  }
0x1d32   : > { %v9127_v51 = vpop.f32.mrf.mxu1  ;;  %6802 = vmatprep.mubr.bf16.mxu1 %v10056_v21  ;;  %v10065_v21 = vld [vmem:[#allocation19 + $0x34] ss:$20 sps:$4 sm:$0xff]  }
0x1d33   : > { %v9419_v7 = vpop.f32.mrf.mxu0  ;;  %v6313_v55 = vadd.f32 %v9126_v14, %v6264_v17  ;;  %v6272_v59 = vadd.f32 %v9104_v39, %v6168_v46 }
0x1d34   : > { %v9128_v53 = vpop.f32.mrf.mxu1 }
0x1d35   : > { %v9129_v61 = vadd.f32 %v9128_v53, %v9127_v51  ;;  %v6358_v19 = vpop.f32.mrf.mxu0 }
0x1d36   : > { %v6359_v49 = vadd.f32 %v6358_v19, %v6310_v52  ;;  %v9130_v28 = vpop.f32.mrf.mxu1 }
0x1d37   : > { %v6318_v38 = vadd.f32 %v9129_v61, %v6269_v8  ;;  %v9420_v1 = vpop.f32.mrf.mxu0  ;;  %v7139_v8 = vld [vmem:[#allocation28] sm:$0xff] }
0x1d38   : > { %v6373_v54 = vmax.f32 %v6359_v49, 0.0  ;;  %v9131_v0 = vpop.f32.mrf.mxu1 }
0x1d39   : > { %v6367_v5 = vadd.f32 %v9419_v7, %v6318_v38  ;;  %v9132_v25 = vadd.f32 %v9131_v0, %v9130_v28  ;;  %v6361_v32 = vpop.f32.mrf.mxu0  ;;  %v6693_v0 = vld [vmem:[%s13962_s1 + $0x18] sm:$0xff] }
0x1d3a   : > { %v6362_v34 = vadd.f32 %v6361_v32, %v6313_v55  ;;  %9423 = vmatprep.mubr.msk.f32.mxu0 %vm13934_vm4, %v6373_v54  ;;  %vm13952_vm4 = vmmov %vm13946_vm0  ;;  %v6692_v54 = vld [vmem:[%s13962_s1 + $0x10] sm:$0xff] }
0x1d3b   : > { %v6375_v35 = vmax.f32 %v6367_v5, 0.0  ;;  %v6321_v15 = vadd.f32 %v9132_v25, %v6272_v59  ;;  %v6690_v5 = vld [vmem:[%s13962_s1] sm:$0xff]  ;;  %v6691_v25 = vld [vmem:[%s13962_s1 + $0x8] sm:$0xff]  ;;  %s14016_s1 = smov 127  }
0x1d3c   : > { %v6374_v6 = vmax.f32 %v6362_v34, 0.0 }
0x1d3d   : > { %v6370_v63 = vadd.f32 %v9420_v1, %v6321_v15 }
0x1d3e   : > { %9424 = vmatmul.mubr.msk.f32.vlgmr.msra.gmra.mxu0 %vm13935_vm9, %v6374_v6  ;;  %vm13953_vm9 = vcmask 121856  }
0x1d3f   : > { %v6376_v57 = vmax.f32 %v6370_v63, 0.0  ;;  %9426 = vmatprep.mubr.msk.f32.mxu0 %vm13936_vm10, %v6375_v35  ;;  %vm13954_vm10 = vcmask 7168  }
0x1d42   : > { %9427 = vmatmul.mubr.msk.f32.gmra.mxu0 %vm13937_vm13, %v6376_v57  ;;  %vm13955_vm13 = vmmov %vm13945_vm5 }
0x1d43   : > { %6851 = vmatprep.mubr.bf16.mxu0 %v10059_v44 }
0x1dfe   : > { %v9425_v20 = vpop.f32.mrf.mxu0 }
0x1e00   : > { %v6459_v3 = vpop.f32.mrf.mxu0 }
0x1e01   : > { %v12927_v41 = vpack.c.bf16 %v9425_v20, %v6459_v3 }
0x1e02   : > { %v9428_v23 = vpop.f32.mrf.mxu0 }
0x1e04   : > { %v6469_v48 = vpop.f32.mrf.mxu0 }
0x1e05   : > { %v12921_v33 = vpack.c.bf16 %v9428_v23, %v6469_v48 }
0x1e07   : > { %6512 = vrot.lane.b32.xlu0 %v12921_v33, %s13938_s9  ;;  %6492 = vrot.lane.b32.xlu1 %v12921_v33, %s13939_s11 }
0x1e0b   : > { %6510 = vrot.lane.b32.xlu0 %v12927_v41, %s13938_s9  ;;  %6490 = vrot.lane.b32.xlu1 %v12927_v41, %s13939_s11 }
0x1e0f   : > { %6508 = vrot.lane.b32.xlu0 %v12935_v2, %s13938_s9  ;;  %6488 = vrot.lane.b32.xlu1 %v12935_v2, %s13939_s11 }
0x1e13   : > { %6506 = vrot.lane.b32.xlu0 %v12943_v31, %s13938_s9  ;;  %6486 = vrot.lane.b32.xlu1 %v12943_v31, %s13939_s11 }
0x1e17   : > { %6606 = vrot.lane.b32.xlu0 %v12927_v41, %s13601_s22  ;;  %6582 = vrot.lane.b32.xlu1 %v12927_v41, %s13944_s0 }
0x1e1b   : > { %6604 = vrot.lane.b32.xlu0 %v12935_v2, %s13601_s22  ;;  %6580 = vrot.lane.b32.xlu1 %v12935_v2, %s13944_s0 }
0x1e1f   : > { %6608 = vrot.lane.b32.xlu0 %v12921_v33, %s13601_s22  ;;  %6584 = vrot.lane.b32.xlu1 %v12921_v33, %s13944_s0 }
0x1e23   : > { %6602 = vrot.lane.b32.xlu0 %v12943_v31, %s13601_s22  ;;  %6578 = vrot.lane.b32.xlu1 %v12943_v31, %s13944_s0 }
0x1e79   : > { %v6513_v16 = vpop.permute.xlu0 %6512  ;;  %v6493_v18 = vpop.permute.xlu1 %6492 }
0x1e7a   : > { %9560 = vmatprep.subr.msk.bf16.mxu0 %vm13945_vm5, %v6513_v16  ;;  %v6504_v9 = vsel %vm13947_vm6, 0, %v6493_v18  ;;  %v6524_v37 = vsel %vm13948_vm15, %v6513_v16, 0  ;;  %vm13957_vm5 = vmmov %vm13953_vm9 }
0x1e7b   : > { %vm13961_vm6 = vmmov %vm13951_vm7 }
0x1e7c   : > { %vm13963_vm15 = vmmov %vm13957_vm5 }
0x1e7d   : > { %v6511_v58 = vpop.permute.xlu0 %6510  ;;  %v6491_v10 = vpop.permute.xlu1 %6490 }
0x1e7e   : > { %v6501_v29 = vsel %vm13946_vm0, 0, %v6491_v10  ;;  %v6521_v45 = vsel %vm13949_vm12, %v6511_v58, 0  ;;  %vm13959_vm0 = vmmov %vm13954_vm10 }
0x1e7f   : > { %6558 = vrot.lane.b32.xlu1 %v6501_v29, %s13601_s22  ;;  %6534 = vrot.lane.b32.xlu0 %v6501_v29, %s13944_s0  ;;  %vm13964_vm12 = vmmov %vm13959_vm0 }
0x1e81   : > { %v6509_v22 = vpop.permute.xlu0 %6508  ;;  %v6489_v42 = vpop.permute.xlu1 %6488 }
0x1e82   : > { %v6498_v36 = vsel %vm13950_vm3, 0, %v6489_v42  ;;  %v6518_v62 = vsel %vm13951_vm7, %v6509_v22, 0  ;;  %vm13965_vm3 = vmmov %vm13961_vm6 }
0x1e83   : > { %6536 = vrot.lane.b32.xlu1 %v6504_v9, %s13944_s0  ;;  %6560 = vrot.lane.b32.xlu0 %v6504_v9, %s13601_s22  ;;  %vm13966_vm7 = vmmov %vm13957_vm5 }
0x1e85   : > { %v6507_v26 = vpop.permute.xlu0 %6506  ;;  %v12972_v30 = vpop.permute.xlu1 %6486 }
0x1e86   : > { %v6495_v60 = vsel %vm13952_vm4, 0, %v12972_v30  ;;  %v6515_v47 = vsel %vm13955_vm13, %v6507_v26, 0  ;;  %vm13967_vm4 = vmmov %vm13959_vm0 }
0x1e87   : > { %6636 = vrot.lane.b32.xlu1 %v6524_v37, %s13944_s0  ;;  %6634 = vrot.lane.b32.xlu0 %v6521_v45, %s13944_s0  ;;  %vm13970_vm13 = vmmov %vm13959_vm0 }
0x1e89   : > { %v6607_v11 = vpop.permute.xlu0 %6606  ;;  %v6583_v56 = vpop.permute.xlu1 %6582 }
0x1e8a   : > { %v6617_v52 = vsel %vm13957_vm5, %v6607_v11, 0  ;;  %v6593_v39 = vsel %vm13959_vm0, 0, %v6583_v56  ;;  %v10057_v11 = vld [vmem:[#allocation19 + $0x8] ss:$20 sps:$4 sm:$0xff]  }
0x1e8b   : > { %6556 = vrot.lane.b32.xlu0 %v6498_v36, %s13601_s22  ;;  %6532 = vrot.lane.b32.xlu1 %v6498_v36, %s13944_s0  ;;  %v6624_v19 = vsel %vm11644_vm8, %v6617_v52, 0 }
0x1e8d   : > { %v6605_v43 = vpop.permute.xlu0 %6604  ;;  %v6581_v24 = vpop.permute.xlu1 %6580 }
0x1e8e   : > { %v6614_v17 = vsel %vm13963_vm15, %v6605_v43, 0  ;;  %v6590_v49 = vsel %vm13964_vm12, 0, %v6581_v24  ;;  %vm13974_vm15 = vmmov %vm13967_vm4 }
0x1e8f   : > { %6632 = vrot.lane.b32.xlu1 %v6518_v62, %s13944_s0  ;;  %6530 = vrot.lane.b32.xlu0 %v6495_v60, %s13944_s0  ;;  %v6623_v1 = vsel %vm11644_vm8, %v6614_v17, 0 }
0x1e91   : > { %v6609_v40 = vpop.permute.xlu0 %6608  ;;  %v6585_v4 = vpop.permute.xlu1 %6584 }
0x1e92   : > { %v6620_v51 = vsel %vm13953_vm9, %v6609_v40, 0  ;;  %v6596_v7 = vsel %vm13954_vm10, 0, %v6585_v4  ;;  %vm13968_vm9 = vmmov %vm13965_vm3  ;;  %v10066_v4 = vld [vmem:[#allocation19 + $0x10] ss:$20 sps:$4 sm:$0xff]  }
0x1e93   : > { %v6625_v53 = vsel %vm11644_vm8, %v6620_v51, 0  ;;  %6554 = vrot.lane.b32.xlu1 %v6495_v60, %s13601_s22  ;;  %6630 = vrot.lane.b32.xlu0 %v6515_v47, %s13944_s0  ;;  %vm13969_vm10 = vmmov %vm13957_vm5  ;;  %v10063_v60 = vld [vmem:[#allocation19 + $0x30] ss:$20 sps:$4 sm:$0xff]  }
0x1e94   : > { %9552 = vmatprep.subr.msk.bf16.mxu1 %vm11636_vm1, %v6596_v7  ;;  %9173 = vmatpush3.bf16.msra.mxu0 %v6625_v53  ;;  %vm13971_vm5 = vmmov %vm13959_vm0 }
0x1e95   : > { %9145 = vmatpush3.bf16.msk.msra.mxu1 %vm11663_vm14, %v6493_v18  ;;  %9561 = vmatprep.subr.msk.bf16.mxu0 %vm13961_vm6, %v6511_v58  ;;  %v6603_v28 = vpop.permute.xlu0 %6602  ;;  %v6579_v38 = vpop.permute.xlu1 %6578  ;;  %vm13972_vm0 = vmmov %vm13966_vm7 }
0x1e96   : > { %9553 = vmatprep.subr.msk.bf16.mxu1 %vm11636_vm1, %v6593_v39  ;;  %v6611_v46 = vsel %vm13966_vm7, %v6603_v28, 0  ;;  %v6587_v55 = vsel %vm13967_vm4, 0, %v6579_v38  ;;  %vm13973_vm6 = vmmov %vm13967_vm4  ;;  %v10067_v39 = vld [vmem:[#allocation19 + $0x38] ss:$20 sps:$4 sm:$0xff]  }
0x1e97   : > { %6660 = vrot.lane.b32.xlu1 %v6524_v37, %s13601_s22  ;;  %6658 = vrot.lane.b32.xlu0 %v6521_v45, %s13601_s22  ;;  %v6622_v59 = vsel %vm11644_vm8, %v6611_v46, 0  ;;  %vm13975_vm12 = vmmov %vm13972_vm0  ;;  %v10054_v45 = vld [vmem:[#allocation19] ss:$20 sps:$4 sm:$0xff]  }
0x1e98   : > { %9175 = vmatpush3.bf16.msra.mxu0 %v6624_v19  ;;  %v13985_v19 = vmov 0.0  }
0x1e99   : > { %9147 = vmatpush3.bf16.msk.msra.mxu1 %vm11663_vm14, %v6491_v10  ;;  %9562 = vmatprep.subr.msk.bf16.mxu0 %vm13965_vm3, %v6509_v22  ;;  %vm13976_vm3 = vmmov %vm13967_vm4 }
0x1e9a   : > { %9554 = vmatprep.subr.msk.bf16.mxu1 %vm11636_vm1, %v6590_v49  ;;  %vm13977_vm7 = vmmov %vm13976_vm3 }
0x1e9b   : > { %6656 = vrot.lane.b32.xlu1 %v6518_v62, %s13601_s22  ;;  %6654 = vrot.lane.b32.xlu0 %v6515_v47, %s13601_s22  ;;  %vm13978_vm4 = vmmov %vm13976_vm3  ;;  %v10060_v62 = vld [vmem:[#allocation19 + $0x28] ss:$20 sps:$4 sm:$0xff]  }
0x1e9c   : > { %9177 = vmatpush3.bf16.msra.mxu0 %v6623_v1 }
0x1e9d   : > { %9149 = vmatpush3.bf16.msk.msra.mxu1 %vm11663_vm14, %v6489_v42  ;;  %9563 = vmatprep.subr.msk.bf16.mxu0 %vm13968_vm9, %v6507_v26  ;;  %vm13979_vm9 = vmmov %vm13976_vm3 }
0x1e9e   : > { %9555 = vmatprep.subr.msk.bf16.mxu1 %vm11636_vm1, %v6587_v55 }
0x1e9f   : > { %6706 = vperm.xlu1 %9856, %v6692_v54   ;;  %6711 = vperm.xlu0 %9845, %v6693_v0  }
0x1ea0   : > { %9179 = vmatpush3.bf16.msra.mxu0 %v6622_v59 }
0x1ea1   : > { %9151 = vmatpush3.bf16.msk.msra.mxu1 %vm11663_vm14, %v12972_v30 }
0x1ea3   : > { %6696 = vperm.xlu1 %9856, %v6690_v5   ;;  %6701 = vperm.xlu0 %9845, %v6691_v25  }
0x1ef1   : > { %v6535_v32 = vpop.permute.xlu0 %6534  ;;  %v6559_v34 = vpop.permute.xlu1 %6558 }
0x1ef2   : > { %v6545_v20 = vsel %vm13971_vm5, 0, %v6535_v32  ;;  %v6569_v3 = vsel %vm13972_vm0, %v6559_v34, 0  ;;  %vm13982_vm5 = vmmov %vm13972_vm0 }
0x1ef3   : > { %v6552_v13 = vsel %vm11636_vm1, %v6545_v20, 0 }
0x1ef5   : > { %v6561_v35 = vpop.permute.xlu0 %6560  ;;  %v6537_v15 = vpop.permute.xlu1 %6536 }
0x1ef6   : > { %v6572_v6 = vsel %vm13969_vm10, %v6561_v35, 0  ;;  %v6548_v63 = vsel %vm13970_vm13, 0, %v6537_v15  ;;  %vm13980_vm10 = vmmov %vm13972_vm0 }
0x1ef7   : > { %v6553_v57 = vsel %vm11636_vm1, %v6548_v63, 0  ;;  %9556 = vmatprep.subr.msk.bf16.mxu1 %vm11644_vm8, %v6572_v6  ;;  %vm13981_vm13 = vmmov %vm13972_vm0 }
0x1ef8   : > { %9153 = vmatpush3.bf16.msra.mxu1 %v6553_v57 }
0x1ef9   : > { %v6635_v23 = vpop.permute.xlu0 %6634  ;;  %9557 = vmatprep.subr.msk.bf16.mxu1 %vm11644_vm8, %v6569_v3  ;;  %v6637_v48 = vpop.permute.xlu1 %6636 }
0x1efa   : > { %v6648_v12 = vsel %vm13973_vm6, 0, %v6637_v48  ;;  %v6645_v50 = vsel %vm13974_vm15, 0, %v6635_v23  ;;  %vm13983_vm6 = vcmask 523264   ;;  %vm13984_vm15 = vmmov %vm13972_vm0 }
0x1efb   : > { %9564 = vmatprep.subr.msk.bf16.mxu0 %vm11636_vm1, %v6648_v12 }
0x1efc   : > { %9155 = vmatpush3.bf16.msra.mxu1 %v6552_v13  ;;  %9181 = vmatpush3.bf16.msra.mxu0 %v12921_v33 }
0x1efd   : > { %v6557_v27 = vpop.permute.xlu0 %6556  ;;  %9565 = vmatprep.subr.msk.bf16.mxu0 %vm11636_vm1, %v6645_v50  ;;  %v6533_v16 = vpop.permute.xlu1 %6532 }
0x1efe   : > { %v6566_v18 = vsel %vm13975_vm12, %v6557_v27, 0  ;;  %v6542_v58 = vsel %vm13976_vm3, 0, %v6533_v16  ;;  %vm13986_vm12 = vmmov %vm13983_vm6  ;;  %vm13987_vm3 = vmmov 0  }
0x1eff   : > { %v6551_v10 = vsel %vm11636_vm1, %v6542_v58, 0  ;;  %9558 = vmatprep.subr.msk.bf16.mxu1 %vm11644_vm8, %v6566_v18 }
0x1f00   : > { %9157 = vmatpush3.bf16.msra.mxu1 %v6551_v10  ;;  %9183 = vmatpush3.bf16.msra.mxu0 %v12927_v41 }
0x1f01   : > { %v6531_v29 = vpop.permute.xlu0 %6530  ;;  %v6633_v33 = vpop.permute.xlu1 %6632 }
0x1f02   : > { %v6642_v22 = vsel %vm13977_vm7, 0, %v6633_v33  ;;  %v6539_v42 = vsel %vm13978_vm4, 0, %v6531_v29  ;;  %vm13988_vm7 = vcmask 97280   ;;  %vm13989_vm4 = vcmask 31744  }
0x1f03   : > { %9566 = vmatprep.subr.msk.bf16.mxu0 %vm11636_vm1, %v6642_v22  ;;  %v6550_v41 = vsel %vm11636_vm1, %v6539_v42, 0 }
0x1f04   : > { %9185 = vmatpush3.bf16.msra.mxu0 %v12935_v2  ;;  %v10062_v2 = vld [vmem:[#allocation19 + $0x2c] ss:$20 sps:$4 sm:$0xff]  }
0x1f05   : > { %v6631_v9 = vpop.permute.xlu0 %6630  ;;  %v6555_v26 = vpop.permute.xlu1 %6554 }
0x1f06   : > { %v6639_v30 = vsel %vm13979_vm9, 0, %v6631_v9  ;;  %v6563_v37 = vsel %vm13980_vm10, %v6555_v26, 0  ;;  %vm13990_vm9 = vmmov %vm13988_vm7 }
0x1f07   : > { %9559 = vmatprep.subr.msk.bf16.mxu1 %vm11644_vm8, %v6563_v37  ;;  %9567 = vmatprep.subr.msk.bf16.mxu0 %vm11636_vm1, %v6639_v30  ;;  %vm13991_vm10 = vmmov %vm13988_vm7 }
0x1f08   : > { %9159 = vmatpush3.bf16.msra.mxu1 %v6550_v41  ;;  %9187 = vmatpush3.bf16.msra.mxu0 %v12943_v31 }
0x1f09   : > { %v6661_v56 = vpop.permute.xlu1 %6660  ;;  %v6659_v44 = vpop.permute.xlu0 %6658 }
0x1f0a   : > { %v6672_v36 = vsel %vm13981_vm13, %v6661_v56, 0  ;;  %v6669_v24 = vsel %vm13982_vm5, %v6659_v44, 0  ;;  %vm13992_vm13 = vmmov %vm13989_vm4  ;;  %vm13993_vm5 = vcmask 7168  }
0x1f0b   : > { %v6677_v43 = vsel %vm11644_vm8, %v6672_v36, 0  ;;  %6803 = vmatmul.mubr.bf16.vlgmr.msra.gmra.mxu1 %v10054_v45  ;;  %6852 = vmatmul.mubr.bf16.vlgmr.msra.gmra.mxu0 %v10057_v11  ;;  %v6676_v40 = vsel %vm11644_vm8, %v6669_v24, 0 }
0x1f0c   : > { %9568 = vmatprep.subr.msk.bf16.mxu1 %vm11644_vm8, %v6672_v36  ;;  %6810 = vmatprep.mubr.bf16.mxu1 %v10062_v2 }
0x1f0d   : > { %9430 = vmatpush3.bf16.msra.mxu1 %v6677_v43  ;;  %6859 = vmatprep.mubr.bf16.mxu0 %v10065_v21  ;;  %v6657_v31 = vpop.permute.xlu1 %6656  ;;  %v6655_v7 = vpop.permute.xlu0 %6654 }
0x1f0e   : > { %9569 = vmatprep.subr.msk.bf16.mxu1 %vm11644_vm8, %v6669_v24  ;;  %v6666_v51 = vsel %vm13972_vm0, %v6657_v31, 0  ;;  %v6663_v53 = vsel %vm13984_vm15, %v6655_v7, 0  ;;  %vm13995_vm0 = vmmov %vm13993_vm5 }
0x1f0f   : > { %v6675_v47 = vsel %vm11644_vm8, %v6666_v51, 0  ;;  %v6674_v52 = vsel %vm11644_vm8, %v6663_v53, 0  ;;  %vm13997_vm15 = vmmov %vm13995_vm0 }
0x1f11   : > { %9432 = vmatpush3.bf16.msra.mxu1 %v6676_v40 }
0x1f12   : > { %9570 = vmatprep.subr.msk.bf16.mxu1 %vm11644_vm8, %v6666_v51 }
0x1f13   : > { %6811 = vmatmul.mubr.bf16.gmra.mxu1 %v10060_v62  ;;  %6860 = vmatmul.mubr.bf16.gmra.mxu0 %v10063_v60 }
0x1f14   : > { %9437 = vmatprep.mubr.msk.bf16.mxu1 %vm13983_vm6, %v10066_v4  ;;  %vm13996_vm6 = vmmov %vm13988_vm7 }
0x1f15   : > { %9434 = vmatpush3.bf16.msra.mxu1 %v6675_v47 }
0x1f16   : > { %9571 = vmatprep.subr.msk.bf16.mxu1 %vm11644_vm8, %v6663_v53 }
0x1f19   : > { %9436 = vmatpush3.bf16.msra.mxu1 %v6674_v52 }
0x1f1a   : > { %9441 = vmatprep.subr.bf16.mxu1 %v13985_v19  ;;  %v6712_v5 = vpop.permute.xlu0 %6711  ;;  %v6707_v34 = vpop.permute.xlu1 %6706 }
0x1f1c   : > { %9438 = vmatmul.mubr.msk.bf16.vlgmr.msra.gmra.mxu1 %vm13986_vm12, %v10067_v39  ;;  %vm13998_vm12 = vcmask 121856  }
0x1f1d   : > { %9445 = vmatprep.mubr.msk.bf16.mxu1 %vm13987_vm3, %v13985_v19 }
0x1f1e   : > { %v6702_v13 = vpop.permute.xlu0 %6701  ;;  %v6697_v27 = vpop.permute.xlu1 %6696 }
0x1fcb   : > { %v9160_v17 = vpop.f32.mrf.mxu1  ;;  %v9188_v49 = vpop.f32.mrf.mxu0 }
0x1fcd   : > { %v9161_v28 = vpop.f32.mrf.mxu1  ;;  %v9189_v38 = vpop.f32.mrf.mxu0 }
0x1fce   : > { %v9162_v57 = vadd.f32 %v9161_v28, %v9160_v17  ;;  %v9190_v42 = vadd.f32 %v9189_v38, %v9188_v49  ;;  %v10070_v38 = vld [vmem:[#allocation20 + $0x4] ss:$12 sps:$4 sm:$0xff]  }
0x1fcf   : > { %v9163_v1 = vpop.f32.mrf.mxu1  ;;  %v9191_v46 = vpop.f32.mrf.mxu0  ;;  %7087 = vmatprep.mubr.bf16.mxu0 %v10070_v38 }
0x1fd0   : > { %v6805_v10 = vadd.f32 %v9162_v57, %v6697_v27 }
0x1fd1   : > { %v9164_v54 = vpop.f32.mrf.mxu1  ;;  %v9192_v0 = vpop.f32.mrf.mxu0 }
0x1fd2   : > { %v9165_v20 = vadd.f32 %v9164_v54, %v9163_v1  ;;  %v9193_v9 = vadd.f32 %v9192_v0, %v9191_v46  ;;  %v6854_v37 = vadd.f32 %v9190_v42, %v6805_v10  ;;  %v7140_v42 = vld [vmem:[#allocation28 + $0x8] sm:$0xff] }
0x1fd3   : > { %v9166_v55 = vpop.f32.mrf.mxu1  ;;  %v9194_v59 = vpop.f32.mrf.mxu0 }
0x1fd4   : > { %v6808_v29 = vadd.f32 %v9165_v20, %v6702_v13 }
0x1fd5   : > { %v9167_v25 = vpop.f32.mrf.mxu1  ;;  %v9195_v32 = vpop.f32.mrf.mxu0 }
0x1fd6   : > { %v9168_v35 = vadd.f32 %v9167_v25, %v9166_v55  ;;  %v9196_v3 = vadd.f32 %v9195_v32, %v9194_v59  ;;  %v6857_v45 = vadd.f32 %v9193_v9, %v6808_v29 }
0x1fd7   : > { %v9169_v15 = vpop.f32.mrf.mxu1  ;;  %v9197_v6 = vpop.f32.mrf.mxu0 }
0x1fd8   : > { %v6813_v63 = vadd.f32 %v9168_v35, %v6707_v34 }
0x1fd9   : > { %v9170_v23 = vpop.f32.mrf.mxu1  ;;  %v9198_v48 = vpop.f32.mrf.mxu0 }
0x1fda   : > { %v9171_v12 = vadd.f32 %v9170_v23, %v9169_v15  ;;  %v6862_v50 = vadd.f32 %v9196_v3, %v6813_v63  ;;  %v9199_v18 = vadd.f32 %v9198_v48, %v9197_v6 }
0x1fdc   : > { %v6816_v16 = vadd.f32 %v9171_v12, %v6712_v5  ;;  %v9439_v58 = vpop.f32.mrf.mxu1 }
0x1fdd   : > { %v6911_v26 = vadd.f32 %v9439_v58, %v6862_v50 }
0x1fde   : > { %v6902_v33 = vpop.f32.mrf.mxu1  ;;  %v6865_v22 = vadd.f32 %v9199_v18, %v6816_v16 }
0x1fdf   : > { %v6919_v2 = vmax.f32 %v6911_v26, 0.0  ;;  %v6903_v56 = vadd.f32 %v6902_v33, %v6854_v37  ;;  %v10068_v33 = vld [vmem:[#allocation20] ss:$12 sps:$4 sm:$0xff]  }
0x1fe0   : > { %v9440_v30 = vpop.f32.mrf.mxu1 }
0x1fe1   : > { %v6914_v41 = vadd.f32 %v9440_v30, %v6865_v22  ;;  %v6917_v24 = vmax.f32 %v6903_v56, 0.0  ;;  %v10071_v22 = vld [vmem:[#allocation20 + $0x8] ss:$12 sps:$4 sm:$0xff]  }
0x1fe2   : > { %v6905_v11 = vpop.f32.mrf.mxu1 }
0x1fe3   : > { %v6920_v21 = vmax.f32 %v6914_v41, 0.0  ;;  %v6906_v44 = vadd.f32 %v6905_v11, %v6857_v45 }
0x1fe5   : > { %v13098_v36 = vpack.c.bf16 %v6920_v21, %v6919_v2  ;;  %v6918_v43 = vmax.f32 %v6906_v44, 0.0 }
0x1fe7   : > { %6937 = vrot.lane.b32.xlu0 %v13098_v36, %s13938_s9  ;;  %6927 = vrot.lane.b32.xlu1 %v13098_v36, %s13939_s11  ;;  %v13104_v31 = vpack.c.bf16 %v6918_v43, %v6917_v24 }
0x1feb   : > { %6935 = vrot.lane.b32.xlu0 %v13104_v31, %s13938_s9  ;;  %6925 = vrot.lane.b32.xlu1 %v13104_v31, %s13939_s11  ;;  %s13994_s11 = sld [smem:[#allocation63_spill]]  ;;  %s14009_s9 = smov 120  }
0x1fef   : > { %6971 = vrot.lane.b32.xlu0 %v13104_v31, %s13944_s0  ;;  %6973 = vrot.lane.b32.xlu1 %v13098_v36, %s13944_s0 }
0x1ff1   : > { %v7026_v46 = vld [vmem:[%s13994_s11 + $0x8] sm:$0xff]  ;;  %v7025_v54 = vld [vmem:[%s13994_s11] sm:$0xff] }
0x2059   : > { %v6938_v62 = vpop.permute.xlu0 %6937  ;;  %v6928_v60 = vpop.permute.xlu1 %6927 }
0x205a   : > { %v6943_v40 = vsel %vm13988_vm7, %v6938_v62, 0  ;;  %v6933_v4 = vsel %vm13989_vm4, 0, %v6928_v60  ;;  %9572 = vmatprep.subr.msk.bf16.mxu0 %vm13990_vm9, %v6938_v62  ;;  %vm13999_vm7 = vmmov %vm13995_vm0 }
0x205b   : > { %6999 = vrot.lane.b32.xlu0 %v6943_v40, %s13944_s0  ;;  %6961 = vrot.lane.b32.xlu1 %v6933_v4, %s13601_s22  ;;  %vm14000_vm4 = vmmov %vm13998_vm12 }
0x205c   : > { %vm14001_vm9 = vmmov %vm14000_vm4 }
0x205d   : > { %v6936_v51 = vpop.permute.xlu0 %6935  ;;  %v6926_v7 = vpop.permute.xlu1 %6925 }
0x205e   : > { %v6940_v47 = vsel %vm13991_vm10, %v6936_v51, 0  ;;  %v6930_v53 = vsel %vm13992_vm13, 0, %v6926_v7  ;;  %vm14002_vm10 = vmmov %vm14000_vm4 }
0x205f   : > { %6997 = vrot.lane.b32.xlu0 %v6940_v47, %s13944_s0  ;;  %6959 = vrot.lane.b32.xlu1 %v6930_v53, %s13601_s22  ;;  %vm14003_vm13 = vmmov %vm13995_vm0 }
0x2061   : > { %v6972_v52 = vpop.permute.xlu0 %6971  ;;  %v6974_v39 = vpop.permute.xlu1 %6973 }
0x2062   : > { %v6979_v17 = vsel %vm13993_vm5, 0, %v6974_v39  ;;  %v6976_v28 = vsel %vm13995_vm0, 0, %v6972_v52  ;;  %vm14004_vm5 = vmmov %vm14000_vm4 }
0x2063   : > { %v6982_v49 = vsel %vm11636_vm1, %v6979_v17, 0  ;;  %6983 = vrot.lane.b32.xlu0 %v13104_v31, %s13601_s22  ;;  %6985 = vrot.lane.b32.xlu1 %v13098_v36, %s13601_s22  ;;  %v6981_v1 = vsel %vm11636_vm1, %v6976_v28, 0 }
0x2064   : > { %9207 = vmatpush3.bf16.msra.mxu0 %v6982_v49 }
0x2065   : > { %9573 = vmatprep.subr.msk.bf16.mxu0 %vm13996_vm6, %v6936_v51  ;;  %vm14005_vm6 = vmmov %vm14000_vm4 }
0x2067   : > { %6947 = vrot.lane.b32.xlu0 %v6930_v53, %s13944_s0  ;;  %6949 = vrot.lane.b32.xlu1 %v6933_v4, %s13944_s0 }
0x2068   : > { %9209 = vmatpush3.bf16.msra.mxu0 %v6981_v1 }
0x206b   : > { %7009 = vrot.lane.b32.xlu0 %v6940_v47, %s13601_s22  ;;  %7011 = vrot.lane.b32.xlu1 %v6943_v40, %s13601_s22  ;;  %s14010_s22 = smov 8   ;;  %v14012_v47 = vld [vmem:[#allocation88_spill] sm:$0xff] }
0x206f   : > { %7034 = vperm.xlu0 %9845, %v7026_v46   ;;  %7029 = vperm.xlu1 %9856, %v7025_v54  }
0x20cd   : > { %v7000_v0 = vpop.permute.xlu0 %6999  ;;  %v6962_v55 = vpop.permute.xlu1 %6961 }
0x20ce   : > { %v7005_v59 = vsel %vm13997_vm15, 0, %v7000_v0  ;;  %v6967_v5 = vsel %vm13998_vm12, %v6962_v55, 0  ;;  %vm14014_vm15 = vcmask 64512  }
0x20cf   : > { %v6970_v25 = vsel %vm11644_vm8, %v6967_v5, 0  ;;  %9574 = vmatprep.subr.msk.bf16.mxu0 %vm11636_vm1, %v7005_v59  ;;  %v7548_v59 = vld [vmem:[#allocation29 + $0x8] sm:$0xff] }
0x20d0   : > { %9211 = vmatpush3.bf16.msra.mxu0 %v6970_v25 }
0x20d1   : > { %v6998_v32 = vpop.permute.xlu0 %6997  ;;  %v6960_v34 = vpop.permute.xlu1 %6959 }
0x20d2   : > { %v7002_v35 = vsel %vm13999_vm7, 0, %v6998_v32  ;;  %v6964_v15 = vsel %vm14000_vm4, %v6960_v34, 0  ;;  %vm14018_vm4 = vmmov %vm14014_vm15  ;;  %v10074_v32 = vld [vmem:[#allocation22 + $0x4] ss:$12 sps:$4 sm:$0xff]  }
0x20d3   : > { %v6969_v6 = vsel %vm11644_vm8, %v6964_v15, 0  ;;  %9575 = vmatprep.subr.msk.bf16.mxu0 %vm11636_vm1, %v7002_v35  ;;  %v7327_v35 = vld [vmem:[%s14020_s2 + $0x8] sm:$0xff]  ;;  %v7326_v15 = vld [vmem:[%s14020_s2] sm:$0xff]  ;;  %s14039_s2 = sld [smem:[#allocation66_spill]] }
0x20d4   : > { %9213 = vmatpush3.bf16.msra.mxu0 %v6969_v6 }
0x20d5   : > { %v6984_v63 = vpop.permute.xlu0 %6983  ;;  %v6986_v57 = vpop.permute.xlu1 %6985 }
0x20d6   : > { %v6991_v20 = vsel %vm14001_vm9, %v6986_v57, 0  ;;  %v6988_v3 = vsel %vm14002_vm10, %v6984_v63, 0  ;;  %vm14019_vm9 = vmmov %vm13995_vm0 }
0x20d7   : > { %9576 = vmatprep.subr.msk.bf16.mxu0 %vm11644_vm8, %v6991_v20  ;;  %vm14022_vm10 = vmmov %vm13995_vm0 }
0x20d8   : > { %9215 = vmatpush3.bf16.msk.msra.mxu0 %vm11663_vm14, %v6928_v60 }
0x20d9   : > { %v6948_v23 = vpop.permute.xlu0 %6947  ;;  %9577 = vmatprep.subr.msk.bf16.mxu0 %vm11644_vm8, %v6988_v3  ;;  %v6950_v48 = vpop.permute.xlu1 %6949 }
0x20da   : > { %v6955_v12 = vsel %vm14003_vm13, 0, %v6950_v48  ;;  %v6952_v58 = vsel %vm13995_vm0, 0, %v6948_v23 }
0x20db   : > { %v6958_v16 = vsel %vm11636_vm1, %v6955_v12, 0  ;;  %v6957_v61 = vsel %vm11636_vm1, %v6952_v58, 0  ;;  %vm14007_vm1 = vcmask 130048  }
0x20dc   : > { %9217 = vmatpush3.bf16.msk.msra.mxu0 %vm11663_vm14, %v6926_v7  ;;  %vm14006_vm14 = vcmask 261120   ;;  %v14011_v7 = vld [vmem:[#allocation87_spill] sm:$0xff] }
0x20dd   : > { %v7010_v13 = vpop.permute.xlu0 %7009  ;;  %9218 = vmatprep.subr.bf16.mxu0 %v13098_v36  ;;  %v7012_v50 = vpop.permute.xlu1 %7011  ;;  %v13191_v53 = vpack.c.bf16 %v14012_v47, %v14011_v7 }
0x20de   : > { %v7017_v27 = vsel %vm14004_vm5, %v7012_v50, 0  ;;  %v7014_v10 = vsel %vm14005_vm6, %v7010_v13, 0  ;;  %vm14024_vm5 = vmmov %vm13995_vm0  ;;  %vm14025_vm0 = vcmask 515072  }
0x20df   : > { %v7020_v18 = vsel %vm11644_vm8, %v7017_v27, 0  ;;  %v7019_v29 = vsel %vm11644_vm8, %v7014_v10, 0  ;;  %vm14008_vm8 = vmmov %vm14007_vm1 }
0x20e0   : > { %9219 = vmatpush3.bf16.msra.mxu0 %v6958_v16  ;;  %9442 = vmatpush3.bf16.msra.mxu1 %v7020_v18  ;;  %vm14027_vm6 = vmmov %vm14024_vm5 }
0x20e1   : > { %9220 = vmatprep.subr.bf16.mxu0 %v13104_v31  ;;  %9443 = vmatprep.subr.bf16.mxu1 %v13985_v19 }
0x20e4   : > { %9221 = vmatpush3.bf16.msra.mxu0 %v6957_v61  ;;  %9444 = vmatpush3.bf16.msra.mxu1 %v7019_v29  ;;  %v14031_v61 = vld [vmem:[#allocation86_spill] sm:$0xff] }
0x20e5   : > { %9456 = vmatprep.subr.bf16.mxu0 %v13985_v19  ;;  %9449 = vmatprep.subr.mxu1 %v7140_v42 }
0x20e7   : > { %7088 = vmatmul.mubr.bf16.vlgmr.msra.gmra.mxu0 %v10068_v33  ;;  %9446 = vmatmul.mubr.msk.bf16.vlgmr.msra.gmra.mxu1 %vm14006_vm14, %v10071_v22  ;;  %vm14028_vm14 = vmmov %vm14025_vm0 }
0x20e8   : > { %9460 = vmatprep.mubr.msk.bf16.mxu0 %vm13987_vm3, %v13985_v19  ;;  %9450 = vmatpush3.msra.mxu1 %v7140_v42  ;;  %vm14013_vm3 = vcmask 457728  }
0x20e9   : > { %9451 = vmatprep.subr.mxu1 %v7139_v8  ;;  %vm14015_vm12 = vmmov %vm14013_vm3 }
0x20ea   : > { %9452 = vmatpush3.msra.mxu1 %v7139_v8  ;;  %v7030_v37 = vpop.permute.xlu1 %7029  ;;  %v7035_v43 = vpop.permute.xlu0 %7034  ;;  %vm14017_vm7 = vmmov %vm14013_vm3 }
0x20eb   : > { %vm14023_vm13 = vmmov %vm14013_vm3 }
0x21a7   : > { %v9222_v14 = vpop.f32.mrf.mxu0  ;;  %v7130_v9 = vpop.f32.mrf.mxu1 }
0x21a9   : > { %v9223_v26 = vpop.f32.mrf.mxu0  ;;  %v9447_v30 = vpop.f32.mrf.mxu1 }
0x21aa   : > { %v9224_v41 = vadd.f32 %v9223_v26, %v9222_v14 }
0x21ab   : > { %v9225_v45 = vpop.f32.mrf.mxu0  ;;  %v7133_v11 = vpop.f32.mrf.mxu1 }
0x21ac   : > { %v7090_v2 = vadd.f32 %v9224_v41, %v7030_v37 }
0x21ad   : > { %v9226_v56 = vpop.f32.mrf.mxu0  ;;  %v9448_v21 = vpop.f32.mrf.mxu1 }
0x21ae   : > { %v7131_v44 = vadd.f32 %v7130_v9, %v7090_v2  ;;  %v9227_v36 = vadd.f32 %v9226_v56, %v9225_v45  ;;  %v10075_v2 = vld [vmem:[#allocation22 + $0x8] ss:$12 sps:$4 sm:$0xff]   ;;  %v14037_v56 = vmov 0  }
0x21b0   : > { %v7137_v24 = vmax.f32 %v7131_v44, 0.0  ;;  %v7093_v31 = vadd.f32 %v9227_v36, %v7035_v43 }
0x21b2   : > { %v7134_v62 = vadd.f32 %v7133_v11, %v7093_v31  ;;  %9453 = vmatprep.mubr.msk.f32.mxu1 %vm14007_vm1, %v7137_v24  ;;  %vm14029_vm1 = vmmov %vm14025_vm0  ;;  %v10072_v11 = vld [vmem:[#allocation22] ss:$12 sps:$4 sm:$0xff]  }
0x21b4   : > { %v7138_v60 = vmax.f32 %v7134_v62, 0.0 }
0x21b6   : > { %9454 = vmatmul.mubr.msk.f32.vlgmr.msra.gmra.mxu1 %vm14008_vm8, %v7138_v60  ;;  %vm14030_vm8 = vmmov %vm14025_vm0 }
0x21b7   : > { %7388 = vmatprep.mubr.bf16.mxu1 %v10074_v32  ;;  %v7560_v32 = vld [vmem:[#allocation29 + $0x68] sm:$0xff] }
0x2276   : > { %v9455_v40 = vpop.f32.mrf.mxu1 }
0x2278   : > { %v7213_v4 = vpop.f32.mrf.mxu1 }
0x2279   : > { %v13183_v51 = vpack.c.bf16 %v9455_v40, %v7213_v4 }
0x227b   : > { %7238 = vrot.lane.b32.xlu0 %v13183_v51, %s14009_s9  ;;  %7228 = vrot.lane.b32.xlu1 %v13183_v51, %s14010_s22 }
0x227f   : > { %7236 = vrot.lane.b32.xlu0 %v13191_v53, %s14009_s9  ;;  %7226 = vrot.lane.b32.xlu1 %v13191_v53, %s14010_s22 }
0x2283   : > { %7272 = vrot.lane.b32.xlu0 %v13191_v53, %s13944_s0  ;;  %7274 = vrot.lane.b32.xlu1 %v13183_v51, %s13944_s0 }
0x22ed   : > { %v7239_v52 = vpop.permute.xlu0 %7238  ;;  %v7229_v39 = vpop.permute.xlu1 %7228 }
0x22ee   : > { %v7244_v17 = vsel %vm14013_vm3, %v7239_v52, 0  ;;  %v7234_v49 = vsel %vm14014_vm15, 0, %v7229_v39  ;;  %9578 = vmatprep.subr.msk.bf16.mxu1 %vm14015_vm12, %v7239_v52  ;;  %vm14032_vm3 = vnez %v14031_v61  ;;  %vm14033_vm15 = vmmov %vm14024_vm5  ;;  %v7551_v61 = vld [vmem:[#allocation29 + $0x20] sm:$0xff] }
0x22ef   : > { %7300 = vrot.lane.b32.xlu0 %v7244_v17, %s13944_s0  ;;  %7262 = vrot.lane.b32.xlu1 %v7234_v49, %s14016_s1  ;;  %vm14034_vm12 = vmmov %vm14025_vm0 }
0x22f1   : > { %v7237_v28 = vpop.permute.xlu0 %7236  ;;  %v7227_v38 = vpop.permute.xlu1 %7226 }
0x22f2   : > { %v7241_v1 = vsel %vm14017_vm7, %v7237_v28, 0  ;;  %v7231_v46 = vsel %vm14018_vm4, 0, %v7227_v38  ;;  %vm14035_vm7 = vmmov %vm14024_vm5 }
0x22f3   : > { %7298 = vrot.lane.b32.xlu0 %v7241_v1, %s13944_s0  ;;  %7260 = vrot.lane.b32.xlu1 %v7231_v46, %s14016_s1  ;;  %vm14036_vm4 = vmmov %vm14025_vm0 }
0x22f5   : > { %v7273_v54 = vpop.permute.xlu0 %7272  ;;  %v7275_v0 = vpop.permute.xlu1 %7274 }
0x22f6   : > { %v7280_v55 = vsel %vm14019_vm9, 0, %v7275_v0  ;;  %v7277_v25 = vsel %vm14022_vm10, 0, %v7273_v54  ;;  %vm14038_vm9 = vcmask 261120   ;;  %vm14040_vm10 = vcmask 64512   ;;  %v7491_v54 = vld [vmem:[%s14039_s2] sm:$0xff]  ;;  %s14050_s2 = smov 112  }
0x22f7   : > { %v7283_v5 = vsel %vm11548_vm11, %v7280_v55, 0  ;;  %7284 = vrot.lane.b32.xlu0 %v13191_v53, %s14016_s1  ;;  %7286 = vrot.lane.b32.xlu1 %v13183_v51, %s14016_s1  ;;  %v7282_v34 = vsel %vm11548_vm11, %v7277_v25, 0  ;;  %v7490_v0 = vld [vmem:[#allocation23] sm:$0xff]  ;;  %v7561_v25 = vld [vmem:[#allocation29 + $0x70] sm:$0xff] }
0x22f8   : > { %9236 = vmatpush3.bf16.msra.mxu1 %v7283_v5  ;;  %v8631_v55 = vcombine.high %v7490_v0, %v7490_v0  ;;  %v7562_v5 = vld [vmem:[#allocation29 + $0x78] sm:$0xff] }
0x22f9   : > { %9579 = vmatprep.subr.msk.bf16.mxu1 %vm14023_vm13, %v7237_v28 }
0x22fb   : > { %7248 = vrot.lane.b32.xlu0 %v7231_v46, %s13944_s0  ;;  %7250 = vrot.lane.b32.xlu1 %v7234_v49, %s13944_s0 }
0x22fc   : > { %9238 = vmatpush3.bf16.msra.mxu1 %v7282_v34  ;;  %v7559_v34 = vld [vmem:[#allocation29 + $0x60] sm:$0xff] }
0x22ff   : > { %7310 = vrot.lane.b32.xlu0 %v7241_v1, %s14016_s1  ;;  %7312 = vrot.lane.b32.xlu1 %v7244_v17, %s14016_s1 }
0x2303   : > { %7335 = vperm.xlu0 %9845, %v7327_v35   ;;  %7330 = vperm.xlu1 %9856, %v7326_v15   ;;  %v7558_v35 = vld [vmem:[#allocation29 + $0x58] sm:$0xff]  ;;  %v7557_v15 = vld [vmem:[#allocation29 + $0x50] sm:$0xff] }
0x2361   : > { %v7301_v6 = vpop.permute.xlu0 %7300  ;;  %v7263_v63 = vpop.permute.xlu1 %7262 }
0x2362   : > { %v7306_v57 = vsel %vm14024_vm5, 0, %v7301_v6  ;;  %v7268_v20 = vsel %vm14025_vm0, %v7263_v63, 0  ;;  %vm14041_vm5 = vcmask 130048   ;;  %v7556_v6 = vld [vmem:[#allocation29 + $0x48] sm:$0xff]  ;;  %v7555_v63 = vld [vmem:[#allocation29 + $0x40] sm:$0xff]  ;;  %vm14042_vm0 = vmmov %vm14027_vm6 }
0x2363   : > { %v7271_v23 = vsel %vm11556_vm2, %v7268_v20, 0  ;;  %9580 = vmatprep.subr.msk.bf16.mxu1 %vm11548_vm11, %v7306_v57  ;;  %v7554_v57 = vld [vmem:[#allocation29 + $0x38] sm:$0xff]  ;;  %v7553_v20 = vld [vmem:[#allocation29 + $0x30] sm:$0xff] }
0x2364   : > { %9240 = vmatpush3.bf16.msra.mxu1 %v7271_v23  ;;  %v7552_v23 = vld [vmem:[#allocation29 + $0x28] sm:$0xff] }
0x2365   : > { %v7299_v48 = vpop.permute.xlu0 %7298  ;;  %v7261_v12 = vpop.permute.xlu1 %7260 }
0x2366   : > { %v7303_v13 = vsel %vm14027_vm6, 0, %v7299_v48  ;;  %v7265_v50 = vsel %vm14028_vm14, %v7261_v12, 0  ;;  %vm14043_vm6 = vmmov %vm14029_vm1 }
0x2367   : > { %v7270_v27 = vsel %vm11556_vm2, %v7265_v50, 0  ;;  %9581 = vmatprep.subr.msk.bf16.mxu1 %vm11548_vm11, %v7303_v13  ;;  %vm14044_vm14 = vmmov %vm14042_vm0 }
0x2368   : > { %9242 = vmatpush3.bf16.msra.mxu1 %v7270_v27 }
0x2369   : > { %v7285_v16 = vpop.permute.xlu0 %7284  ;;  %v7287_v18 = vpop.permute.xlu1 %7286 }
0x236a   : > { %v7292_v58 = vsel %vm14029_vm1, %v7287_v18, 0  ;;  %v7289_v10 = vsel %vm14030_vm8, %v7285_v16, 0  ;;  %vm14045_vm8 = vmmov %vm14042_vm0 }
0x236b   : > { %9582 = vmatprep.subr.msk.bf16.mxu1 %vm11556_vm2, %v7292_v58 }
0x236c   : > { %9244 = vmatpush3.bf16.msk.msra.mxu1 %vm14032_vm3, %v7229_v39 }
0x236d   : > { %v7249_v29 = vpop.permute.xlu0 %7248  ;;  %9583 = vmatprep.subr.msk.bf16.mxu1 %vm11556_vm2, %v7289_v10  ;;  %v7251_v33 = vpop.permute.xlu1 %7250 }
0x236e   : > { %v7256_v22 = vsel %vm14033_vm15, 0, %v7251_v33  ;;  %v7253_v30 = vsel %vm14035_vm7, 0, %v7249_v29  ;;  %vm14046_vm15 = vmmov %vm14029_vm1 }
0x236f   : > { %v7259_v9 = vsel %vm11548_vm11, %v7256_v22, 0  ;;  %v7258_v41 = vsel %vm11548_vm11, %v7253_v30, 0  ;;  %vm14056_vm7 = vmmov %vm14041_vm5 }
0x2370   : > { %9246 = vmatpush3.bf16.msk.msra.mxu1 %vm14032_vm3, %v7227_v38 }
0x2371   : > { %v7311_v42 = vpop.permute.xlu0 %7310  ;;  %9247 = vmatprep.subr.bf16.mxu1 %v13183_v51  ;;  %v7313_v8 = vpop.permute.xlu1 %7312 }
0x2372   : > { %v7318_v14 = vsel %vm14034_vm12, %v7313_v8, 0  ;;  %v7315_v37 = vsel %vm14036_vm4, %v7311_v42, 0  ;;  %vm14057_vm4 = vmmov %vm14041_vm5 }
0x2373   : > { %v7321_v26 = vsel %vm11556_vm2, %v7318_v14, 0  ;;  %v7320_v45 = vsel %vm11556_vm2, %v7315_v37, 0  ;;  %v8630_v37 = vcombine.low %v7490_v0, %v7490_v0 }
0x2374   : > { %9248 = vmatpush3.bf16.msra.mxu1 %v7259_v9  ;;  %9457 = vmatpush3.bf16.msra.mxu0 %v7321_v26 }
0x2375   : > { %9249 = vmatprep.subr.bf16.mxu1 %v13191_v53  ;;  %9458 = vmatprep.subr.bf16.mxu0 %v13985_v19 }
0x2378   : > { %9250 = vmatpush3.bf16.msra.mxu1 %v7258_v41  ;;  %9459 = vmatpush3.bf16.msra.mxu0 %v7320_v45  ;;  %v7550_v41 = vld [vmem:[#allocation29 + $0x18] sm:$0xff]  ;;  %v7549_v45 = vld [vmem:[#allocation29 + $0x10] sm:$0xff] }
0x2379   : > { %7506 = vmatprep.subr.bf16.mxu0 %v14037_v56  ;;  %7582 = vmatprep.subr.mxu1 %v7562_v5  ;;  %v14061_v5 = vld [vmem:[#allocation81_spill] sm:$0xff] }
0x237b   : > { %7389 = vmatmul.mubr.bf16.vlgmr.msra.gmra.mxu1 %v10072_v11  ;;  %9461 = vmatmul.mubr.msk.bf16.vlgmr.msra.gmra.mxu0 %vm14038_vm9, %v10075_v2  ;;  %v7547_v11 = vld [vmem:[#allocation29] sm:$0xff]  ;;  %vm14058_vm9 = vmmov %vm14057_vm4 }
0x237c   : > { %7630 = vmatprep.mubr.f32.mxu1 %v13985_v19  ;;  %8634 = vmatprep.mubr.msk.bf16.mxu0 %vm14041_vm5, %v8631_v55  ;;  %vm14062_vm5 = vnez %v14061_v5  ;;  %v10088_v5 = vld [vmem:[%s11147_s26] sm:$0xff]  ;;  %s8401_s26 = sshll.u32 %s14125_s15, 1 }
0x237d   : > { %7583 = vmatpush1.msra.mxu1 %v7561_v25 }
0x237e   : > { %v7331_v24 = vpop.permute.xlu1 %7330  ;;  %v7336_v47 = vpop.permute.xlu0 %7335  ;;  %7584 = vmatprep.subr.mxu1 %v7560_v32  ;;  %v14063_v32 = vld [vmem:[#allocation79_spill] sm:$0xff] }
0x237f   : > { %7585 = vmatpush1.msra.mxu1 %v7559_v34 }
0x2380   : > { %7586 = vmatprep.subr.mxu1 %v7558_v35 }
0x2381   : > { %7587 = vmatpush1.msra.mxu1 %v7557_v15 }
0x2382   : > { %7588 = vmatprep.subr.mxu1 %v7556_v6 }
0x2383   : > { %7589 = vmatpush1.msra.mxu1 %v7555_v63  ;;  %v14067_v63 = vld [vmem:[#allocation80_spill] sm:$0xff] }
0x2384   : > { %7590 = vmatprep.subr.mxu1 %v7554_v57 }
0x2385   : > { %7591 = vmatpush1.msra.mxu1 %v7553_v20  ;;  %v14069_v20 = vld [vmem:[#allocation78_spill] sm:$0xff] }
0x2386   : > { %7592 = vmatprep.subr.mxu1 %v7552_v23 }
0x2387   : > { %7593 = vmatpush1.msra.mxu1 %v7551_v61 }
0x2388   : > { %7594 = vmatprep.subr.mxu1 %v7550_v41 }
0x2389   : > { %7595 = vmatpush1.msra.mxu1 %v7549_v45 }
0x238a   : > { %7596 = vmatprep.subr.mxu1 %v7548_v59 }
0x238b   : > { %7597 = vmatpush1.msra.mxu1 %v7547_v11 }
0x243b   : > { %v9251_v21 = vpop.f32.mrf.mxu1  ;;  %v7431_v44 = vpop.f32.mrf.mxu0 }
0x243d   : > { %v9252_v36 = vpop.f32.mrf.mxu1  ;;  %v9462_v43 = vpop.f32.mrf.mxu0 }
0x243e   : > { %v9253_v31 = vadd.f32 %v9252_v36, %v9251_v21 }
0x243f   : > { %v9254_v62 = vpop.f32.mrf.mxu1  ;;  %v7434_v60 = vpop.f32.mrf.mxu0 }
0x2440   : > { %v7391_v40 = vadd.f32 %v9253_v31, %v7331_v24 }
0x2441   : > { %v9255_v4 = vpop.f32.mrf.mxu1  ;;  %v9463_v51 = vpop.f32.mrf.mxu0 }
0x2442   : > { %v9256_v7 = vadd.f32 %v9255_v4, %v9254_v62  ;;  %v7432_v53 = vadd.f32 %v7431_v44, %v7391_v40  ;;  %v14048_v62 = vld [vmem:[#allocation82_spill] sm:$0xff]  ;;  %v14049_v4 = vld [vmem:[#allocation83_spill] sm:$0xff] }
0x2444   : > { %v7394_v52 = vadd.f32 %v9256_v7, %v7336_v47  ;;  %v7438_v17 = vmax.f32 %v7432_v53, 0.0 }
0x2446   : > { %v7435_v39 = vadd.f32 %v7434_v60, %v7394_v52 }
0x2448   : > { %v7439_v49 = vmax.f32 %v7435_v39, 0.0 }
0x244a   : > { %v7440_v19 = vpack.c.bf16 %v7439_v49, %v7438_v17 }
0x244c   : > { %7442 = vrot.lane.b32.xlu0 %v7440_v19, %s14010_s22  ;;  %7447 = vrot.lane.b32.xlu1 %v7440_v19, %s14009_s9  ;;  %s14051_s22 = smov 16   ;;  %s14055_s9 = sld [smem:[#allocation68_spill]] }
0x2450   : > { %7471 = vrot.lane.b32.xlu0 %v7440_v19, %s14016_s1 }
0x24be   : > { %v7443_v28 = vpop.permute.xlu0 %7442  ;;  %v7448_v38 = vpop.permute.xlu1 %7447 }
0x24bf   : > { %v7445_v1 = vsel %vm14040_vm10, 0, %v7443_v28  ;;  %v7450_v46 = vsel %vm14023_vm13, %v7448_v38, 0  ;;  %vm14059_vm10 = vmmov %vm14042_vm0 }
0x24c0   : > { %7459 = vrot.lane.b32.xlu0 %v7445_v1, %s14016_s1  ;;  %7478 = vrot.lane.b32.xlu1 %v7450_v46, %s13944_s0  ;;  %vm14060_vm13 = vmmov %vm14042_vm0 }
0x24c1   : > { %7507 = vmatpush1.bf16.msra.mxu0 %v7450_v46 }
0x24c2   : > { %7508 = vmatprep.subr.bf16.mxu0 %v14037_v56  ;;  %v7472_v48 = vpop.permute.xlu0 %7471 }
0x24c3   : > { %v7474_v27 = vsel %vm14043_vm6, %v7472_v48, 0  ;;  %vm14065_vm6 = vcmask 1039360  }
0x24c4   : > { %7484 = vrot.lane.b32.xlu0 %v7450_v46, %s14016_s1  ;;  %7465 = vrot.lane.b32.xlu1 %v7440_v19, %s13944_s0  ;;  %v7476_v16 = vsel %vm11556_vm2, %v7474_v27, 0 }
0x24c8   : > { %7453 = vrot.lane.b32.xlu1 %v7445_v1, %s13944_s0  ;;  %v7728_v1 = vld [vmem:[%s14055_s9] sm:$0xff] }
0x24cc   : > { %7494 = vperm.xlu1 %9856, %v7491_v54  }
0x2532   : > { %v7479_v12 = vpop.permute.xlu1 %7478  ;;  %v7460_v10 = vpop.permute.xlu0 %7459 }
0x2533   : > { %v7481_v13 = vsel %vm14042_vm0, 0, %v7479_v12  ;;  %v7462_v33 = vsel %vm14029_vm1, %v7460_v10, 0  ;;  %vm14064_vm0 = vcmp.ne.s16.totalorder %v14063_v32, 0  ;;  %vm14068_vm1 = vnez %v14067_v63 }
0x2534   : > { %v7483_v50 = vsel %vm11548_vm11, %v7481_v13, 0  ;;  %v7464_v22 = vsel %vm11556_vm2, %v7462_v33, 0 }
0x2535   : > { %7509 = vmatpush1.bf16.msra.mxu0 %v7483_v50 }
0x2536   : > { %7510 = vmatprep.subr.bf16.mxu0 %v14037_v56  ;;  %v7466_v18 = vpop.permute.xlu1 %7465  ;;  %v7485_v14 = vpop.permute.xlu0 %7484 }
0x2537   : > { %v7468_v58 = vsel %vm14044_vm14, 0, %v7466_v18  ;;  %v7487_v26 = vsel %vm14046_vm15, %v7485_v14, 0  ;;  %vm14066_vm14 = vmmov %vm14065_vm6 }
0x2538   : > { %v7470_v29 = vsel %vm11548_vm11, %v7468_v58, 0  ;;  %v7489_v30 = vsel %vm11556_vm2, %v7487_v26, 0  ;;  %vm14052_vm2 = vcmask 916480   ;;  %vm14071_vm15 = vmmov %vm14059_vm10 }
0x2539   : > { %7511 = vmatpush1.bf16.msra.mxu0 %v7476_v16  ;;  %vm14054_vm12 = vmmov %vm14052_vm2 }
0x253a   : > { %7512 = vmatprep.subr.bf16.mxu0 %v14037_v56  ;;  %v7454_v42 = vpop.permute.xlu1 %7453 }
0x253b   : > { %v7456_v8 = vsel %vm14045_vm8, 0, %v7454_v42  ;;  %vm14070_vm8 = vcmp.ne.s16.totalorder %v14069_v20, 0 }
0x253c   : > { %v7458_v9 = vsel %vm11548_vm11, %v7456_v8, 0  ;;  %vm14047_vm11 = vcmask 523264  }
0x253d   : > { %7513 = vmatpush1.bf16.msra.mxu0 %v7440_v19 }
0x253e   : > { %7514 = vmatprep.subr.bf16.mxu0 %v14037_v56 }
0x2541   : > { %7515 = vmatpush1.bf16.msra.mxu0 %v7470_v29 }
0x2542   : > { %7516 = vmatprep.subr.bf16.mxu0 %v14037_v56 }
0x2545   : > { %7517 = vmatpush1.bf16.msra.mxu0 %v7464_v22 }
0x2546   : > { %7518 = vmatprep.subr.bf16.mxu0 %v14037_v56 }
0x2547   : > { %v7495_v2 = vpop.permute.xlu1 %7494 }
0x2549   : > { %8633 = vmatpush1.bf16.msk.msra.mxu0 %vm14032_vm3, %v7443_v28  ;;  %vm14053_vm3 = vmmov %vm14052_vm2  ;;  %v7727_v28 = vld [vmem:[#allocation25] sm:$0xff] }
0x254a   : > { %7520 = vmatprep.subr.bf16.mxu0 %v14037_v56  ;;  %v8637_v38 = vcombine.high %v7727_v28, %v7727_v28  ;;  %v8636_v61 = vcombine.low %v7727_v28, %v7727_v28 }
0x254d   : > { %7521 = vmatpush1.bf16.msra.mxu0 %v7458_v9 }
0x254e   : > { %7536 = vmatprep.subr.bf16.mxu0 %v14037_v56 }
0x2551   : > { %7537 = vmatpush2.bf16.msra.mxu0 %v7489_v30 }
0x2554   : > { %7539 = vmatmul.mubr.bf16.vlgmr.msra.gmra.mxu0 %v8630_v37 }
0x2555   : > { %7964 = vmatprep.mubr.bf16.mxu0 %v14037_v56 }
0x2614   : > { %v7540_v21 = vpop.f32.mrf.mxu0 }
0x2615   : > { %v7541_v44 = vadd.f32 %v7540_v21, %v7495_v2 }
0x2616   : > { %v7542_v3 = vpop.f32.mrf.mxu0 }
0x2617   : > { %v7546_v36 = vmax.f32 %v7541_v44, 0.0 }
0x2618   : > { %v7543_v43 = vpop.f32.mrf.mxu0 }
0x2619   : > { %8635 = vmatmul.mubr.msk.f32.vlgmr.msra.gmra.mxu1 %vm14047_vm11, %v7546_v36  ;;  %vm14072_vm11 = vmmov %vm14059_vm10 }
0x261a   : > { %v7544_v24 = vpop.f32.mrf.mxu0  ;;  %8647 = vmatprep.mubr.msk.bf16.mxu1 %vm14058_vm9, %v8637_v38  ;;  %vm8643_vm9 = vmneg %vm14057_vm4 }
0x26d9   : > { %v7632_v31 = vpop.f32.mrf.mxu1 }
0x26da   : > { %v7637_v60 = vpack.c.bf16 %v7632_v31, %v14048_v62 }
0x26db   : > { %v7634_v40 = vpop.f32.mrf.mxu1 }
0x26dc   : > { %v7638_v51 = vpack.c.bf16 %v7634_v40, %v14049_v4  ;;  %7650 = vrot.lane.b32.xlu0 %v7637_v60, %s14050_s2 }
0x26de   : > { %7652 = vrot.lane.b32.xlu1 %v7638_v51, %s14050_s2 }
0x26e0   : > { %7641 = vrot.lane.b32.xlu0 %v7637_v60, %s14051_s22 }
0x26e2   : > { %7643 = vrot.lane.b32.xlu1 %v7638_v51, %s14051_s22 }
0x274e   : > { %v7651_v7 = vpop.permute.xlu0 %7650 }
0x2750   : > { %v7653_v47 = vpop.permute.xlu1 %7652 }
0x2751   : > { %8638 = vmatprep.subr.msk.bf16.mxu1 %vm14052_vm2, %v7653_v47  ;;  %v7657_v53 = vsel %vm14053_vm3, %v7653_v47, 0  ;;  %v7654_v52 = vsel %vm14054_vm12, %v7651_v7, %v7653_v47  ;;  %vm14073_vm2 = vmmov %vm14064_vm0 }
0x2752   : > { %7707 = vrot.lane.b32.xlu1 %v7657_v53, %s13944_s0  ;;  %7705 = vrot.lane.b32.xlu0 %v7654_v52, %s13944_s0  ;;  %v7642_v39 = vpop.permute.xlu0 %7641  ;;  %vm14074_vm3 = vmmov %vm14065_vm6 }
0x2753   : > { %7744 = vmatpush1.bf16.msra.mxu1 %v7654_v52  ;;  %v7648_v19 = vsel %vm14057_vm4, 0, %v7642_v39  ;;  %vm14075_vm12 = vmmov %vm14074_vm3 }
0x2754   : > { %v7644_v17 = vpop.permute.xlu1 %7643 }
0x2755   : > { %v7645_v49 = vsel %vm14056_vm7, %v7642_v39, %v7644_v17  ;;  %vm14076_vm7 = vmmov %vm14070_vm8 }
0x2756   : > { %7695 = vrot.lane.b32.xlu1 %v7638_v51, %s14016_s1  ;;  %7693 = vrot.lane.b32.xlu0 %v7637_v60, %s14016_s1 }
0x275a   : > { %7684 = vrot.lane.b32.xlu1 %v7638_v51, %s13944_s0  ;;  %7682 = vrot.lane.b32.xlu0 %v7637_v60, %s13944_s0 }
0x275e   : > { %7671 = vrot.lane.b32.xlu0 %v7648_v19, %s14016_s1  ;;  %7673 = vrot.lane.b32.xlu1 %v7645_v49, %s14016_s1 }
0x2762   : > { %7660 = vrot.lane.b32.xlu0 %v7648_v19, %s13944_s0  ;;  %7662 = vrot.lane.b32.xlu1 %v7645_v49, %s13944_s0 }
0x2766   : > { %7716 = vrot.lane.b32.xlu0 %v7654_v52, %s14016_s1  ;;  %7718 = vrot.lane.b32.xlu1 %v7657_v53, %s14016_s1  ;;  %v7990_v53 = vld [vmem:[#allocation2] sm:$0x1] }
0x276a   : > { %7731 = vperm.xlu0 %9845, %v7728_v1  }
0x27c4   : > { %v7706_v46 = vpop.permute.xlu0 %7705  ;;  %v7708_v54 = vpop.permute.xlu1 %7707 }
0x27c5   : > { %v7712_v0 = vsel %vm14059_vm10, 0, %v7706_v46  ;;  %v7709_v55 = vsel %vm14060_vm13, %v7706_v46, %v7708_v54  ;;  %vm14077_vm13 = vmmov %vm14059_vm10 }
0x27c6   : > { %v7714_v25 = vsel %vm14062_vm5, %v7712_v0, 0  ;;  %8639 = vmatprep.subr.msk.bf16.mxu1 %vm14064_vm0, %v7709_v55 }
0x27c7   : > { %7746 = vmatpush1.bf16.msra.mxu1 %v7714_v25 }
0x27c8   : > { %v7694_v34 = vpop.permute.xlu0 %7693  ;;  %v7696_v35 = vpop.permute.xlu1 %7695 }
0x27c9   : > { %v7697_v15 = vsel %vm14065_vm6, %v7694_v34, %v7696_v35  ;;  %v7700_v6 = vsel %vm14066_vm14, %v7696_v35, 0  ;;  %vm14078_vm6 = vmmov %vm14074_vm3 }
0x27ca   : > { %v7702_v57 = vsel %vm14068_vm1, %v7697_v15, 0  ;;  %8640 = vmatprep.subr.msk.bf16.mxu1 %vm14070_vm8, %v7700_v6  ;;  %vm14079_vm14 = vmmov %vm14074_vm3 }
0x27cb   : > { %7748 = vmatpush1.bf16.msra.mxu1 %v7702_v57  ;;  %vm14080_vm8 = vmmov %vm14076_vm7 }
0x27cc   : > { %v7683_v23 = vpop.permute.xlu0 %7682  ;;  %7749 = vmatprep.subr.bf16.mxu1 %v7638_v51  ;;  %v7685_v48 = vpop.permute.xlu1 %7684 }
0x27cd   : > { %v7689_v12 = vsel %vm14071_vm15, 0, %v7683_v23  ;;  %v7686_v13 = vsel %vm14072_vm11, %v7683_v23, %v7685_v48  ;;  %vm14081_vm15 = vcmask 916480  }
0x27ce   : > { %v7691_v16 = vsel %vm14062_vm5, %v7689_v12, 0  ;;  %vm14082_vm11 = vmmov %vm14081_vm15 }
0x27cf   : > { %7750 = vmatpush1.bf16.msra.mxu1 %v7637_v60 }
0x27d0   : > { %v7672_v50 = vpop.permute.xlu0 %7671  ;;  %8641 = vmatprep.subr.msk.bf16.mxu1 %vm14073_vm2, %v7686_v13  ;;  %v7674_v27 = vpop.permute.xlu1 %7673  ;;  %vm14084_vm2 = vmmov %vm14057_vm4 }
0x27d1   : > { %v7675_v18 = vsel %vm14074_vm3, %v7672_v50, %v7674_v27  ;;  %v7678_v58 = vsel %vm14075_vm12, %v7674_v27, 0  ;;  %vm14085_vm3 = vmmov %vm14084_vm2 }
0x27d2   : > { %v7680_v10 = vsel %vm14068_vm1, %v7675_v18, 0  ;;  %vm14086_vm12 = vmmov %vm14078_vm6 }
0x27d3   : > { %7752 = vmatpush1.bf16.msra.mxu1 %v7691_v16  ;;  %vm14088_vm4 = vmmov %vm14078_vm6 }
0x27d4   : > { %8642 = vmatprep.subr.msk.bf16.mxu1 %vm14076_vm7, %v7678_v58  ;;  %v7661_v29 = vpop.permute.xlu0 %7660  ;;  %v7663_v33 = vpop.permute.xlu1 %7662  ;;  %vm14087_vm7 = vmmov %vm14078_vm6 }
0x27d5   : > { %v7667_v22 = vsel %vm14059_vm10, 0, %v7661_v29  ;;  %v7664_v42 = vsel %vm14077_vm13, %v7661_v29, %v7663_v33  ;;  %vm14090_vm10 = vmmov %vm14088_vm4 }
0x27d6   : > { %v7669_v9 = vsel %vm14062_vm5, %v7667_v22, 0  ;;  %vm14091_vm13 = vmmov %vm14080_vm8 }
0x27d7   : > { %7754 = vmatpush1.bf16.msra.mxu1 %v7680_v10 }
0x27d8   : > { %7755 = vmatprep.subr.bf16.mxu1 %v7645_v49  ;;  %v7717_v8 = vpop.permute.xlu0 %7716  ;;  %v7719_v14 = vpop.permute.xlu1 %7718 }
0x27d9   : > { %v7720_v26 = vsel %vm14078_vm6, %v7717_v8, %v7719_v14  ;;  %v7723_v30 = vsel %vm14079_vm14, %v7719_v14, 0  ;;  %vm14094_vm14 = vcmask 7168  }
0x27da   : > { %v7725_v37 = vsel %vm14068_vm1, %v7720_v26, 0 }
0x27db   : > { %8644 = vmatpush1.bf16.msk.msra.mxu1 %vm8643_vm9, %v7642_v39  ;;  %vm14089_vm9 = vmmov %vm14080_vm8 }
0x27dc   : > { %8645 = vmatprep.subr.msk.bf16.mxu1 %vm14064_vm0, %v7664_v42  ;;  %vm14092_vm0 = vcmask 1043456  }
0x27dd   : > { %vm14093_vm6 = vmmov %vm14092_vm0 }
0x27df   : > { %7758 = vmatpush1.bf16.msra.mxu1 %v7669_v9 }
0x27e0   : > { %8646 = vmatprep.subr.msk.bf16.mxu1 %vm14080_vm8, %v7723_v30  ;;  %vm14095_vm8 = vmmov %vm14094_vm14 }
0x27e3   : > { %7774 = vmatpush2.bf16.msra.mxu1 %v7725_v37 }
0x27e5   : > { %v7732_v41 = vpop.permute.xlu0 %7731 }
0x27e6   : > { %7776 = vmatmul.mubr.bf16.vlgmr.msra.gmra.mxu1 %v8636_v61 }
0x28a6   : > { %v7777_v45 = vpop.f32.mrf.mxu1 }
0x28a7   : > { %v7778_v59 = vadd.f32 %v7777_v45, %v7732_v41 }
0x28a8   : > { %v7779_v11 = vpop.f32.mrf.mxu1 }
0x28a9   : > { %v7784_v2 = vmax.f32 %v7778_v59, 0.0  ;;  %v7780_v21 = vadd.f32 %v7779_v11, %v7732_v41 }
0x28aa   : > { %v7781_v44 = vpop.f32.mrf.mxu1 }
0x28ab   : > { %v13371_v3 = vpack.c.bf16 %v7784_v2, %v7784_v2  ;;  %v7785_v36 = vmax.f32 %v7780_v21, 0.0 }
0x28ac   : > { %v7782_v43 = vpop.f32.mrf.mxu1 }
0x28ad   : > { %v13373_v24 = vpack.c.bf16 %v7785_v36, %v7785_v36  ;;  %7797 = vrot.lane.b32.xlu1 %v13371_v3, %s14050_s2 }
0x28af   : > { %7799 = vrot.lane.b32.xlu0 %v13373_v24, %s14050_s2  ;;  %s14083_s2 = sld [smem:[#allocation70_spill]] }
0x28b1   : > { %7790 = vrot.lane.b32.xlu1 %v13371_v3, %s14051_s22 }
0x28b3   : > { %7792 = vrot.lane.b32.xlu0 %v13373_v24, %s14051_s22  ;;  %s1658_s22 = scalar_lea.vmem %s10931_s16, %s8401_s26 }
0x28b5   : > { %7840 = vrot.lane.b32.xlu1 %v13373_v24, %s14016_s1  ;;  %v7917_v52 = vld [vmem:[%s14083_s2] sm:$0xff] }
0x28b7   : > { %7838 = vrot.lane.b32.xlu0 %v13371_v3, %s14016_s1 }
0x291f   : > { %v7798_v31 = vpop.permute.xlu1 %7797 }
0x2921   : > { %v7800_v62 = vpop.permute.xlu0 %7799 }
0x2922   : > { %v7801_v60 = vsel %vm14081_vm15, %v7798_v31, %v7800_v62  ;;  %v7803_v40 = vsel %vm14082_vm11, %v7800_v62, 0  ;;  %vm14096_vm15 = vcmp.ne.s16.totalorder %v14063_v32, 0  ;;  %vm14097_vm11 = vmmov %vm14092_vm0 }
0x2923   : > { %7863 = vrot.lane.b32.xlu0 %v7803_v40, %s14016_s1  ;;  %7861 = vrot.lane.b32.xlu1 %v7801_v60, %s14016_s1  ;;  %v7791_v4 = vpop.permute.xlu1 %7790  ;;  %v7882_v34 = vrot.slane %v7801_v60, 4  ;;  %v7883_v35 = vrot.slane %v7803_v40, 4 }
0x2924   : > { %v13398_v7 = vsel %vm14084_vm2, 0, %v7791_v4  ;;  %vm14098_vm2 = vmmov %vm14092_vm0 }
0x2925   : > { %v7793_v51 = vpop.permute.xlu0 %7792 }
0x2926   : > { %v13401_v47 = vsel %vm14085_vm3, %v7791_v4, %v7793_v51  ;;  %vm14099_vm3 = vmmov %vm14095_vm8 }
0x2927   : > { %7852 = vrot.lane.b32.xlu0 %v7803_v40, %s13944_s0  ;;  %7850 = vrot.lane.b32.xlu1 %v7801_v60, %s13944_s0  ;;  %v7841_v39 = vpop.permute.xlu1 %7840  ;;  %v7873_v36 = vrot.slane %v13401_v47, 4  ;;  %v14114_v40 = vld [vmem:[#allocation76_spill] sm:$0xff] }
0x2928   : > { %v7845_v49 = vsel %vm14086_vm12, %v7841_v39, 0  ;;  %vm14100_vm12 = vmmov %vm14099_vm3  ;;  %v7977_v4 = vsub.s32 3, %v14114_v40  ;;  %v7981_v51 = vsub.s32 7, %v14114_v40 }
0x2929   : > { %v7839_v17 = vpop.permute.xlu0 %7838  ;;  %v7848_v46 = vsel %vm14089_vm9, %v7845_v49, 0  ;;  %vm14103_vm9 = vmmov %vm14092_vm0 }
0x292a   : > { %v7842_v54 = vsel %vm14090_vm10, %v7839_v17, %v7841_v39  ;;  %v7881_v57 = vrot.slane %v7848_v46, 4 }
0x292b   : > { %7829 = vrot.lane.b32.xlu0 %v13373_v24, %s13944_s0  ;;  %7827 = vrot.lane.b32.xlu1 %v13371_v3, %s13944_s0  ;;  %v7847_v23 = vsel %vm14068_vm1, %v7842_v54, 0 }
0x292c   : > { %v7880_v18 = vrot.slane %v7847_v23, 4 }
0x292e   : > { %v7902_v26 = vsel %vm14103_vm9, %v13371_v3, %v7880_v18  ;;  %v7872_v3 = vrot.slane %v13398_v7, 4  ;;  %vm14121_vm9 = vcmask 97280  }
0x292f   : > { %7816 = vrot.lane.b32.xlu0 %v13398_v7, %s14016_s1  ;;  %7818 = vrot.lane.b32.xlu1 %v13401_v47, %s14016_s1  ;;  %s14108_s1 = sld [smem:[#allocation69_spill]] }
0x2933   : > { %7807 = vrot.lane.b32.xlu0 %v13401_v47, %s13944_s0  ;;  %7805 = vrot.lane.b32.xlu1 %v13398_v7, %s13944_s0  ;;  %v7978_v7 = vrot.slane %v10088_v5, %v7977_v4  ;;  %s14115_s0 = sld [smem:[#allocation71_spill]] }
0x2935   : > { %v7916_v60 = vld [vmem:[%s14108_s1] sm:$0xf] }
0x2937   : > { %7993 = vperm.xlu0 %9845, %v7990_v53   ;;  %7920 = vperm.xlu1 %9856, %v7917_v52   ;;  %v7982_v53 = vrot.slane %v10088_v5, %v7981_v51 }
0x2995   : > { %v7864_v19 = vpop.permute.xlu0 %7863  ;;  %v7862_v28 = vpop.permute.xlu1 %7861 }
0x2996   : > { %v7868_v38 = vsel %vm14087_vm7, %v7864_v19, 0  ;;  %v7865_v1 = vsel %vm14088_vm4, %v7862_v28, %v7864_v19  ;;  %vm14101_vm7 = vmmov %vm14092_vm0  ;;  %v14117_v28 = vld [vmem:[#allocation75_spill] sm:$0xff] }
0x2997   : > { %v7871_v0 = vsel %vm14091_vm13, %v7868_v38, 0  ;;  %v7870_v55 = vsel %vm14068_vm1, %v7865_v1, 0  ;;  %v7906_v22 = vsel %vm14101_vm7, %v13373_v24, %v7881_v57  ;;  %vm14102_vm4 = vmmov %vm14096_vm15  ;;  %vm14119_vm7 = vcmask 1045504  }
0x2998   : > { %8648 = vmatprep.subr.msk.bf16.mxu0 %vm14092_vm0, %v7871_v0  ;;  %v7927_v25 = vsel %vm14093_vm6, %v7870_v55, 0  ;;  %vm14104_vm13 = vmmov %vm14090_vm10  ;;  %vm14105_vm0 = vcmp.ne.s16.totalorder %v14069_v20, 0 }
0x2999   : > { %v7853_v15 = vpop.permute.xlu0 %7852  ;;  %7939 = vmatpush1.bf16.msra.mxu0 %v7927_v25  ;;  %v7851_v6 = vpop.permute.xlu1 %7850  ;;  %vm14106_vm6 = vmmov %vm14098_vm2  ;;  %v7989_v25 = vld [vmem:[%s14115_s0] sm:$0x1] }
0x299a   : > { %v7854_v48 = vsel %vm14094_vm14, %v7851_v6, %v7853_v15  ;;  %v7857_v12 = vsel %vm14095_vm8, 0, %v7851_v6  ;;  %vm14107_vm14 = vmmov %vm14098_vm2 }
0x299b   : > { %v7859_v13 = vsel %vm14062_vm5, %v7857_v12, 0  ;;  %v7860_v50 = vsel %vm14096_vm15, %v7854_v48, 0  ;;  %vm14109_vm8 = vmmov %vm14099_vm3 }
0x299c   : > { %v7914_v27 = vsel %vm14097_vm11, %v7860_v50, %v7883_v35  ;;  %v7910_v16 = vsel %vm14098_vm2, %v7859_v13, %v7882_v34  ;;  %vm14110_vm15 = vmmov %vm14099_vm3  ;;  %v14122_v35 = vld [vmem:[#allocation77_spill] sm:$0xff] }
0x299d   : > { %v7830_v58 = vpop.permute.xlu0 %7829  ;;  %7940 = vmatprep.subr.bf16.mxu0 %v7914_v27  ;;  %v7828_v10 = vpop.permute.xlu1 %7827  ;;  %vm14112_vm11 = vmmov %vm14098_vm2 }
0x299e   : > { %v7831_v29 = vsel %vm14099_vm3, %v7828_v10, %v7830_v58  ;;  %v7834_v33 = vsel %vm14100_vm12, 0, %v7828_v10  ;;  %7941 = vmatpush1.bf16.msra.mxu0 %v7910_v16  ;;  %vm14113_vm3 = vcmask 588800  }
0x299f   : > { %v7836_v42 = vsel %vm14062_vm5, %v7834_v33, 0  ;;  %v7837_v8 = vsel %vm14102_vm4, %v7831_v29, 0  ;;  %7942 = vmatprep.subr.bf16.mxu0 %v7906_v22  ;;  %v10694_v29 = vmov 1966171168  }
0x29a0   : > { %v7876_v30 = vrot.slane %v7836_v42, 4  ;;  %v7877_v37 = vrot.slane %v7837_v8, 4  ;;  %v8066_v33 = vunpack.c.l.s4 %v10694_v29 }
0x29a1   : > { %v7817_v14 = vpop.permute.xlu0 %7816  ;;  %v7819_v9 = vpop.permute.xlu1 %7818 }
0x29a2   : > { %v7820_v61 = vsel %vm14090_vm10, %v7817_v14, %v7819_v9  ;;  %v7823_v41 = vsel %vm14104_vm13, %v7819_v9, 0  ;;  %7943 = vmatpush1.bf16.msra.mxu0 %v7902_v26  ;;  %v8067_v22 = vunpack.c.0.s8 %v8066_v33 }
0x29a3   : > { %v7825_v45 = vsel %vm14068_vm1, %v7820_v61, 0  ;;  %v7826_v59 = vsel %vm14105_vm0, %v7823_v41, 0  ;;  %vm14111_vm1 = vmmov %vm14102_vm4 }
0x29a4   : > { %v7898_v11 = vsel %vm14106_vm6, %v7826_v59, %v7877_v37  ;;  %v7894_v2 = vsel %vm14107_vm14, %v7825_v45, %v7876_v30  ;;  %vm14120_vm4 = vmmov %vm14119_vm7  ;;  %v8070_v8 = vsub.s32 %v8067_v22, %v14114_v40  ;;  %v14123_v30 = vlaneseq }
0x29a5   : > { %v7808_v21 = vpop.permute.xlu0 %7807  ;;  %7944 = vmatprep.subr.bf16.mxu0 %v7898_v11  ;;  %v7806_v44 = vpop.permute.xlu1 %7805 }
0x29a6   : > { %v7809_v43 = vsel %vm14109_vm8, %v7806_v44, %v7808_v21  ;;  %v7812_v63 = vsel %vm14110_vm15, 0, %v7806_v44  ;;  %7945 = vmatpush1.bf16.msra.mxu0 %v7894_v2  ;;  %vm8082_vm10 = vcmp.lt.s32.totalorder %v14123_v30, 256 }
0x29a7   : > { %v7814_v20 = vsel %vm14062_vm5, %v7812_v63, 0  ;;  %v7815_v24 = vsel %vm14111_vm1, %v7809_v43, 0  ;;  %vm14116_vm5 = vcmask 1042432  }
0x29a8   : > { %v7890_v31 = vsel %vm14112_vm11, %v7815_v24, %v7873_v36  ;;  %v7886_v62 = vsel %vm14098_vm2, %v7814_v20, %v7872_v3  ;;  %v7985_v39 = vsel %vm14116_vm5, %v10088_v5, %v7978_v7  ;;  %vm14118_vm12 = vmmov %vm14116_vm5 }
0x29a9   : > { %7946 = vmatprep.subr.bf16.mxu0 %v7890_v31  ;;  %v7986_v38 = vsel %vm14118_vm12, %v14117_v28, %v7982_v53 }
0x29aa   : > { %7947 = vmatpush1.bf16.msra.mxu0 %v7886_v62 }
0x29ad   : > { %8649 = vmatmul.mubr.msk.bf16.vlgmr.msra.gmra.mxu0 %vm14113_vm3, %v7916_v60 }
0x29ae   : > { %8041 = vmatprep.mubr.bf16.mxu0 %v14037_v56 }
0x29b2   : > { %v7921_v47 = vpop.permute.xlu1 %7920  ;;  %v7994_v34 = vpop.permute.xlu0 %7993 }
0x29b3   : > { %v7999_v15 = vrot.slane %v7994_v34, %v14122_v35 }
0x2a6d   : > { %v7966_v32 = vpop.f32.mrf.mxu0 }
0x2a6e   : > { %v7967_v52 = vadd.f32 %v7966_v32, %v7921_v47 }
0x2a6f   : > { %v7968_v17 = vpop.f32.mrf.mxu0 }
0x2a70   : > { %v7973_v49 = vmax.f32 %v7967_v52, 0.0  ;;  %v7969_v19 = vadd.f32 %v7968_v17, %v7921_v47 }
0x2a71   : > { %v7970_v56 = vpop.f32.mrf.mxu0 }
0x2a72   : > { %v7987_v1 = vpack.c.bf16 %v7985_v39, %v7973_v49  ;;  %v7974_v46 = vmax.f32 %v7969_v19, 0.0 }
0x2a73   : > { %v7971_v54 = vpop.f32.mrf.mxu0 }
0x2a74   : > { %v7988_v0 = vpack.c.bf16 %v7986_v38, %v7974_v46  ;;  %v8004_v55 = vsel %vm14120_vm4, %v7987_v1, 0 }
0x2a76   : > { %8650 = vmatprep.subr.msk.bf16.mxu0 %vm14119_vm7, %v7988_v0 }
0x2a77   : > { %8024 = vmatpush1.bf16.msra.mxu0 %v8004_v55 }
0x2a7a   : > { %8651 = vmatmul.mubr.msk.bf16.vlgmr.msra.gmra.mxu0 %vm14121_vm9, %v7989_v25 }
0x2b3a   : > { %v8043_v6 = vpop.f32.mrf.mxu0 }
0x2b3b   : > { %v8044_v57 = vadd.f32 %v8043_v6, %v7999_v15 }
0x2b3c   : > { %v8045_v23 = vpop.f32.mrf.mxu0 }
0x2b3d   : > { %v8652_v48 = vmul.f32 -1.442695, %v8044_v57  ;;  %v8046_v12 = vadd.f32 %v8045_v23, %v7999_v15 }
0x2b3e   : > { %v8047_v13 = vpop.f32.mrf.mxu0 }
0x2b3f   : > { %10080 = vpow2.f32 %v8652_v48  ;;  %v8653_v50 = vmul.f32 -1.442695, %v8046_v12 }
0x2b40   : > { %v8048_v27 = vpop.f32.mrf.mxu0 }
0x2b41   : > { %10082 = vpow2.f32 %v8653_v50 }
0x2b4c   : > { %v10081_v16 = vpop.eup %10080 }
0x2b4d   : > { %v8056_v18 = vadd.f32 1.0, %v10081_v16 }
0x2b4e   : > { %v10083_v58 = vpop.eup %10082 }
0x2b4f   : > { %v8057_v10 = vadd.f32 1.0, %v10083_v58  ;;  %10084 = vrcp.f32 %v8056_v18 }
0x2b51   : > { %10086 = vrcp.f32 %v8057_v10 }
0x2b5c   : > { %v10085_v42 = vpop.eup %10084 }
0x2b5e   : > { %v10087_v14 = vpop.eup %10086 }
0x2b5f   : > { %v8064_v9 = vcombine.low %v10085_v42, %v10087_v14 }
0x2b61   : > { %v8071_v26 = vrot.slane %v8064_v9, %v8070_v8 }
0x2b63   : > { %v8078_v37 = vrot.slane %v8071_v26, %v8070_v8 }
0x2b65   : > { %8084 = vst.msk [vmem:[%s1658_s22] sm:$0x3] %vm8082_vm10, %v8078_v37 }
0x2b66 PF: > { %s117_s12 = sadd.s32 1, %s10603_s12  }
0x2b67   : > { %p114_p11 = scmp.ge.s32.totalorder %s117_s12, 4  }
0x2b69   :  { %116 = sbr.rel (!%p114_p11) target bundleno = 92 (0x5c), region = 358 }
0x2b6e   :  { %8104 = vsyncpa [#allocation4], 1 }
0x2b6f   :  { %8106 = vsyncpa [#allocation4 + $0x1], 1 }
0x2b70   :  { %8107 = vsyncpa [#allocation6], 1 }
0x2b71   :  { %8108 = vsyncpa [#allocation9], 1 }
0x2b72   :  { %8109 = vsyncpa [#allocation12], 1 }
0x2b73   :  { %8110 = vsyncpa [#allocation15], 1 }
0x2b74   :  { %8111 = vsyncpa [#allocation18], 1 }
0x2b75   :  { %8112 = vsyncpa [#allocation21], 1 }
0x2b76   :  { %8113 = vsyncpa [#allocation24], 1 }
0x2b77   :  { %8114 = vsyncpa [#allocation27], 1 }
0x2b78   :  { %8115 = vsyncpa [#allocation30], 1 }

</bundles_post_ra>
